<compile_context>
chip_gen: v6e
topology: v6e:2x2x1
jax: 0.10.0
libtpu: 0.0.40
codegen_flags: <defaults>
</compile_context>

<pallas_src>
import functools

import jax
import jax.numpy as jnp
from jax.experimental import pallas as pl
from jax.experimental.pallas import tpu as pltpu


def _round_up(x, m):
    return ((x + m - 1) // m) * m


def _largest_128_divisor(n, cap):
    """Largest divisor of n that is a multiple of 128 and <= cap (n % 128 == 0)."""
    d = (min(cap, n) // 128) * 128
    while d >= 128:
        if n % d == 0:
            return d
        d -= 128
    return 128


def _tpu_profile():
    """(scoped_vmem_budget_bytes, default_tm, default_tf, num_tensorcores)."""
    kind = ""
    try:
        kind = jax.devices()[0].device_kind.lower()
    except Exception:
        pass
    vmem_cap = None
    try:
        vmem_cap = int(pltpu.get_tpu_info().vmem_capacity_bytes)
    except Exception:
        pass
    if vmem_cap is None:
        vmem_cap = 128 * 1024 * 1024 if ("v5" in kind or "v6" in kind) else 64 * 1024 * 1024

    if "v5" in kind:
        tm, tf = 256, 2048       # v5e ridge ~240 FLOP/B: tm=256 already compute-bound
    elif "v6" in kind:
        tm, tf = 512, 2048       # v6e ridge ~650 FLOP/B: needs the bigger row tile
    elif "v7" in kind:
        tm, tf = 512, 512        # v7x: 64 MiB VMEM -> smaller d_ff chunks
    else:
        tm, tf = (512, 1024) if vmem_cap >= 96 * 1024 * 1024 else (384, 512)

    budget = int(vmem_cap * 0.85)            # leave headroom below physical VMEM
    cores = 2 if "v7" in kind else 1
    return budget, tm, tf, cores


def ffn_kernel(x_ref, w1_ref, b1_ref, w2_ref, b2_ref, gamma_ref, beta_ref,
               o_ref, acc_ref, *, eps, inv_d_model):
    # x_ref: (tm, d_model)      w1_ref: (d_model, tf)   b1_ref: (1, tf)
    # w2_ref: (tf, d_model)     b2/gamma/beta: (1, d_model)
    # acc_ref: (tm, d_model) f32 scratch, resident across the d_ff-chunk axis.
    k = pl.program_id(1)
    n_k = pl.num_programs(1)

    x = x_ref[...]  # native dtype straight into the MXU

    # fc1 chunk + ReLU (dropout_2 is identity in eval mode); f32 accumulation.
    h = jnp.dot(x, w1_ref[...], preferred_element_type=jnp.float32)
    h = jnp.maximum(h + b1_ref[...].astype(jnp.float32), 0.0)

    # fc2 chunk partial (f32 accumulate on the MXU).
    part = jnp.dot(h.astype(w2_ref.dtype), w2_ref[...],
                   preferred_element_type=jnp.float32)

    @pl.when(k == 0)
    def _():
        # Fold residual + fc2 bias into the first partial: no zero-init write/read
        # of the accumulator, and the epilogue has nothing left to add.
        acc_ref[...] = (x.astype(jnp.float32)
                        + b2_ref[...].astype(jnp.float32)
                        + part)

    @pl.when(k > 0)
    def _():
        acc_ref[...] += part

    @pl.when(k == n_k - 1)
    def _():
        # LayerNorm in f32, two-pass (centered) variance: robust to large residuals.
        z = acc_ref[...]
        mean = jnp.sum(z, axis=-1, keepdims=True) * inv_d_model
        zc = z - mean
        var = jnp.maximum(jnp.sum(zc * zc, axis=-1, keepdims=True) * inv_d_model, 0.0)
        zn = zc * jax.lax.rsqrt(var + eps)
        o_ref[...] = (zn * gamma_ref[...].astype(jnp.float32)
                      + beta_ref[...].astype(jnp.float32)).astype(o_ref.dtype)


def position_wise_feed_forward(x, w1, b1, w2, b2, gamma, beta, *,
                               eps=1e-5, tm=None, tf=None, compute_dtype=None):
    """x: (B, S, d_model). Weights stored as (in, out) = transpose of nn.Linear.weight.

    compute_dtype: optionally cast x/W1/W2 (e.g. jnp.bfloat16) before the kernel for
    halved weight HBM traffic and full-rate MXU; accumulation stays f32 either way.
    """
    out_dtype = x.dtype
    if compute_dtype is not None:
        x = x.astype(compute_dtype)
        w1 = w1.astype(compute_dtype)
        w2 = w2.astype(compute_dtype)

    B, S, d_model = x.shape
    d_ff = w1.shape[1]
    N = B * S

    budget, tm_def, tf_def, cores = _tpu_profile()
    if tm is None:
        tm = tm_def
    if tf is None:
        tf = tf_def

    # Row tile: sublane-aligned (multiple of 16, bf16-safe), never larger than the
    # padded row count; on 2-TC parts keep >= 2 row tiles so both cores get work.
    tm = max(16, (min(tm, _round_up(N, 16)) // 16) * 16)
    if cores >= 2 and N > 16:
        tm = min(tm, max(16, _round_up((N + 1) // 2, 16)))

    xbytes = jnp.dtype(x.dtype).itemsize
    wbytes = jnp.dtype(w1.dtype).itemsize

    def footprint(tm_, tf_):
        return (2 * tm_ * d_model * xbytes          # x tile (double-buffered)
                + 2 * d_model * tf_ * wbytes        # W1 chunk
                + 2 * 8 * tf_ * wbytes              # b1 chunk (sublane-padded)
                + 2 * tf_ * d_model * wbytes        # W2 chunk
                + 3 * 2 * 8 * d_model * 4           # b2 / gamma / beta
                + 2 * tm_ * d_model * xbytes        # output tile
                + tm_ * d_model * 4)                # f32 accumulator

    # Weight-resident fast path: constant weight block index across the whole grid
    # -> Pallas DMAs W1/W2 from HBM exactly once for the whole call.
    can_chunk = (d_ff % 128 == 0)
    if footprint(tm, d_ff) <= budget or not can_chunk:
        tf = d_ff
    else:
        tf = _largest_128_divisor(d_ff, min(tf, d_ff))
        while footprint(tm, tf) > budget and tf > 128:
            tf = _largest_128_divisor(d_ff, tf - 128)
    while footprint(tm, tf) > budget and tm > 16:
        tm = max(16, ((tm // 2) // 16) * 16)

    est = footprint(tm, tf)
    vmem_limit = int(min(budget, max(int(est * 1.3) + (2 << 20), 8 << 20)))

    x2d = x.reshape(N, d_model)
    b1_2d = b1.reshape(1, d_ff)
    b2_2d = b2.reshape(1, d_model)
    gamma_2d = gamma.reshape(1, d_model)
    beta_2d = beta.reshape(1, d_model)

    kernel = functools.partial(ffn_kernel, eps=eps, inv_d_model=1.0 / d_model)

    out2d = pl.pallas_call(
        kernel,
        out_shape=jax.ShapeDtypeStruct((N, d_model), out_dtype),
        grid_spec=pltpu.PrefetchScalarGridSpec(
            num_scalar_prefetch=0,
            grid=(pl.cdiv(N, tm), d_ff // tf),
            in_specs=[
                pl.BlockSpec((tm, d_model), lambda i, k: (i, 0)),   # x rows
                pl.BlockSpec((d_model, tf), lambda i, k: (0, k)),   # W1 chunk
                pl.BlockSpec((1, tf), lambda i, k: (0, k)),         # b1 chunk
                pl.BlockSpec((tf, d_model), lambda i, k: (k, 0)),   # W2 chunk
                pl.BlockSpec((1, d_model), lambda i, k: (0, 0)),    # b2
                pl.BlockSpec((1, d_model), lambda i, k: (0, 0)),    # gamma
                pl.BlockSpec((1, d_model), lambda i, k: (0, 0)),    # beta
            ],
            out_specs=pl.BlockSpec((tm, d_model), lambda i, k: (i, 0)),
            scratch_shapes=[pltpu.VMEM((tm, d_model), jnp.float32)],
        ),
        compiler_params=pltpu.CompilerParams(
            dimension_semantics=("parallel", "arbitrary"),
            vmem_limit_bytes=vmem_limit,
        ),
    )(x2d, w1, b1_2d, w2, b2_2d, gamma_2d, beta_2d)

    return out2d.reshape(B, S, d_model)


def reference_ffn(x, w1, b1, w2, b2, gamma, beta, eps=1e-5):
    """Pure-JAX reference matching the PyTorch forward (eval mode)."""
    h = jnp.maximum(x @ w1 + b1, 0.0)
    y = h @ w2 + b2
    z = x + y
    mean = jnp.mean(z, axis=-1, keepdims=True)
    var = jnp.mean((z - mean) ** 2, axis=-1, keepdims=True)
    return (z - mean) / jnp.sqrt(var + eps) * gamma + beta


if __name__ == "__main__":
    # Module defaults d_model=512, d_ff=2048 with a small batch/sequence.
    B, S = 2, 8
    d_model, d_ff = 512, 2048

    key = jax.random.PRNGKey(0)
    kx, k1, kb1, k2, kb2, kg, kb = jax.random.split(key, 7)

    x = jax.random.normal(kx, (B, S, d_model), dtype=jnp.float32)
    # Weights stored as (in, out), i.e. already W.T relative to nn.Linear.weight.
    w1 = jax.random.normal(k1, (d_model, d_ff), dtype=jnp.float32) * 0.05
    b1 = jax.random.normal(kb1, (d_ff,), dtype=jnp.float32) * 0.05
    w2 = jax.random.normal(k2, (d_ff, d_model), dtype=jnp.float32) * 0.05
    b2 = jax.random.normal(kb2, (d_model,), dtype=jnp.float32) * 0.05
    gamma = 1.0 + 0.1 * jax.random.normal(kg, (d_model,), dtype=jnp.float32)
    beta = 0.1 * jax.random.normal(kb, (d_model,), dtype=jnp.float32)

    out = position_wise_feed_forward(x, w1, b1, w2, b2, gamma, beta)
    out = jax.block_until_ready(out)

    ref = reference_ffn(x, w1, b1, w2, b2, gamma, beta)
    assert out.shape == (B, S, d_model)
    max_err = float(jnp.max(jnp.abs(out - ref)))
    assert jnp.allclose(out, ref, atol=2e-2, rtol=2e-2), f"mismatch vs reference (max {max_err})"

    # TODO(synk): dropout layers are identity in eval mode; training-mode stochastic
    # dropout (pltpu.prng_*) is not implemented.
    print("KERNEL_OK")
</pallas_src>

<mosaic_0001>
module attributes {stable_mosaic.version = 11 : i64} {
  func.func @ffn_kernel(%arg0: i32, %arg1: i32, %arg2: memref<16x512xf32, #tpu.memory_space<vmem>>, %arg3: memref<512x2048xf32, #tpu.memory_space<vmem>>, %arg4: memref<1x2048xf32, #tpu.memory_space<vmem>>, %arg5: memref<2048x512xf32, #tpu.memory_space<vmem>>, %arg6: memref<1x512xf32, #tpu.memory_space<vmem>>, %arg7: memref<1x512xf32, #tpu.memory_space<vmem>>, %arg8: memref<1x512xf32, #tpu.memory_space<vmem>>, %arg9: memref<16x512xf32, #tpu.memory_space<vmem>>, %arg10: memref<16x512xf32, #tpu.memory_space<vmem>>) attributes {dimension_semantics = [#tpu.dimension_semantics<parallel>, #tpu.dimension_semantics<arbitrary>], iteration_bounds = array<i64: 1, 1>, scalar_prefetch = 0 : i64, scratch_operands = 1 : i64, tpu.core_type = #tpu.core_type<tc>, window_params = [{transform_indices = @transform_0, window_bounds = array<i64: 16, 512>}, {transform_indices = @transform_1, window_bounds = array<i64: 512, 2048>}, {transform_indices = @transform_2, window_bounds = array<i64: 1, 2048>}, {transform_indices = @transform_3, window_bounds = array<i64: 2048, 512>}, {pipeline_mode = #tpu.pipeline_mode<synchronous>, transform_indices = @transform_4, window_bounds = array<i64: 1, 512>}, {pipeline_mode = #tpu.pipeline_mode<synchronous>, transform_indices = @transform_5, window_bounds = array<i64: 1, 512>}, {pipeline_mode = #tpu.pipeline_mode<synchronous>, transform_indices = @transform_6, window_bounds = array<i64: 1, 512>}, {transform_indices = @transform_7, window_bounds = array<i64: 16, 512>}]} {
    %c0 = arith.constant 0 : index
    %c0_0 = arith.constant 0 : index
    %0 = vector.load %arg2[%c0, %c0_0] : memref<16x512xf32, #tpu.memory_space<vmem>>, vector<16x512xf32>
    %c0_1 = arith.constant 0 : index
    %c0_2 = arith.constant 0 : index
    %1 = vector.load %arg3[%c0_1, %c0_2] : memref<512x2048xf32, #tpu.memory_space<vmem>>, vector<512x2048xf32>
    %cst = arith.constant dense<0.000000e+00> : vector<16x2048xf32>
    %2 = tpu.matmul %0, %1, %cst {dimension_numbers = #tpu.dot_dimension_numbers<[1], [0], [0], [1], [0, 0, 1, 1], [], []>} : vector<16x512xf32>, vector<512x2048xf32>, vector<16x2048xf32> -> vector<16x2048xf32>
    %c0_3 = arith.constant 0 : index
    %c0_4 = arith.constant 0 : index
    %3 = vector.load %arg4[%c0_3, %c0_4] : memref<1x2048xf32, #tpu.memory_space<vmem>>, vector<1x2048xf32>
    %4 = vector.broadcast %3 : vector<1x2048xf32> to vector<16x2048xf32>
    %5 = arith.addf %2, %4 : vector<16x2048xf32>
    %cst_5 = arith.constant 0.000000e+00 : f32
    %6 = vector.broadcast %cst_5 : f32 to vector<16x2048xf32>
    %7 = arith.maximumf %5, %6 : vector<16x2048xf32>
    %c0_6 = arith.constant 0 : index
    %c0_7 = arith.constant 0 : index
    %8 = vector.load %arg5[%c0_6, %c0_7] : memref<2048x512xf32, #tpu.memory_space<vmem>>, vector<2048x512xf32>
    %cst_8 = arith.constant dense<0.000000e+00> : vector<16x512xf32>
    %9 = tpu.matmul %7, %8, %cst_8 {dimension_numbers = #tpu.dot_dimension_numbers<[1], [0], [0], [1], [0, 0, 1, 1], [], []>} : vector<16x2048xf32>, vector<2048x512xf32>, vector<16x512xf32> -> vector<16x512xf32>
    %c0_i32 = arith.constant 0 : i32
    %10 = arith.cmpi eq, %arg1, %c0_i32 : i32
    %11 = arith.extui %10 : i1 to i32
    %c0_i32_9 = arith.constant 0 : i32
    %12 = arith.cmpi ne, %11, %c0_i32_9 : i32
    scf.if %12 {
      %c0_14 = arith.constant 0 : index
      %c0_15 = arith.constant 0 : index
      %19 = vector.load %arg6[%c0_14, %c0_15] : memref<1x512xf32, #tpu.memory_space<vmem>>, vector<1x512xf32>
      %20 = vector.broadcast %19 : vector<1x512xf32> to vector<16x512xf32>
      %21 = arith.addf %0, %20 : vector<16x512xf32>
      %22 = arith.addf %21, %9 : vector<16x512xf32>
      %c0_16 = arith.constant 0 : index
      %c0_17 = arith.constant 0 : index
      %23 = vector.load %arg10[%c0_16, %c0_17] : memref<16x512xf32, #tpu.memory_space<vmem>>, vector<16x512xf32>
      tpu.vector_store %arg10[%c0_16, %c0_17], %22 {strides = array<i32>} : memref<16x512xf32, #tpu.memory_space<vmem>>, vector<16x512xf32>,
    } else {
    }
    %c0_i32_10 = arith.constant 0 : i32
    %13 = arith.cmpi sgt, %arg1, %c0_i32_10 : i32
    %14 = arith.extui %13 : i1 to i32
    %c0_i32_11 = arith.constant 0 : i32
    %15 = arith.cmpi ne, %14, %c0_i32_11 : i32
    scf.if %15 {
      %c0_14 = arith.constant 0 : index
      %c0_15 = arith.constant 0 : index
      %19 = vector.load %arg10[%c0_14, %c0_15] : memref<16x512xf32, #tpu.memory_space<vmem>>, vector<16x512xf32>
      %20 = arith.addf %19, %9 : vector<16x512xf32>
      %c0_16 = arith.constant 0 : index
      %c0_17 = arith.constant 0 : index
      %21 = vector.load %arg10[%c0_16, %c0_17] : memref<16x512xf32, #tpu.memory_space<vmem>>, vector<16x512xf32>
      tpu.vector_store %arg10[%c0_16, %c0_17], %20 {strides = array<i32>} : memref<16x512xf32, #tpu.memory_space<vmem>>, vector<16x512xf32>,
    } else {
    }
    %c0_i32_12 = arith.constant 0 : i32
    %16 = arith.cmpi eq, %arg1, %c0_i32_12 : i32
    %17 = arith.extui %16 : i1 to i32
    %c0_i32_13 = arith.constant 0 : i32
    %18 = arith.cmpi ne, %17, %c0_i32_13 : i32
    scf.if %18 {
      %c0_14 = arith.constant 0 : index
      %c0_15 = arith.constant 0 : index
      %19 = vector.load %arg10[%c0_14, %c0_15] : memref<16x512xf32, #tpu.memory_space<vmem>>, vector<16x512xf32>
      %cst_16 = arith.constant dense<0.000000e+00> : vector<16xf32>
      %20 = vector.multi_reduction <add>, %19, %cst_16 [1] : vector<16x512xf32> to vector<16xf32>
      %21 = vector.shape_cast %20 : vector<16xf32> to vector<16x1xf32>
      %cst_17 = arith.constant 0.001953125 : f32
      %22 = vector.broadcast %cst_17 : f32 to vector<16x1xf32>
      %23 = arith.mulf %21, %22 : vector<16x1xf32>
      %24 = vector.broadcast %23 : vector<16x1xf32> to vector<16x512xf32>
      %25 = arith.subf %19, %24 : vector<16x512xf32>
      %26 = arith.mulf %25, %25 : vector<16x512xf32>
      %cst_18 = arith.constant dense<0.000000e+00> : vector<16xf32>
      %27 = vector.multi_reduction <add>, %26, %cst_18 [1] : vector<16x512xf32> to vector<16xf32>
      %28 = vector.shape_cast %27 : vector<16xf32> to vector<16x1xf32>
      %cst_19 = arith.constant 0.001953125 : f32
      %29 = vector.broadcast %cst_19 : f32 to vector<16x1xf32>
      %30 = arith.mulf %28, %29 : vector<16x1xf32>
      %cst_20 = arith.constant 0.000000e+00 : f32
      %31 = vector.broadcast %cst_20 : f32 to vector<16x1xf32>
      %32 = arith.maximumf %30, %31 : vector<16x1xf32>
      %cst_21 = arith.constant 9.99999974E-6 : f32
      %33 = vector.broadcast %cst_21 : f32 to vector<16x1xf32>
      %34 = arith.addf %32, %33 : vector<16x1xf32>
      %35 = math.rsqrt %34 : vector<16x1xf32>
      %36 = vector.broadcast %35 : vector<16x1xf32> to vector<16x512xf32>
      %37 = arith.mulf %25, %36 : vector<16x512xf32>
      %c0_22 = arith.constant 0 : index
      %c0_23 = arith.constant 0 : index
      %38 = vector.load %arg7[%c0_22, %c0_23] : memref<1x512xf32, #tpu.memory_space<vmem>>, vector<1x512xf32>
      %39 = vector.broadcast %38 : vector<1x512xf32> to vector<16x512xf32>
      %40 = arith.mulf %37, %39 : vector<16x512xf32>
      %c0_24 = arith.constant 0 : index
      %c0_25 = arith.constant 0 : index
      %41 = vector.load %arg8[%c0_24, %c0_25] : memref<1x512xf32, #tpu.memory_space<vmem>>, vector<1x512xf32>
      %42 = vector.broadcast %41 : vector<1x512xf32> to vector<16x512xf32>
      %43 = arith.addf %40, %42 : vector<16x512xf32>
      %c0_26 = arith.constant 0 : index
      %c0_27 = arith.constant 0 : index
      %44 = vector.load %arg9[%c0_26, %c0_27] : memref<16x512xf32, #tpu.memory_space<vmem>>, vector<16x512xf32>
      tpu.vector_store %arg9[%c0_26, %c0_27], %43 {strides = array<i32>} : memref<16x512xf32, #tpu.memory_space<vmem>>, vector<16x512xf32>,
    } else {
    }
    return
  }
  func.func @transform_0(%arg0: i32, %arg1: i32) -> (i32, i32) {
    %c0_i32 = arith.constant 0 : i32
    %c0_i32_0 = arith.constant 0 : i32
    return %arg0, %c0_i32 : i32, i32
  }
  func.func @transform_1(%arg0: i32, %arg1: i32) -> (i32, i32) {
    %c0_i32 = arith.constant 0 : i32
    %c0_i32_0 = arith.constant 0 : i32
    return %c0_i32, %arg1 : i32, i32
  }
  func.func @transform_2(%arg0: i32, %arg1: i32) -> (i32, i32) {
    %c0_i32 = arith.constant 0 : i32
    %c0_i32_0 = arith.constant 0 : i32
    return %c0_i32, %arg1 : i32, i32
  }
  func.func @transform_3(%arg0: i32, %arg1: i32) -> (i32, i32) {
    %c0_i32 = arith.constant 0 : i32
    %c0_i32_0 = arith.constant 0 : i32
    return %arg1, %c0_i32 : i32, i32
  }
  func.func @transform_4(%arg0: i32, %arg1: i32) -> (i32, i32) {
    %c0_i32 = arith.constant 0 : i32
    %c0_i32_0 = arith.constant 0 : i32
    %c0_i32_1 = arith.constant 0 : i32
    return %c0_i32, %c0_i32_0 : i32, i32
  }
  func.func @transform_5(%arg0: i32, %arg1: i32) -> (i32, i32) {
    %c0_i32 = arith.constant 0 : i32
    %c0_i32_0 = arith.constant 0 : i32
    %c0_i32_1 = arith.constant 0 : i32
    return %c0_i32, %c0_i32_0 : i32, i32
  }
  func.func @transform_6(%arg0: i32, %arg1: i32) -> (i32, i32) {
    %c0_i32 = arith.constant 0 : i32
    %c0_i32_0 = arith.constant 0 : i32
    %c0_i32_1 = arith.constant 0 : i32
    return %c0_i32, %c0_i32_0 : i32, i32
  }
  func.func @transform_7(%arg0: i32, %arg1: i32) -> (i32, i32) {
    %c0_i32 = arith.constant 0 : i32
    %c0_i32_0 = arith.constant 0 : i32
    return %arg0, %c0_i32 : i32, i32
  }
}

</mosaic_0001>

<bundles_post_ra>
// kernel: tpu_custom_call.1
= control target key start
LH: loop header
LB: loop body
LE: loop exit
PB: predicated region body
PF: predicated region fallthrough
CT: control target
= control target key end

     0   :  { %12 = vsyncpa [#allocation4], 0  ;;  %s5880_s0 = inlined_call_operand.hbm [shape: f32[16,512], index: 0, kind: input, shape index: {}]   ;;  %s5881_s1 = inlined_call_operand.hbm [shape: f32[512,2048], index: 1, kind: input, shape index: {}]   ;;  %s5882_s2 = inlined_call_operand.hbm [shape: f32[1,2048], index: 2, kind: input, shape index: {}]   ;;  %s5883_s3 = inlined_call_operand.hbm [shape: f32[2048,512], index: 3, kind: input, shape index: {}]   ;;  %s5884_s4 = inlined_call_operand.hbm [shape: f32[1,512], index: 4, kind: input, shape index: {}]   ;;  %s5885_s5 = inlined_call_operand.hbm [shape: f32[1,512], index: 5, kind: input, shape index: {}]   ;;  %s5886_s6 = inlined_call_operand.hbm [shape: f32[1,512], index: 6, kind: input, shape index: {}]   ;;  %s5887_s7 = inlined_call_operand.hbm [shape: f32[16,512], index: 7, kind: output, shape index: {}]  }
   0x1   :  { %13 = vsyncpa [#allocation7], 0 }
   0x2   :  { %14 = vsyncpa [#allocation10], 0 }
   0x3   :  { %15 = vsyncpa [#allocation13], 0 }
   0x4   :  { %16 = vsyncpa [#allocation5], 0  ;;  %s5204_s24 = smov [#allocation6]  }
   0x5   :  { %s34_s25 = sshll.u32 %s5204_s24, 4  ;;  %s35_s25 = int_to_ptr.vmem [resolvable:$true] %s34_s25 }
   0x6   :  { %s5042_s26 = scalar_lea.vmem %s35_s25, 131072  ;;  %p5047_p1 = scmp.lt.s32.totalorder %s35_s25, %s35_s25 }
   0x7   :  { %p5043_p0 = scmp.ne.s32.totalorder %s35_s25, %s5042_s26  ;;  %p5048_p2 = scmp.lt.s32.totalorder %s5042_s26, %s5042_s26 }
   0x9   :  { %p5049_p3 = por %p5048_p2, %p5047_p1 }
   0xb   :  { %p5050_p4 = pnand %p5049_p3, %p5043_p0 }
   0xd   :  { %5053 = shalt.err (!%p5050_p4)
}
   0xe   :  { %s5205_s27 = smov 2048   ;;  %s5206_s28 = smov 128  }
   0xf   :  { %40 = dma.hbm_to_vmem [thread:$0]  %s5881_s1, 131072, %s35_s25, [#allocation7], %s5205_s27, %s5205_s27, %s5206_s28  }
  0x10   :  { %s5207_s8 = smov [#allocation9]   ;;  %s5208_s10 = smov [#allocation12]  }
  0x11   :  { %s56_s9 = sshll.u32 %s5207_s8, 4  ;;  %s79_s11 = sshll.u32 %s5208_s10, 4  ;;  %s57_s9 = int_to_ptr.vmem [resolvable:$true] %s56_s9  ;;  %s80_s11 = int_to_ptr.vmem [resolvable:$true] %s79_s11 }
  0x12   :  { %s5062_s12 = scalar_lea.vmem %s57_s9, 131072  ;;  %p5067_p6 = scmp.lt.s32.totalorder %s57_s9, %s57_s9 }
  0x13   :  { %p5063_p5 = scmp.ne.s32.totalorder %s57_s9, %s5062_s12  ;;  %p5068_p7 = scmp.lt.s32.totalorder %s5062_s12, %s5062_s12 }
  0x15   :  { %p5069_p8 = por %p5068_p7, %p5067_p6 }
  0x17   :  { %p5070_p9 = pnand %p5069_p8, %p5063_p5 }
  0x19   :  { %5073 = shalt.err (!%p5070_p9)
}
  0x1a   :  { %s5209_s13 = smov 512   ;;  %s5210_s14 = smov 32  }
  0x1b   :  { %62 = dma.hbm_to_vmem [thread:$0]  %s5883_s3, 131072, %s57_s9, [#allocation10], %s5209_s13, %s5209_s13, %s5210_s14  }
  0x1c   :  { %s5082_s1 = scalar_lea.vmem %s80_s11, 64  ;;  %p5087_p11 = scmp.lt.s32.totalorder %s80_s11, %s80_s11 }
  0x1d   :  { %p5083_p10 = scmp.ne.s32.totalorder %s80_s11, %s5082_s1  ;;  %p5088_p12 = scmp.lt.s32.totalorder %s5082_s1, %s5082_s1 }
  0x1f   :  { %p5089_p13 = por %p5088_p12, %p5087_p11 }
  0x21   :  { %p5090_p0 = pnand %p5089_p13, %p5083_p10 }
  0x23   :  { %5093 = shalt.err (!%p5090_p0)
}
  0x24   :  { %82 = dma.hbm_to_vmem [thread:$0]  %s5885_s5, 64, %s80_s11, [#allocation13]  }
  0x25   :  { %s5211_s19 = smov [#allocation3]   ;;  %s5212_s21 = smov [#allocation8]  }
  0x26   :  { %s22_s20 = sshll.u32 %s5211_s19, 4  ;;  %s47_s22 = sshll.u32 %s5212_s21, 4  ;;  %s23_s20 = int_to_ptr.vmem [resolvable:$true] %s22_s20  ;;  %s48_s22 = int_to_ptr.vmem [resolvable:$true] %s47_s22 }
  0x27   :  { %s5102_s23 = scalar_lea.vmem %s23_s20, 1024  ;;  %p5107_p2 = scmp.lt.s32.totalorder %s23_s20, %s23_s20 }
  0x28   :  { %p5103_p1 = scmp.ne.s32.totalorder %s23_s20, %s5102_s23  ;;  %p5108_p3 = scmp.lt.s32.totalorder %s5102_s23, %s5102_s23 }
  0x2a   :  { %p5109_p4 = por %p5108_p3, %p5107_p2 }
  0x2c   :  { %p5110_p5 = pnand %p5109_p4, %p5103_p1 }
  0x2e   :  { %5113 = shalt.err (!%p5110_p5)
}
  0x2f   :  { %28 = dma.hbm_to_vmem [thread:$0]  %s5880_s0, 1024, %s23_s20, [#allocation4], %s5209_s13, %s5209_s13, %s5210_s14  }
  0x30   :  { %s5122_s5 = scalar_lea.vmem %s48_s22, 256  ;;  %p5127_p7 = scmp.lt.s32.totalorder %s48_s22, %s48_s22 }
  0x31   :  { %p5123_p6 = scmp.ne.s32.totalorder %s48_s22, %s5122_s5  ;;  %p5128_p8 = scmp.lt.s32.totalorder %s5122_s5, %s5122_s5 }
  0x33   :  { %p5129_p9 = por %p5128_p8, %p5127_p7 }
  0x35   :  { %p5130_p10 = pnand %p5129_p9, %p5123_p6 }
  0x37   :  { %5133 = shalt.err (!%p5130_p10)
}
  0x38   :  { %50 = dma.hbm_to_vmem [thread:$0]  %s5882_s2, 256, %s48_s22, [#allocation7]  }
  0x39   :  { %s5213_s27 = smov [#allocation11]   ;;  %s5214_s29 = smov [#allocation14]  }
  0x3a   :  { %s69_s28 = sshll.u32 %s5213_s27, 4  ;;  %s89_s30 = sshll.u32 %s5214_s29, 4  ;;  %s70_s28 = int_to_ptr.vmem [resolvable:$true] %s69_s28  ;;  %s90_s30 = int_to_ptr.vmem [resolvable:$true] %s89_s30 }
  0x3b   :  { %s5142_s8 = scalar_lea.vmem %s70_s28, 64  ;;  %p5147_p12 = scmp.lt.s32.totalorder %s70_s28, %s70_s28 }
  0x3c   :  { %p5143_p11 = scmp.ne.s32.totalorder %s70_s28, %s5142_s8  ;;  %p5148_p13 = scmp.lt.s32.totalorder %s5142_s8, %s5142_s8 }
  0x3e   :  { %p5149_p0 = por %p5148_p13, %p5147_p12 }
  0x40   :  { %p5150_p1 = pnand %p5149_p0, %p5143_p11 }
  0x42   :  { %5153 = shalt.err (!%p5150_p1)
}
  0x43   :  { %72 = dma.hbm_to_vmem [thread:$0]  %s5884_s4, 64, %s70_s28, [#allocation10]  }
  0x44   :  { %s5162_s10 = scalar_lea.vmem %s90_s30, 64  ;;  %p5167_p3 = scmp.lt.s32.totalorder %s90_s30, %s90_s30 }
  0x45   :  { %p5163_p2 = scmp.ne.s32.totalorder %s90_s30, %s5162_s10  ;;  %p5168_p4 = scmp.lt.s32.totalorder %s5162_s10, %s5162_s10 }
  0x47   :  { %p5169_p5 = por %p5168_p4, %p5167_p3 }
  0x49   :  { %p5170_p6 = pnand %p5169_p5, %p5163_p2 }
  0x4b   :  { %5173 = shalt.err (!%p5170_p6)
}
  0x4c   :  { %92 = dma.hbm_to_vmem [thread:$0]  %s5886_s6, 64, %s90_s30, [#allocation13]  }
  0x4d   :  { %5194 = dma.done.wait [#allocation4], 1024  }
  0x4e   :  { %5195 = vsyncadd [#allocation4], 4294966272 }
  0x4f   :  { %5196 = dma.done.wait [#allocation7], 131328  }
  0x50   :  { %5197 = vsyncadd [#allocation7], 4294835968 }
  0x51   :  { %5198 = dma.done.wait [#allocation10], 131136  }
  0x52   :  { %5199 = vsyncadd [#allocation10], 4294836160 }
  0x53   :  { %5200 = dma.done.wait [#allocation13], 128  }
  0x54   :  { %5201 = vsyncadd [#allocation13], 4294967168  ;;  %v363_v0 = vld [vmem:[#allocation6 + $0x788] sm:$0xff]  ;;  %v362_v2 = vld [vmem:[#allocation6 + $0x780] sm:$0xff]  ;;  %s5215_s4 = smov [#allocation15]  }
  0x55   :  { %v875_v1 = vld [vmem:[#allocation6 + $0x1788] sm:$0xff]  ;;  %1230 = vmatprep.subr.mxu0 %v363_v0  ;;  %v874_v3 = vld [vmem:[#allocation6 + $0x1780] sm:$0xff]  ;;  %s4966_s6 = sshll.u32 %s5215_s4, 4  ;;  %s4967_s6 = int_to_ptr.vmem [resolvable:$true] %s4966_s6 }
  0x56   :  { %1307 = vmatprep.subr.mxu1 %v875_v1  ;;  %v347_v4 = vld [vmem:[#allocation6 + $0x708] sm:$0xff]  ;;  %1231 = vmatpush1.msra.mxu0 %v362_v2  ;;  %v346_v6 = vld [vmem:[#allocation6 + $0x700] sm:$0xff]  ;;  %s5174_s12 = scalar_lea.vmem %s4967_s6, 1024  ;;  %p5179_p8 = scmp.lt.s32.totalorder %s4967_s6, %s4967_s6 }
  0x57   :  { %v859_v5 = vld [vmem:[#allocation6 + $0x1708] sm:$0xff]  ;;  %1308 = vmatpush1.msra.mxu1 %v874_v3  ;;  %v858_v7 = vld [vmem:[#allocation6 + $0x1700] sm:$0xff]  ;;  %1232 = vmatprep.subr.mxu0 %v347_v4  ;;  %p5175_p7 = scmp.ne.s32.totalorder %s4967_s6, %s5174_s12  ;;  %p5180_p9 = scmp.lt.s32.totalorder %s5174_s12, %s5174_s12 }
  0x58   :  { %v331_v8 = vld [vmem:[#allocation6 + $0x688] sm:$0xff]  ;;  %1309 = vmatprep.subr.mxu1 %v859_v5  ;;  %v330_v10 = vld [vmem:[#allocation6 + $0x680] sm:$0xff]  ;;  %1233 = vmatpush1.msra.mxu0 %v346_v6 }
  0x59   :  { %v843_v9 = vld [vmem:[#allocation6 + $0x1688] sm:$0xff]  ;;  %v842_v11 = vld [vmem:[#allocation6 + $0x1680] sm:$0xff]  ;;  %1310 = vmatpush1.msra.mxu1 %v858_v7  ;;  %1234 = vmatprep.subr.mxu0 %v331_v8  ;;  %p5181_p10 = por %p5180_p9, %p5179_p8 }
  0x5a   :  { %v315_v12 = vld [vmem:[#allocation6 + $0x608] sm:$0xff]  ;;  %1311 = vmatprep.subr.mxu1 %v843_v9  ;;  %v314_v14 = vld [vmem:[#allocation6 + $0x600] sm:$0xff]  ;;  %1235 = vmatpush1.msra.mxu0 %v330_v10 }
  0x5b   :  { %v827_v13 = vld [vmem:[#allocation6 + $0x1608] sm:$0xff]  ;;  %v826_v15 = vld [vmem:[#allocation6 + $0x1600] sm:$0xff]  ;;  %1312 = vmatpush1.msra.mxu1 %v842_v11  ;;  %1236 = vmatprep.subr.mxu0 %v315_v12  ;;  %p5182_p11 = pnand %p5181_p10, %p5175_p7 }
  0x5c   :  { %v299_v16 = vld [vmem:[#allocation6 + $0x588] sm:$0xff]  ;;  %1313 = vmatprep.subr.mxu1 %v827_v13  ;;  %v298_v18 = vld [vmem:[#allocation6 + $0x580] sm:$0xff]  ;;  %1237 = vmatpush1.msra.mxu0 %v314_v14 }
  0x5d   :  { %v811_v17 = vld [vmem:[#allocation6 + $0x1588] sm:$0xff]  ;;  %v810_v19 = vld [vmem:[#allocation6 + $0x1580] sm:$0xff]  ;;  %1314 = vmatpush1.msra.mxu1 %v826_v15  ;;  %1238 = vmatprep.subr.mxu0 %v299_v16 }
  0x5e   :  { %v283_v20 = vld [vmem:[#allocation6 + $0x508] sm:$0xff]  ;;  %1315 = vmatprep.subr.mxu1 %v811_v17  ;;  %v282_v22 = vld [vmem:[#allocation6 + $0x500] sm:$0xff]  ;;  %1239 = vmatpush1.msra.mxu0 %v298_v18 }
  0x5f   :  { %v795_v21 = vld [vmem:[#allocation6 + $0x1508] sm:$0xff]  ;;  %v794_v23 = vld [vmem:[#allocation6 + $0x1500] sm:$0xff]  ;;  %1316 = vmatpush1.msra.mxu1 %v810_v19  ;;  %1240 = vmatprep.subr.mxu0 %v283_v20 }
  0x60   :  { %v267_v24 = vld [vmem:[#allocation6 + $0x488] sm:$0xff]  ;;  %1317 = vmatprep.subr.mxu1 %v795_v21  ;;  %v266_v26 = vld [vmem:[#allocation6 + $0x480] sm:$0xff]  ;;  %1241 = vmatpush1.msra.mxu0 %v282_v22 }
  0x61   :  { %v779_v25 = vld [vmem:[#allocation6 + $0x1488] sm:$0xff]  ;;  %v778_v27 = vld [vmem:[#allocation6 + $0x1480] sm:$0xff]  ;;  %1318 = vmatpush1.msra.mxu1 %v794_v23  ;;  %1242 = vmatprep.subr.mxu0 %v267_v24 }
  0x62   :  { %v251_v28 = vld [vmem:[#allocation6 + $0x408] sm:$0xff]  ;;  %1319 = vmatprep.subr.mxu1 %v779_v25  ;;  %v250_v30 = vld [vmem:[#allocation6 + $0x400] sm:$0xff]  ;;  %1243 = vmatpush1.msra.mxu0 %v266_v26 }
  0x63   :  { %v763_v29 = vld [vmem:[#allocation6 + $0x1408] sm:$0xff]  ;;  %v762_v31 = vld [vmem:[#allocation6 + $0x1400] sm:$0xff]  ;;  %1320 = vmatpush1.msra.mxu1 %v778_v27  ;;  %1244 = vmatprep.subr.mxu0 %v251_v28 }
  0x64   :  { %v235_v32 = vld [vmem:[#allocation6 + $0x388] sm:$0xff]  ;;  %1321 = vmatprep.subr.mxu1 %v763_v29  ;;  %v234_v34 = vld [vmem:[#allocation6 + $0x380] sm:$0xff]  ;;  %1245 = vmatpush1.msra.mxu0 %v250_v30 }
  0x65   :  { %v747_v33 = vld [vmem:[#allocation6 + $0x1388] sm:$0xff]  ;;  %v746_v35 = vld [vmem:[#allocation6 + $0x1380] sm:$0xff]  ;;  %1322 = vmatpush1.msra.mxu1 %v762_v31  ;;  %1246 = vmatprep.subr.mxu0 %v235_v32 }
  0x66   :  { %v219_v36 = vld [vmem:[#allocation6 + $0x308] sm:$0xff]  ;;  %1323 = vmatprep.subr.mxu1 %v747_v33  ;;  %v218_v38 = vld [vmem:[#allocation6 + $0x300] sm:$0xff]  ;;  %1247 = vmatpush1.msra.mxu0 %v234_v34 }
  0x67   :  { %v731_v37 = vld [vmem:[#allocation6 + $0x1308] sm:$0xff]  ;;  %v730_v39 = vld [vmem:[#allocation6 + $0x1300] sm:$0xff]  ;;  %1324 = vmatpush1.msra.mxu1 %v746_v35  ;;  %1248 = vmatprep.subr.mxu0 %v219_v36 }
  0x68   :  { %v203_v40 = vld [vmem:[#allocation6 + $0x288] sm:$0xff]  ;;  %1325 = vmatprep.subr.mxu1 %v731_v37  ;;  %v202_v42 = vld [vmem:[#allocation6 + $0x280] sm:$0xff]  ;;  %1249 = vmatpush1.msra.mxu0 %v218_v38 }
  0x69   :  { %v715_v41 = vld [vmem:[#allocation6 + $0x1288] sm:$0xff]  ;;  %v714_v43 = vld [vmem:[#allocation6 + $0x1280] sm:$0xff]  ;;  %1326 = vmatpush1.msra.mxu1 %v730_v39  ;;  %1250 = vmatprep.subr.mxu0 %v203_v40 }
  0x6a   :  { %v187_v44 = vld [vmem:[#allocation6 + $0x208] sm:$0xff]  ;;  %1327 = vmatprep.subr.mxu1 %v715_v41  ;;  %v186_v46 = vld [vmem:[#allocation6 + $0x200] sm:$0xff]  ;;  %1251 = vmatpush1.msra.mxu0 %v202_v42 }
  0x6b   :  { %v699_v45 = vld [vmem:[#allocation6 + $0x1208] sm:$0xff]  ;;  %v698_v47 = vld [vmem:[#allocation6 + $0x1200] sm:$0xff]  ;;  %1328 = vmatpush1.msra.mxu1 %v714_v43  ;;  %1252 = vmatprep.subr.mxu0 %v187_v44 }
  0x6c   :  { %v171_v48 = vld [vmem:[#allocation6 + $0x188] sm:$0xff]  ;;  %1329 = vmatprep.subr.mxu1 %v699_v45  ;;  %v170_v50 = vld [vmem:[#allocation6 + $0x180] sm:$0xff]  ;;  %1253 = vmatpush1.msra.mxu0 %v186_v46 }
  0x6d   :  { %v683_v49 = vld [vmem:[#allocation6 + $0x1188] sm:$0xff]  ;;  %v682_v51 = vld [vmem:[#allocation6 + $0x1180] sm:$0xff]  ;;  %1330 = vmatpush1.msra.mxu1 %v698_v47  ;;  %1254 = vmatprep.subr.mxu0 %v171_v48 }
  0x6e   :  { %v155_v52 = vld [vmem:[#allocation6 + $0x108] sm:$0xff]  ;;  %1331 = vmatprep.subr.mxu1 %v683_v49  ;;  %v154_v54 = vld [vmem:[#allocation6 + $0x100] sm:$0xff]  ;;  %1255 = vmatpush1.msra.mxu0 %v170_v50 }
  0x6f   :  { %v667_v53 = vld [vmem:[#allocation6 + $0x1108] sm:$0xff]  ;;  %v666_v55 = vld [vmem:[#allocation6 + $0x1100] sm:$0xff]  ;;  %1332 = vmatpush1.msra.mxu1 %v682_v51  ;;  %1256 = vmatprep.subr.mxu0 %v155_v52 }
  0x70   :  { %v139_v56 = vld [vmem:[#allocation6 + $0x88] sm:$0xff]  ;;  %1333 = vmatprep.subr.mxu1 %v667_v53  ;;  %v138_v58 = vld [vmem:[#allocation6 + $0x80] sm:$0xff]  ;;  %1257 = vmatpush1.msra.mxu0 %v154_v54 }
  0x71   :  { %v651_v57 = vld [vmem:[#allocation6 + $0x1088] sm:$0xff]  ;;  %v650_v59 = vld [vmem:[#allocation6 + $0x1080] sm:$0xff]  ;;  %1334 = vmatpush1.msra.mxu1 %v666_v55  ;;  %1258 = vmatprep.subr.mxu0 %v139_v56 }
  0x72   :  { %v123_v60 = vld [vmem:[#allocation6 + $0x8] sm:$0xff]  ;;  %1335 = vmatprep.subr.mxu1 %v651_v57  ;;  %v122_v62 = vld [vmem:[#allocation6] sm:$0xff]  ;;  %1259 = vmatpush1.msra.mxu0 %v138_v58 }
  0x73   :  { %v635_v61 = vld [vmem:[#allocation6 + $0x1008] sm:$0xff]  ;;  %v634_v63 = vld [vmem:[#allocation6 + $0x1000] sm:$0xff]  ;;  %1336 = vmatpush1.msra.mxu1 %v650_v59  ;;  %1260 = vmatprep.subr.mxu0 %v123_v60 }
  0x74   :  { %v619_v0 = vld [vmem:[#allocation6 + $0xf88] sm:$0xff]  ;;  %1337 = vmatprep.subr.mxu1 %v635_v61  ;;  %v618_v2 = vld [vmem:[#allocation6 + $0xf80] sm:$0xff]  ;;  %1261 = vmatpush1.msra.mxu0 %v122_v62 }
  0x75   :  { %v1131_v1 = vld [vmem:[#allocation6 + $0x1f88] sm:$0xff]  ;;  %v1130_v3 = vld [vmem:[#allocation6 + $0x1f80] sm:$0xff]  ;;  %1338 = vmatpush1.msra.mxu1 %v634_v63  ;;  %1262 = vmatprep.subr.mxu0 %v619_v0 }
  0x76   :  { %v603_v4 = vld [vmem:[#allocation6 + $0xf08] sm:$0xff]  ;;  %1339 = vmatprep.subr.mxu1 %v1131_v1  ;;  %v602_v6 = vld [vmem:[#allocation6 + $0xf00] sm:$0xff]  ;;  %1263 = vmatpush2.msra.mxu0 %v618_v2  ;;  %v5287_v2 = vld [vmem:[#allocation3 + $0x18] sm:$0xff] }
  0x77   :  { %v1115_v5 = vld [vmem:[#allocation6 + $0x1f08] sm:$0xff]  ;;  %v1114_v7 = vld [vmem:[#allocation6 + $0x1f00] sm:$0xff]  ;;  %1340 = vmatpush2.msra.mxu1 %v1130_v3  ;;  %1264 = vmatprep.subr.mxu0 %v603_v4  ;;  %v365_v3 = vld [vmem:[#allocation6 + $0x798] sm:$0xff] }
  0x78   :  { %v587_v8 = vld [vmem:[#allocation6 + $0xe88] sm:$0xff]  ;;  %1341 = vmatprep.subr.mxu1 %v1115_v5  ;;  %v586_v10 = vld [vmem:[#allocation6 + $0xe80] sm:$0xff]  ;;  %1265 = vmatpush2.msra.mxu0 %v602_v6  ;;  %v877_v4 = vld [vmem:[#allocation6 + $0x1798] sm:$0xff] }
  0x79   :  { %v1099_v9 = vld [vmem:[#allocation6 + $0x1e88] sm:$0xff]  ;;  %v1098_v11 = vld [vmem:[#allocation6 + $0x1e80] sm:$0xff]  ;;  %1342 = vmatpush2.msra.mxu1 %v1114_v7  ;;  %1266 = vmatprep.subr.mxu0 %v587_v8  ;;  %v5290_v5 = vld [vmem:[#allocation3 + $0x10] sm:$0xff] }
  0x7a   :  { %v571_v12 = vld [vmem:[#allocation6 + $0xe08] sm:$0xff]  ;;  %1343 = vmatprep.subr.mxu1 %v1099_v9  ;;  %v570_v14 = vld [vmem:[#allocation6 + $0xe00] sm:$0xff]  ;;  %1267 = vmatpush2.msra.mxu0 %v586_v10  ;;  %v364_v6 = vld [vmem:[#allocation6 + $0x790] sm:$0xff] }
  0x7b   :  { %v1083_v13 = vld [vmem:[#allocation6 + $0x1e08] sm:$0xff]  ;;  %v1082_v15 = vld [vmem:[#allocation6 + $0x1e00] sm:$0xff]  ;;  %1344 = vmatpush2.msra.mxu1 %v1098_v11  ;;  %1268 = vmatprep.subr.mxu0 %v571_v12  ;;  %v876_v7 = vld [vmem:[#allocation6 + $0x1790] sm:$0xff] }
  0x7c   :  { %v555_v16 = vld [vmem:[#allocation6 + $0xd88] sm:$0xff]  ;;  %1345 = vmatprep.subr.mxu1 %v1083_v13  ;;  %v554_v18 = vld [vmem:[#allocation6 + $0xd80] sm:$0xff]  ;;  %1269 = vmatpush2.msra.mxu0 %v570_v14  ;;  %v349_v8 = vld [vmem:[#allocation6 + $0x718] sm:$0xff] }
  0x7d   :  { %v1067_v17 = vld [vmem:[#allocation6 + $0x1d88] sm:$0xff]  ;;  %v1066_v19 = vld [vmem:[#allocation6 + $0x1d80] sm:$0xff]  ;;  %1346 = vmatpush2.msra.mxu1 %v1082_v15  ;;  %1270 = vmatprep.subr.mxu0 %v555_v16  ;;  %v861_v9 = vld [vmem:[#allocation6 + $0x1718] sm:$0xff] }
  0x7e   :  { %v539_v20 = vld [vmem:[#allocation6 + $0xd08] sm:$0xff]  ;;  %1347 = vmatprep.subr.mxu1 %v1067_v17  ;;  %v538_v22 = vld [vmem:[#allocation6 + $0xd00] sm:$0xff]  ;;  %1271 = vmatpush2.msra.mxu0 %v554_v18  ;;  %v348_v10 = vld [vmem:[#allocation6 + $0x710] sm:$0xff] }
  0x7f   :  { %v1051_v21 = vld [vmem:[#allocation6 + $0x1d08] sm:$0xff]  ;;  %v1050_v23 = vld [vmem:[#allocation6 + $0x1d00] sm:$0xff]  ;;  %1348 = vmatpush2.msra.mxu1 %v1066_v19  ;;  %1272 = vmatprep.subr.mxu0 %v539_v20  ;;  %v860_v11 = vld [vmem:[#allocation6 + $0x1710] sm:$0xff] }
  0x80   :  { %v523_v24 = vld [vmem:[#allocation6 + $0xc88] sm:$0xff]  ;;  %1349 = vmatprep.subr.mxu1 %v1051_v21  ;;  %v522_v26 = vld [vmem:[#allocation6 + $0xc80] sm:$0xff]  ;;  %1273 = vmatpush2.msra.mxu0 %v538_v22  ;;  %v333_v12 = vld [vmem:[#allocation6 + $0x698] sm:$0xff] }
  0x81   :  { %v1035_v25 = vld [vmem:[#allocation6 + $0x1c88] sm:$0xff]  ;;  %v1034_v27 = vld [vmem:[#allocation6 + $0x1c80] sm:$0xff]  ;;  %1350 = vmatpush2.msra.mxu1 %v1050_v23  ;;  %1274 = vmatprep.subr.mxu0 %v523_v24  ;;  %v845_v13 = vld [vmem:[#allocation6 + $0x1698] sm:$0xff] }
  0x82   :  { %v507_v28 = vld [vmem:[#allocation6 + $0xc08] sm:$0xff]  ;;  %1351 = vmatprep.subr.mxu1 %v1035_v25  ;;  %v506_v30 = vld [vmem:[#allocation6 + $0xc00] sm:$0xff]  ;;  %1275 = vmatpush2.msra.mxu0 %v522_v26  ;;  %v332_v14 = vld [vmem:[#allocation6 + $0x690] sm:$0xff] }
  0x83   :  { %v1019_v29 = vld [vmem:[#allocation6 + $0x1c08] sm:$0xff]  ;;  %v1018_v31 = vld [vmem:[#allocation6 + $0x1c00] sm:$0xff]  ;;  %1352 = vmatpush2.msra.mxu1 %v1034_v27  ;;  %1276 = vmatprep.subr.mxu0 %v507_v28  ;;  %v844_v15 = vld [vmem:[#allocation6 + $0x1690] sm:$0xff] }
  0x84   :  { %v491_v32 = vld [vmem:[#allocation6 + $0xb88] sm:$0xff]  ;;  %1353 = vmatprep.subr.mxu1 %v1019_v29  ;;  %v490_v34 = vld [vmem:[#allocation6 + $0xb80] sm:$0xff]  ;;  %1277 = vmatpush2.msra.mxu0 %v506_v30  ;;  %v317_v16 = vld [vmem:[#allocation6 + $0x618] sm:$0xff] }
  0x85   :  { %v1003_v33 = vld [vmem:[#allocation6 + $0x1b88] sm:$0xff]  ;;  %v1002_v35 = vld [vmem:[#allocation6 + $0x1b80] sm:$0xff]  ;;  %1354 = vmatpush2.msra.mxu1 %v1018_v31  ;;  %1278 = vmatprep.subr.mxu0 %v491_v32  ;;  %v829_v17 = vld [vmem:[#allocation6 + $0x1618] sm:$0xff] }
  0x86   :  { %v475_v36 = vld [vmem:[#allocation6 + $0xb08] sm:$0xff]  ;;  %1355 = vmatprep.subr.mxu1 %v1003_v33  ;;  %v474_v38 = vld [vmem:[#allocation6 + $0xb00] sm:$0xff]  ;;  %1279 = vmatpush2.msra.mxu0 %v490_v34  ;;  %v316_v18 = vld [vmem:[#allocation6 + $0x610] sm:$0xff] }
  0x87   :  { %v987_v37 = vld [vmem:[#allocation6 + $0x1b08] sm:$0xff]  ;;  %v986_v39 = vld [vmem:[#allocation6 + $0x1b00] sm:$0xff]  ;;  %1356 = vmatpush2.msra.mxu1 %v1002_v35  ;;  %1280 = vmatprep.subr.mxu0 %v475_v36  ;;  %v828_v19 = vld [vmem:[#allocation6 + $0x1610] sm:$0xff] }
  0x88   :  { %v459_v40 = vld [vmem:[#allocation6 + $0xa88] sm:$0xff]  ;;  %1357 = vmatprep.subr.mxu1 %v987_v37  ;;  %v458_v42 = vld [vmem:[#allocation6 + $0xa80] sm:$0xff]  ;;  %1281 = vmatpush2.msra.mxu0 %v474_v38  ;;  %v301_v20 = vld [vmem:[#allocation6 + $0x598] sm:$0xff] }
  0x89   :  { %v971_v41 = vld [vmem:[#allocation6 + $0x1a88] sm:$0xff]  ;;  %v970_v43 = vld [vmem:[#allocation6 + $0x1a80] sm:$0xff]  ;;  %1358 = vmatpush2.msra.mxu1 %v986_v39  ;;  %1282 = vmatprep.subr.mxu0 %v459_v40  ;;  %v813_v21 = vld [vmem:[#allocation6 + $0x1598] sm:$0xff] }
  0x8a   :  { %v443_v44 = vld [vmem:[#allocation6 + $0xa08] sm:$0xff]  ;;  %1359 = vmatprep.subr.mxu1 %v971_v41  ;;  %v442_v46 = vld [vmem:[#allocation6 + $0xa00] sm:$0xff]  ;;  %1283 = vmatpush2.msra.mxu0 %v458_v42  ;;  %v300_v22 = vld [vmem:[#allocation6 + $0x590] sm:$0xff] }
  0x8b   :  { %v955_v45 = vld [vmem:[#allocation6 + $0x1a08] sm:$0xff]  ;;  %v954_v47 = vld [vmem:[#allocation6 + $0x1a00] sm:$0xff]  ;;  %1360 = vmatpush2.msra.mxu1 %v970_v43  ;;  %1284 = vmatprep.subr.mxu0 %v443_v44  ;;  %v812_v23 = vld [vmem:[#allocation6 + $0x1590] sm:$0xff] }
  0x8c   :  { %v427_v48 = vld [vmem:[#allocation6 + $0x988] sm:$0xff]  ;;  %1361 = vmatprep.subr.mxu1 %v955_v45  ;;  %v426_v50 = vld [vmem:[#allocation6 + $0x980] sm:$0xff]  ;;  %1285 = vmatpush2.msra.mxu0 %v442_v46  ;;  %v285_v24 = vld [vmem:[#allocation6 + $0x518] sm:$0xff] }
  0x8d   :  { %v939_v49 = vld [vmem:[#allocation6 + $0x1988] sm:$0xff]  ;;  %v938_v51 = vld [vmem:[#allocation6 + $0x1980] sm:$0xff]  ;;  %1362 = vmatpush2.msra.mxu1 %v954_v47  ;;  %1286 = vmatprep.subr.mxu0 %v427_v48  ;;  %v797_v25 = vld [vmem:[#allocation6 + $0x1518] sm:$0xff] }
  0x8e   :  { %v411_v52 = vld [vmem:[#allocation6 + $0x908] sm:$0xff]  ;;  %1363 = vmatprep.subr.mxu1 %v939_v49  ;;  %v410_v54 = vld [vmem:[#allocation6 + $0x900] sm:$0xff]  ;;  %1287 = vmatpush2.msra.mxu0 %v426_v50  ;;  %v284_v26 = vld [vmem:[#allocation6 + $0x510] sm:$0xff] }
  0x8f   :  { %v923_v53 = vld [vmem:[#allocation6 + $0x1908] sm:$0xff]  ;;  %v922_v55 = vld [vmem:[#allocation6 + $0x1900] sm:$0xff]  ;;  %1364 = vmatpush2.msra.mxu1 %v938_v51  ;;  %1288 = vmatprep.subr.mxu0 %v411_v52  ;;  %v796_v27 = vld [vmem:[#allocation6 + $0x1510] sm:$0xff] }
  0x90   :  { %v395_v56 = vld [vmem:[#allocation6 + $0x888] sm:$0xff]  ;;  %1365 = vmatprep.subr.mxu1 %v923_v53  ;;  %v394_v58 = vld [vmem:[#allocation6 + $0x880] sm:$0xff]  ;;  %1289 = vmatpush2.msra.mxu0 %v410_v54  ;;  %v269_v28 = vld [vmem:[#allocation6 + $0x498] sm:$0xff] }
  0x91   :  { %v907_v57 = vld [vmem:[#allocation6 + $0x1888] sm:$0xff]  ;;  %v906_v59 = vld [vmem:[#allocation6 + $0x1880] sm:$0xff]  ;;  %1366 = vmatpush2.msra.mxu1 %v922_v55  ;;  %1290 = vmatprep.subr.mxu0 %v395_v56  ;;  %v781_v29 = vld [vmem:[#allocation6 + $0x1498] sm:$0xff] }
  0x92   :  { %v379_v60 = vld [vmem:[#allocation6 + $0x808] sm:$0xff]  ;;  %1367 = vmatprep.subr.mxu1 %v907_v57  ;;  %v378_v62 = vld [vmem:[#allocation6 + $0x800] sm:$0xff]  ;;  %1291 = vmatpush2.msra.mxu0 %v394_v58  ;;  %v268_v30 = vld [vmem:[#allocation6 + $0x490] sm:$0xff] }
  0x93   :  { %v891_v61 = vld [vmem:[#allocation6 + $0x1808] sm:$0xff]  ;;  %1368 = vmatpush2.msra.mxu1 %v906_v59  ;;  %v890_v0 = vld [vmem:[#allocation6 + $0x1800] sm:$0xff]  ;;  %1292 = vmatprep.subr.mxu0 %v379_v60  ;;  %v780_v31 = vld [vmem:[#allocation6 + $0x1490] sm:$0xff] }
  0x94   :  { %v5283_v63 = vld [vmem:[#allocation3 + $0x8] sm:$0xff]  ;;  %v5285_v1 = vld [vmem:[#allocation3] sm:$0xff]  ;;  %1369 = vmatprep.subr.mxu1 %v891_v61  ;;  %1293 = vmatpush2.msra.mxu0 %v378_v62  ;;  %v253_v32 = vld [vmem:[#allocation6 + $0x418] sm:$0xff] }
  0x95   :  { %1294 = vmatprep.mubr.f32.mxu0 %v5283_v63  ;;  %1370 = vmatpush2.msra.mxu1 %v890_v0  ;;  %v765_v33 = vld [vmem:[#allocation6 + $0x1418] sm:$0xff]  ;;  %v252_v34 = vld [vmem:[#allocation6 + $0x410] sm:$0xff] }
  0x96   :  { %1295 = vmatmul.mubr.f32.vlgmr.msra.gmra.mxu0 %v5285_v1  ;;  %1371 = vmatprep.mubr.f32.mxu1 %v5287_v2  ;;  %v764_v35 = vld [vmem:[#allocation6 + $0x1410] sm:$0xff]  ;;  %v237_v36 = vld [vmem:[#allocation6 + $0x398] sm:$0xff] }
  0x97   :  { %1384 = vmatprep.subr.mxu0 %v365_v3  ;;  %1461 = vmatprep.subr.mxu1 %v877_v4  ;;  %v749_v37 = vld [vmem:[#allocation6 + $0x1398] sm:$0xff]  ;;  %v236_v38 = vld [vmem:[#allocation6 + $0x390] sm:$0xff] }
  0x98   :  { %1372 = vmatmul.mubr.f32.vlgmr.msra.gmra.mxu1 %v5290_v5  ;;  %1385 = vmatpush1.msra.mxu0 %v364_v6  ;;  %v748_v39 = vld [vmem:[#allocation6 + $0x1390] sm:$0xff]  ;;  %v221_v40 = vld [vmem:[#allocation6 + $0x318] sm:$0xff] }
  0x99   :  { %1462 = vmatpush1.msra.mxu1 %v876_v7  ;;  %1386 = vmatprep.subr.mxu0 %v349_v8  ;;  %v733_v41 = vld [vmem:[#allocation6 + $0x1318] sm:$0xff]  ;;  %v220_v42 = vld [vmem:[#allocation6 + $0x310] sm:$0xff] }
  0x9a   :  { %1463 = vmatprep.subr.mxu1 %v861_v9  ;;  %1387 = vmatpush1.msra.mxu0 %v348_v10  ;;  %v732_v43 = vld [vmem:[#allocation6 + $0x1310] sm:$0xff]  ;;  %v205_v44 = vld [vmem:[#allocation6 + $0x298] sm:$0xff] }
  0x9b   :  { %1464 = vmatpush1.msra.mxu1 %v860_v11  ;;  %1388 = vmatprep.subr.mxu0 %v333_v12  ;;  %v717_v45 = vld [vmem:[#allocation6 + $0x1298] sm:$0xff]  ;;  %v204_v46 = vld [vmem:[#allocation6 + $0x290] sm:$0xff] }
  0x9c   :  { %1465 = vmatprep.subr.mxu1 %v845_v13  ;;  %1389 = vmatpush1.msra.mxu0 %v332_v14  ;;  %v716_v47 = vld [vmem:[#allocation6 + $0x1290] sm:$0xff]  ;;  %v189_v48 = vld [vmem:[#allocation6 + $0x218] sm:$0xff] }
  0x9d   :  { %1466 = vmatpush1.msra.mxu1 %v844_v15  ;;  %1390 = vmatprep.subr.mxu0 %v317_v16  ;;  %v701_v49 = vld [vmem:[#allocation6 + $0x1218] sm:$0xff]  ;;  %v188_v50 = vld [vmem:[#allocation6 + $0x210] sm:$0xff] }
  0x9e   :  { %1467 = vmatprep.subr.mxu1 %v829_v17  ;;  %1391 = vmatpush1.msra.mxu0 %v316_v18  ;;  %v700_v51 = vld [vmem:[#allocation6 + $0x1210] sm:$0xff]  ;;  %v173_v52 = vld [vmem:[#allocation6 + $0x198] sm:$0xff] }
  0x9f   :  { %1468 = vmatpush1.msra.mxu1 %v828_v19  ;;  %1392 = vmatprep.subr.mxu0 %v301_v20  ;;  %v685_v53 = vld [vmem:[#allocation6 + $0x1198] sm:$0xff]  ;;  %v172_v54 = vld [vmem:[#allocation6 + $0x190] sm:$0xff] }
  0xa0   :  { %1469 = vmatprep.subr.mxu1 %v813_v21  ;;  %1393 = vmatpush1.msra.mxu0 %v300_v22  ;;  %v684_v55 = vld [vmem:[#allocation6 + $0x1190] sm:$0xff]  ;;  %v157_v56 = vld [vmem:[#allocation6 + $0x118] sm:$0xff] }
  0xa1   :  { %1470 = vmatpush1.msra.mxu1 %v812_v23  ;;  %1394 = vmatprep.subr.mxu0 %v285_v24  ;;  %v669_v57 = vld [vmem:[#allocation6 + $0x1118] sm:$0xff]  ;;  %v156_v58 = vld [vmem:[#allocation6 + $0x110] sm:$0xff] }
  0xa2   :  { %1471 = vmatprep.subr.mxu1 %v797_v25  ;;  %1395 = vmatpush1.msra.mxu0 %v284_v26  ;;  %v668_v59 = vld [vmem:[#allocation6 + $0x1110] sm:$0xff]  ;;  %v141_v60 = vld [vmem:[#allocation6 + $0x98] sm:$0xff] }
  0xa3   :  { %1472 = vmatpush1.msra.mxu1 %v796_v27  ;;  %1396 = vmatprep.subr.mxu0 %v269_v28  ;;  %v653_v61 = vld [vmem:[#allocation6 + $0x1098] sm:$0xff]  ;;  %v140_v62 = vld [vmem:[#allocation6 + $0x90] sm:$0xff] }
  0xa4   :  { %1473 = vmatprep.subr.mxu1 %v781_v29  ;;  %1397 = vmatpush1.msra.mxu0 %v268_v30  ;;  %v652_v0 = vld [vmem:[#allocation6 + $0x1090] sm:$0xff]  ;;  %v125_v3 = vld [vmem:[#allocation6 + $0x18] sm:$0xff] }
  0xa5   :  { %1474 = vmatpush1.msra.mxu1 %v780_v31  ;;  %1398 = vmatprep.subr.mxu0 %v253_v32  ;;  %v637_v4 = vld [vmem:[#allocation6 + $0x1018] sm:$0xff]  ;;  %v124_v6 = vld [vmem:[#allocation6 + $0x10] sm:$0xff] }
  0xa6   :  { %1475 = vmatprep.subr.mxu1 %v765_v33  ;;  %1399 = vmatpush1.msra.mxu0 %v252_v34  ;;  %v636_v7 = vld [vmem:[#allocation6 + $0x1010] sm:$0xff]  ;;  %v621_v8 = vld [vmem:[#allocation6 + $0xf98] sm:$0xff] }
  0xa7   :  { %1476 = vmatpush1.msra.mxu1 %v764_v35  ;;  %1400 = vmatprep.subr.mxu0 %v237_v36  ;;  %v1133_v9 = vld [vmem:[#allocation6 + $0x1f98] sm:$0xff]  ;;  %v620_v10 = vld [vmem:[#allocation6 + $0xf90] sm:$0xff] }
  0xa8   :  { %1477 = vmatprep.subr.mxu1 %v749_v37  ;;  %1401 = vmatpush1.msra.mxu0 %v236_v38  ;;  %v1132_v11 = vld [vmem:[#allocation6 + $0x1f90] sm:$0xff]  ;;  %v605_v12 = vld [vmem:[#allocation6 + $0xf18] sm:$0xff] }
  0xa9   :  { %1478 = vmatpush1.msra.mxu1 %v748_v39  ;;  %1402 = vmatprep.subr.mxu0 %v221_v40  ;;  %v1117_v13 = vld [vmem:[#allocation6 + $0x1f18] sm:$0xff]  ;;  %v604_v14 = vld [vmem:[#allocation6 + $0xf10] sm:$0xff] }
  0xaa   :  { %1479 = vmatprep.subr.mxu1 %v733_v41  ;;  %1403 = vmatpush1.msra.mxu0 %v220_v42  ;;  %v1116_v15 = vld [vmem:[#allocation6 + $0x1f10] sm:$0xff]  ;;  %v589_v16 = vld [vmem:[#allocation6 + $0xe98] sm:$0xff] }
  0xab   :  { %1480 = vmatpush1.msra.mxu1 %v732_v43  ;;  %1404 = vmatprep.subr.mxu0 %v205_v44  ;;  %v1101_v17 = vld [vmem:[#allocation6 + $0x1e98] sm:$0xff]  ;;  %v588_v18 = vld [vmem:[#allocation6 + $0xe90] sm:$0xff] }
  0xac   :  { %1481 = vmatprep.subr.mxu1 %v717_v45  ;;  %1405 = vmatpush1.msra.mxu0 %v204_v46  ;;  %v1100_v19 = vld [vmem:[#allocation6 + $0x1e90] sm:$0xff]  ;;  %v573_v20 = vld [vmem:[#allocation6 + $0xe18] sm:$0xff] }
  0xad   :  { %1482 = vmatpush1.msra.mxu1 %v716_v47  ;;  %1406 = vmatprep.subr.mxu0 %v189_v48  ;;  %v1085_v21 = vld [vmem:[#allocation6 + $0x1e18] sm:$0xff]  ;;  %v572_v22 = vld [vmem:[#allocation6 + $0xe10] sm:$0xff] }
  0xae   :  { %1483 = vmatprep.subr.mxu1 %v701_v49  ;;  %1407 = vmatpush1.msra.mxu0 %v188_v50  ;;  %v1084_v23 = vld [vmem:[#allocation6 + $0x1e10] sm:$0xff]  ;;  %v557_v24 = vld [vmem:[#allocation6 + $0xd98] sm:$0xff] }
  0xaf   :  { %1484 = vmatpush1.msra.mxu1 %v700_v51  ;;  %1408 = vmatprep.subr.mxu0 %v173_v52  ;;  %v1069_v25 = vld [vmem:[#allocation6 + $0x1d98] sm:$0xff]  ;;  %v556_v26 = vld [vmem:[#allocation6 + $0xd90] sm:$0xff] }
  0xb0   :  { %1485 = vmatprep.subr.mxu1 %v685_v53  ;;  %1409 = vmatpush1.msra.mxu0 %v172_v54  ;;  %v1068_v27 = vld [vmem:[#allocation6 + $0x1d90] sm:$0xff]  ;;  %v541_v28 = vld [vmem:[#allocation6 + $0xd18] sm:$0xff] }
  0xb1   :  { %1486 = vmatpush1.msra.mxu1 %v684_v55  ;;  %1410 = vmatprep.subr.mxu0 %v157_v56  ;;  %v1053_v29 = vld [vmem:[#allocation6 + $0x1d18] sm:$0xff]  ;;  %v540_v30 = vld [vmem:[#allocation6 + $0xd10] sm:$0xff] }
  0xb2   :  { %1487 = vmatprep.subr.mxu1 %v669_v57  ;;  %1411 = vmatpush1.msra.mxu0 %v156_v58  ;;  %v1052_v31 = vld [vmem:[#allocation6 + $0x1d10] sm:$0xff]  ;;  %v525_v32 = vld [vmem:[#allocation6 + $0xc98] sm:$0xff] }
  0xb3   :  { %1488 = vmatpush1.msra.mxu1 %v668_v59  ;;  %1412 = vmatprep.subr.mxu0 %v141_v60  ;;  %v1037_v33 = vld [vmem:[#allocation6 + $0x1c98] sm:$0xff]  ;;  %v524_v34 = vld [vmem:[#allocation6 + $0xc90] sm:$0xff]  ;;  %v5295_v60 = vld [vmem:[#allocation3 + $0x28] sm:$0xff] }
  0xb4   :  { %1489 = vmatprep.subr.mxu1 %v653_v61  ;;  %1413 = vmatpush1.msra.mxu0 %v140_v62  ;;  %v1036_v35 = vld [vmem:[#allocation6 + $0x1c90] sm:$0xff]  ;;  %v509_v36 = vld [vmem:[#allocation6 + $0xc18] sm:$0xff] }
  0xb5   :  { %1490 = vmatpush1.msra.mxu1 %v652_v0  ;;  %1414 = vmatprep.subr.mxu0 %v125_v3  ;;  %v1021_v37 = vld [vmem:[#allocation6 + $0x1c18] sm:$0xff]  ;;  %v508_v38 = vld [vmem:[#allocation6 + $0xc10] sm:$0xff]  ;;  %v5297_v0 = vld [vmem:[#allocation3 + $0x20] sm:$0xff] }
  0xb6   :  { %1491 = vmatprep.subr.mxu1 %v637_v4  ;;  %1415 = vmatpush1.msra.mxu0 %v124_v6  ;;  %v1020_v39 = vld [vmem:[#allocation6 + $0x1c10] sm:$0xff]  ;;  %v493_v40 = vld [vmem:[#allocation6 + $0xb98] sm:$0xff] }
  0xb7   :  { %1492 = vmatpush1.msra.mxu1 %v636_v7  ;;  %1416 = vmatprep.subr.mxu0 %v621_v8  ;;  %v1005_v41 = vld [vmem:[#allocation6 + $0x1b98] sm:$0xff]  ;;  %v492_v42 = vld [vmem:[#allocation6 + $0xb90] sm:$0xff] }
  0xb8   :  { %1493 = vmatprep.subr.mxu1 %v1133_v9  ;;  %1417 = vmatpush2.msra.mxu0 %v620_v10  ;;  %v1004_v43 = vld [vmem:[#allocation6 + $0x1b90] sm:$0xff]  ;;  %v477_v44 = vld [vmem:[#allocation6 + $0xb18] sm:$0xff] }
  0xb9   :  { %1494 = vmatpush2.msra.mxu1 %v1132_v11  ;;  %1418 = vmatprep.subr.mxu0 %v605_v12  ;;  %v989_v45 = vld [vmem:[#allocation6 + $0x1b18] sm:$0xff]  ;;  %v476_v46 = vld [vmem:[#allocation6 + $0xb10] sm:$0xff] }
  0xba   :  { %1495 = vmatprep.subr.mxu1 %v1117_v13  ;;  %1419 = vmatpush2.msra.mxu0 %v604_v14  ;;  %v988_v47 = vld [vmem:[#allocation6 + $0x1b10] sm:$0xff]  ;;  %v461_v48 = vld [vmem:[#allocation6 + $0xa98] sm:$0xff] }
  0xbb   :  { %1496 = vmatpush2.msra.mxu1 %v1116_v15  ;;  %1420 = vmatprep.subr.mxu0 %v589_v16  ;;  %v973_v49 = vld [vmem:[#allocation6 + $0x1a98] sm:$0xff]  ;;  %v460_v50 = vld [vmem:[#allocation6 + $0xa90] sm:$0xff]  ;;  %v367_v16 = vld [vmem:[#allocation6 + $0x7a8] sm:$0xff] }
  0xbc   :  { %1497 = vmatprep.subr.mxu1 %v1101_v17  ;;  %1421 = vmatpush2.msra.mxu0 %v588_v18  ;;  %v972_v51 = vld [vmem:[#allocation6 + $0x1a90] sm:$0xff]  ;;  %v445_v52 = vld [vmem:[#allocation6 + $0xa18] sm:$0xff]  ;;  %v879_v17 = vld [vmem:[#allocation6 + $0x17a8] sm:$0xff] }
  0xbd   :  { %1498 = vmatpush2.msra.mxu1 %v1100_v19  ;;  %1422 = vmatprep.subr.mxu0 %v573_v20  ;;  %v957_v53 = vld [vmem:[#allocation6 + $0x1a18] sm:$0xff]  ;;  %v444_v54 = vld [vmem:[#allocation6 + $0xa10] sm:$0xff]  ;;  %v366_v18 = vld [vmem:[#allocation6 + $0x7a0] sm:$0xff] }
  0xbe   :  { %1499 = vmatprep.subr.mxu1 %v1085_v21  ;;  %1423 = vmatpush2.msra.mxu0 %v572_v22  ;;  %v956_v55 = vld [vmem:[#allocation6 + $0x1a10] sm:$0xff]  ;;  %v429_v56 = vld [vmem:[#allocation6 + $0x998] sm:$0xff]  ;;  %v878_v19 = vld [vmem:[#allocation6 + $0x17a0] sm:$0xff] }
  0xbf   :  { %1500 = vmatpush2.msra.mxu1 %v1084_v23  ;;  %1424 = vmatprep.subr.mxu0 %v557_v24  ;;  %v941_v57 = vld [vmem:[#allocation6 + $0x1998] sm:$0xff]  ;;  %v428_v58 = vld [vmem:[#allocation6 + $0x990] sm:$0xff]  ;;  %v351_v20 = vld [vmem:[#allocation6 + $0x728] sm:$0xff] }
  0xc0   :  { %1501 = vmatprep.subr.mxu1 %v1069_v25  ;;  %1425 = vmatpush2.msra.mxu0 %v556_v26  ;;  %v940_v59 = vld [vmem:[#allocation6 + $0x1990] sm:$0xff]  ;;  %v413_v61 = vld [vmem:[#allocation6 + $0x918] sm:$0xff]  ;;  %v863_v21 = vld [vmem:[#allocation6 + $0x1728] sm:$0xff] }
  0xc1   :  { %1502 = vmatpush2.msra.mxu1 %v1068_v27  ;;  %1426 = vmatprep.subr.mxu0 %v541_v28  ;;  %v925_v62 = vld [vmem:[#allocation6 + $0x1918] sm:$0xff]  ;;  %v412_v3 = vld [vmem:[#allocation6 + $0x910] sm:$0xff]  ;;  %v350_v22 = vld [vmem:[#allocation6 + $0x720] sm:$0xff] }
  0xc2   :  { %1503 = vmatprep.subr.mxu1 %v1053_v29  ;;  %1427 = vmatpush2.msra.mxu0 %v540_v30  ;;  %v924_v4 = vld [vmem:[#allocation6 + $0x1910] sm:$0xff]  ;;  %v5300_v6 = vld [vmem:[#allocation3 + $0x38] sm:$0xff]  ;;  %v862_v23 = vld [vmem:[#allocation6 + $0x1720] sm:$0xff] }
  0xc3   :  { %1504 = vmatpush2.msra.mxu1 %v1052_v31  ;;  %1428 = vmatprep.subr.mxu0 %v525_v32  ;;  %v397_v7 = vld [vmem:[#allocation6 + $0x898] sm:$0xff]  ;;  %v5303_v9 = vld [vmem:[#allocation3 + $0x30] sm:$0xff]  ;;  %v335_v24 = vld [vmem:[#allocation6 + $0x6a8] sm:$0xff] }
  0xc4   :  { %1505 = vmatprep.subr.mxu1 %v1037_v33  ;;  %1429 = vmatpush2.msra.mxu0 %v524_v34  ;;  %v909_v8 = vld [vmem:[#allocation6 + $0x1898] sm:$0xff]  ;;  %v396_v10 = vld [vmem:[#allocation6 + $0x890] sm:$0xff]  ;;  %v334_v25 = vld [vmem:[#allocation6 + $0x6a0] sm:$0xff] }
  0xc5   :  { %1506 = vmatpush2.msra.mxu1 %v1036_v35  ;;  %1430 = vmatprep.subr.mxu0 %v509_v36  ;;  %v908_v11 = vld [vmem:[#allocation6 + $0x1890] sm:$0xff]  ;;  %v381_v12 = vld [vmem:[#allocation6 + $0x818] sm:$0xff]  ;;  %v319_v26 = vld [vmem:[#allocation6 + $0x628] sm:$0xff] }
  0xc6   :  { %1507 = vmatprep.subr.mxu1 %v1021_v37  ;;  %1431 = vmatpush2.msra.mxu0 %v508_v38  ;;  %v893_v13 = vld [vmem:[#allocation6 + $0x1818] sm:$0xff]  ;;  %v380_v14 = vld [vmem:[#allocation6 + $0x810] sm:$0xff]  ;;  %v318_v27 = vld [vmem:[#allocation6 + $0x620] sm:$0xff] }
  0xc7   :  { %1508 = vmatpush2.msra.mxu1 %v1020_v39  ;;  %1432 = vmatprep.subr.mxu0 %v493_v40  ;;  %v892_v15 = vld [vmem:[#allocation6 + $0x1810] sm:$0xff]  ;;  %v830_v28 = vld [vmem:[#allocation6 + $0x1620] sm:$0xff]  ;;  %v815_v29 = vld [vmem:[#allocation6 + $0x15a8] sm:$0xff] }
  0xc8   :  { %1509 = vmatprep.subr.mxu1 %v1005_v41  ;;  %1433 = vmatpush2.msra.mxu0 %v492_v42  ;;  %v302_v30 = vld [vmem:[#allocation6 + $0x5a0] sm:$0xff]  ;;  %v287_v32 = vld [vmem:[#allocation6 + $0x528] sm:$0xff] }
  0xc9   :  { %1510 = vmatpush2.msra.mxu1 %v1004_v43  ;;  %1434 = vmatprep.subr.mxu0 %v477_v44  ;;  %v814_v31 = vld [vmem:[#allocation6 + $0x15a0] sm:$0xff]  ;;  %v799_v33 = vld [vmem:[#allocation6 + $0x1528] sm:$0xff] }
  0xca   :  { %1511 = vmatprep.subr.mxu1 %v989_v45  ;;  %1435 = vmatpush2.msra.mxu0 %v476_v46  ;;  %v286_v34 = vld [vmem:[#allocation6 + $0x520] sm:$0xff]  ;;  %v271_v36 = vld [vmem:[#allocation6 + $0x4a8] sm:$0xff] }
  0xcb   :  { %1512 = vmatpush2.msra.mxu1 %v988_v47  ;;  %1436 = vmatprep.subr.mxu0 %v461_v48  ;;  %v798_v35 = vld [vmem:[#allocation6 + $0x1520] sm:$0xff]  ;;  %v783_v37 = vld [vmem:[#allocation6 + $0x14a8] sm:$0xff] }
  0xcc   :  { %1513 = vmatprep.subr.mxu1 %v973_v49  ;;  %1437 = vmatpush2.msra.mxu0 %v460_v50  ;;  %v270_v38 = vld [vmem:[#allocation6 + $0x4a0] sm:$0xff]  ;;  %v255_v40 = vld [vmem:[#allocation6 + $0x428] sm:$0xff] }
  0xcd   :  { %1514 = vmatpush2.msra.mxu1 %v972_v51  ;;  %1438 = vmatprep.subr.mxu0 %v445_v52  ;;  %v782_v39 = vld [vmem:[#allocation6 + $0x14a0] sm:$0xff]  ;;  %v767_v41 = vld [vmem:[#allocation6 + $0x1428] sm:$0xff] }
  0xce   :  { %1515 = vmatprep.subr.mxu1 %v957_v53  ;;  %1439 = vmatpush2.msra.mxu0 %v444_v54  ;;  %v254_v42 = vld [vmem:[#allocation6 + $0x420] sm:$0xff]  ;;  %v239_v44 = vld [vmem:[#allocation6 + $0x3a8] sm:$0xff] }
  0xcf   :  { %1516 = vmatpush2.msra.mxu1 %v956_v55  ;;  %1440 = vmatprep.subr.mxu0 %v429_v56  ;;  %v766_v43 = vld [vmem:[#allocation6 + $0x1420] sm:$0xff]  ;;  %v751_v45 = vld [vmem:[#allocation6 + $0x13a8] sm:$0xff] }
  0xd0   :  { %1517 = vmatprep.subr.mxu1 %v941_v57  ;;  %1441 = vmatpush2.msra.mxu0 %v428_v58  ;;  %v238_v46 = vld [vmem:[#allocation6 + $0x3a0] sm:$0xff]  ;;  %v223_v48 = vld [vmem:[#allocation6 + $0x328] sm:$0xff] }
  0xd1   :  { %1518 = vmatpush2.msra.mxu1 %v940_v59  ;;  %1300 = vmatprep.mubr.f32.mxu0 %v5295_v60  ;;  %v750_v47 = vld [vmem:[#allocation6 + $0x13a0] sm:$0xff]  ;;  %v735_v49 = vld [vmem:[#allocation6 + $0x1328] sm:$0xff] }
  0xd2   :  { %1442 = vmatprep.subr.mxu0 %v413_v61  ;;  %1519 = vmatprep.subr.mxu1 %v925_v62  ;;  %v222_v50 = vld [vmem:[#allocation6 + $0x320] sm:$0xff]  ;;  %v207_v52 = vld [vmem:[#allocation6 + $0x2a8] sm:$0xff] }
  0xd3   :  { %1301 = vmatmul.mubr.f32.gmra.mxu0 %v5297_v0  ;;  %1520 = vmatpush2.msra.mxu1 %v924_v4  ;;  %v734_v51 = vld [vmem:[#allocation6 + $0x1320] sm:$0xff]  ;;  %v719_v53 = vld [vmem:[#allocation6 + $0x12a8] sm:$0xff] }
  0xd4   :  { %1443 = vmatpush2.msra.mxu0 %v412_v3  ;;  %1377 = vmatprep.mubr.f32.mxu1 %v5300_v6  ;;  %v206_v54 = vld [vmem:[#allocation6 + $0x2a0] sm:$0xff]  ;;  %v191_v56 = vld [vmem:[#allocation6 + $0x228] sm:$0xff] }
  0xd5   :  { %1444 = vmatprep.subr.mxu0 %v397_v7  ;;  %1521 = vmatprep.subr.mxu1 %v909_v8  ;;  %v718_v55 = vld [vmem:[#allocation6 + $0x12a0] sm:$0xff]  ;;  %v703_v57 = vld [vmem:[#allocation6 + $0x1228] sm:$0xff] }
  0xd6   :  { %1378 = vmatmul.mubr.f32.gmra.mxu1 %v5303_v9  ;;  %1445 = vmatpush2.msra.mxu0 %v396_v10  ;;  %v190_v58 = vld [vmem:[#allocation6 + $0x220] sm:$0xff]  ;;  %v175_v61 = vld [vmem:[#allocation6 + $0x1a8] sm:$0xff] }
  0xd7   :  { %1522 = vmatpush2.msra.mxu1 %v908_v11  ;;  %1446 = vmatprep.subr.mxu0 %v381_v12  ;;  %v702_v59 = vld [vmem:[#allocation6 + $0x1220] sm:$0xff]  ;;  %v687_v62 = vld [vmem:[#allocation6 + $0x11a8] sm:$0xff] }
  0xd8   :  { %1523 = vmatprep.subr.mxu1 %v893_v13  ;;  %1447 = vmatpush2.msra.mxu0 %v380_v14  ;;  %v174_v3 = vld [vmem:[#allocation6 + $0x1a0] sm:$0xff]  ;;  %v159_v7 = vld [vmem:[#allocation6 + $0x128] sm:$0xff] }
  0xd9   :  { %1448 = vmatprep.mubr.f32.mxu0 %v5283_v63  ;;  %1524 = vmatpush2.msra.mxu1 %v892_v15  ;;  %v847_v63 = vld [vmem:[#allocation6 + $0x16a8] sm:$0xff]  ;;  %v686_v4 = vld [vmem:[#allocation6 + $0x11a0] sm:$0xff] }
  0xda   :  { %1449 = vmatmul.mubr.f32.vlgmr.msra.gmra.mxu0 %v5285_v1  ;;  %1525 = vmatprep.mubr.f32.mxu1 %v5287_v2  ;;  %v846_v1 = vld [vmem:[#allocation6 + $0x16a0] sm:$0xff]  ;;  %v831_v2 = vld [vmem:[#allocation6 + $0x1628] sm:$0xff] }
  0xdb   :  { %1538 = vmatprep.subr.mxu0 %v367_v16  ;;  %1615 = vmatprep.subr.mxu1 %v879_v17  ;;  %v671_v8 = vld [vmem:[#allocation6 + $0x1128] sm:$0xff]  ;;  %v158_v10 = vld [vmem:[#allocation6 + $0x120] sm:$0xff] }
  0xdc   :  { %1526 = vmatmul.mubr.f32.vlgmr.msra.gmra.mxu1 %v5290_v5  ;;  %1539 = vmatpush1.msra.mxu0 %v366_v18  ;;  %v303_v5 = vld [vmem:[#allocation6 + $0x5a8] sm:$0xff]  ;;  %v670_v11 = vld [vmem:[#allocation6 + $0x1120] sm:$0xff] }
  0xdd   :  { %1616 = vmatpush1.msra.mxu1 %v878_v19  ;;  %1540 = vmatprep.subr.mxu0 %v351_v20  ;;  %v143_v12 = vld [vmem:[#allocation6 + $0xa8] sm:$0xff]  ;;  %v142_v14 = vld [vmem:[#allocation6 + $0xa0] sm:$0xff] }
  0xde   :  { %1617 = vmatprep.subr.mxu1 %v863_v21  ;;  %1541 = vmatpush1.msra.mxu0 %v350_v22  ;;  %v655_v13 = vld [vmem:[#allocation6 + $0x10a8] sm:$0xff]  ;;  %v654_v15 = vld [vmem:[#allocation6 + $0x10a0] sm:$0xff] }
  0xdf   :  { %1618 = vmatpush1.msra.mxu1 %v862_v23  ;;  %1542 = vmatprep.subr.mxu0 %v335_v24  ;;  %v127_v16 = vld [vmem:[#allocation6 + $0x28] sm:$0xff]  ;;  %v126_v18 = vld [vmem:[#allocation6 + $0x20] sm:$0xff] }
  0xe0   :  { %1619 = vmatprep.subr.mxu1 %v847_v63  ;;  %1543 = vmatpush1.msra.mxu0 %v334_v25  ;;  %v639_v17 = vld [vmem:[#allocation6 + $0x1028] sm:$0xff]  ;;  %v638_v19 = vld [vmem:[#allocation6 + $0x1020] sm:$0xff] }
  0xe1   :  { %1620 = vmatpush1.msra.mxu1 %v846_v1  ;;  %1544 = vmatprep.subr.mxu0 %v319_v26  ;;  %v623_v20 = vld [vmem:[#allocation6 + $0xfa8] sm:$0xff]  ;;  %v622_v22 = vld [vmem:[#allocation6 + $0xfa0] sm:$0xff] }
  0xe2   :  { %1621 = vmatprep.subr.mxu1 %v831_v2  ;;  %1545 = vmatpush1.msra.mxu0 %v318_v27  ;;  %v1135_v21 = vld [vmem:[#allocation6 + $0x1fa8] sm:$0xff]  ;;  %v1134_v23 = vld [vmem:[#allocation6 + $0x1fa0] sm:$0xff] }
  0xe3   :  { %1622 = vmatpush1.msra.mxu1 %v830_v28  ;;  %1546 = vmatprep.subr.mxu0 %v303_v5  ;;  %v607_v24 = vld [vmem:[#allocation6 + $0xf28] sm:$0xff]  ;;  %v606_v25 = vld [vmem:[#allocation6 + $0xf20] sm:$0xff] }
  0xe4   :  { %1623 = vmatprep.subr.mxu1 %v815_v29  ;;  %1547 = vmatpush1.msra.mxu0 %v302_v30  ;;  %v1119_v63 = vld [vmem:[#allocation6 + $0x1f28] sm:$0xff]  ;;  %v1118_v1 = vld [vmem:[#allocation6 + $0x1f20] sm:$0xff] }
  0xe5   :  { %1624 = vmatpush1.msra.mxu1 %v814_v31  ;;  %1548 = vmatprep.subr.mxu0 %v287_v32  ;;  %v591_v26 = vld [vmem:[#allocation6 + $0xea8] sm:$0xff]  ;;  %v590_v27 = vld [vmem:[#allocation6 + $0xea0] sm:$0xff] }
  0xe6   :  { %1625 = vmatprep.subr.mxu1 %v799_v33  ;;  %1549 = vmatpush1.msra.mxu0 %v286_v34  ;;  %v1103_v2 = vld [vmem:[#allocation6 + $0x1ea8] sm:$0xff]  ;;  %v1102_v28 = vld [vmem:[#allocation6 + $0x1ea0] sm:$0xff] }
  0xe7   :  { %1626 = vmatpush1.msra.mxu1 %v798_v35  ;;  %1550 = vmatprep.subr.mxu0 %v271_v36  ;;  %v575_v5 = vld [vmem:[#allocation6 + $0xe28] sm:$0xff]  ;;  %v574_v30 = vld [vmem:[#allocation6 + $0xe20] sm:$0xff] }
  0xe8   :  { %1627 = vmatprep.subr.mxu1 %v783_v37  ;;  %1551 = vmatpush1.msra.mxu0 %v270_v38  ;;  %v1087_v29 = vld [vmem:[#allocation6 + $0x1e28] sm:$0xff]  ;;  %v1086_v31 = vld [vmem:[#allocation6 + $0x1e20] sm:$0xff] }
  0xe9   :  { %1628 = vmatpush1.msra.mxu1 %v782_v39  ;;  %1552 = vmatprep.subr.mxu0 %v255_v40  ;;  %v559_v32 = vld [vmem:[#allocation6 + $0xda8] sm:$0xff]  ;;  %v558_v34 = vld [vmem:[#allocation6 + $0xda0] sm:$0xff] }
  0xea   :  { %1629 = vmatprep.subr.mxu1 %v767_v41  ;;  %1553 = vmatpush1.msra.mxu0 %v254_v42  ;;  %v1071_v33 = vld [vmem:[#allocation6 + $0x1da8] sm:$0xff]  ;;  %v1070_v35 = vld [vmem:[#allocation6 + $0x1da0] sm:$0xff] }
  0xeb   :  { %1630 = vmatpush1.msra.mxu1 %v766_v43  ;;  %1554 = vmatprep.subr.mxu0 %v239_v44  ;;  %v543_v36 = vld [vmem:[#allocation6 + $0xd28] sm:$0xff]  ;;  %v542_v38 = vld [vmem:[#allocation6 + $0xd20] sm:$0xff] }
  0xec   :  { %1631 = vmatprep.subr.mxu1 %v751_v45  ;;  %1555 = vmatpush1.msra.mxu0 %v238_v46  ;;  %v1055_v37 = vld [vmem:[#allocation6 + $0x1d28] sm:$0xff]  ;;  %v1054_v39 = vld [vmem:[#allocation6 + $0x1d20] sm:$0xff] }
  0xed   :  { %1632 = vmatpush1.msra.mxu1 %v750_v47  ;;  %1556 = vmatprep.subr.mxu0 %v223_v48  ;;  %v527_v40 = vld [vmem:[#allocation6 + $0xca8] sm:$0xff]  ;;  %v526_v42 = vld [vmem:[#allocation6 + $0xca0] sm:$0xff] }
  0xee   :  { %1633 = vmatprep.subr.mxu1 %v735_v49  ;;  %1557 = vmatpush1.msra.mxu0 %v222_v50  ;;  %v1039_v41 = vld [vmem:[#allocation6 + $0x1ca8] sm:$0xff]  ;;  %v1038_v43 = vld [vmem:[#allocation6 + $0x1ca0] sm:$0xff] }
  0xef   :  { %1634 = vmatpush1.msra.mxu1 %v734_v51  ;;  %1558 = vmatprep.subr.mxu0 %v207_v52  ;;  %v511_v44 = vld [vmem:[#allocation6 + $0xc28] sm:$0xff]  ;;  %v510_v46 = vld [vmem:[#allocation6 + $0xc20] sm:$0xff] }
  0xf0   :  { %1635 = vmatprep.subr.mxu1 %v719_v53  ;;  %1559 = vmatpush1.msra.mxu0 %v206_v54  ;;  %v1023_v45 = vld [vmem:[#allocation6 + $0x1c28] sm:$0xff]  ;;  %v1022_v47 = vld [vmem:[#allocation6 + $0x1c20] sm:$0xff] }
  0xf1   :  { %1636 = vmatpush1.msra.mxu1 %v718_v55  ;;  %1560 = vmatprep.subr.mxu0 %v191_v56  ;;  %v495_v48 = vld [vmem:[#allocation6 + $0xba8] sm:$0xff]  ;;  %v494_v50 = vld [vmem:[#allocation6 + $0xba0] sm:$0xff] }
  0xf2   :  { %1637 = vmatprep.subr.mxu1 %v703_v57  ;;  %1561 = vmatpush1.msra.mxu0 %v190_v58  ;;  %v1007_v49 = vld [vmem:[#allocation6 + $0x1ba8] sm:$0xff]  ;;  %v1006_v51 = vld [vmem:[#allocation6 + $0x1ba0] sm:$0xff] }
  0xf3   :  { %1638 = vmatpush1.msra.mxu1 %v702_v59  ;;  %1562 = vmatprep.subr.mxu0 %v175_v61  ;;  %v479_v52 = vld [vmem:[#allocation6 + $0xb28] sm:$0xff]  ;;  %v478_v54 = vld [vmem:[#allocation6 + $0xb20] sm:$0xff] }
  0xf4   :  { %1639 = vmatprep.subr.mxu1 %v687_v62  ;;  %1563 = vmatpush1.msra.mxu0 %v174_v3  ;;  %v991_v53 = vld [vmem:[#allocation6 + $0x1b28] sm:$0xff]  ;;  %v990_v55 = vld [vmem:[#allocation6 + $0x1b20] sm:$0xff] }
  0xf5   :  { %1640 = vmatpush1.msra.mxu1 %v686_v4  ;;  %1564 = vmatprep.subr.mxu0 %v159_v7  ;;  %v463_v56 = vld [vmem:[#allocation6 + $0xaa8] sm:$0xff]  ;;  %v462_v58 = vld [vmem:[#allocation6 + $0xaa0] sm:$0xff] }
  0xf6   :  { %1641 = vmatprep.subr.mxu1 %v671_v8  ;;  %1565 = vmatpush1.msra.mxu0 %v158_v10  ;;  %v975_v57 = vld [vmem:[#allocation6 + $0x1aa8] sm:$0xff]  ;;  %v974_v59 = vld [vmem:[#allocation6 + $0x1aa0] sm:$0xff] }
  0xf7   :  { %1642 = vmatpush1.msra.mxu1 %v670_v11  ;;  %1566 = vmatprep.subr.mxu0 %v143_v12  ;;  %v447_v61 = vld [vmem:[#allocation6 + $0xa28] sm:$0xff]  ;;  %v446_v3 = vld [vmem:[#allocation6 + $0xa20] sm:$0xff] }
  0xf8   :  { %1643 = vmatprep.subr.mxu1 %v655_v13  ;;  %1567 = vmatpush1.msra.mxu0 %v142_v14  ;;  %v959_v62 = vld [vmem:[#allocation6 + $0x1a28] sm:$0xff]  ;;  %v958_v4 = vld [vmem:[#allocation6 + $0x1a20] sm:$0xff] }
  0xf9   :  { %1644 = vmatpush1.msra.mxu1 %v654_v15  ;;  %1568 = vmatprep.subr.mxu0 %v127_v16  ;;  %v431_v7 = vld [vmem:[#allocation6 + $0x9a8] sm:$0xff]  ;;  %v430_v10 = vld [vmem:[#allocation6 + $0x9a0] sm:$0xff] }
  0xfa   :  { %1645 = vmatprep.subr.mxu1 %v639_v17  ;;  %1569 = vmatpush1.msra.mxu0 %v126_v18  ;;  %v943_v8 = vld [vmem:[#allocation6 + $0x19a8] sm:$0xff]  ;;  %v942_v11 = vld [vmem:[#allocation6 + $0x19a0] sm:$0xff] }
  0xfb   :  { %1646 = vmatpush1.msra.mxu1 %v638_v19  ;;  %1570 = vmatprep.subr.mxu0 %v623_v20  ;;  %v415_v12 = vld [vmem:[#allocation6 + $0x928] sm:$0xff]  ;;  %v414_v14 = vld [vmem:[#allocation6 + $0x920] sm:$0xff] }
  0xfc   :  { %1647 = vmatprep.subr.mxu1 %v1135_v21  ;;  %1571 = vmatpush2.msra.mxu0 %v622_v22  ;;  %v927_v13 = vld [vmem:[#allocation6 + $0x1928] sm:$0xff]  ;;  %v926_v15 = vld [vmem:[#allocation6 + $0x1920] sm:$0xff] }
  0xfd   :  { %1648 = vmatpush2.msra.mxu1 %v1134_v23  ;;  %1572 = vmatprep.subr.mxu0 %v607_v24  ;;  %v399_v16 = vld [vmem:[#allocation6 + $0x8a8] sm:$0xff]  ;;  %v398_v18 = vld [vmem:[#allocation6 + $0x8a0] sm:$0xff]  ;;  %v881_v24 = vld [vmem:[#allocation6 + $0x17b8] sm:$0xff] }
  0xfe   :  { %1649 = vmatprep.subr.mxu1 %v1119_v63  ;;  %1573 = vmatpush2.msra.mxu0 %v606_v25  ;;  %v911_v17 = vld [vmem:[#allocation6 + $0x18a8] sm:$0xff]  ;;  %v910_v19 = vld [vmem:[#allocation6 + $0x18a0] sm:$0xff]  ;;  %v368_v63 = vld [vmem:[#allocation6 + $0x7b0] sm:$0xff] }
  0xff   :  { %1650 = vmatpush2.msra.mxu1 %v1118_v1  ;;  %1574 = vmatprep.subr.mxu0 %v591_v26  ;;  %v383_v20 = vld [vmem:[#allocation6 + $0x828] sm:$0xff]  ;;  %v382_v22 = vld [vmem:[#allocation6 + $0x820] sm:$0xff]  ;;  %v5321_v25 = vld [vmem:[#allocation3 + $0x18] sm:$0xff] }
 0x100   :  { %1651 = vmatprep.subr.mxu1 %v1103_v2  ;;  %1575 = vmatpush2.msra.mxu0 %v590_v27  ;;  %v895_v21 = vld [vmem:[#allocation6 + $0x1828] sm:$0xff]  ;;  %v353_v1 = vld [vmem:[#allocation6 + $0x738] sm:$0xff]  ;;  %v5324_v2 = vld [vmem:[#allocation3 + $0x10] sm:$0xff] }
 0x101   :  { %1652 = vmatpush2.msra.mxu1 %v1102_v28  ;;  %1576 = vmatprep.subr.mxu0 %v575_v5  ;;  %v5315_v23 = vld [vmem:[#allocation3 + $0x8] sm:$0xff]  ;;  %v865_v26 = vld [vmem:[#allocation6 + $0x1738] sm:$0xff]  ;;  %v352_v27 = vld [vmem:[#allocation6 + $0x730] sm:$0xff] }
 0x102   :  { %1653 = vmatprep.subr.mxu1 %v1087_v29  ;;  %1577 = vmatpush2.msra.mxu0 %v574_v30  ;;  %v864_v28 = vld [vmem:[#allocation6 + $0x1730] sm:$0xff]  ;;  %v337_v5 = vld [vmem:[#allocation6 + $0x6b8] sm:$0xff] }
 0x103   :  { %1654 = vmatpush2.msra.mxu1 %v1086_v31  ;;  %1578 = vmatprep.subr.mxu0 %v559_v32  ;;  %v849_v29 = vld [vmem:[#allocation6 + $0x16b8] sm:$0xff]  ;;  %v336_v30 = vld [vmem:[#allocation6 + $0x6b0] sm:$0xff] }
 0x104   :  { %1655 = vmatprep.subr.mxu1 %v1071_v33  ;;  %1579 = vmatpush2.msra.mxu0 %v558_v34  ;;  %v848_v31 = vld [vmem:[#allocation6 + $0x16b0] sm:$0xff]  ;;  %v321_v32 = vld [vmem:[#allocation6 + $0x638] sm:$0xff] }
 0x105   :  { %1656 = vmatpush2.msra.mxu1 %v1070_v35  ;;  %1580 = vmatprep.subr.mxu0 %v543_v36  ;;  %v833_v33 = vld [vmem:[#allocation6 + $0x1638] sm:$0xff]  ;;  %v320_v34 = vld [vmem:[#allocation6 + $0x630] sm:$0xff] }
 0x106   :  { %1657 = vmatprep.subr.mxu1 %v1055_v37  ;;  %1581 = vmatpush2.msra.mxu0 %v542_v38  ;;  %v832_v35 = vld [vmem:[#allocation6 + $0x1630] sm:$0xff]  ;;  %v305_v36 = vld [vmem:[#allocation6 + $0x5b8] sm:$0xff] }
 0x107   :  { %1658 = vmatpush2.msra.mxu1 %v1054_v39  ;;  %1582 = vmatprep.subr.mxu0 %v527_v40  ;;  %v817_v37 = vld [vmem:[#allocation6 + $0x15b8] sm:$0xff]  ;;  %v304_v38 = vld [vmem:[#allocation6 + $0x5b0] sm:$0xff] }
 0x108   :  { %1659 = vmatprep.subr.mxu1 %v1039_v41  ;;  %1583 = vmatpush2.msra.mxu0 %v526_v42  ;;  %v816_v39 = vld [vmem:[#allocation6 + $0x15b0] sm:$0xff]  ;;  %v289_v40 = vld [vmem:[#allocation6 + $0x538] sm:$0xff] }
 0x109   :  { %1660 = vmatpush2.msra.mxu1 %v1038_v43  ;;  %1584 = vmatprep.subr.mxu0 %v511_v44  ;;  %v801_v41 = vld [vmem:[#allocation6 + $0x1538] sm:$0xff]  ;;  %v288_v42 = vld [vmem:[#allocation6 + $0x530] sm:$0xff] }
 0x10a   :  { %1661 = vmatprep.subr.mxu1 %v1023_v45  ;;  %1585 = vmatpush2.msra.mxu0 %v510_v46  ;;  %v800_v43 = vld [vmem:[#allocation6 + $0x1530] sm:$0xff]  ;;  %v273_v44 = vld [vmem:[#allocation6 + $0x4b8] sm:$0xff] }
 0x10b   :  { %1662 = vmatpush2.msra.mxu1 %v1022_v47  ;;  %1586 = vmatprep.subr.mxu0 %v495_v48  ;;  %v785_v45 = vld [vmem:[#allocation6 + $0x14b8] sm:$0xff]  ;;  %v272_v46 = vld [vmem:[#allocation6 + $0x4b0] sm:$0xff] }
 0x10c   :  { %1663 = vmatprep.subr.mxu1 %v1007_v49  ;;  %1587 = vmatpush2.msra.mxu0 %v494_v50  ;;  %v784_v47 = vld [vmem:[#allocation6 + $0x14b0] sm:$0xff]  ;;  %v257_v48 = vld [vmem:[#allocation6 + $0x438] sm:$0xff] }
 0x10d   :  { %1664 = vmatpush2.msra.mxu1 %v1006_v51  ;;  %1588 = vmatprep.subr.mxu0 %v479_v52  ;;  %v769_v49 = vld [vmem:[#allocation6 + $0x1438] sm:$0xff]  ;;  %v256_v50 = vld [vmem:[#allocation6 + $0x430] sm:$0xff] }
 0x10e   :  { %1665 = vmatprep.subr.mxu1 %v991_v53  ;;  %1589 = vmatpush2.msra.mxu0 %v478_v54  ;;  %v768_v51 = vld [vmem:[#allocation6 + $0x1430] sm:$0xff]  ;;  %v241_v52 = vld [vmem:[#allocation6 + $0x3b8] sm:$0xff] }
 0x10f   :  { %1666 = vmatpush2.msra.mxu1 %v990_v55  ;;  %1590 = vmatprep.subr.mxu0 %v463_v56  ;;  %v753_v53 = vld [vmem:[#allocation6 + $0x13b8] sm:$0xff]  ;;  %v240_v54 = vld [vmem:[#allocation6 + $0x3b0] sm:$0xff] }
 0x110   :  { %1667 = vmatprep.subr.mxu1 %v975_v57  ;;  %1591 = vmatpush2.msra.mxu0 %v462_v58  ;;  %v752_v55 = vld [vmem:[#allocation6 + $0x13b0] sm:$0xff]  ;;  %v225_v56 = vld [vmem:[#allocation6 + $0x338] sm:$0xff] }
 0x111   :  { %1668 = vmatpush2.msra.mxu1 %v974_v59  ;;  %1592 = vmatprep.subr.mxu0 %v447_v61  ;;  %v737_v57 = vld [vmem:[#allocation6 + $0x1338] sm:$0xff]  ;;  %v224_v58 = vld [vmem:[#allocation6 + $0x330] sm:$0xff] }
 0x112   :  { %1669 = vmatprep.subr.mxu1 %v959_v62  ;;  %1593 = vmatpush2.msra.mxu0 %v446_v3  ;;  %v736_v59 = vld [vmem:[#allocation6 + $0x1330] sm:$0xff]  ;;  %v209_v61 = vld [vmem:[#allocation6 + $0x2b8] sm:$0xff] }
 0x113   :  { %1670 = vmatpush2.msra.mxu1 %v958_v4  ;;  %1594 = vmatprep.subr.mxu0 %v431_v7  ;;  %v721_v62 = vld [vmem:[#allocation6 + $0x12b8] sm:$0xff]  ;;  %v208_v3 = vld [vmem:[#allocation6 + $0x2b0] sm:$0xff] }
 0x114   :  { %1671 = vmatprep.subr.mxu1 %v943_v8  ;;  %1595 = vmatpush2.msra.mxu0 %v430_v10  ;;  %v720_v4 = vld [vmem:[#allocation6 + $0x12b0] sm:$0xff]  ;;  %v193_v7 = vld [vmem:[#allocation6 + $0x238] sm:$0xff] }
 0x115   :  { %1672 = vmatpush2.msra.mxu1 %v942_v11  ;;  %1454 = vmatprep.mubr.f32.mxu0 %v5295_v60  ;;  %v894_v60 = vld [vmem:[#allocation6 + $0x1820] sm:$0xff]  ;;  %v705_v8 = vld [vmem:[#allocation6 + $0x1238] sm:$0xff]  ;;  %v192_v10 = vld [vmem:[#allocation6 + $0x230] sm:$0xff] }
 0x116   :  { %1596 = vmatprep.subr.mxu0 %v415_v12  ;;  %1673 = vmatprep.subr.mxu1 %v927_v13  ;;  %v704_v11 = vld [vmem:[#allocation6 + $0x1230] sm:$0xff]  ;;  %v177_v12 = vld [vmem:[#allocation6 + $0x1b8] sm:$0xff] }
 0x117   :  { %1455 = vmatmul.mubr.f32.gmra.mxu0 %v5297_v0  ;;  %1674 = vmatpush2.msra.mxu1 %v926_v15  ;;  %v369_v0 = vld [vmem:[#allocation6 + $0x7b8] sm:$0xff]  ;;  %v688_v15 = vld [vmem:[#allocation6 + $0x11b0] sm:$0xff] }
 0x118   :  { %1597 = vmatpush2.msra.mxu0 %v414_v14  ;;  %1531 = vmatprep.mubr.f32.mxu1 %v5300_v6  ;;  %v5318_v6 = vld [vmem:[#allocation3] sm:$0xff]  ;;  %v689_v13 = vld [vmem:[#allocation6 + $0x11b8] sm:$0xff]  ;;  %v176_v14 = vld [vmem:[#allocation6 + $0x1b0] sm:$0xff] }
 0x119   :  { %1598 = vmatprep.subr.mxu0 %v399_v16  ;;  %1675 = vmatprep.subr.mxu1 %v911_v17  ;;  %v161_v16 = vld [vmem:[#allocation6 + $0x138] sm:$0xff] }
 0x11a   :  { %1532 = vmatmul.mubr.f32.gmra.mxu1 %v5303_v9  ;;  %1599 = vmatpush2.msra.mxu0 %v398_v18  ;;  %v880_v9 = vld [vmem:[#allocation6 + $0x17b0] sm:$0xff]  ;;  %v673_v17 = vld [vmem:[#allocation6 + $0x1138] sm:$0xff] }
 0x11b   :  { %1676 = vmatpush2.msra.mxu1 %v910_v19  ;;  %1600 = vmatprep.subr.mxu0 %v383_v20  ;;  %v160_v18 = vld [vmem:[#allocation6 + $0x130] sm:$0xff]  ;;  %v145_v20 = vld [vmem:[#allocation6 + $0xb8] sm:$0xff] }
 0x11c   :  { %1677 = vmatprep.subr.mxu1 %v895_v21  ;;  %1601 = vmatpush2.msra.mxu0 %v382_v22  ;;  %v672_v19 = vld [vmem:[#allocation6 + $0x1130] sm:$0xff]  ;;  %v657_v21 = vld [vmem:[#allocation6 + $0x10b8] sm:$0xff] }
 0x11d   :  { %1602 = vmatprep.mubr.f32.mxu0 %v5315_v23  ;;  %1678 = vmatpush2.msra.mxu1 %v894_v60  ;;  %v144_v22 = vld [vmem:[#allocation6 + $0xb0] sm:$0xff] }
 0x11e   :  { %1603 = vmatmul.mubr.f32.vlgmr.msra.gmra.mxu0 %v5318_v6  ;;  %1679 = vmatprep.mubr.f32.mxu1 %v5321_v25  ;;  %v656_v60 = vld [vmem:[#allocation6 + $0x10b0] sm:$0xff] }
 0x11f   :  { %1692 = vmatprep.subr.mxu0 %v369_v0  ;;  %1769 = vmatprep.subr.mxu1 %v881_v24  ;;  %v129_v0 = vld [vmem:[#allocation6 + $0x38] sm:$0xff] }
 0x120   :  { %1680 = vmatmul.mubr.f32.vlgmr.msra.gmra.mxu1 %v5324_v2  ;;  %1693 = vmatpush1.msra.mxu0 %v368_v63  ;;  %v641_v24 = vld [vmem:[#allocation6 + $0x1038] sm:$0xff]  ;;  %v128_v63 = vld [vmem:[#allocation6 + $0x30] sm:$0xff] }
 0x121   :  { %1770 = vmatpush1.msra.mxu1 %v880_v9  ;;  %1694 = vmatprep.subr.mxu0 %v353_v1  ;;  %v640_v9 = vld [vmem:[#allocation6 + $0x1030] sm:$0xff]  ;;  %v625_v1 = vld [vmem:[#allocation6 + $0xfb8] sm:$0xff] }
 0x122   :  { %1771 = vmatprep.subr.mxu1 %v865_v26  ;;  %1695 = vmatpush1.msra.mxu0 %v352_v27  ;;  %v1137_v26 = vld [vmem:[#allocation6 + $0x1fb8] sm:$0xff]  ;;  %v624_v27 = vld [vmem:[#allocation6 + $0xfb0] sm:$0xff] }
 0x123   :  { %1772 = vmatpush1.msra.mxu1 %v864_v28  ;;  %1696 = vmatprep.subr.mxu0 %v337_v5  ;;  %v1136_v28 = vld [vmem:[#allocation6 + $0x1fb0] sm:$0xff]  ;;  %v609_v5 = vld [vmem:[#allocation6 + $0xf38] sm:$0xff] }
 0x124   :  { %1773 = vmatprep.subr.mxu1 %v849_v29  ;;  %1697 = vmatpush1.msra.mxu0 %v336_v30  ;;  %v1121_v29 = vld [vmem:[#allocation6 + $0x1f38] sm:$0xff]  ;;  %v608_v30 = vld [vmem:[#allocation6 + $0xf30] sm:$0xff] }
 0x125   :  { %1774 = vmatpush1.msra.mxu1 %v848_v31  ;;  %1698 = vmatprep.subr.mxu0 %v321_v32  ;;  %v1120_v31 = vld [vmem:[#allocation6 + $0x1f30] sm:$0xff]  ;;  %v593_v32 = vld [vmem:[#allocation6 + $0xeb8] sm:$0xff] }
 0x126   :  { %1775 = vmatprep.subr.mxu1 %v833_v33  ;;  %1699 = vmatpush1.msra.mxu0 %v320_v34  ;;  %v1105_v33 = vld [vmem:[#allocation6 + $0x1eb8] sm:$0xff]  ;;  %v592_v34 = vld [vmem:[#allocation6 + $0xeb0] sm:$0xff] }
 0x127   :  { %1776 = vmatpush1.msra.mxu1 %v832_v35  ;;  %1700 = vmatprep.subr.mxu0 %v305_v36  ;;  %v1104_v35 = vld [vmem:[#allocation6 + $0x1eb0] sm:$0xff]  ;;  %v577_v36 = vld [vmem:[#allocation6 + $0xe38] sm:$0xff] }
 0x128   :  { %1777 = vmatprep.subr.mxu1 %v817_v37  ;;  %1701 = vmatpush1.msra.mxu0 %v304_v38  ;;  %v1089_v37 = vld [vmem:[#allocation6 + $0x1e38] sm:$0xff]  ;;  %v576_v38 = vld [vmem:[#allocation6 + $0xe30] sm:$0xff] }
 0x129   :  { %1778 = vmatpush1.msra.mxu1 %v816_v39  ;;  %1702 = vmatprep.subr.mxu0 %v289_v40  ;;  %v1088_v39 = vld [vmem:[#allocation6 + $0x1e30] sm:$0xff]  ;;  %v561_v40 = vld [vmem:[#allocation6 + $0xdb8] sm:$0xff] }
 0x12a   :  { %1779 = vmatprep.subr.mxu1 %v801_v41  ;;  %1703 = vmatpush1.msra.mxu0 %v288_v42  ;;  %v1073_v41 = vld [vmem:[#allocation6 + $0x1db8] sm:$0xff]  ;;  %v560_v42 = vld [vmem:[#allocation6 + $0xdb0] sm:$0xff] }
 0x12b   :  { %1780 = vmatpush1.msra.mxu1 %v800_v43  ;;  %1704 = vmatprep.subr.mxu0 %v273_v44  ;;  %v1072_v43 = vld [vmem:[#allocation6 + $0x1db0] sm:$0xff]  ;;  %v545_v44 = vld [vmem:[#allocation6 + $0xd38] sm:$0xff] }
 0x12c   :  { %1781 = vmatprep.subr.mxu1 %v785_v45  ;;  %1705 = vmatpush1.msra.mxu0 %v272_v46  ;;  %v1057_v45 = vld [vmem:[#allocation6 + $0x1d38] sm:$0xff]  ;;  %v1150_v46 = vlaneseq }
 0x12d   :  { %1782 = vmatpush1.msra.mxu1 %v784_v47  ;;  %1706 = vmatprep.subr.mxu0 %v257_v48  ;;  %v544_v47 = vld [vmem:[#allocation6 + $0xd30] sm:$0xff] }
 0x12e   :  { %1783 = vmatprep.subr.mxu1 %v769_v49  ;;  %1707 = vmatpush1.msra.mxu0 %v256_v50  ;;  %v1056_v48 = vld [vmem:[#allocation6 + $0x1d30] sm:$0xff]  ;;  %v529_v49 = vld [vmem:[#allocation6 + $0xcb8] sm:$0xff] }
 0x12f   :  { %1784 = vmatpush1.msra.mxu1 %v768_v51  ;;  %1708 = vmatprep.subr.mxu0 %v241_v52  ;;  %v1041_v50 = vld [vmem:[#allocation6 + $0x1cb8] sm:$0xff]  ;;  %v528_v51 = vld [vmem:[#allocation6 + $0xcb0] sm:$0xff] }
 0x130   :  { %1785 = vmatprep.subr.mxu1 %v753_v53  ;;  %1709 = vmatpush1.msra.mxu0 %v240_v54  ;;  %v1040_v52 = vld [vmem:[#allocation6 + $0x1cb0] sm:$0xff]  ;;  %v513_v53 = vld [vmem:[#allocation6 + $0xc38] sm:$0xff] }
 0x131   :  { %1786 = vmatpush1.msra.mxu1 %v752_v55  ;;  %1710 = vmatprep.subr.mxu0 %v225_v56  ;;  %v1025_v54 = vld [vmem:[#allocation6 + $0x1c38] sm:$0xff]  ;;  %v5327_v55 = vshrl.u32 %v1150_v46, 7  ;;  %v512_v56 = vld [vmem:[#allocation6 + $0xc30] sm:$0xff]  ;;  %v867_v46 = vld [vmem:[#allocation6 + $0x1748] sm:$0xff] }
 0x132   :  { %1787 = vmatprep.subr.mxu1 %v737_v57  ;;  %1711 = vmatpush1.msra.mxu0 %v224_v58  ;;  %v1024_v57 = vld [vmem:[#allocation6 + $0x1c30] sm:$0xff]  ;;  %v497_v58 = vld [vmem:[#allocation6 + $0xbb8] sm:$0xff] }
 0x133   :  { %1788 = vmatpush1.msra.mxu1 %v736_v59  ;;  %1712 = vmatprep.subr.mxu0 %v209_v61  ;;  %v1009_v59 = vld [vmem:[#allocation6 + $0x1bb8] sm:$0xff]  ;;  %v496_v61 = vld [vmem:[#allocation6 + $0xbb0] sm:$0xff] }
 0x134   :  { %1789 = vmatprep.subr.mxu1 %v721_v62  ;;  %1713 = vmatpush1.msra.mxu0 %v208_v3  ;;  %v1008_v62 = vld [vmem:[#allocation6 + $0x1bb0] sm:$0xff]  ;;  %v481_v3 = vld [vmem:[#allocation6 + $0xb38] sm:$0xff] }
 0x135   :  { %1790 = vmatpush1.msra.mxu1 %v720_v4  ;;  %1714 = vmatprep.subr.mxu0 %v193_v7  ;;  %v993_v4 = vld [vmem:[#allocation6 + $0x1b38] sm:$0xff]  ;;  %v5330_v7 = vsub.s32 0, %v5327_v55 }
 0x136   :  { %1791 = vmatprep.subr.mxu1 %v705_v8  ;;  %1715 = vmatpush1.msra.mxu0 %v192_v10  ;;  %v480_v8 = vld [vmem:[#allocation6 + $0xb30] sm:$0xff] }
 0x137   :  { %1792 = vmatpush1.msra.mxu1 %v704_v11  ;;  %1716 = vmatprep.subr.mxu0 %v177_v12  ;;  %v992_v10 = vld [vmem:[#allocation6 + $0x1b30] sm:$0xff]  ;;  %v5332_v11 = vld [vmem:[#allocation8] sm:$0xff]  ;;  %v465_v12 = vld [vmem:[#allocation6 + $0xab8] sm:$0xff] }
 0x138   :  { %1793 = vmatprep.subr.mxu1 %v689_v13  ;;  %1717 = vmatpush1.msra.mxu0 %v176_v14  ;;  %v977_v13 = vld [vmem:[#allocation6 + $0x1ab8] sm:$0xff]  ;;  %v464_v14 = vld [vmem:[#allocation6 + $0xab0] sm:$0xff] }
 0x139   :  { %1794 = vmatpush1.msra.mxu1 %v688_v15  ;;  %1718 = vmatprep.subr.mxu0 %v161_v16  ;;  %v976_v15 = vld [vmem:[#allocation6 + $0x1ab0] sm:$0xff]  ;;  %v449_v16 = vld [vmem:[#allocation6 + $0xa38] sm:$0xff] }
 0x13a   :  { %1795 = vmatprep.subr.mxu1 %v673_v17  ;;  %1719 = vmatpush1.msra.mxu0 %v160_v18  ;;  %v961_v17 = vld [vmem:[#allocation6 + $0x1a38] sm:$0xff]  ;;  %v5336_v18 = vrot.slane %v5332_v11, %v5330_v7 }
 0x13b   :  { %1796 = vmatpush1.msra.mxu1 %v672_v19  ;;  %1720 = vmatprep.subr.mxu0 %v145_v20  ;;  %v448_v19 = vld [vmem:[#allocation6 + $0xa30] sm:$0xff] }
 0x13c   :  { %1797 = vmatprep.subr.mxu1 %v657_v21  ;;  %1721 = vmatpush1.msra.mxu0 %v144_v22  ;;  %v960_v20 = vld [vmem:[#allocation6 + $0x1a30] sm:$0xff]  ;;  %v433_v21 = vld [vmem:[#allocation6 + $0x9b8] sm:$0xff] }
 0x13d   :  { %1798 = vmatpush1.msra.mxu1 %v656_v60  ;;  %1722 = vmatprep.subr.mxu0 %v129_v0  ;;  %v945_v22 = vld [vmem:[#allocation6 + $0x19b8] sm:$0xff]  ;;  %v432_v60 = vld [vmem:[#allocation6 + $0x9b0] sm:$0xff] }
 0x13e   :  { %1799 = vmatprep.subr.mxu1 %v641_v24  ;;  %1723 = vmatpush1.msra.mxu0 %v128_v63  ;;  %v944_v0 = vld [vmem:[#allocation6 + $0x19b0] sm:$0xff]  ;;  %v417_v63 = vld [vmem:[#allocation6 + $0x938] sm:$0xff] }
 0x13f   :  { %1800 = vmatpush1.msra.mxu1 %v640_v9  ;;  %1724 = vmatprep.subr.mxu0 %v625_v1  ;;  %v929_v1 = vld [vmem:[#allocation6 + $0x1938] sm:$0xff] }
 0x140   :  { %1801 = vmatprep.subr.mxu1 %v1137_v26  ;;  %1725 = vmatpush2.msra.mxu0 %v624_v27  ;;  %v416_v27 = vld [vmem:[#allocation6 + $0x930] sm:$0xff] }
 0x141   :  { %1802 = vmatpush2.msra.mxu1 %v1136_v28  ;;  %1726 = vmatprep.subr.mxu0 %v609_v5  ;;  %v928_v28 = vld [vmem:[#allocation6 + $0x1930] sm:$0xff] }
 0x142   :  { %1803 = vmatprep.subr.mxu1 %v1121_v29  ;;  %1727 = vmatpush2.msra.mxu0 %v608_v30  ;;  %v5341_v29 = vld [vmem:[#allocation3 + $0x28] sm:$0xff]  ;;  %v401_v30 = vld [vmem:[#allocation6 + $0x8b8] sm:$0xff] }
 0x143   :  { %1804 = vmatpush2.msra.mxu1 %v1120_v31  ;;  %1728 = vmatprep.subr.mxu0 %v593_v32  ;;  %v5344_v31 = vld [vmem:[#allocation3 + $0x20] sm:$0xff]  ;;  %v913_v32 = vld [vmem:[#allocation6 + $0x18b8] sm:$0xff] }
 0x144   :  { %1805 = vmatprep.subr.mxu1 %v1105_v33  ;;  %1729 = vmatpush2.msra.mxu0 %v592_v34  ;;  %v400_v33 = vld [vmem:[#allocation6 + $0x8b0] sm:$0xff] }
 0x145   :  { %1806 = vmatpush2.msra.mxu1 %v1104_v35  ;;  %1730 = vmatprep.subr.mxu0 %v577_v36  ;;  %v912_v34 = vld [vmem:[#allocation6 + $0x18b0] sm:$0xff]  ;;  %v5347_v35 = vld [vmem:[#allocation3 + $0x38] sm:$0xff] }
 0x146   :  { %1807 = vmatprep.subr.mxu1 %v1089_v37  ;;  %1731 = vmatpush2.msra.mxu0 %v576_v38  ;;  %v385_v36 = vld [vmem:[#allocation6 + $0x838] sm:$0xff]  ;;  %v5350_v38 = vld [vmem:[#allocation3 + $0x30] sm:$0xff] }
 0x147   :  { %1808 = vmatpush2.msra.mxu1 %v1088_v39  ;;  %1732 = vmatprep.subr.mxu0 %v561_v40  ;;  %v897_v37 = vld [vmem:[#allocation6 + $0x1838] sm:$0xff]  ;;  %v384_v39 = vld [vmem:[#allocation6 + $0x830] sm:$0xff] }
 0x148   :  { %1809 = vmatprep.subr.mxu1 %v1073_v41  ;;  %1733 = vmatpush2.msra.mxu0 %v560_v42  ;;  %v896_v40 = vld [vmem:[#allocation6 + $0x1830] sm:$0xff]  ;;  %v371_v41 = vld [vmem:[#allocation6 + $0x7c8] sm:$0xff] }
 0x149   :  { %1810 = vmatpush2.msra.mxu1 %v1072_v43  ;;  %1734 = vmatprep.subr.mxu0 %v545_v44  ;;  %v883_v42 = vld [vmem:[#allocation6 + $0x17c8] sm:$0xff]  ;;  %v370_v43 = vld [vmem:[#allocation6 + $0x7c0] sm:$0xff] }
 0x14a   :  { %1811 = vmatprep.subr.mxu1 %v1057_v45  ;;  %1735 = vmatpush2.msra.mxu0 %v544_v47  ;;  %v882_v44 = vld [vmem:[#allocation6 + $0x17c0] sm:$0xff]  ;;  %v355_v45 = vld [vmem:[#allocation6 + $0x748] sm:$0xff] }
 0x14b   :  { %1812 = vmatpush2.msra.mxu1 %v1056_v48  ;;  %1736 = vmatprep.subr.mxu0 %v529_v49  ;;  %v354_v47 = vld [vmem:[#allocation6 + $0x740] sm:$0xff]  ;;  %v339_v49 = vld [vmem:[#allocation6 + $0x6c8] sm:$0xff] }
 0x14c   :  { %1813 = vmatprep.subr.mxu1 %v1041_v50  ;;  %1737 = vmatpush2.msra.mxu0 %v528_v51  ;;  %v866_v48 = vld [vmem:[#allocation6 + $0x1740] sm:$0xff]  ;;  %v323_v51 = vld [vmem:[#allocation6 + $0x648] sm:$0xff] }
 0x14d   :  { %1814 = vmatpush2.msra.mxu1 %v1040_v52  ;;  %1738 = vmatprep.subr.mxu0 %v513_v53  ;;  %v338_v50 = vld [vmem:[#allocation6 + $0x6c0] sm:$0xff] }
 0x14e   :  { %1815 = vmatprep.subr.mxu1 %v1025_v54  ;;  %1739 = vmatpush2.msra.mxu0 %v512_v56  ;;  %v322_v52 = vld [vmem:[#allocation6 + $0x640] sm:$0xff]  ;;  %v819_v54 = vld [vmem:[#allocation6 + $0x15c8] sm:$0xff] }
 0x14f   :  { %1816 = vmatpush2.msra.mxu1 %v1024_v57  ;;  %1740 = vmatprep.subr.mxu0 %v497_v58  ;;  %v834_v53 = vld [vmem:[#allocation6 + $0x1640] sm:$0xff]  ;;  %v291_v58 = vld [vmem:[#allocation6 + $0x548] sm:$0xff] }
 0x150   :  { %1817 = vmatprep.subr.mxu1 %v1009_v59  ;;  %1741 = vmatpush2.msra.mxu0 %v496_v61  ;;  %v306_v56 = vld [vmem:[#allocation6 + $0x5c0] sm:$0xff]  ;;  %v803_v59 = vld [vmem:[#allocation6 + $0x1548] sm:$0xff] }
 0x151   :  { %1818 = vmatpush2.msra.mxu1 %v1008_v62  ;;  %1742 = vmatprep.subr.mxu0 %v481_v3  ;;  %v818_v57 = vld [vmem:[#allocation6 + $0x15c0] sm:$0xff]  ;;  %v275_v3 = vld [vmem:[#allocation6 + $0x4c8] sm:$0xff] }
 0x152   :  { %1819 = vmatprep.subr.mxu1 %v993_v4  ;;  %1743 = vmatpush2.msra.mxu0 %v480_v8  ;;  %v290_v61 = vld [vmem:[#allocation6 + $0x540] sm:$0xff]  ;;  %v787_v4 = vld [vmem:[#allocation6 + $0x14c8] sm:$0xff] }
 0x153   :  { %1820 = vmatpush2.msra.mxu1 %v992_v10  ;;  %1744 = vmatprep.subr.mxu0 %v465_v12  ;;  %v802_v62 = vld [vmem:[#allocation6 + $0x1540] sm:$0xff]  ;;  %v259_v12 = vld [vmem:[#allocation6 + $0x448] sm:$0xff] }
 0x154   :  { %1821 = vmatprep.subr.mxu1 %v977_v13  ;;  %1745 = vmatpush2.msra.mxu0 %v464_v14  ;;  %v274_v8 = vld [vmem:[#allocation6 + $0x4c0] sm:$0xff]  ;;  %v771_v13 = vld [vmem:[#allocation6 + $0x1448] sm:$0xff] }
 0x155   :  { %1822 = vmatpush2.msra.mxu1 %v976_v15  ;;  %1746 = vmatprep.subr.mxu0 %v449_v16  ;;  %v786_v10 = vld [vmem:[#allocation6 + $0x14c0] sm:$0xff]  ;;  %v243_v16 = vld [vmem:[#allocation6 + $0x3c8] sm:$0xff] }
 0x156   :  { %1823 = vmatprep.subr.mxu1 %v961_v17  ;;  %v1296_v24 = vpop.f32.mrf.mxu0  ;;  %1747 = vmatpush2.msra.mxu0 %v448_v19  ;;  %v258_v14 = vld [vmem:[#allocation6 + $0x440] sm:$0xff]  ;;  %v755_v17 = vld [vmem:[#allocation6 + $0x13c8] sm:$0xff] }
 0x157   :  { %1824 = vmatpush2.msra.mxu1 %v960_v20  ;;  %v1297_v9 = vadd.f32 %v1296_v24, %v5336_v18  ;;  %1748 = vmatprep.subr.mxu0 %v433_v21  ;;  %v770_v15 = vld [vmem:[#allocation6 + $0x1440] sm:$0xff]  ;;  %v227_v21 = vld [vmem:[#allocation6 + $0x348] sm:$0xff] }
 0x158   :  { %1825 = vmatprep.subr.mxu1 %v945_v22  ;;  %v1373_v26 = vpop.f32.mrf.mxu1  ;;  %1749 = vmatpush2.msra.mxu0 %v432_v60  ;;  %v242_v19 = vld [vmem:[#allocation6 + $0x3c0] sm:$0xff]  ;;  %v739_v22 = vld [vmem:[#allocation6 + $0x1348] sm:$0xff] }
 0x159   :  { %1826 = vmatpush2.msra.mxu1 %v944_v0  ;;  %v5339_v5 = vadd.f32 %v1373_v26, %v1297_v9  ;;  %1608 = vmatprep.mubr.f32.mxu0 %v5341_v29  ;;  %v754_v20 = vld [vmem:[#allocation6 + $0x13c0] sm:$0xff]  ;;  %v211_v24 = vld [vmem:[#allocation6 + $0x2c8] sm:$0xff] }
 0x15a   :  { %1750 = vmatprep.subr.mxu0 %v417_v63  ;;  %1827 = vmatprep.subr.mxu1 %v929_v1  ;;  %v226_v60 = vld [vmem:[#allocation6 + $0x340] sm:$0xff]  ;;  %v723_v63 = vld [vmem:[#allocation6 + $0x12c8] sm:$0xff] }
 0x15b   :  { %1609 = vmatmul.mubr.f32.gmra.mxu0 %v5344_v31  ;;  %1828 = vmatpush2.msra.mxu1 %v928_v28  ;;  %v738_v0 = vld [vmem:[#allocation6 + $0x1340] sm:$0xff]  ;;  %v195_v26 = vld [vmem:[#allocation6 + $0x248] sm:$0xff] }
 0x15c   :  { %1751 = vmatpush2.msra.mxu0 %v416_v27  ;;  %1685 = vmatprep.mubr.f32.mxu1 %v5347_v35  ;;  %v210_v9 = vld [vmem:[#allocation6 + $0x2c0] sm:$0xff]  ;;  %v707_v27 = vld [vmem:[#allocation6 + $0x1248] sm:$0xff] }
 0x15d   :  { %1752 = vmatprep.subr.mxu0 %v401_v30  ;;  %1829 = vmatprep.subr.mxu1 %v913_v32  ;;  %v722_v1 = vld [vmem:[#allocation6 + $0x12c0] sm:$0xff]  ;;  %v179_v32 = vld [vmem:[#allocation6 + $0x1c8] sm:$0xff] }
 0x15e   :  { %1686 = vmatmul.mubr.f32.gmra.mxu1 %v5350_v38  ;;  %1753 = vmatpush2.msra.mxu0 %v400_v33  ;;  %v194_v28 = vld [vmem:[#allocation6 + $0x240] sm:$0xff]  ;;  %v691_v33 = vld [vmem:[#allocation6 + $0x11c8] sm:$0xff] }
 0x15f   :  { %1830 = vmatpush2.msra.mxu1 %v912_v34  ;;  %1754 = vmatprep.subr.mxu0 %v385_v36  ;;  %v706_v30 = vld [vmem:[#allocation6 + $0x1240] sm:$0xff] }
 0x160   :  { %1831 = vmatprep.subr.mxu1 %v897_v37  ;;  %1755 = vmatpush2.msra.mxu0 %v384_v39  ;;  %v178_v34 = vld [vmem:[#allocation6 + $0x1c0] sm:$0xff]  ;;  %v163_v37 = vld [vmem:[#allocation6 + $0x148] sm:$0xff] }
 0x161   :  { %1756 = vmatprep.mubr.f32.mxu0 %v5315_v23  ;;  %1832 = vmatpush2.msra.mxu1 %v896_v40  ;;  %v851_v23 = vld [vmem:[#allocation6 + $0x16c8] sm:$0xff]  ;;  %v690_v36 = vld [vmem:[#allocation6 + $0x11c0] sm:$0xff] }
 0x162   :  { %1757 = vmatmul.mubr.f32.vlgmr.msra.gmra.mxu0 %v5318_v6  ;;  %1833 = vmatprep.mubr.f32.mxu1 %v5321_v25  ;;  %v850_v6 = vld [vmem:[#allocation6 + $0x16c0] sm:$0xff]  ;;  %v835_v25 = vld [vmem:[#allocation6 + $0x1648] sm:$0xff] }
 0x163   :  { %1846 = vmatprep.subr.mxu0 %v371_v41  ;;  %1923 = vmatprep.subr.mxu1 %v883_v42  ;;  %v675_v39 = vld [vmem:[#allocation6 + $0x1148] sm:$0xff]  ;;  %v162_v40 = vld [vmem:[#allocation6 + $0x140] sm:$0xff] }
 0x164   :  { %1834 = vmatmul.mubr.f32.vlgmr.msra.gmra.mxu1 %v5324_v2  ;;  %1847 = vmatpush1.msra.mxu0 %v370_v43  ;;  %v307_v2 = vld [vmem:[#allocation6 + $0x5c8] sm:$0xff]  ;;  %v674_v41 = vld [vmem:[#allocation6 + $0x1140] sm:$0xff] }
 0x165   :  { %1924 = vmatpush1.msra.mxu1 %v882_v44  ;;  %1848 = vmatprep.subr.mxu0 %v355_v45  ;;  %v147_v42 = vld [vmem:[#allocation6 + $0xc8] sm:$0xff]  ;;  %v146_v44 = vld [vmem:[#allocation6 + $0xc0] sm:$0xff] }
 0x166   :  { %1925 = vmatprep.subr.mxu1 %v867_v46  ;;  %1849 = vmatpush1.msra.mxu0 %v354_v47  ;;  %v659_v43 = vld [vmem:[#allocation6 + $0x10c8] sm:$0xff]  ;;  %v658_v45 = vld [vmem:[#allocation6 + $0x10c0] sm:$0xff] }
 0x167   :  { %1926 = vmatpush1.msra.mxu1 %v866_v48  ;;  %1850 = vmatprep.subr.mxu0 %v339_v49  ;;  %v131_v46 = vld [vmem:[#allocation6 + $0x48] sm:$0xff]  ;;  %v130_v48 = vld [vmem:[#allocation6 + $0x40] sm:$0xff] }
 0x168   :  { %1927 = vmatprep.subr.mxu1 %v851_v23  ;;  %1851 = vmatpush1.msra.mxu0 %v338_v50  ;;  %v643_v47 = vld [vmem:[#allocation6 + $0x1048] sm:$0xff]  ;;  %v642_v49 = vld [vmem:[#allocation6 + $0x1040] sm:$0xff] }
 0x169   :  { %1928 = vmatpush1.msra.mxu1 %v850_v6  ;;  %1852 = vmatprep.subr.mxu0 %v323_v51  ;;  %v627_v23 = vld [vmem:[#allocation6 + $0xfc8] sm:$0xff]  ;;  %v626_v6 = vld [vmem:[#allocation6 + $0xfc0] sm:$0xff] }
 0x16a   :  { %1929 = vmatprep.subr.mxu1 %v835_v25  ;;  %1853 = vmatpush1.msra.mxu0 %v322_v52  ;;  %v1139_v50 = vld [vmem:[#allocation6 + $0x1fc8] sm:$0xff]  ;;  %v1138_v51 = vld [vmem:[#allocation6 + $0x1fc0] sm:$0xff] }
 0x16b   :  { %1930 = vmatpush1.msra.mxu1 %v834_v53  ;;  %1854 = vmatprep.subr.mxu0 %v307_v2  ;;  %v611_v25 = vld [vmem:[#allocation6 + $0xf48] sm:$0xff]  ;;  %v610_v53 = vld [vmem:[#allocation6 + $0xf40] sm:$0xff] }
 0x16c   :  { %1931 = vmatprep.subr.mxu1 %v819_v54  ;;  %1855 = vmatpush1.msra.mxu0 %v306_v56  ;;  %v1123_v52 = vld [vmem:[#allocation6 + $0x1f48] sm:$0xff]  ;;  %v1122_v2 = vld [vmem:[#allocation6 + $0x1f40] sm:$0xff] }
 0x16d   :  { %1932 = vmatpush1.msra.mxu1 %v818_v57  ;;  %1856 = vmatprep.subr.mxu0 %v291_v58  ;;  %v595_v54 = vld [vmem:[#allocation6 + $0xec8] sm:$0xff]  ;;  %v594_v57 = vld [vmem:[#allocation6 + $0xec0] sm:$0xff] }
 0x16e   :  { %1933 = vmatprep.subr.mxu1 %v803_v59  ;;  %1857 = vmatpush1.msra.mxu0 %v290_v61  ;;  %v1107_v56 = vld [vmem:[#allocation6 + $0x1ec8] sm:$0xff]  ;;  %v1106_v58 = vld [vmem:[#allocation6 + $0x1ec0] sm:$0xff] }
 0x16f   :  { %1934 = vmatpush1.msra.mxu1 %v802_v62  ;;  %1858 = vmatprep.subr.mxu0 %v275_v3  ;;  %v579_v59 = vld [vmem:[#allocation6 + $0xe48] sm:$0xff]  ;;  %v578_v62 = vld [vmem:[#allocation6 + $0xe40] sm:$0xff] }
 0x170   :  { %1935 = vmatprep.subr.mxu1 %v787_v4  ;;  %1859 = vmatpush1.msra.mxu0 %v274_v8  ;;  %v1091_v61 = vld [vmem:[#allocation6 + $0x1e48] sm:$0xff]  ;;  %v1090_v3 = vld [vmem:[#allocation6 + $0x1e40] sm:$0xff] }
 0x171   :  { %1936 = vmatpush1.msra.mxu1 %v786_v10  ;;  %1860 = vmatprep.subr.mxu0 %v259_v12  ;;  %v563_v4 = vld [vmem:[#allocation6 + $0xdc8] sm:$0xff]  ;;  %v562_v10 = vld [vmem:[#allocation6 + $0xdc0] sm:$0xff] }
 0x172   :  { %1937 = vmatprep.subr.mxu1 %v771_v13  ;;  %1861 = vmatpush1.msra.mxu0 %v258_v14  ;;  %v1075_v8 = vld [vmem:[#allocation6 + $0x1dc8] sm:$0xff]  ;;  %v1074_v12 = vld [vmem:[#allocation6 + $0x1dc0] sm:$0xff] }
 0x173   :  { %1938 = vmatpush1.msra.mxu1 %v770_v15  ;;  %1862 = vmatprep.subr.mxu0 %v243_v16  ;;  %v547_v13 = vld [vmem:[#allocation6 + $0xd48] sm:$0xff]  ;;  %v546_v15 = vld [vmem:[#allocation6 + $0xd40] sm:$0xff] }
 0x174   :  { %1939 = vmatprep.subr.mxu1 %v755_v17  ;;  %1863 = vmatpush1.msra.mxu0 %v242_v19  ;;  %v1059_v14 = vld [vmem:[#allocation6 + $0x1d48] sm:$0xff]  ;;  %v1058_v16 = vld [vmem:[#allocation6 + $0x1d40] sm:$0xff] }
 0x175   :  { %1940 = vmatpush1.msra.mxu1 %v754_v20  ;;  %1864 = vmatprep.subr.mxu0 %v227_v21  ;;  %v531_v17 = vld [vmem:[#allocation6 + $0xcc8] sm:$0xff]  ;;  %v530_v20 = vld [vmem:[#allocation6 + $0xcc0] sm:$0xff] }
 0x176   :  { %1941 = vmatprep.subr.mxu1 %v739_v22  ;;  %1865 = vmatpush1.msra.mxu0 %v226_v60  ;;  %v1043_v19 = vld [vmem:[#allocation6 + $0x1cc8] sm:$0xff]  ;;  %v1042_v21 = vld [vmem:[#allocation6 + $0x1cc0] sm:$0xff] }
 0x177   :  { %1942 = vmatpush1.msra.mxu1 %v738_v0  ;;  %1866 = vmatprep.subr.mxu0 %v211_v24  ;;  %v515_v22 = vld [vmem:[#allocation6 + $0xc48] sm:$0xff]  ;;  %v5358_v0 = vsub.s32 1, %v5327_v55  ;;  %v514_v24 = vld [vmem:[#allocation6 + $0xc40] sm:$0xff] }
 0x178   :  { %1943 = vmatprep.subr.mxu1 %v723_v63  ;;  %1867 = vmatpush1.msra.mxu0 %v210_v9  ;;  %v1027_v60 = vld [vmem:[#allocation6 + $0x1c48] sm:$0xff]  ;;  %v1026_v63 = vld [vmem:[#allocation6 + $0x1c40] sm:$0xff]  ;;  %v5360_v9 = vpop.f32.mrf.mxu0 }
 0x179   :  { %1944 = vmatpush1.msra.mxu1 %v722_v1  ;;  %1868 = vmatprep.subr.mxu0 %v195_v26  ;;  %v499_v1 = vld [vmem:[#allocation6 + $0xbc8] sm:$0xff] }
 0x17a   :  { %1945 = vmatprep.subr.mxu1 %v707_v27  ;;  %1869 = vmatpush1.msra.mxu0 %v194_v28  ;;  %v1011_v26 = vld [vmem:[#allocation6 + $0x1bc8] sm:$0xff]  ;;  %v498_v27 = vld [vmem:[#allocation6 + $0xbc0] sm:$0xff] }
 0x17b   :  { %1946 = vmatpush1.msra.mxu1 %v706_v30  ;;  %1870 = vmatprep.subr.mxu0 %v179_v32  ;;  %v1010_v28 = vld [vmem:[#allocation6 + $0x1bc0] sm:$0xff]  ;;  %v483_v30 = vld [vmem:[#allocation6 + $0xb48] sm:$0xff] }
 0x17c   :  { %1947 = vmatprep.subr.mxu1 %v691_v33  ;;  %1871 = vmatpush1.msra.mxu0 %v178_v34  ;;  %v995_v32 = vld [vmem:[#allocation6 + $0x1b48] sm:$0xff]  ;;  %v5364_v34 = vrot.slane %v5332_v11, %v5358_v0 }
 0x17d   :  { %1948 = vmatpush1.msra.mxu1 %v690_v36  ;;  %1872 = vmatprep.subr.mxu0 %v163_v37  ;;  %v5366_v36 = vpop.f32.mrf.mxu1  ;;  %v482_v37 = vld [vmem:[#allocation6 + $0xb40] sm:$0xff] }
 0x17e   :  { %1949 = vmatprep.subr.mxu1 %v675_v39  ;;  %1873 = vmatpush1.msra.mxu0 %v162_v40  ;;  %v994_v39 = vld [vmem:[#allocation6 + $0x1b40] sm:$0xff] }
 0x17f   :  { %1950 = vmatpush1.msra.mxu1 %v674_v41  ;;  %1874 = vmatprep.subr.mxu0 %v147_v42  ;;  %v467_v41 = vld [vmem:[#allocation6 + $0xac8] sm:$0xff] }
 0x180   :  { %1951 = vmatprep.subr.mxu1 %v659_v43  ;;  %1875 = vmatpush1.msra.mxu0 %v146_v44  ;;  %v979_v42 = vld [vmem:[#allocation6 + $0x1ac8] sm:$0xff]  ;;  %v466_v44 = vld [vmem:[#allocation6 + $0xac0] sm:$0xff] }
 0x181   :  { %1952 = vmatpush1.msra.mxu1 %v658_v45  ;;  %1876 = vmatprep.subr.mxu0 %v131_v46  ;;  %v978_v45 = vld [vmem:[#allocation6 + $0x1ac0] sm:$0xff] }
 0x182   :  { %1953 = vmatprep.subr.mxu1 %v643_v47  ;;  %1877 = vmatpush1.msra.mxu0 %v130_v48  ;;  %v451_v47 = vld [vmem:[#allocation6 + $0xa48] sm:$0xff] }
 0x183   :  { %1954 = vmatpush1.msra.mxu1 %v642_v49  ;;  %1878 = vmatprep.subr.mxu0 %v627_v23  ;;  %v963_v48 = vld [vmem:[#allocation6 + $0x1a48] sm:$0xff]  ;;  %v962_v23 = vld [vmem:[#allocation6 + $0x1a40] sm:$0xff] }
 0x184   :  { %1955 = vmatprep.subr.mxu1 %v1139_v50  ;;  %1879 = vmatpush2.msra.mxu0 %v626_v6  ;;  %v435_v6 = vld [vmem:[#allocation6 + $0x9c8] sm:$0xff] }
 0x185   :  { %1956 = vmatpush2.msra.mxu1 %v1138_v51  ;;  %1880 = vmatprep.subr.mxu0 %v611_v25  ;;  %v947_v51 = vld [vmem:[#allocation6 + $0x19c8] sm:$0xff] }
 0x186   :  { %1957 = vmatprep.subr.mxu1 %v1123_v52  ;;  %1881 = vmatpush2.msra.mxu0 %v610_v53  ;;  %v434_v52 = vld [vmem:[#allocation6 + $0x9c0] sm:$0xff] }
 0x187   :  { %1958 = vmatpush2.msra.mxu1 %v1122_v2  ;;  %1882 = vmatprep.subr.mxu0 %v595_v54  ;;  %v946_v53 = vld [vmem:[#allocation6 + $0x19c0] sm:$0xff]  ;;  %v419_v2 = vld [vmem:[#allocation6 + $0x948] sm:$0xff] }
 0x188   :  { %1959 = vmatprep.subr.mxu1 %v1107_v56  ;;  %1883 = vmatpush2.msra.mxu0 %v594_v57  ;;  %v931_v54 = vld [vmem:[#allocation6 + $0x1948] sm:$0xff]  ;;  %v418_v56 = vld [vmem:[#allocation6 + $0x940] sm:$0xff] }
 0x189   :  { %1960 = vmatpush2.msra.mxu1 %v1106_v58  ;;  %1884 = vmatprep.subr.mxu0 %v579_v59  ;;  %v930_v57 = vld [vmem:[#allocation6 + $0x1940] sm:$0xff]  ;;  %v403_v58 = vld [vmem:[#allocation6 + $0x8c8] sm:$0xff] }
 0x18a   :  { %1961 = vmatprep.subr.mxu1 %v1091_v61  ;;  %1885 = vmatpush2.msra.mxu0 %v578_v62  ;;  %v915_v59 = vld [vmem:[#allocation6 + $0x18c8] sm:$0xff]  ;;  %v402_v61 = vld [vmem:[#allocation6 + $0x8c0] sm:$0xff] }
 0x18b   :  { %1962 = vmatpush2.msra.mxu1 %v1090_v3  ;;  %1886 = vmatprep.subr.mxu0 %v563_v4  ;;  %v914_v62 = vld [vmem:[#allocation6 + $0x18c0] sm:$0xff]  ;;  %v387_v3 = vld [vmem:[#allocation6 + $0x848] sm:$0xff] }
 0x18c   :  { %1963 = vmatprep.subr.mxu1 %v1075_v8  ;;  %1887 = vmatpush2.msra.mxu0 %v562_v10  ;;  %v899_v4 = vld [vmem:[#allocation6 + $0x1848] sm:$0xff]  ;;  %v386_v8 = vld [vmem:[#allocation6 + $0x840] sm:$0xff] }
 0x18d   :  { %1964 = vmatpush2.msra.mxu1 %v1074_v12  ;;  %1888 = vmatprep.subr.mxu0 %v547_v13  ;;  %v5378_v10 = vld [vmem:[#allocation3 + $0x8] sm:$0xff]  ;;  %v885_v12 = vld [vmem:[#allocation6 + $0x17d8] sm:$0xff]  ;;  %v372_v13 = vld [vmem:[#allocation6 + $0x7d0] sm:$0xff] }
 0x18e   :  { %1965 = vmatprep.subr.mxu1 %v1059_v14  ;;  %1889 = vmatpush2.msra.mxu0 %v546_v15  ;;  %v5384_v14 = vld [vmem:[#allocation3 + $0x18] sm:$0xff] }
 0x18f   :  { %1966 = vmatpush2.msra.mxu1 %v1058_v16  ;;  %1890 = vmatprep.subr.mxu0 %v531_v17  ;;  %v357_v15 = vld [vmem:[#allocation6 + $0x758] sm:$0xff]  ;;  %v5387_v17 = vld [vmem:[#allocation3 + $0x10] sm:$0xff] }
 0x190   :  { %1967 = vmatprep.subr.mxu1 %v1043_v19  ;;  %1891 = vmatpush2.msra.mxu0 %v530_v20  ;;  %v869_v16 = vld [vmem:[#allocation6 + $0x1758] sm:$0xff]  ;;  %v356_v19 = vld [vmem:[#allocation6 + $0x750] sm:$0xff] }
 0x191   :  { %1968 = vmatpush2.msra.mxu1 %v1042_v21  ;;  %1892 = vmatprep.subr.mxu0 %v515_v22  ;;  %v868_v20 = vld [vmem:[#allocation6 + $0x1750] sm:$0xff]  ;;  %v341_v21 = vld [vmem:[#allocation6 + $0x6d8] sm:$0xff] }
 0x192   :  { %1969 = vmatprep.subr.mxu1 %v1027_v60  ;;  %1893 = vmatpush2.msra.mxu0 %v514_v24  ;;  %v853_v22 = vld [vmem:[#allocation6 + $0x16d8] sm:$0xff]  ;;  %v340_v60 = vld [vmem:[#allocation6 + $0x6d0] sm:$0xff] }
 0x193   :  { %1970 = vmatpush2.msra.mxu1 %v1026_v63  ;;  %v1302_v33 = vpop.f32.mrf.mxu0  ;;  %1894 = vmatprep.subr.mxu0 %v499_v1  ;;  %v852_v24 = vld [vmem:[#allocation6 + $0x16d0] sm:$0xff]  ;;  %v325_v63 = vld [vmem:[#allocation6 + $0x658] sm:$0xff] }
 0x194   :  { %1971 = vmatprep.subr.mxu1 %v1011_v26  ;;  %v1303_v40 = vadd.f32 %v1302_v33, %v5336_v18  ;;  %1895 = vmatpush2.msra.mxu0 %v498_v27  ;;  %v450_v18 = vld [vmem:[#allocation6 + $0xa40] sm:$0xff]  ;;  %v837_v1 = vld [vmem:[#allocation6 + $0x1658] sm:$0xff]  ;;  %v324_v26 = vld [vmem:[#allocation6 + $0x650] sm:$0xff] }
 0x195   :  { %1972 = vmatpush2.msra.mxu1 %v1010_v28  ;;  %v1304_v43 = vpop.f32.mrf.mxu0  ;;  %1896 = vmatprep.subr.mxu0 %v483_v30  ;;  %v836_v27 = vld [vmem:[#allocation6 + $0x1650] sm:$0xff]  ;;  %v309_v28 = vld [vmem:[#allocation6 + $0x5d8] sm:$0xff] }
 0x196   :  { %1973 = vmatprep.subr.mxu1 %v995_v32  ;;  %v1305_v11 = vadd.f32 %v1304_v43, %v5364_v34  ;;  %v1379_v46 = vpop.f32.mrf.mxu1  ;;  %1897 = vmatpush2.msra.mxu0 %v482_v37  ;;  %v821_v30 = vld [vmem:[#allocation6 + $0x15d8] sm:$0xff]  ;;  %v308_v32 = vld [vmem:[#allocation6 + $0x5d0] sm:$0xff] }
 0x197   :  { %1974 = vmatpush2.msra.mxu1 %v994_v39  ;;  %v5370_v49 = vadd.f32 %v1379_v46, %v1303_v40  ;;  %1898 = vmatprep.subr.mxu0 %v467_v41  ;;  %v820_v33 = vld [vmem:[#allocation6 + $0x15d0] sm:$0xff]  ;;  %v293_v37 = vld [vmem:[#allocation6 + $0x558] sm:$0xff] }
 0x198   :  { %1975 = vmatprep.subr.mxu1 %v979_v42  ;;  %v1381_v50 = vpop.f32.mrf.mxu1  ;;  %1899 = vmatpush2.msra.mxu0 %v466_v44  ;;  %v805_v39 = vld [vmem:[#allocation6 + $0x1558] sm:$0xff]  ;;  %v292_v40 = vld [vmem:[#allocation6 + $0x550] sm:$0xff] }
 0x199   :  { %1976 = vmatpush2.msra.mxu1 %v978_v45  ;;  %v5372_v25 = vadd.f32 %v1381_v50, %v1305_v11  ;;  %1900 = vmatprep.subr.mxu0 %v451_v47  ;;  %v804_v41 = vld [vmem:[#allocation6 + $0x1550] sm:$0xff]  ;;  %v277_v42 = vld [vmem:[#allocation6 + $0x4d8] sm:$0xff] }
 0x19a   :  { %1977 = vmatprep.subr.mxu1 %v963_v48  ;;  %1901 = vmatpush2.msra.mxu0 %v450_v18  ;;  %v789_v43 = vld [vmem:[#allocation6 + $0x14d8] sm:$0xff]  ;;  %v276_v44 = vld [vmem:[#allocation6 + $0x4d0] sm:$0xff] }
 0x19b   :  { %1978 = vmatpush2.msra.mxu1 %v962_v23  ;;  %1902 = vmatprep.subr.mxu0 %v435_v6  ;;  %v788_v45 = vld [vmem:[#allocation6 + $0x14d0] sm:$0xff]  ;;  %v261_v11 = vld [vmem:[#allocation6 + $0x458] sm:$0xff] }
 0x19c   :  { %1979 = vmatprep.subr.mxu1 %v947_v51  ;;  %1903 = vmatpush2.msra.mxu0 %v434_v52  ;;  %v773_v46 = vld [vmem:[#allocation6 + $0x1458] sm:$0xff]  ;;  %v260_v47 = vld [vmem:[#allocation6 + $0x450] sm:$0xff] }
 0x19d   :  { %1980 = vmatpush2.msra.mxu1 %v946_v53  ;;  %1762 = vmatprep.mubr.f32.mxu0 %v5341_v29  ;;  %v898_v29 = vld [vmem:[#allocation6 + $0x1840] sm:$0xff]  ;;  %v772_v48 = vld [vmem:[#allocation6 + $0x1450] sm:$0xff]  ;;  %v245_v18 = vld [vmem:[#allocation6 + $0x3d8] sm:$0xff] }
 0x19e   :  { %1904 = vmatprep.subr.mxu0 %v419_v2  ;;  %1981 = vmatprep.subr.mxu1 %v931_v54  ;;  %v757_v23 = vld [vmem:[#allocation6 + $0x13d8] sm:$0xff]  ;;  %v244_v50 = vld [vmem:[#allocation6 + $0x3d0] sm:$0xff] }
 0x19f   :  { %1763 = vmatmul.mubr.f32.gmra.mxu0 %v5344_v31  ;;  %1982 = vmatpush2.msra.mxu1 %v930_v57  ;;  %v373_v31 = vld [vmem:[#allocation6 + $0x7d8] sm:$0xff]  ;;  %v756_v6 = vld [vmem:[#allocation6 + $0x13d0] sm:$0xff] }
 0x1a0   :  { %1905 = vmatpush2.msra.mxu0 %v418_v56  ;;  %1839 = vmatprep.mubr.f32.mxu1 %v5347_v35  ;;  %v5381_v35 = vld [vmem:[#allocation3] sm:$0xff]  ;;  %v229_v51 = vld [vmem:[#allocation6 + $0x358] sm:$0xff]  ;;  %v228_v53 = vld [vmem:[#allocation6 + $0x350] sm:$0xff] }
 0x1a1   :  { %1906 = vmatprep.subr.mxu0 %v403_v58  ;;  %1983 = vmatprep.subr.mxu1 %v915_v59  ;;  %v741_v52 = vld [vmem:[#allocation6 + $0x1358] sm:$0xff]  ;;  %v740_v2 = vld [vmem:[#allocation6 + $0x1350] sm:$0xff] }
 0x1a2   :  { %1840 = vmatmul.mubr.f32.gmra.mxu1 %v5350_v38  ;;  %1907 = vmatpush2.msra.mxu0 %v402_v61  ;;  %v884_v38 = vld [vmem:[#allocation6 + $0x17d0] sm:$0xff]  ;;  %v213_v54 = vld [vmem:[#allocation6 + $0x2d8] sm:$0xff] }
 0x1a3   :  { %1984 = vmatpush2.msra.mxu1 %v914_v62  ;;  %1908 = vmatprep.subr.mxu0 %v387_v3  ;;  %v725_v56 = vld [vmem:[#allocation6 + $0x12d8] sm:$0xff]  ;;  %v212_v57 = vld [vmem:[#allocation6 + $0x2d0] sm:$0xff] }
 0x1a4   :  { %1985 = vmatprep.subr.mxu1 %v899_v4  ;;  %1909 = vmatpush2.msra.mxu0 %v386_v8  ;;  %v724_v58 = vld [vmem:[#allocation6 + $0x12d0] sm:$0xff]  ;;  %v197_v59 = vld [vmem:[#allocation6 + $0x258] sm:$0xff] }
 0x1a5   :  { %1910 = vmatprep.mubr.f32.mxu0 %v5378_v10  ;;  %1986 = vmatpush2.msra.mxu1 %v898_v29  ;;  %v709_v61 = vld [vmem:[#allocation6 + $0x1258] sm:$0xff]  ;;  %v196_v62 = vld [vmem:[#allocation6 + $0x250] sm:$0xff] }
 0x1a6   :  { %1911 = vmatmul.mubr.f32.vlgmr.msra.gmra.mxu0 %v5381_v35  ;;  %1987 = vmatprep.mubr.f32.mxu1 %v5384_v14  ;;  %v708_v3 = vld [vmem:[#allocation6 + $0x1250] sm:$0xff]  ;;  %v181_v4 = vld [vmem:[#allocation6 + $0x1d8] sm:$0xff] }
 0x1a7   :  { %2000 = vmatprep.subr.mxu0 %v373_v31  ;;  %2077 = vmatprep.subr.mxu1 %v885_v12  ;;  %v693_v8 = vld [vmem:[#allocation6 + $0x11d8] sm:$0xff]  ;;  %v180_v29 = vld [vmem:[#allocation6 + $0x1d0] sm:$0xff] }
 0x1a8   :  { %1988 = vmatmul.mubr.f32.vlgmr.msra.gmra.mxu1 %v5387_v17  ;;  %2001 = vmatpush1.msra.mxu0 %v372_v13  ;;  %v692_v31 = vld [vmem:[#allocation6 + $0x11d0] sm:$0xff]  ;;  %v165_v12 = vld [vmem:[#allocation6 + $0x158] sm:$0xff] }
 0x1a9   :  { %2078 = vmatpush1.msra.mxu1 %v884_v38  ;;  %2002 = vmatprep.subr.mxu0 %v357_v15  ;;  %v677_v13 = vld [vmem:[#allocation6 + $0x1158] sm:$0xff]  ;;  %v164_v38 = vld [vmem:[#allocation6 + $0x150] sm:$0xff] }
 0x1aa   :  { %2079 = vmatprep.subr.mxu1 %v869_v16  ;;  %2003 = vmatpush1.msra.mxu0 %v356_v19  ;;  %v676_v15 = vld [vmem:[#allocation6 + $0x1150] sm:$0xff]  ;;  %v149_v16 = vld [vmem:[#allocation6 + $0xd8] sm:$0xff] }
 0x1ab   :  { %2080 = vmatpush1.msra.mxu1 %v868_v20  ;;  %2004 = vmatprep.subr.mxu0 %v341_v21  ;;  %v661_v19 = vld [vmem:[#allocation6 + $0x10d8] sm:$0xff]  ;;  %v148_v20 = vld [vmem:[#allocation6 + $0xd0] sm:$0xff] }
 0x1ac   :  { %2081 = vmatprep.subr.mxu1 %v853_v22  ;;  %2005 = vmatpush1.msra.mxu0 %v340_v60  ;;  %v660_v21 = vld [vmem:[#allocation6 + $0x10d0] sm:$0xff]  ;;  %v133_v22 = vld [vmem:[#allocation6 + $0x58] sm:$0xff] }
 0x1ad   :  { %2082 = vmatpush1.msra.mxu1 %v852_v24  ;;  %2006 = vmatprep.subr.mxu0 %v325_v63  ;;  %v645_v60 = vld [vmem:[#allocation6 + $0x1058] sm:$0xff]  ;;  %v132_v24 = vld [vmem:[#allocation6 + $0x50] sm:$0xff] }
 0x1ae   :  { %2083 = vmatprep.subr.mxu1 %v837_v1  ;;  %2007 = vmatpush1.msra.mxu0 %v324_v26  ;;  %v644_v63 = vld [vmem:[#allocation6 + $0x1050] sm:$0xff]  ;;  %v629_v1 = vld [vmem:[#allocation6 + $0xfd8] sm:$0xff] }
 0x1af   :  { %2084 = vmatpush1.msra.mxu1 %v836_v27  ;;  %2008 = vmatprep.subr.mxu0 %v309_v28  ;;  %v1141_v26 = vld [vmem:[#allocation6 + $0x1fd8] sm:$0xff]  ;;  %v628_v27 = vld [vmem:[#allocation6 + $0xfd0] sm:$0xff] }
 0x1b0   :  { %2085 = vmatprep.subr.mxu1 %v821_v30  ;;  %2009 = vmatpush1.msra.mxu0 %v308_v32  ;;  %v1140_v28 = vld [vmem:[#allocation6 + $0x1fd0] sm:$0xff]  ;;  %v613_v30 = vld [vmem:[#allocation6 + $0xf58] sm:$0xff] }
 0x1b1   :  { %2086 = vmatpush1.msra.mxu1 %v820_v33  ;;  %2010 = vmatprep.subr.mxu0 %v293_v37  ;;  %v1125_v32 = vld [vmem:[#allocation6 + $0x1f58] sm:$0xff]  ;;  %v612_v33 = vld [vmem:[#allocation6 + $0xf50] sm:$0xff] }
 0x1b2   :  { %2087 = vmatprep.subr.mxu1 %v805_v39  ;;  %2011 = vmatpush1.msra.mxu0 %v292_v40  ;;  %v1124_v37 = vld [vmem:[#allocation6 + $0x1f50] sm:$0xff]  ;;  %v597_v39 = vld [vmem:[#allocation6 + $0xed8] sm:$0xff] }
 0x1b3   :  { %2088 = vmatpush1.msra.mxu1 %v804_v41  ;;  %2012 = vmatprep.subr.mxu0 %v277_v42  ;;  %v1109_v40 = vld [vmem:[#allocation6 + $0x1ed8] sm:$0xff]  ;;  %v596_v41 = vld [vmem:[#allocation6 + $0xed0] sm:$0xff] }
 0x1b4   :  { %2089 = vmatprep.subr.mxu1 %v789_v43  ;;  %2013 = vmatpush1.msra.mxu0 %v276_v44  ;;  %v1108_v42 = vld [vmem:[#allocation6 + $0x1ed0] sm:$0xff]  ;;  %v581_v43 = vld [vmem:[#allocation6 + $0xe58] sm:$0xff] }
 0x1b5   :  { %2090 = vmatpush1.msra.mxu1 %v788_v45  ;;  %2014 = vmatprep.subr.mxu0 %v261_v11  ;;  %v1093_v44 = vld [vmem:[#allocation6 + $0x1e58] sm:$0xff]  ;;  %v580_v45 = vld [vmem:[#allocation6 + $0xe50] sm:$0xff] }
 0x1b6   :  { %2091 = vmatprep.subr.mxu1 %v773_v46  ;;  %2015 = vmatpush1.msra.mxu0 %v260_v47  ;;  %v1092_v11 = vld [vmem:[#allocation6 + $0x1e50] sm:$0xff]  ;;  %v565_v46 = vld [vmem:[#allocation6 + $0xdd8] sm:$0xff] }
 0x1b7   :  { %2092 = vmatpush1.msra.mxu1 %v772_v48  ;;  %2016 = vmatprep.subr.mxu0 %v245_v18  ;;  %v1077_v47 = vld [vmem:[#allocation6 + $0x1dd8] sm:$0xff]  ;;  %v564_v48 = vld [vmem:[#allocation6 + $0xdd0] sm:$0xff] }
 0x1b8   :  { %2093 = vmatprep.subr.mxu1 %v757_v23  ;;  %2017 = vmatpush1.msra.mxu0 %v244_v50  ;;  %v1076_v18 = vld [vmem:[#allocation6 + $0x1dd0] sm:$0xff]  ;;  %v549_v23 = vld [vmem:[#allocation6 + $0xd58] sm:$0xff] }
 0x1b9   :  { %2094 = vmatpush1.msra.mxu1 %v756_v6  ;;  %2018 = vmatprep.subr.mxu0 %v229_v51  ;;  %v1061_v50 = vld [vmem:[#allocation6 + $0x1d58] sm:$0xff]  ;;  %v548_v6 = vld [vmem:[#allocation6 + $0xd50] sm:$0xff] }
 0x1ba   :  { %2095 = vmatprep.subr.mxu1 %v741_v52  ;;  %2019 = vmatpush1.msra.mxu0 %v228_v53  ;;  %v1060_v51 = vld [vmem:[#allocation6 + $0x1d50] sm:$0xff]  ;;  %v5390_v52 = vpop.f32.mrf.mxu0  ;;  %v533_v53 = vld [vmem:[#allocation6 + $0xcd8] sm:$0xff] }
 0x1bb   :  { %2096 = vmatpush1.msra.mxu1 %v740_v2  ;;  %2020 = vmatprep.subr.mxu0 %v213_v54  ;;  %v1045_v2 = vld [vmem:[#allocation6 + $0x1cd8] sm:$0xff]  ;;  %v532_v54 = vld [vmem:[#allocation6 + $0xcd0] sm:$0xff] }
 0x1bc   :  { %2097 = vmatprep.subr.mxu1 %v725_v56  ;;  %2021 = vmatpush1.msra.mxu0 %v212_v57  ;;  %v1044_v56 = vld [vmem:[#allocation6 + $0x1cd0] sm:$0xff]  ;;  %v517_v57 = vld [vmem:[#allocation6 + $0xc58] sm:$0xff] }
 0x1bd   :  { %2098 = vmatpush1.msra.mxu1 %v724_v58  ;;  %2022 = vmatprep.subr.mxu0 %v197_v59  ;;  %v1029_v58 = vld [vmem:[#allocation6 + $0x1c58] sm:$0xff]  ;;  %v5392_v59 = vpop.f32.mrf.mxu1 }
 0x1be   :  { %2099 = vmatprep.subr.mxu1 %v709_v61  ;;  %2023 = vmatpush1.msra.mxu0 %v196_v62  ;;  %v516_v61 = vld [vmem:[#allocation6 + $0xc50] sm:$0xff] }
 0x1bf   :  { %2100 = vmatpush1.msra.mxu1 %v708_v3  ;;  %2024 = vmatprep.subr.mxu0 %v181_v4  ;;  %v1028_v62 = vld [vmem:[#allocation6 + $0x1c50] sm:$0xff]  ;;  %v5394_v3 = vpop.f32.mrf.mxu0  ;;  %v501_v4 = vld [vmem:[#allocation6 + $0xbd8] sm:$0xff] }
 0x1c0   :  { %2101 = vmatprep.subr.mxu1 %v693_v8  ;;  %2025 = vmatpush1.msra.mxu0 %v180_v29  ;;  %v1013_v8 = vld [vmem:[#allocation6 + $0x1bd8] sm:$0xff]  ;;  %v500_v29 = vld [vmem:[#allocation6 + $0xbd0] sm:$0xff] }
 0x1c1   :  { %2102 = vmatpush1.msra.mxu1 %v692_v31  ;;  %2026 = vmatprep.subr.mxu0 %v165_v12  ;;  %v1012_v31 = vld [vmem:[#allocation6 + $0x1bd0] sm:$0xff]  ;;  %v485_v12 = vld [vmem:[#allocation6 + $0xb58] sm:$0xff] }
 0x1c2   :  { %2103 = vmatprep.subr.mxu1 %v677_v13  ;;  %2027 = vmatpush1.msra.mxu0 %v164_v38  ;;  %v997_v13 = vld [vmem:[#allocation6 + $0x1b58] sm:$0xff] }
 0x1c3   :  { %2104 = vmatpush1.msra.mxu1 %v676_v15  ;;  %2028 = vmatprep.subr.mxu0 %v149_v16  ;;  %v1168_v15 = vsub.s32 4, %v5327_v55  ;;  %v5399_v16 = vpop.f32.mrf.mxu1 }
 0x1c4   :  { %2105 = vmatprep.subr.mxu1 %v661_v19  ;;  %2029 = vmatpush1.msra.mxu0 %v148_v20  ;;  %v484_v19 = vld [vmem:[#allocation6 + $0xb50] sm:$0xff] }
 0x1c5   :  { %2106 = vmatpush1.msra.mxu1 %v660_v21  ;;  %2030 = vmatprep.subr.mxu0 %v133_v22  ;;  %v996_v20 = vld [vmem:[#allocation6 + $0x1b50] sm:$0xff]  ;;  %v469_v21 = vld [vmem:[#allocation6 + $0xad8] sm:$0xff] }
 0x1c6   :  { %2107 = vmatprep.subr.mxu1 %v645_v60  ;;  %2031 = vmatpush1.msra.mxu0 %v132_v24  ;;  %v981_v22 = vld [vmem:[#allocation6 + $0x1ad8] sm:$0xff]  ;;  %v468_v60 = vld [vmem:[#allocation6 + $0xad0] sm:$0xff] }
 0x1c7   :  { %2108 = vmatpush1.msra.mxu1 %v644_v63  ;;  %2032 = vmatprep.subr.mxu0 %v629_v1  ;;  %v980_v24 = vld [vmem:[#allocation6 + $0x1ad0] sm:$0xff] }
 0x1c8   :  { %2109 = vmatprep.subr.mxu1 %v1141_v26  ;;  %2033 = vmatpush2.msra.mxu0 %v628_v27  ;;  %v453_v26 = vld [vmem:[#allocation6 + $0xa58] sm:$0xff] }
 0x1c9   :  { %2110 = vmatpush2.msra.mxu1 %v1140_v28  ;;  %2034 = vmatprep.subr.mxu0 %v613_v30  ;;  %v965_v27 = vld [vmem:[#allocation6 + $0x1a58] sm:$0xff]  ;;  %v5405_v28 = vld [vmem:[#allocation8] sm:$0xff] }
 0x1ca   :  { %2111 = vmatprep.subr.mxu1 %v1125_v32  ;;  %2035 = vmatpush2.msra.mxu0 %v612_v33  ;;  %v5410_v30 = vrot.slane %v5405_v28, %v1168_v15  ;;  %v452_v32 = vld [vmem:[#allocation6 + $0xa50] sm:$0xff] }
 0x1cb   :  { %2112 = vmatpush2.msra.mxu1 %v1124_v37  ;;  %2036 = vmatprep.subr.mxu0 %v597_v39  ;;  %v964_v33 = vld [vmem:[#allocation6 + $0x1a50] sm:$0xff]  ;;  %v437_v39 = vld [vmem:[#allocation6 + $0x9d8] sm:$0xff] }
 0x1cc   :  { %2113 = vmatprep.subr.mxu1 %v1109_v40  ;;  %2037 = vmatpush2.msra.mxu0 %v596_v41  ;;  %v949_v40 = vld [vmem:[#allocation6 + $0x19d8] sm:$0xff]  ;;  %v436_v41 = vld [vmem:[#allocation6 + $0x9d0] sm:$0xff] }
 0x1cd   :  { %2114 = vmatpush2.msra.mxu1 %v1108_v42  ;;  %2038 = vmatprep.subr.mxu0 %v581_v43  ;;  %v948_v42 = vld [vmem:[#allocation6 + $0x19d0] sm:$0xff] }
 0x1ce   :  { %2115 = vmatprep.subr.mxu1 %v1093_v44  ;;  %2039 = vmatpush2.msra.mxu0 %v580_v45  ;;  %v421_v44 = vld [vmem:[#allocation6 + $0x958] sm:$0xff] }
 0x1cf   :  { %2116 = vmatpush2.msra.mxu1 %v1092_v11  ;;  %2040 = vmatprep.subr.mxu0 %v565_v46  ;;  %v933_v11 = vld [vmem:[#allocation6 + $0x1958] sm:$0xff] }
 0x1d0   :  { %2117 = vmatprep.subr.mxu1 %v1077_v47  ;;  %2041 = vmatpush2.msra.mxu0 %v564_v48  ;;  %v420_v47 = vld [vmem:[#allocation6 + $0x950] sm:$0xff] }
 0x1d1   :  { %2118 = vmatpush2.msra.mxu1 %v1076_v18  ;;  %2042 = vmatprep.subr.mxu0 %v549_v23  ;;  %v932_v48 = vld [vmem:[#allocation6 + $0x1950] sm:$0xff]  ;;  %v5417_v23 = vld [vmem:[#allocation3 + $0x28] sm:$0xff] }
 0x1d2   :  { %2119 = vmatprep.subr.mxu1 %v1061_v50  ;;  %2043 = vmatpush2.msra.mxu0 %v548_v6  ;;  %v405_v50 = vld [vmem:[#allocation6 + $0x8d8] sm:$0xff]  ;;  %v5420_v6 = vld [vmem:[#allocation3 + $0x20] sm:$0xff] }
 0x1d3   :  { %2120 = vmatpush2.msra.mxu1 %v1060_v51  ;;  %2044 = vmatprep.subr.mxu0 %v533_v53  ;;  %v917_v51 = vld [vmem:[#allocation6 + $0x18d8] sm:$0xff]  ;;  %v404_v53 = vld [vmem:[#allocation6 + $0x8d0] sm:$0xff] }
 0x1d4   :  { %2121 = vmatprep.subr.mxu1 %v1045_v2  ;;  %2045 = vmatpush2.msra.mxu0 %v532_v54  ;;  %v916_v2 = vld [vmem:[#allocation6 + $0x18d0] sm:$0xff]  ;;  %v5423_v54 = vld [vmem:[#allocation3 + $0x38] sm:$0xff] }
 0x1d5   :  { %2122 = vmatpush2.msra.mxu1 %v1044_v56  ;;  %2046 = vmatprep.subr.mxu0 %v517_v57  ;;  %v389_v56 = vld [vmem:[#allocation6 + $0x858] sm:$0xff] }
 0x1d6   :  { %2123 = vmatprep.subr.mxu1 %v1029_v58  ;;  %2047 = vmatpush2.msra.mxu0 %v516_v61  ;;  %v901_v57 = vld [vmem:[#allocation6 + $0x1858] sm:$0xff]  ;;  %v5426_v58 = vld [vmem:[#allocation3 + $0x30] sm:$0xff] }
 0x1d7   :  { %2124 = vmatpush2.msra.mxu1 %v1028_v62  ;;  %v5396_v38 = vpop.f32.mrf.mxu0  ;;  %2048 = vmatprep.subr.mxu0 %v501_v4  ;;  %v388_v61 = vld [vmem:[#allocation6 + $0x850] sm:$0xff]  ;;  %v375_v4 = vld [vmem:[#allocation6 + $0x7e8] sm:$0xff] }
 0x1d8   :  { %2125 = vmatprep.subr.mxu1 %v1013_v8  ;;  %2049 = vmatpush2.msra.mxu0 %v500_v29  ;;  %v900_v62 = vld [vmem:[#allocation6 + $0x1850] sm:$0xff]  ;;  %v887_v8 = vld [vmem:[#allocation6 + $0x17e8] sm:$0xff]  ;;  %v374_v29 = vld [vmem:[#allocation6 + $0x7e0] sm:$0xff] }
 0x1d9   :  { %2126 = vmatpush2.msra.mxu1 %v1012_v31  ;;  %2050 = vmatprep.subr.mxu0 %v485_v12  ;;  %v5401_v63 = vpop.f32.mrf.mxu0  ;;  %v886_v31 = vld [vmem:[#allocation6 + $0x17e0] sm:$0xff]  ;;  %v359_v12 = vld [vmem:[#allocation6 + $0x768] sm:$0xff] }
 0x1da   :  { %2127 = vmatprep.subr.mxu1 %v997_v13  ;;  %v5403_v1 = vpop.f32.mrf.mxu1  ;;  %2051 = vmatpush2.msra.mxu0 %v484_v19  ;;  %v871_v13 = vld [vmem:[#allocation6 + $0x1768] sm:$0xff]  ;;  %v358_v19 = vld [vmem:[#allocation6 + $0x760] sm:$0xff] }
 0x1db   :  { %2128 = vmatpush2.msra.mxu1 %v996_v20  ;;  %2052 = vmatprep.subr.mxu0 %v469_v21  ;;  %v870_v20 = vld [vmem:[#allocation6 + $0x1760] sm:$0xff]  ;;  %v343_v21 = vld [vmem:[#allocation6 + $0x6e8] sm:$0xff] }
 0x1dc   :  { %2129 = vmatprep.subr.mxu1 %v981_v22  ;;  %v5412_v37 = vpop.f32.mrf.mxu1  ;;  %2053 = vmatpush2.msra.mxu0 %v468_v60  ;;  %v342_v22 = vld [vmem:[#allocation6 + $0x6e0] sm:$0xff]  ;;  %v327_v60 = vld [vmem:[#allocation6 + $0x668] sm:$0xff] }
 0x1dd   :  { %2130 = vmatpush2.msra.mxu1 %v980_v24  ;;  %2054 = vmatprep.subr.mxu0 %v453_v26  ;;  %v326_v24 = vld [vmem:[#allocation6 + $0x660] sm:$0xff] }
 0x1de   :  { %2131 = vmatprep.subr.mxu1 %v965_v27  ;;  %v1604_v43 = vpop.f32.mrf.mxu0  ;;  %2055 = vmatpush2.msra.mxu0 %v452_v32  ;;  %v838_v26 = vld [vmem:[#allocation6 + $0x1660] sm:$0xff]  ;;  %v823_v27 = vld [vmem:[#allocation6 + $0x15e8] sm:$0xff] }
 0x1df   :  { %2132 = vmatpush2.msra.mxu1 %v964_v33  ;;  %v1605_v45 = vadd.f32 %v1604_v43, %v5410_v30  ;;  %2056 = vmatprep.subr.mxu0 %v437_v39  ;;  %v310_v32 = vld [vmem:[#allocation6 + $0x5e0] sm:$0xff]  ;;  %v295_v39 = vld [vmem:[#allocation6 + $0x568] sm:$0xff] }
 0x1e0   :  { %2133 = vmatprep.subr.mxu1 %v949_v40  ;;  %v1681_v46 = vpop.f32.mrf.mxu1  ;;  %2057 = vmatpush2.msra.mxu0 %v436_v41  ;;  %v822_v33 = vld [vmem:[#allocation6 + $0x15e0] sm:$0xff]  ;;  %v807_v40 = vld [vmem:[#allocation6 + $0x1568] sm:$0xff] }
 0x1e1   :  { %2134 = vmatpush2.msra.mxu1 %v948_v42  ;;  %v5415_v18 = vadd.f32 %v1681_v46, %v1605_v45  ;;  %1916 = vmatprep.mubr.f32.mxu0 %v5417_v23  ;;  %v294_v41 = vld [vmem:[#allocation6 + $0x560] sm:$0xff]  ;;  %v279_v43 = vld [vmem:[#allocation6 + $0x4e8] sm:$0xff] }
 0x1e2   :  { %2058 = vmatprep.subr.mxu0 %v421_v44  ;;  %2135 = vmatprep.subr.mxu1 %v933_v11  ;;  %v806_v42 = vld [vmem:[#allocation6 + $0x1560] sm:$0xff]  ;;  %v791_v44 = vld [vmem:[#allocation6 + $0x14e8] sm:$0xff] }
 0x1e3   :  { %1917 = vmatmul.mubr.f32.gmra.mxu0 %v5420_v6  ;;  %2136 = vmatpush2.msra.mxu1 %v932_v48  ;;  %v278_v45 = vld [vmem:[#allocation6 + $0x4e0] sm:$0xff]  ;;  %v263_v46 = vld [vmem:[#allocation6 + $0x468] sm:$0xff] }
 0x1e4   :  { %2059 = vmatpush2.msra.mxu0 %v420_v47  ;;  %1993 = vmatprep.mubr.f32.mxu1 %v5423_v54  ;;  %v790_v11 = vld [vmem:[#allocation6 + $0x14e0] sm:$0xff]  ;;  %v775_v47 = vld [vmem:[#allocation6 + $0x1468] sm:$0xff] }
 0x1e5   :  { %2060 = vmatprep.subr.mxu0 %v405_v50  ;;  %2137 = vmatprep.subr.mxu1 %v917_v51  ;;  %v262_v48 = vld [vmem:[#allocation6 + $0x460] sm:$0xff]  ;;  %v247_v51 = vld [vmem:[#allocation6 + $0x3e8] sm:$0xff] }
 0x1e6   :  { %1994 = vmatmul.mubr.f32.gmra.mxu1 %v5426_v58  ;;  %2061 = vmatpush2.msra.mxu0 %v404_v53  ;;  %v774_v50 = vld [vmem:[#allocation6 + $0x1460] sm:$0xff]  ;;  %v759_v53 = vld [vmem:[#allocation6 + $0x13e8] sm:$0xff] }
 0x1e7   :  { %2138 = vmatpush2.msra.mxu1 %v916_v2  ;;  %2062 = vmatprep.subr.mxu0 %v389_v56  ;;  %v246_v2 = vld [vmem:[#allocation6 + $0x3e0] sm:$0xff] }
 0x1e8   :  { %2139 = vmatprep.subr.mxu1 %v901_v57  ;;  %2063 = vmatpush2.msra.mxu0 %v388_v61  ;;  %v758_v56 = vld [vmem:[#allocation6 + $0x13e0] sm:$0xff]  ;;  %v231_v57 = vld [vmem:[#allocation6 + $0x368] sm:$0xff] }
 0x1e9   :  { %2064 = vmatprep.mubr.f32.mxu0 %v5378_v10  ;;  %2140 = vmatpush2.msra.mxu1 %v900_v62  ;;  %v855_v10 = vld [vmem:[#allocation6 + $0x16e8] sm:$0xff]  ;;  %v230_v62 = vld [vmem:[#allocation6 + $0x360] sm:$0xff] }
 0x1ea   :  { %2065 = vmatmul.mubr.f32.vlgmr.msra.gmra.mxu0 %v5381_v35  ;;  %2141 = vmatprep.mubr.f32.mxu1 %v5384_v14  ;;  %v854_v35 = vld [vmem:[#allocation6 + $0x16e0] sm:$0xff]  ;;  %v839_v14 = vld [vmem:[#allocation6 + $0x1668] sm:$0xff] }
 0x1eb   :  { %2154 = vmatprep.subr.mxu0 %v375_v4  ;;  %2231 = vmatprep.subr.mxu1 %v887_v8  ;;  %v743_v61 = vld [vmem:[#allocation6 + $0x1368] sm:$0xff]  ;;  %v742_v4 = vld [vmem:[#allocation6 + $0x1360] sm:$0xff] }
 0x1ec   :  { %2142 = vmatmul.mubr.f32.vlgmr.msra.gmra.mxu1 %v5387_v17  ;;  %2155 = vmatpush1.msra.mxu0 %v374_v29  ;;  %v311_v17 = vld [vmem:[#allocation6 + $0x5e8] sm:$0xff] }
 0x1ed   :  { %2232 = vmatpush1.msra.mxu1 %v886_v31  ;;  %2156 = vmatprep.subr.mxu0 %v359_v12  ;;  %v215_v8 = vld [vmem:[#allocation6 + $0x2e8] sm:$0xff]  ;;  %v214_v31 = vld [vmem:[#allocation6 + $0x2e0] sm:$0xff] }
 0x1ee   :  { %2233 = vmatprep.subr.mxu1 %v871_v13  ;;  %2157 = vmatpush1.msra.mxu0 %v358_v19  ;;  %v727_v29 = vld [vmem:[#allocation6 + $0x12e8] sm:$0xff]  ;;  %v726_v12 = vld [vmem:[#allocation6 + $0x12e0] sm:$0xff] }
 0x1ef   :  { %2234 = vmatpush1.msra.mxu1 %v870_v20  ;;  %2158 = vmatprep.subr.mxu0 %v343_v21  ;;  %v199_v13 = vld [vmem:[#allocation6 + $0x268] sm:$0xff]  ;;  %v198_v20 = vld [vmem:[#allocation6 + $0x260] sm:$0xff] }
 0x1f0   :  { %2235 = vmatprep.subr.mxu1 %v855_v10  ;;  %2159 = vmatpush1.msra.mxu0 %v342_v22  ;;  %v711_v19 = vld [vmem:[#allocation6 + $0x1268] sm:$0xff]  ;;  %v710_v21 = vld [vmem:[#allocation6 + $0x1260] sm:$0xff] }
 0x1f1   :  { %2236 = vmatpush1.msra.mxu1 %v854_v35  ;;  %2160 = vmatprep.subr.mxu0 %v327_v60  ;;  %v183_v10 = vld [vmem:[#allocation6 + $0x1e8] sm:$0xff]  ;;  %v182_v35 = vld [vmem:[#allocation6 + $0x1e0] sm:$0xff] }
 0x1f2   :  { %2237 = vmatprep.subr.mxu1 %v839_v14  ;;  %2161 = vmatpush1.msra.mxu0 %v326_v24  ;;  %v695_v22 = vld [vmem:[#allocation6 + $0x11e8] sm:$0xff]  ;;  %v694_v60 = vld [vmem:[#allocation6 + $0x11e0] sm:$0xff] }
 0x1f3   :  { %2238 = vmatpush1.msra.mxu1 %v838_v26  ;;  %2162 = vmatprep.subr.mxu0 %v311_v17  ;;  %v167_v14 = vld [vmem:[#allocation6 + $0x168] sm:$0xff]  ;;  %v166_v26 = vld [vmem:[#allocation6 + $0x160] sm:$0xff] }
 0x1f4   :  { %2239 = vmatprep.subr.mxu1 %v823_v27  ;;  %2163 = vmatpush1.msra.mxu0 %v310_v32  ;;  %v679_v24 = vld [vmem:[#allocation6 + $0x1168] sm:$0xff]  ;;  %v678_v17 = vld [vmem:[#allocation6 + $0x1160] sm:$0xff] }
 0x1f5   :  { %2240 = vmatpush1.msra.mxu1 %v822_v33  ;;  %2164 = vmatprep.subr.mxu0 %v295_v39  ;;  %v151_v27 = vld [vmem:[#allocation6 + $0xe8] sm:$0xff]  ;;  %v150_v33 = vld [vmem:[#allocation6 + $0xe0] sm:$0xff] }
 0x1f6   :  { %2241 = vmatprep.subr.mxu1 %v807_v40  ;;  %2165 = vmatpush1.msra.mxu0 %v294_v41  ;;  %v663_v32 = vld [vmem:[#allocation6 + $0x10e8] sm:$0xff]  ;;  %v662_v39 = vld [vmem:[#allocation6 + $0x10e0] sm:$0xff] }
 0x1f7   :  { %2242 = vmatpush1.msra.mxu1 %v806_v42  ;;  %2166 = vmatprep.subr.mxu0 %v279_v43  ;;  %v135_v40 = vld [vmem:[#allocation6 + $0x68] sm:$0xff]  ;;  %v134_v42 = vld [vmem:[#allocation6 + $0x60] sm:$0xff] }
 0x1f8   :  { %2243 = vmatprep.subr.mxu1 %v791_v44  ;;  %2167 = vmatpush1.msra.mxu0 %v278_v45  ;;  %v647_v41 = vld [vmem:[#allocation6 + $0x1068] sm:$0xff]  ;;  %v646_v43 = vld [vmem:[#allocation6 + $0x1060] sm:$0xff] }
 0x1f9   :  { %2244 = vmatpush1.msra.mxu1 %v790_v11  ;;  %2168 = vmatprep.subr.mxu0 %v263_v46  ;;  %v631_v44 = vld [vmem:[#allocation6 + $0xfe8] sm:$0xff]  ;;  %v630_v11 = vld [vmem:[#allocation6 + $0xfe0] sm:$0xff] }
 0x1fa   :  { %2245 = vmatprep.subr.mxu1 %v775_v47  ;;  %2169 = vmatpush1.msra.mxu0 %v262_v48  ;;  %v1143_v45 = vld [vmem:[#allocation6 + $0x1fe8] sm:$0xff]  ;;  %v1142_v46 = vld [vmem:[#allocation6 + $0x1fe0] sm:$0xff] }
 0x1fb   :  { %2246 = vmatpush1.msra.mxu1 %v774_v50  ;;  %2170 = vmatprep.subr.mxu0 %v247_v51  ;;  %v615_v47 = vld [vmem:[#allocation6 + $0xf68] sm:$0xff]  ;;  %v614_v50 = vld [vmem:[#allocation6 + $0xf60] sm:$0xff] }
 0x1fc   :  { %2247 = vmatprep.subr.mxu1 %v759_v53  ;;  %2171 = vmatpush1.msra.mxu0 %v246_v2  ;;  %v1127_v48 = vld [vmem:[#allocation6 + $0x1f68] sm:$0xff]  ;;  %v1126_v51 = vld [vmem:[#allocation6 + $0x1f60] sm:$0xff] }
 0x1fd   :  { %2248 = vmatpush1.msra.mxu1 %v758_v56  ;;  %2172 = vmatprep.subr.mxu0 %v231_v57  ;;  %v599_v53 = vld [vmem:[#allocation6 + $0xee8] sm:$0xff]  ;;  %v598_v56 = vld [vmem:[#allocation6 + $0xee0] sm:$0xff] }
 0x1fe   :  { %2249 = vmatprep.subr.mxu1 %v743_v61  ;;  %2173 = vmatpush1.msra.mxu0 %v230_v62  ;;  %v1111_v2 = vld [vmem:[#allocation6 + $0x1ee8] sm:$0xff]  ;;  %v1110_v57 = vld [vmem:[#allocation6 + $0x1ee0] sm:$0xff] }
 0x1ff   :  { %2250 = vmatpush1.msra.mxu1 %v742_v4  ;;  %2174 = vmatprep.subr.mxu0 %v215_v8  ;;  %v583_v61 = vld [vmem:[#allocation6 + $0xe68] sm:$0xff]  ;;  %v582_v4 = vld [vmem:[#allocation6 + $0xe60] sm:$0xff] }
 0x200   :  { %2251 = vmatprep.subr.mxu1 %v727_v29  ;;  %2175 = vmatpush1.msra.mxu0 %v214_v31  ;;  %v1095_v62 = vld [vmem:[#allocation6 + $0x1e68] sm:$0xff]  ;;  %v1094_v8 = vld [vmem:[#allocation6 + $0x1e60] sm:$0xff] }
 0x201   :  { %2252 = vmatpush1.msra.mxu1 %v726_v12  ;;  %2176 = vmatprep.subr.mxu0 %v199_v13  ;;  %v567_v29 = vld [vmem:[#allocation6 + $0xde8] sm:$0xff]  ;;  %v566_v12 = vld [vmem:[#allocation6 + $0xde0] sm:$0xff] }
 0x202   :  { %2253 = vmatprep.subr.mxu1 %v711_v19  ;;  %2177 = vmatpush1.msra.mxu0 %v198_v20  ;;  %v1079_v31 = vld [vmem:[#allocation6 + $0x1de8] sm:$0xff]  ;;  %v1078_v13 = vld [vmem:[#allocation6 + $0x1de0] sm:$0xff] }
 0x203   :  { %2254 = vmatpush1.msra.mxu1 %v710_v21  ;;  %2178 = vmatprep.subr.mxu0 %v183_v10  ;;  %v551_v19 = vld [vmem:[#allocation6 + $0xd68] sm:$0xff]  ;;  %v550_v21 = vld [vmem:[#allocation6 + $0xd60] sm:$0xff] }
 0x204   :  { %2255 = vmatprep.subr.mxu1 %v695_v22  ;;  %2179 = vmatpush1.msra.mxu0 %v182_v35  ;;  %v1063_v20 = vld [vmem:[#allocation6 + $0x1d68] sm:$0xff]  ;;  %v1062_v10 = vld [vmem:[#allocation6 + $0x1d60] sm:$0xff] }
 0x205   :  { %2256 = vmatpush1.msra.mxu1 %v694_v60  ;;  %2180 = vmatprep.subr.mxu0 %v167_v14  ;;  %v535_v22 = vld [vmem:[#allocation6 + $0xce8] sm:$0xff]  ;;  %v534_v60 = vld [vmem:[#allocation6 + $0xce0] sm:$0xff] }
 0x206   :  { %2257 = vmatprep.subr.mxu1 %v679_v24  ;;  %2181 = vmatpush1.msra.mxu0 %v166_v26  ;;  %v1047_v35 = vld [vmem:[#allocation6 + $0x1ce8] sm:$0xff]  ;;  %v1046_v14 = vld [vmem:[#allocation6 + $0x1ce0] sm:$0xff] }
 0x207   :  { %2258 = vmatpush1.msra.mxu1 %v678_v17  ;;  %2182 = vmatprep.subr.mxu0 %v151_v27  ;;  %v519_v24 = vld [vmem:[#allocation6 + $0xc68] sm:$0xff]  ;;  %v1172_v17 = vsub.s32 5, %v5327_v55  ;;  %v518_v27 = vld [vmem:[#allocation6 + $0xc60] sm:$0xff] }
 0x208   :  { %2259 = vmatprep.subr.mxu1 %v663_v32  ;;  %2183 = vmatpush1.msra.mxu0 %v150_v33  ;;  %v1031_v26 = vld [vmem:[#allocation6 + $0x1c68] sm:$0xff]  ;;  %v1030_v32 = vld [vmem:[#allocation6 + $0x1c60] sm:$0xff]  ;;  %v5434_v33 = vpop.f32.mrf.mxu0 }
 0x209   :  { %2260 = vmatpush1.msra.mxu1 %v662_v39  ;;  %2184 = vmatprep.subr.mxu0 %v135_v40  ;;  %v503_v39 = vld [vmem:[#allocation6 + $0xbe8] sm:$0xff] }
 0x20a   :  { %2261 = vmatprep.subr.mxu1 %v647_v41  ;;  %2185 = vmatpush1.msra.mxu0 %v134_v42  ;;  %v1015_v40 = vld [vmem:[#allocation6 + $0x1be8] sm:$0xff]  ;;  %v502_v41 = vld [vmem:[#allocation6 + $0xbe0] sm:$0xff] }
 0x20b   :  { %2262 = vmatpush1.msra.mxu1 %v646_v43  ;;  %2186 = vmatprep.subr.mxu0 %v631_v44  ;;  %v1014_v42 = vld [vmem:[#allocation6 + $0x1be0] sm:$0xff]  ;;  %v487_v43 = vld [vmem:[#allocation6 + $0xb68] sm:$0xff] }
 0x20c   :  { %2263 = vmatprep.subr.mxu1 %v1143_v45  ;;  %2187 = vmatpush2.msra.mxu0 %v630_v11  ;;  %v999_v44 = vld [vmem:[#allocation6 + $0x1b68] sm:$0xff]  ;;  %v5439_v11 = vrot.slane %v5405_v28, %v1172_v17 }
 0x20d   :  { %2264 = vmatpush2.msra.mxu1 %v1142_v46  ;;  %2188 = vmatprep.subr.mxu0 %v615_v47  ;;  %v5441_v46 = vpop.f32.mrf.mxu1  ;;  %v486_v47 = vld [vmem:[#allocation6 + $0xb60] sm:$0xff] }
 0x20e   :  { %2265 = vmatprep.subr.mxu1 %v1127_v48  ;;  %2189 = vmatpush2.msra.mxu0 %v614_v50  ;;  %v998_v48 = vld [vmem:[#allocation6 + $0x1b60] sm:$0xff] }
 0x20f   :  { %2266 = vmatpush2.msra.mxu1 %v1126_v51  ;;  %2190 = vmatprep.subr.mxu0 %v599_v53  ;;  %v471_v51 = vld [vmem:[#allocation6 + $0xae8] sm:$0xff] }
 0x210   :  { %2267 = vmatprep.subr.mxu1 %v1111_v2  ;;  %2191 = vmatpush2.msra.mxu0 %v598_v56  ;;  %v983_v53 = vld [vmem:[#allocation6 + $0x1ae8] sm:$0xff]  ;;  %v470_v56 = vld [vmem:[#allocation6 + $0xae0] sm:$0xff] }
 0x211   :  { %2268 = vmatpush2.msra.mxu1 %v1110_v57  ;;  %2192 = vmatprep.subr.mxu0 %v583_v61  ;;  %v982_v57 = vld [vmem:[#allocation6 + $0x1ae0] sm:$0xff] }
 0x212   :  { %2269 = vmatprep.subr.mxu1 %v1095_v62  ;;  %2193 = vmatpush2.msra.mxu0 %v582_v4  ;;  %v455_v62 = vld [vmem:[#allocation6 + $0xa68] sm:$0xff] }
 0x213   :  { %2270 = vmatpush2.msra.mxu1 %v1094_v8  ;;  %2194 = vmatprep.subr.mxu0 %v567_v29  ;;  %v967_v4 = vld [vmem:[#allocation6 + $0x1a68] sm:$0xff]  ;;  %v966_v29 = vld [vmem:[#allocation6 + $0x1a60] sm:$0xff] }
 0x214   :  { %2271 = vmatprep.subr.mxu1 %v1079_v31  ;;  %2195 = vmatpush2.msra.mxu0 %v566_v12  ;;  %v439_v12 = vld [vmem:[#allocation6 + $0x9e8] sm:$0xff] }
 0x215   :  { %2272 = vmatpush2.msra.mxu1 %v1078_v13  ;;  %2196 = vmatprep.subr.mxu0 %v551_v19  ;;  %v951_v13 = vld [vmem:[#allocation6 + $0x19e8] sm:$0xff] }
 0x216   :  { %2273 = vmatprep.subr.mxu1 %v1063_v20  ;;  %2197 = vmatpush2.msra.mxu0 %v550_v21  ;;  %v438_v20 = vld [vmem:[#allocation6 + $0x9e0] sm:$0xff] }
 0x217   :  { %2274 = vmatpush2.msra.mxu1 %v1062_v10  ;;  %2198 = vmatprep.subr.mxu0 %v535_v22  ;;  %v950_v21 = vld [vmem:[#allocation6 + $0x19e0] sm:$0xff]  ;;  %v423_v10 = vld [vmem:[#allocation6 + $0x968] sm:$0xff] }
 0x218   :  { %2275 = vmatprep.subr.mxu1 %v1047_v35  ;;  %2199 = vmatpush2.msra.mxu0 %v534_v60  ;;  %v935_v22 = vld [vmem:[#allocation6 + $0x1968] sm:$0xff]  ;;  %v422_v35 = vld [vmem:[#allocation6 + $0x960] sm:$0xff] }
 0x219   :  { %2276 = vmatpush2.msra.mxu1 %v1046_v14  ;;  %2200 = vmatprep.subr.mxu0 %v519_v24  ;;  %v934_v60 = vld [vmem:[#allocation6 + $0x1960] sm:$0xff]  ;;  %v407_v14 = vld [vmem:[#allocation6 + $0x8e8] sm:$0xff] }
 0x21a   :  { %2277 = vmatprep.subr.mxu1 %v1031_v26  ;;  %2201 = vmatpush2.msra.mxu0 %v518_v27  ;;  %v919_v24 = vld [vmem:[#allocation6 + $0x18e8] sm:$0xff]  ;;  %v406_v26 = vld [vmem:[#allocation6 + $0x8e0] sm:$0xff] }
 0x21b   :  { %2278 = vmatpush2.msra.mxu1 %v1030_v32  ;;  %v1610_v45 = vpop.f32.mrf.mxu0  ;;  %2202 = vmatprep.subr.mxu0 %v503_v39  ;;  %v918_v27 = vld [vmem:[#allocation6 + $0x18e0] sm:$0xff]  ;;  %v391_v32 = vld [vmem:[#allocation6 + $0x868] sm:$0xff] }
 0x21c   :  { %2279 = vmatprep.subr.mxu1 %v1015_v40  ;;  %v1611_v50 = vadd.f32 %v1610_v45, %v5410_v30  ;;  %2203 = vmatpush2.msra.mxu0 %v502_v41  ;;  %v454_v30 = vld [vmem:[#allocation6 + $0xa60] sm:$0xff]  ;;  %v903_v39 = vld [vmem:[#allocation6 + $0x1868] sm:$0xff]  ;;  %v361_v45 = vld [vmem:[#allocation6 + $0x778] sm:$0xff] }
 0x21d   :  { %2280 = vmatpush2.msra.mxu1 %v1014_v42  ;;  %v1612_v2 = vpop.f32.mrf.mxu0  ;;  %2204 = vmatprep.subr.mxu0 %v487_v43  ;;  %v390_v40 = vld [vmem:[#allocation6 + $0x860] sm:$0xff]  ;;  %v5453_v41 = vld [vmem:[#allocation3 + $0x8] sm:$0xff]  ;;  %v889_v42 = vld [vmem:[#allocation6 + $0x17f8] sm:$0xff] }
 0x21e   :  { %2281 = vmatprep.subr.mxu1 %v999_v44  ;;  %v1613_v28 = vadd.f32 %v1612_v2, %v5439_v11  ;;  %v1687_v61 = vpop.f32.mrf.mxu1  ;;  %2205 = vmatpush2.msra.mxu0 %v486_v47  ;;  %v376_v43 = vld [vmem:[#allocation6 + $0x7f0] sm:$0xff]  ;;  %v5459_v44 = vld [vmem:[#allocation3 + $0x18] sm:$0xff] }
 0x21f   :  { %2282 = vmatpush2.msra.mxu1 %v998_v48  ;;  %v5445_v8 = vadd.f32 %v1687_v61, %v1611_v50  ;;  %2206 = vmatprep.subr.mxu0 %v471_v51  ;;  %v873_v47 = vld [vmem:[#allocation6 + $0x1778] sm:$0xff]  ;;  %v5462_v48 = vld [vmem:[#allocation3 + $0x10] sm:$0xff] }
 0x220   :  { %2283 = vmatprep.subr.mxu1 %v983_v53  ;;  %v1689_v31 = vpop.f32.mrf.mxu1  ;;  %2207 = vmatpush2.msra.mxu0 %v470_v56  ;;  %v360_v50 = vld [vmem:[#allocation6 + $0x770] sm:$0xff]  ;;  %v345_v53 = vld [vmem:[#allocation6 + $0x6f8] sm:$0xff] }
 0x221   :  { %2284 = vmatpush2.msra.mxu1 %v982_v57  ;;  %v5447_v19 = vadd.f32 %v1689_v31, %v1613_v28  ;;  %2208 = vmatprep.subr.mxu0 %v455_v62  ;;  %v872_v51 = vld [vmem:[#allocation6 + $0x1770] sm:$0xff]  ;;  %v857_v2 = vld [vmem:[#allocation6 + $0x16f8] sm:$0xff] }
 0x222   :  { %2285 = vmatprep.subr.mxu1 %v967_v4  ;;  %2209 = vmatpush2.msra.mxu0 %v454_v30  ;;  %v344_v56 = vld [vmem:[#allocation6 + $0x6f0] sm:$0xff]  ;;  %v329_v28 = vld [vmem:[#allocation6 + $0x678] sm:$0xff] }
 0x223   :  { %2286 = vmatpush2.msra.mxu1 %v966_v29  ;;  %2210 = vmatprep.subr.mxu0 %v439_v12  ;;  %v856_v57 = vld [vmem:[#allocation6 + $0x16f0] sm:$0xff]  ;;  %v841_v61 = vld [vmem:[#allocation6 + $0x1678] sm:$0xff] }
 0x224   :  { %2287 = vmatprep.subr.mxu1 %v951_v13  ;;  %2211 = vmatpush2.msra.mxu0 %v438_v20  ;;  %v328_v62 = vld [vmem:[#allocation6 + $0x670] sm:$0xff]  ;;  %v313_v30 = vld [vmem:[#allocation6 + $0x5f8] sm:$0xff] }
 0x225   :  { %2288 = vmatpush2.msra.mxu1 %v950_v21  ;;  %2070 = vmatprep.mubr.f32.mxu0 %v5417_v23  ;;  %v902_v23 = vld [vmem:[#allocation6 + $0x1860] sm:$0xff]  ;;  %v840_v4 = vld [vmem:[#allocation6 + $0x1670] sm:$0xff]  ;;  %v825_v29 = vld [vmem:[#allocation6 + $0x15f8] sm:$0xff] }
 0x226   :  { %2212 = vmatprep.subr.mxu0 %v423_v10  ;;  %2289 = vmatprep.subr.mxu1 %v935_v22  ;;  %v312_v31 = vld [vmem:[#allocation6 + $0x5f0] sm:$0xff]  ;;  %v297_v13 = vld [vmem:[#allocation6 + $0x578] sm:$0xff] }
 0x227   :  { %2071 = vmatmul.mubr.f32.gmra.mxu0 %v5420_v6  ;;  %2290 = vmatpush2.msra.mxu1 %v934_v60  ;;  %v377_v6 = vld [vmem:[#allocation6 + $0x7f8] sm:$0xff]  ;;  %v824_v12 = vld [vmem:[#allocation6 + $0x15f0] sm:$0xff] }
 0x228   :  { %2213 = vmatpush2.msra.mxu0 %v422_v35  ;;  %2147 = vmatprep.mubr.f32.mxu1 %v5423_v54  ;;  %v5456_v54 = vld [vmem:[#allocation3] sm:$0xff]  ;;  %v809_v20 = vld [vmem:[#allocation6 + $0x1578] sm:$0xff]  ;;  %v296_v21 = vld [vmem:[#allocation6 + $0x570] sm:$0xff] }
 0x229   :  { %2214 = vmatprep.subr.mxu0 %v407_v14  ;;  %2291 = vmatprep.subr.mxu1 %v919_v24  ;;  %v808_v10 = vld [vmem:[#allocation6 + $0x1570] sm:$0xff]  ;;  %v281_v22 = vld [vmem:[#allocation6 + $0x4f8] sm:$0xff] }
 0x22a   :  { %2148 = vmatmul.mubr.f32.gmra.mxu1 %v5426_v58  ;;  %2215 = vmatpush2.msra.mxu0 %v406_v26  ;;  %v888_v58 = vld [vmem:[#allocation6 + $0x17f0] sm:$0xff]  ;;  %v793_v35 = vld [vmem:[#allocation6 + $0x14f8] sm:$0xff] }
 0x22b   :  { %2292 = vmatpush2.msra.mxu1 %v918_v27  ;;  %2216 = vmatprep.subr.mxu0 %v391_v32  ;;  %v280_v60 = vld [vmem:[#allocation6 + $0x4f0] sm:$0xff]  ;;  %v265_v24 = vld [vmem:[#allocation6 + $0x478] sm:$0xff] }
 0x22c   :  { %2293 = vmatprep.subr.mxu1 %v903_v39  ;;  %2217 = vmatpush2.msra.mxu0 %v390_v40  ;;  %v792_v14 = vld [vmem:[#allocation6 + $0x14f0] sm:$0xff]  ;;  %v777_v26 = vld [vmem:[#allocation6 + $0x1478] sm:$0xff] }
 0x22d   :  { %2218 = vmatprep.mubr.f32.mxu0 %v5453_v41  ;;  %2294 = vmatpush2.msra.mxu1 %v902_v23  ;;  %v264_v27 = vld [vmem:[#allocation6 + $0x470] sm:$0xff]  ;;  %v249_v39 = vld [vmem:[#allocation6 + $0x3f8] sm:$0xff] }
 0x22e   :  { %2219 = vmatmul.mubr.f32.vlgmr.msra.gmra.mxu0 %v5456_v54  ;;  %2295 = vmatprep.mubr.f32.mxu1 %v5459_v44  ;;  %v776_v32 = vld [vmem:[#allocation6 + $0x1470] sm:$0xff]  ;;  %v761_v40 = vld [vmem:[#allocation6 + $0x13f8] sm:$0xff] }
 0x22f   :  { %2308 = vmatprep.subr.mxu0 %v377_v6  ;;  %2385 = vmatprep.subr.mxu1 %v889_v42  ;;  %v248_v23 = vld [vmem:[#allocation6 + $0x3f0] sm:$0xff]  ;;  %v233_v42 = vld [vmem:[#allocation6 + $0x378] sm:$0xff] }
 0x230   :  { %2296 = vmatmul.mubr.f32.vlgmr.msra.gmra.mxu1 %v5462_v48  ;;  %2309 = vmatpush1.msra.mxu0 %v376_v43  ;;  %v760_v6 = vld [vmem:[#allocation6 + $0x13f0] sm:$0xff]  ;;  %v745_v43 = vld [vmem:[#allocation6 + $0x1378] sm:$0xff] }
 0x231   :  { %2386 = vmatpush1.msra.mxu1 %v888_v58  ;;  %2310 = vmatprep.subr.mxu0 %v361_v45  ;;  %v232_v58 = vld [vmem:[#allocation6 + $0x370] sm:$0xff] }
 0x232   :  { %2387 = vmatprep.subr.mxu1 %v873_v47  ;;  %2311 = vmatpush1.msra.mxu0 %v360_v50  ;;  %v744_v45 = vld [vmem:[#allocation6 + $0x1370] sm:$0xff]  ;;  %v217_v47 = vld [vmem:[#allocation6 + $0x2f8] sm:$0xff] }
 0x233   :  { %2388 = vmatpush1.msra.mxu1 %v872_v51  ;;  %2312 = vmatprep.subr.mxu0 %v345_v53  ;;  %v729_v50 = vld [vmem:[#allocation6 + $0x12f8] sm:$0xff]  ;;  %v216_v51 = vld [vmem:[#allocation6 + $0x2f0] sm:$0xff] }
 0x234   :  { %2389 = vmatprep.subr.mxu1 %v857_v2  ;;  %2313 = vmatpush1.msra.mxu0 %v344_v56  ;;  %v728_v53 = vld [vmem:[#allocation6 + $0x12f0] sm:$0xff]  ;;  %v201_v2 = vld [vmem:[#allocation6 + $0x278] sm:$0xff] }
 0x235   :  { %2390 = vmatpush1.msra.mxu1 %v856_v57  ;;  %2314 = vmatprep.subr.mxu0 %v329_v28  ;;  %v713_v56 = vld [vmem:[#allocation6 + $0x1278] sm:$0xff]  ;;  %v200_v57 = vld [vmem:[#allocation6 + $0x270] sm:$0xff] }
 0x236   :  { %2391 = vmatprep.subr.mxu1 %v841_v61  ;;  %2315 = vmatpush1.msra.mxu0 %v328_v62  ;;  %v712_v28 = vld [vmem:[#allocation6 + $0x1270] sm:$0xff]  ;;  %v185_v61 = vld [vmem:[#allocation6 + $0x1f8] sm:$0xff] }
 0x237   :  { %2392 = vmatpush1.msra.mxu1 %v840_v4  ;;  %2316 = vmatprep.subr.mxu0 %v313_v30  ;;  %v697_v62 = vld [vmem:[#allocation6 + $0x11f8] sm:$0xff]  ;;  %v184_v4 = vld [vmem:[#allocation6 + $0x1f0] sm:$0xff] }
 0x238   :  { %2393 = vmatprep.subr.mxu1 %v825_v29  ;;  %2317 = vmatpush1.msra.mxu0 %v312_v31  ;;  %v696_v30 = vld [vmem:[#allocation6 + $0x11f0] sm:$0xff]  ;;  %v169_v29 = vld [vmem:[#allocation6 + $0x178] sm:$0xff] }
 0x239   :  { %2394 = vmatpush1.msra.mxu1 %v824_v12  ;;  %2318 = vmatprep.subr.mxu0 %v297_v13  ;;  %v681_v31 = vld [vmem:[#allocation6 + $0x1178] sm:$0xff]  ;;  %v168_v12 = vld [vmem:[#allocation6 + $0x170] sm:$0xff] }
 0x23a   :  { %2395 = vmatprep.subr.mxu1 %v809_v20  ;;  %2319 = vmatpush1.msra.mxu0 %v296_v21  ;;  %v680_v13 = vld [vmem:[#allocation6 + $0x1170] sm:$0xff]  ;;  %v153_v20 = vld [vmem:[#allocation6 + $0xf8] sm:$0xff] }
 0x23b   :  { %2396 = vmatpush1.msra.mxu1 %v808_v10  ;;  %2320 = vmatprep.subr.mxu0 %v281_v22  ;;  %v665_v21 = vld [vmem:[#allocation6 + $0x10f8] sm:$0xff]  ;;  %v152_v10 = vld [vmem:[#allocation6 + $0xf0] sm:$0xff] }
 0x23c   :  { %2397 = vmatprep.subr.mxu1 %v793_v35  ;;  %2321 = vmatpush1.msra.mxu0 %v280_v60  ;;  %v664_v22 = vld [vmem:[#allocation6 + $0x10f0] sm:$0xff]  ;;  %v137_v35 = vld [vmem:[#allocation6 + $0x78] sm:$0xff] }
 0x23d   :  { %2398 = vmatpush1.msra.mxu1 %v792_v14  ;;  %2322 = vmatprep.subr.mxu0 %v265_v24  ;;  %v649_v60 = vld [vmem:[#allocation6 + $0x1078] sm:$0xff]  ;;  %v136_v14 = vld [vmem:[#allocation6 + $0x70] sm:$0xff] }
 0x23e   :  { %2399 = vmatprep.subr.mxu1 %v777_v26  ;;  %2323 = vmatpush1.msra.mxu0 %v264_v27  ;;  %v648_v24 = vld [vmem:[#allocation6 + $0x1070] sm:$0xff]  ;;  %v633_v26 = vld [vmem:[#allocation6 + $0xff8] sm:$0xff] }
 0x23f   :  { %2400 = vmatpush1.msra.mxu1 %v776_v32  ;;  %2324 = vmatprep.subr.mxu0 %v249_v39  ;;  %v1145_v27 = vld [vmem:[#allocation6 + $0x1ff8] sm:$0xff]  ;;  %v632_v32 = vld [vmem:[#allocation6 + $0xff0] sm:$0xff] }
 0x240   :  { %2401 = vmatprep.subr.mxu1 %v761_v40  ;;  %2325 = vmatpush1.msra.mxu0 %v248_v23  ;;  %v1144_v39 = vld [vmem:[#allocation6 + $0x1ff0] sm:$0xff]  ;;  %v617_v40 = vld [vmem:[#allocation6 + $0xf78] sm:$0xff] }
 0x241   :  { %2402 = vmatpush1.msra.mxu1 %v760_v6  ;;  %2326 = vmatprep.subr.mxu0 %v233_v42  ;;  %v1129_v23 = vld [vmem:[#allocation6 + $0x1f78] sm:$0xff]  ;;  %v616_v6 = vld [vmem:[#allocation6 + $0xf70] sm:$0xff] }
 0x242   :  { %2403 = vmatprep.subr.mxu1 %v745_v43  ;;  %2327 = vmatpush1.msra.mxu0 %v232_v58  ;;  %v1128_v42 = vld [vmem:[#allocation6 + $0x1f70] sm:$0xff]  ;;  %v601_v43 = vld [vmem:[#allocation6 + $0xef8] sm:$0xff] }
 0x243   :  { %2404 = vmatpush1.msra.mxu1 %v744_v45  ;;  %2328 = vmatprep.subr.mxu0 %v217_v47  ;;  %v1113_v58 = vld [vmem:[#allocation6 + $0x1ef8] sm:$0xff]  ;;  %v600_v45 = vld [vmem:[#allocation6 + $0xef0] sm:$0xff] }
 0x244   :  { %2405 = vmatprep.subr.mxu1 %v729_v50  ;;  %2329 = vmatpush1.msra.mxu0 %v216_v51  ;;  %v1112_v47 = vld [vmem:[#allocation6 + $0x1ef0] sm:$0xff]  ;;  %v585_v50 = vld [vmem:[#allocation6 + $0xe78] sm:$0xff] }
 0x245   :  { %2406 = vmatpush1.msra.mxu1 %v728_v53  ;;  %2330 = vmatprep.subr.mxu0 %v201_v2  ;;  %v1097_v51 = vld [vmem:[#allocation6 + $0x1e78] sm:$0xff]  ;;  %v584_v53 = vld [vmem:[#allocation6 + $0xe70] sm:$0xff] }
 0x246   :  { %2407 = vmatprep.subr.mxu1 %v713_v56  ;;  %2331 = vmatpush1.msra.mxu0 %v200_v57  ;;  %v1096_v2 = vld [vmem:[#allocation6 + $0x1e70] sm:$0xff]  ;;  %v569_v56 = vld [vmem:[#allocation6 + $0xdf8] sm:$0xff] }
 0x247   :  { %2408 = vmatpush1.msra.mxu1 %v712_v28  ;;  %2332 = vmatprep.subr.mxu0 %v185_v61  ;;  %v1081_v57 = vld [vmem:[#allocation6 + $0x1df8] sm:$0xff]  ;;  %v568_v28 = vld [vmem:[#allocation6 + $0xdf0] sm:$0xff] }
 0x248   :  { %2409 = vmatprep.subr.mxu1 %v697_v62  ;;  %2333 = vmatpush1.msra.mxu0 %v184_v4  ;;  %v1080_v61 = vld [vmem:[#allocation6 + $0x1df0] sm:$0xff]  ;;  %v553_v62 = vld [vmem:[#allocation6 + $0xd78] sm:$0xff] }
 0x249   :  { %2410 = vmatpush1.msra.mxu1 %v696_v30  ;;  %2334 = vmatprep.subr.mxu0 %v169_v29  ;;  %v1065_v4 = vld [vmem:[#allocation6 + $0x1d78] sm:$0xff]  ;;  %v552_v30 = vld [vmem:[#allocation6 + $0xd70] sm:$0xff] }
 0x24a   :  { %2411 = vmatprep.subr.mxu1 %v681_v31  ;;  %2335 = vmatpush1.msra.mxu0 %v168_v12  ;;  %v1064_v29 = vld [vmem:[#allocation6 + $0x1d70] sm:$0xff]  ;;  %v5465_v31 = vpop.f32.mrf.mxu0  ;;  %v537_v12 = vld [vmem:[#allocation6 + $0xcf8] sm:$0xff] }
 0x24b   :  { %2412 = vmatpush1.msra.mxu1 %v680_v13  ;;  %2336 = vmatprep.subr.mxu0 %v153_v20  ;;  %v1049_v13 = vld [vmem:[#allocation6 + $0x1cf8] sm:$0xff]  ;;  %v536_v20 = vld [vmem:[#allocation6 + $0xcf0] sm:$0xff] }
 0x24c   :  { %2413 = vmatprep.subr.mxu1 %v665_v21  ;;  %2337 = vmatpush1.msra.mxu0 %v152_v10  ;;  %v1048_v21 = vld [vmem:[#allocation6 + $0x1cf0] sm:$0xff]  ;;  %v521_v10 = vld [vmem:[#allocation6 + $0xc78] sm:$0xff] }
 0x24d   :  { %2414 = vmatpush1.msra.mxu1 %v664_v22  ;;  %2338 = vmatprep.subr.mxu0 %v137_v35  ;;  %v1033_v22 = vld [vmem:[#allocation6 + $0x1c78] sm:$0xff]  ;;  %v5467_v35 = vpop.f32.mrf.mxu1 }
 0x24e   :  { %2415 = vmatprep.subr.mxu1 %v649_v60  ;;  %2339 = vmatpush1.msra.mxu0 %v136_v14  ;;  %v520_v60 = vld [vmem:[#allocation6 + $0xc70] sm:$0xff] }
 0x24f   :  { %2416 = vmatpush1.msra.mxu1 %v648_v24  ;;  %2340 = vmatprep.subr.mxu0 %v633_v26  ;;  %v1032_v14 = vld [vmem:[#allocation6 + $0x1c70] sm:$0xff]  ;;  %v5469_v24 = vpop.f32.mrf.mxu0  ;;  %v505_v26 = vld [vmem:[#allocation6 + $0xbf8] sm:$0xff] }
 0x250   :  { %2417 = vmatprep.subr.mxu1 %v1145_v27  ;;  %2341 = vmatpush2.msra.mxu0 %v632_v32  ;;  %v1017_v27 = vld [vmem:[#allocation6 + $0x1bf8] sm:$0xff]  ;;  %v504_v32 = vld [vmem:[#allocation6 + $0xbf0] sm:$0xff] }
 0x251   :  { %2418 = vmatpush2.msra.mxu1 %v1144_v39  ;;  %2342 = vmatprep.subr.mxu0 %v617_v40  ;;  %v1016_v39 = vld [vmem:[#allocation6 + $0x1bf0] sm:$0xff]  ;;  %v489_v40 = vld [vmem:[#allocation6 + $0xb78] sm:$0xff] }
 0x252   :  { %2419 = vmatprep.subr.mxu1 %v1129_v23  ;;  %2343 = vmatpush2.msra.mxu0 %v616_v6  ;;  %v1001_v23 = vld [vmem:[#allocation6 + $0x1b78] sm:$0xff] }
 0x253   :  { %2420 = vmatpush2.msra.mxu1 %v1128_v42  ;;  %2344 = vmatprep.subr.mxu0 %v601_v43  ;;  %v5473_v42 = vpop.f32.mrf.mxu1  ;;  %v488_v43 = vld [vmem:[#allocation6 + $0xb70] sm:$0xff] }
 0x254   :  { %2421 = vmatprep.subr.mxu1 %v1113_v58  ;;  %2345 = vmatpush2.msra.mxu0 %v600_v45  ;;  %v1000_v58 = vld [vmem:[#allocation6 + $0x1b70] sm:$0xff]  ;;  %v5475_v45 = vld [vmem:[#allocation8 + $0x8] sm:$0xff] }
 0x255   :  { %2422 = vmatpush2.msra.mxu1 %v1112_v47  ;;  %2346 = vmatprep.subr.mxu0 %v585_v50  ;;  %v473_v47 = vld [vmem:[#allocation6 + $0xaf8] sm:$0xff] }
 0x256   :  { %2423 = vmatprep.subr.mxu1 %v1097_v51  ;;  %2347 = vmatpush2.msra.mxu0 %v584_v53  ;;  %v985_v50 = vld [vmem:[#allocation6 + $0x1af8] sm:$0xff]  ;;  %v472_v51 = vld [vmem:[#allocation6 + $0xaf0] sm:$0xff] }
 0x257   :  { %2424 = vmatpush2.msra.mxu1 %v1096_v2  ;;  %2348 = vmatprep.subr.mxu0 %v569_v56  ;;  %v984_v53 = vld [vmem:[#allocation6 + $0x1af0] sm:$0xff] }
 0x258   :  { %2425 = vmatprep.subr.mxu1 %v1081_v57  ;;  %2349 = vmatpush2.msra.mxu0 %v568_v28  ;;  %v457_v57 = vld [vmem:[#allocation6 + $0xa78] sm:$0xff] }
 0x259   :  { %2426 = vmatpush2.msra.mxu1 %v1080_v61  ;;  %2350 = vmatprep.subr.mxu0 %v553_v62  ;;  %v969_v28 = vld [vmem:[#allocation6 + $0x1a78] sm:$0xff]  ;;  %v5483_v61 = vrot.slane %v5475_v45, %v5330_v7  ;;  %v456_v62 = vld [vmem:[#allocation6 + $0xa70] sm:$0xff] }
 0x25a   :  { %2427 = vmatprep.subr.mxu1 %v1065_v4  ;;  %2351 = vmatpush2.msra.mxu0 %v552_v30  ;;  %v968_v4 = vld [vmem:[#allocation6 + $0x1a70] sm:$0xff] }
 0x25b   :  { %2428 = vmatpush2.msra.mxu1 %v1064_v29  ;;  %2352 = vmatprep.subr.mxu0 %v537_v12  ;;  %v441_v29 = vld [vmem:[#allocation6 + $0x9f8] sm:$0xff] }
 0x25c   :  { %2429 = vmatprep.subr.mxu1 %v1049_v13  ;;  %2353 = vmatpush2.msra.mxu0 %v536_v20  ;;  %v953_v12 = vld [vmem:[#allocation6 + $0x19f8] sm:$0xff]  ;;  %v440_v13 = vld [vmem:[#allocation6 + $0x9f0] sm:$0xff] }
 0x25d   :  { %2430 = vmatpush2.msra.mxu1 %v1048_v21  ;;  %2354 = vmatprep.subr.mxu0 %v521_v10  ;;  %v952_v20 = vld [vmem:[#allocation6 + $0x19f0] sm:$0xff]  ;;  %v425_v10 = vld [vmem:[#allocation6 + $0x978] sm:$0xff] }
 0x25e   :  { %2431 = vmatprep.subr.mxu1 %v1033_v22  ;;  %2355 = vmatpush2.msra.mxu0 %v520_v60  ;;  %v937_v60 = vld [vmem:[#allocation6 + $0x1978] sm:$0xff] }
 0x25f   :  { %2432 = vmatpush2.msra.mxu1 %v1032_v14  ;;  %v5471_v6 = vpop.f32.mrf.mxu0  ;;  %2356 = vmatprep.subr.mxu0 %v505_v26  ;;  %v424_v26 = vld [vmem:[#allocation6 + $0x970] sm:$0xff] }
 0x260   :  { %2433 = vmatprep.subr.mxu1 %v1017_v27  ;;  %2357 = vmatpush2.msra.mxu0 %v504_v32  ;;  %v5491_v32 = vsub.s32 3, %v5327_v55 }
 0x261   :  { %2434 = vmatpush2.msra.mxu1 %v1016_v39  ;;  %2358 = vmatprep.subr.mxu0 %v489_v40  ;;  %v5477_v2 = vpop.f32.mrf.mxu0  ;;  %v5018_v39 = vld [vmem:[#allocation3 + $0x28] sm:$0xff]  ;;  %v936_v40 = vld [vmem:[#allocation6 + $0x1970] sm:$0xff] }
 0x262   :  { %2435 = vmatprep.subr.mxu1 %v1001_v23  ;;  %v5479_v56 = vpop.f32.mrf.mxu1  ;;  %2359 = vmatpush2.msra.mxu0 %v488_v43  ;;  %5911 = vst [vmem:[#allocation21_spill] sm:$0xff] %v5491_v32  ;;  %v409_v23 = vld [vmem:[#allocation6 + $0x8f8] sm:$0xff]  ;;  %v5019_v43 = vld [vmem:[#allocation3 + $0x20] sm:$0xff] }
 0x263   :  { %2436 = vmatpush2.msra.mxu1 %v1000_v58  ;;  %2360 = vmatprep.subr.mxu0 %v473_v47  ;;  %v921_v58 = vld [vmem:[#allocation6 + $0x18f8] sm:$0xff] }
 0x264   :  { %2437 = vmatprep.subr.mxu1 %v985_v50  ;;  %v5485_v30 = vpop.f32.mrf.mxu1  ;;  %2361 = vmatpush2.msra.mxu0 %v472_v51  ;;  %v5020_v47 = vld [vmem:[#allocation3 + $0x38] sm:$0xff]  ;;  %v408_v50 = vld [vmem:[#allocation6 + $0x8f0] sm:$0xff] }
 0x265   :  { %2438 = vmatpush2.msra.mxu1 %v984_v53  ;;  %2362 = vmatprep.subr.mxu0 %v457_v57  ;;  %v920_v51 = vld [vmem:[#allocation6 + $0x18f0] sm:$0xff]  ;;  %v393_v53 = vld [vmem:[#allocation6 + $0x878] sm:$0xff] }
 0x266   :  { %2439 = vmatprep.subr.mxu1 %v969_v28  ;;  %v1912_v21 = vpop.f32.mrf.mxu0  ;;  %2363 = vmatpush2.msra.mxu0 %v456_v62  ;;  %v905_v57 = vld [vmem:[#allocation6 + $0x1878] sm:$0xff]  ;;  %v5493_v28 = vld [vmem:[#allocation8] sm:$0xff] }
 0x267   :  { %2440 = vmatpush2.msra.mxu1 %v968_v4  ;;  %v1913_v22 = vadd.f32 %v1912_v21, %v5483_v61  ;;  %2364 = vmatprep.subr.mxu0 %v441_v29  ;;  %v5497_v62 = vrot.slane %v5493_v28, %v5491_v32  ;;  %v5022_v4 = vld [vmem:[#allocation3 + $0x30] sm:$0xff]  ;;  %v2683_v21 = vld [vmem:[#allocation9 + $0x5e8] sm:$0xff] }
 0x268   :  { %2441 = vmatprep.subr.mxu1 %v953_v12  ;;  %v1989_v14 = vpop.f32.mrf.mxu1  ;;  %2365 = vmatpush2.msra.mxu0 %v440_v13  ;;  %v392_v29 = vld [vmem:[#allocation6 + $0x870] sm:$0xff]  ;;  %v1299_v13 = vadd.f32 %v5360_v9, %v5364_v34 }
 0x269   :  { %2442 = vmatpush2.msra.mxu1 %v952_v20  ;;  %v5488_v27 = vadd.f32 %v1989_v14, %v1913_v22  ;;  %2224 = vmatprep.mubr.f32.mxu0 %v5018_v39  ;;  %v904_v12 = vld [vmem:[#allocation6 + $0x1870] sm:$0xff]  ;;  %v2555_v20 = vld [vmem:[#allocation9 + $0x1e8] sm:$0xff] }
 0x26a   :  { %2366 = vmatprep.subr.mxu0 %v425_v10  ;;  %2443 = vmatprep.subr.mxu1 %v937_v60  ;;  %v1453_v10 = vadd.f32 %v5394_v3, %v5497_v62  ;;  %v2554_v22 = vld [vmem:[#allocation9 + $0x1e0] sm:$0xff]  ;;  %v2551_v14 = vld [vmem:[#allocation9 + $0x1c8] sm:$0xff]  ;;  %v5508_v9 = vadd.f32 %v5366_v36, %v1299_v13 }
 0x26b   :  { %2225 = vmatmul.mubr.f32.gmra.mxu0 %v5019_v43  ;;  %2301 = vmatprep.mubr.f32.mxu1 %v5020_v47  ;;  %v2682_v60 = vld [vmem:[#allocation9 + $0x5e0] sm:$0xff]  ;;  %v2531_v13 = vld [vmem:[#allocation9 + $0x128] sm:$0xff] }
 0x26c   :  { %2367 = vmatpush2.msra.mxu0 %v424_v26  ;;  %2444 = vmatpush2.msra.mxu1 %v936_v40  ;;  %v2679_v26 = vld [vmem:[#allocation9 + $0x5c8] sm:$0xff]  ;;  %v2550_v34 = vld [vmem:[#allocation9 + $0x1c0] sm:$0xff]  ;;  %v2463_v40 = vmax.f32 %v5508_v9, 0.0  ;;  %v2536_v9 = vld [vmem:[#allocation9 + $0x150] sm:$0xff] }
 0x26d   :  { %2368 = vmatprep.subr.mxu0 %v409_v23  ;;  %2302 = vmatmul.mubr.f32.gmra.mxu1 %v5022_v4  ;;  %v2678_v3 = vld [vmem:[#allocation9 + $0x5c0] sm:$0xff] }
 0x26e   :  { %2445 = vmatprep.subr.mxu1 %v921_v58  ;;  %2369 = vmatpush2.msra.mxu0 %v408_v50  ;;  %v2674_v36 = vld [vmem:[#allocation9 + $0x5a0] sm:$0xff]  ;;  %v2671_v58 = vld [vmem:[#allocation9 + $0x588] sm:$0xff] }
 0x26f   :  { %2446 = vmatpush2.msra.mxu1 %v920_v51  ;;  %2370 = vmatprep.subr.mxu0 %v393_v53  ;;  %v2539_v50 = vld [vmem:[#allocation9 + $0x168] sm:$0xff]  ;;  %v2538_v51 = vld [vmem:[#allocation9 + $0x160] sm:$0xff] }
 0x270   :  { %2447 = vmatprep.subr.mxu1 %v905_v57  ;;  %2371 = vmatpush2.msra.mxu0 %v392_v29  ;;  %v2666_v53 = vld [vmem:[#allocation9 + $0x560] sm:$0xff]  ;;  %v2535_v57 = vld [vmem:[#allocation9 + $0x148] sm:$0xff] }
 0x271   :  { %2372 = vmatprep.mubr.f32.mxu0 %v5453_v41  ;;  %2448 = vmatpush2.msra.mxu1 %v904_v12  ;;  %v5511_v41 = vadd.f32 %v5399_v16, %v1453_v10  ;;  %v2543_v16 = vld [vmem:[#allocation9 + $0x188] sm:$0xff]  ;;  %v2534_v29 = vld [vmem:[#allocation9 + $0x140] sm:$0xff] }
 0x272   :  { %2449 = vmatprep.mubr.f32.mxu1 %v5459_v44  ;;  %2373 = vmatmul.mubr.f32.vlgmr.msra.gmra.mxu0 %v5456_v54  ;;  %v2547_v54 = vld [vmem:[#allocation9 + $0x1a8] sm:$0xff]  ;;  %v2662_v12 = vld [vmem:[#allocation9 + $0x540] sm:$0xff] }
 0x273   :  { %2450 = vmatmul.mubr.f32.vlgmr.msra.gmra.mxu1 %v5462_v48  ;;  %3518 = vmatprep.subr.mxu0 %v2555_v20  ;;  %v2675_v44 = vld [vmem:[#allocation9 + $0x5a8] sm:$0xff]  ;;  %v2546_v48 = vld [vmem:[#allocation9 + $0x1a0] sm:$0xff]  ;;  %v2465_v23 = vmax.f32 %v5511_v41, 0.0  ;;  %v2532_v41 = vld [vmem:[#allocation9 + $0x130] sm:$0xff] }
 0x274   :  { %3595 = vmatprep.subr.mxu1 %v2683_v21  ;;  %3519 = vmatpush1.msra.mxu0 %v2554_v22  ;;  %v2659_v20 = vld [vmem:[#allocation9 + $0x528] sm:$0xff]  ;;  %v2530_v21 = vld [vmem:[#allocation9 + $0x120] sm:$0xff] }
 0x275   :  { %3596 = vmatpush1.msra.mxu1 %v2682_v60  ;;  %3520 = vmatprep.subr.mxu0 %v2551_v14  ;;  %v2658_v10 = vld [vmem:[#allocation9 + $0x520] sm:$0xff]  ;;  %v2527_v22 = vld [vmem:[#allocation9 + $0x108] sm:$0xff] }
 0x276   :  { %3597 = vmatprep.subr.mxu1 %v2679_v26  ;;  %2378 = vmatprep.mubr.f32.mxu0 %v5018_v39  ;;  %v2542_v39 = vld [vmem:[#allocation9 + $0x180] sm:$0xff]  ;;  %v2655_v60 = vld [vmem:[#allocation9 + $0x508] sm:$0xff] }
 0x277   :  { %2455 = vmatprep.mubr.f32.mxu1 %v5020_v47  ;;  %3521 = vmatpush1.msra.mxu0 %v2550_v34  ;;  %v2670_v47 = vld [vmem:[#allocation9 + $0x580] sm:$0xff]  ;;  %v2523_v34 = vld [vmem:[#allocation9 + $0xe8] sm:$0xff] }
 0x278   :  { %3598 = vmatpush1.msra.mxu1 %v2678_v3  ;;  %2379 = vmatmul.mubr.f32.gmra.mxu0 %v5019_v43  ;;  %v2667_v43 = vld [vmem:[#allocation9 + $0x568] sm:$0xff]  ;;  %v2526_v14 = vld [vmem:[#allocation9 + $0x100] sm:$0xff] }
 0x279   :  { %2456 = vmatmul.mubr.f32.gmra.mxu1 %v5022_v4  ;;  %3522 = vmatprep.subr.mxu0 %v2547_v54  ;;  %v2663_v4 = vld [vmem:[#allocation9 + $0x548] sm:$0xff]  ;;  %v2654_v26 = vld [vmem:[#allocation9 + $0x500] sm:$0xff] }
 0x27a   :  { %3599 = vmatprep.subr.mxu1 %v2675_v44  ;;  %3523 = vmatpush1.msra.mxu0 %v2546_v48  ;;  %v2651_v3 = vld [vmem:[#allocation9 + $0x4e8] sm:$0xff]  ;;  %v2522_v54 = vld [vmem:[#allocation9 + $0xe0] sm:$0xff] }
 0x27b   :  { %3582 = vmatprep.mubr.f32.mxu0 %v2463_v40  ;;  %3600 = vmatpush1.msra.mxu1 %v2674_v36  ;;  %v2650_v44 = vld [vmem:[#allocation9 + $0x4e0] sm:$0xff]  ;;  %v2519_v48 = vld [vmem:[#allocation9 + $0xc8] sm:$0xff] }
 0x27c   :  { %3659 = vmatprep.mubr.f32.mxu1 %v2465_v23  ;;  %3524 = vmatprep.subr.mxu0 %v2543_v16  ;;  %v2647_v36 = vld [vmem:[#allocation9 + $0x4c8] sm:$0xff]  ;;  %v2518_v16 = vld [vmem:[#allocation9 + $0xc0] sm:$0xff] }
 0x27d   :  { %3601 = vmatprep.subr.mxu1 %v2671_v58  ;;  %3525 = vmatpush1.msra.mxu0 %v2542_v39  ;;  %v2646_v58 = vld [vmem:[#allocation9 + $0x4c0] sm:$0xff]  ;;  %v2515_v39 = vld [vmem:[#allocation9 + $0xa8] sm:$0xff] }
 0x27e   :  { %3602 = vmatpush1.msra.mxu1 %v2670_v47  ;;  %3526 = vmatprep.subr.mxu0 %v2539_v50  ;;  %v2643_v47 = vld [vmem:[#allocation9 + $0x4a8] sm:$0xff]  ;;  %v2514_v50 = vld [vmem:[#allocation9 + $0xa0] sm:$0xff] }
 0x27f   :  { %3603 = vmatprep.subr.mxu1 %v2667_v43  ;;  %3527 = vmatpush1.msra.mxu0 %v2538_v51  ;;  %v2642_v43 = vld [vmem:[#allocation9 + $0x4a0] sm:$0xff]  ;;  %v2511_v51 = vld [vmem:[#allocation9 + $0x88] sm:$0xff] }
 0x280   :  { %3604 = vmatpush1.msra.mxu1 %v2666_v53  ;;  %3528 = vmatprep.subr.mxu0 %v2535_v57  ;;  %v2639_v53 = vld [vmem:[#allocation9 + $0x488] sm:$0xff]  ;;  %v2510_v57 = vld [vmem:[#allocation9 + $0x80] sm:$0xff] }
 0x281   :  { %3605 = vmatprep.subr.mxu1 %v2663_v4  ;;  %3529 = vmatpush1.msra.mxu0 %v2534_v29  ;;  %v2638_v4 = vld [vmem:[#allocation9 + $0x480] sm:$0xff]  ;;  %v2507_v29 = vld [vmem:[#allocation9 + $0x68] sm:$0xff] }
 0x282   :  { %3606 = vmatpush1.msra.mxu1 %v2662_v12  ;;  %3530 = vmatprep.subr.mxu0 %v2531_v13  ;;  %v2635_v12 = vld [vmem:[#allocation9 + $0x468] sm:$0xff]  ;;  %v2506_v13 = vld [vmem:[#allocation9 + $0x60] sm:$0xff] }
 0x283   :  { %3607 = vmatprep.subr.mxu1 %v2659_v20  ;;  %3531 = vmatpush1.msra.mxu0 %v2530_v21  ;;  %v2634_v20 = vld [vmem:[#allocation9 + $0x460] sm:$0xff]  ;;  %v2503_v21 = vld [vmem:[#allocation9 + $0x48] sm:$0xff] }
 0x284   :  { %3608 = vmatpush1.msra.mxu1 %v2658_v10  ;;  %3532 = vmatprep.subr.mxu0 %v2527_v22  ;;  %v2631_v10 = vld [vmem:[#allocation9 + $0x448] sm:$0xff]  ;;  %v2502_v22 = vld [vmem:[#allocation9 + $0x40] sm:$0xff] }
 0x285   :  { %3609 = vmatprep.subr.mxu1 %v2655_v60  ;;  %3533 = vmatpush1.msra.mxu0 %v2526_v14  ;;  %v2630_v60 = vld [vmem:[#allocation9 + $0x440] sm:$0xff]  ;;  %v2499_v14 = vld [vmem:[#allocation9 + $0x28] sm:$0xff] }
 0x286   :  { %3610 = vmatpush1.msra.mxu1 %v2654_v26  ;;  %3534 = vmatprep.subr.mxu0 %v2523_v34  ;;  %v2627_v26 = vld [vmem:[#allocation9 + $0x428] sm:$0xff]  ;;  %v2498_v34 = vld [vmem:[#allocation9 + $0x20] sm:$0xff] }
 0x287   :  { %3611 = vmatprep.subr.mxu1 %v2651_v3  ;;  %3535 = vmatpush1.msra.mxu0 %v2522_v54  ;;  %v2626_v3 = vld [vmem:[#allocation9 + $0x420] sm:$0xff]  ;;  %v2495_v54 = vld [vmem:[#allocation9 + $0x8] sm:$0xff] }
 0x288   :  { %3612 = vmatpush1.msra.mxu1 %v2650_v44  ;;  %3536 = vmatprep.subr.mxu0 %v2519_v48  ;;  %v2623_v44 = vld [vmem:[#allocation9 + $0x408] sm:$0xff]  ;;  %v2494_v48 = vld [vmem:[#allocation9] sm:$0xff] }
 0x289   :  { %3613 = vmatprep.subr.mxu1 %v2647_v36  ;;  %3537 = vmatpush1.msra.mxu0 %v2518_v16  ;;  %v2622_v36 = vld [vmem:[#allocation9 + $0x400] sm:$0xff]  ;;  %v2619_v16 = vld [vmem:[#allocation9 + $0x3e8] sm:$0xff] }
 0x28a   :  { %3614 = vmatpush1.msra.mxu1 %v2646_v58  ;;  %3538 = vmatprep.subr.mxu0 %v2515_v39  ;;  %v2747_v58 = vld [vmem:[#allocation9 + $0x7e8] sm:$0xff]  ;;  %v2618_v39 = vld [vmem:[#allocation9 + $0x3e0] sm:$0xff] }
 0x28b   :  { %3615 = vmatprep.subr.mxu1 %v2643_v47  ;;  %3539 = vmatpush1.msra.mxu0 %v2514_v50  ;;  %v2746_v47 = vld [vmem:[#allocation9 + $0x7e0] sm:$0xff]  ;;  %v2615_v50 = vld [vmem:[#allocation9 + $0x3c8] sm:$0xff] }
 0x28c   :  { %3616 = vmatpush1.msra.mxu1 %v2642_v43  ;;  %3540 = vmatprep.subr.mxu0 %v2511_v51  ;;  %v2743_v43 = vld [vmem:[#allocation9 + $0x7c8] sm:$0xff]  ;;  %v2614_v51 = vld [vmem:[#allocation9 + $0x3c0] sm:$0xff] }
 0x28d   :  { %3617 = vmatprep.subr.mxu1 %v2639_v53  ;;  %3541 = vmatpush1.msra.mxu0 %v2510_v57  ;;  %v2742_v53 = vld [vmem:[#allocation9 + $0x7c0] sm:$0xff]  ;;  %v2611_v57 = vld [vmem:[#allocation9 + $0x3a8] sm:$0xff] }
 0x28e   :  { %3618 = vmatpush1.msra.mxu1 %v2638_v4  ;;  %3542 = vmatprep.subr.mxu0 %v2507_v29  ;;  %v2739_v4 = vld [vmem:[#allocation9 + $0x7a8] sm:$0xff]  ;;  %v2610_v29 = vld [vmem:[#allocation9 + $0x3a0] sm:$0xff] }
 0x28f   :  { %3619 = vmatprep.subr.mxu1 %v2635_v12  ;;  %3543 = vmatpush1.msra.mxu0 %v2506_v13  ;;  %v2738_v12 = vld [vmem:[#allocation9 + $0x7a0] sm:$0xff]  ;;  %v2607_v13 = vld [vmem:[#allocation9 + $0x388] sm:$0xff] }
 0x290   :  { %3620 = vmatpush1.msra.mxu1 %v2634_v20  ;;  %3544 = vmatprep.subr.mxu0 %v2503_v21  ;;  %v2735_v20 = vld [vmem:[#allocation9 + $0x788] sm:$0xff]  ;;  %v2606_v21 = vld [vmem:[#allocation9 + $0x380] sm:$0xff] }
 0x291   :  { %3621 = vmatprep.subr.mxu1 %v2631_v10  ;;  %3545 = vmatpush1.msra.mxu0 %v2502_v22  ;;  %v2734_v10 = vld [vmem:[#allocation9 + $0x780] sm:$0xff]  ;;  %v2603_v22 = vld [vmem:[#allocation9 + $0x368] sm:$0xff] }
 0x292   :  { %3622 = vmatpush1.msra.mxu1 %v2630_v60  ;;  %3546 = vmatprep.subr.mxu0 %v2499_v14  ;;  %v2731_v60 = vld [vmem:[#allocation9 + $0x768] sm:$0xff]  ;;  %v2602_v14 = vld [vmem:[#allocation9 + $0x360] sm:$0xff] }
 0x293   :  { %3623 = vmatprep.subr.mxu1 %v2627_v26  ;;  %3547 = vmatpush1.msra.mxu0 %v2498_v34  ;;  %v2730_v26 = vld [vmem:[#allocation9 + $0x760] sm:$0xff]  ;;  %v2599_v34 = vld [vmem:[#allocation9 + $0x348] sm:$0xff] }
 0x294   :  { %3624 = vmatpush1.msra.mxu1 %v2626_v3  ;;  %3548 = vmatprep.subr.mxu0 %v2495_v54  ;;  %v2727_v3 = vld [vmem:[#allocation9 + $0x748] sm:$0xff]  ;;  %v2598_v54 = vld [vmem:[#allocation9 + $0x340] sm:$0xff] }
 0x295   :  { %3625 = vmatprep.subr.mxu1 %v2623_v44  ;;  %3549 = vmatpush1.msra.mxu0 %v2494_v48  ;;  %v2726_v44 = vld [vmem:[#allocation9 + $0x740] sm:$0xff]  ;;  %v2595_v48 = vld [vmem:[#allocation9 + $0x328] sm:$0xff] }
 0x296   :  { %3626 = vmatpush1.msra.mxu1 %v2622_v36  ;;  %3550 = vmatprep.subr.mxu0 %v2619_v16  ;;  %v2723_v36 = vld [vmem:[#allocation9 + $0x728] sm:$0xff]  ;;  %v5519_v16 = vpop.f32.mrf.mxu0 }
 0x297   :  { %3627 = vmatprep.subr.mxu1 %v2747_v58  ;;  %3551 = vmatpush2.msra.mxu0 %v2618_v39  ;;  %v2594_v58 = vld [vmem:[#allocation9 + $0x320] sm:$0xff] }
 0x298   :  { %3628 = vmatpush2.msra.mxu1 %v2746_v47  ;;  %3552 = vmatprep.subr.mxu0 %v2615_v50  ;;  %v2722_v39 = vld [vmem:[#allocation9 + $0x720] sm:$0xff]  ;;  %v2591_v47 = vld [vmem:[#allocation9 + $0x308] sm:$0xff] }
 0x299   :  { %3629 = vmatprep.subr.mxu1 %v2743_v43  ;;  %3553 = vmatpush2.msra.mxu0 %v2614_v51  ;;  %v2719_v50 = vld [vmem:[#allocation9 + $0x708] sm:$0xff]  ;;  %v2590_v43 = vld [vmem:[#allocation9 + $0x300] sm:$0xff] }
 0x29a   :  { %3630 = vmatpush2.msra.mxu1 %v2742_v53  ;;  %3554 = vmatprep.subr.mxu0 %v2611_v57  ;;  %v2718_v51 = vld [vmem:[#allocation9 + $0x700] sm:$0xff]  ;;  %v5523_v57 = vrot.slane %v5475_v45, %v5358_v0  ;;  %v2583_v45 = vld [vmem:[#allocation9 + $0x2c8] sm:$0xff] }
 0x29b   :  { %3631 = vmatprep.subr.mxu1 %v2739_v4  ;;  %3555 = vmatpush2.msra.mxu0 %v2610_v29  ;;  %v5525_v4 = vpop.f32.mrf.mxu1  ;;  %v2587_v29 = vld [vmem:[#allocation9 + $0x2e8] sm:$0xff] }
 0x29c   :  { %3632 = vmatpush2.msra.mxu1 %v2738_v12  ;;  %3556 = vmatprep.subr.mxu0 %v2607_v13  ;;  %v2715_v12 = vld [vmem:[#allocation9 + $0x6e8] sm:$0xff] }
 0x29d   :  { %3633 = vmatprep.subr.mxu1 %v2735_v20  ;;  %3557 = vmatpush2.msra.mxu0 %v2606_v21  ;;  %v5529_v20 = vsub.s32 2, %v5327_v55  ;;  %v2586_v21 = vld [vmem:[#allocation9 + $0x2e0] sm:$0xff] }
 0x29e   :  { %3634 = vmatpush2.msra.mxu1 %v2734_v10  ;;  %3558 = vmatprep.subr.mxu0 %v2603_v22  ;;  %v2714_v10 = vld [vmem:[#allocation9 + $0x6e0] sm:$0xff] }
 0x29f   :  { %3635 = vmatprep.subr.mxu1 %v2731_v60  ;;  %3559 = vmatpush2.msra.mxu0 %v2602_v14  ;;  %v2711_v60 = vld [vmem:[#allocation9 + $0x6c8] sm:$0xff] }
 0x2a0   :  { %3636 = vmatpush2.msra.mxu1 %v2730_v26  ;;  %3560 = vmatprep.subr.mxu0 %v2599_v34  ;;  %v2582_v34 = vld [vmem:[#allocation9 + $0x2c0] sm:$0xff] }
 0x2a1   :  { %3637 = vmatprep.subr.mxu1 %v2727_v3  ;;  %3561 = vmatpush2.msra.mxu0 %v2598_v54  ;;  %v2710_v3 = vld [vmem:[#allocation9 + $0x6c0] sm:$0xff]  ;;  %v2579_v54 = vld [vmem:[#allocation9 + $0x2a8] sm:$0xff] }
 0x2a2   :  { %3638 = vmatpush2.msra.mxu1 %v2726_v44  ;;  %3562 = vmatprep.subr.mxu0 %v2595_v48  ;;  %v2707_v44 = vld [vmem:[#allocation9 + $0x6a8] sm:$0xff] }
 0x2a3   :  { %3639 = vmatprep.subr.mxu1 %v2723_v36  ;;  %v1918_v53 = vpop.f32.mrf.mxu0  ;;  %3563 = vmatpush2.msra.mxu0 %v2594_v58  ;;  %v1161_v36 = vrot.slane %v5493_v28, %v5529_v20  ;;  %v2578_v58 = vld [vmem:[#allocation9 + $0x2a0] sm:$0xff] }
 0x2a4   :  { %3640 = vmatpush2.msra.mxu1 %v2722_v39  ;;  %v1919_v13 = vadd.f32 %v1918_v53, %v5483_v61  ;;  %3564 = vmatprep.subr.mxu0 %v2591_v47  ;;  %v2706_v39 = vld [vmem:[#allocation9 + $0x6a0] sm:$0xff] }
 0x2a5   :  { %3641 = vmatprep.subr.mxu1 %v2719_v50  ;;  %v1920_v22 = vpop.f32.mrf.mxu0  ;;  %3565 = vmatpush2.msra.mxu0 %v2590_v43  ;;  %v2575_v50 = vld [vmem:[#allocation9 + $0x288] sm:$0xff]  ;;  %v2702_v53 = vld [vmem:[#allocation9 + $0x680] sm:$0xff] }
 0x2a6   :  { %3642 = vmatpush2.msra.mxu1 %v2718_v51  ;;  %v1921_v14 = vadd.f32 %v1920_v22, %v5523_v57  ;;  %v1995_v26 = vpop.f32.mrf.mxu1  ;;  %3566 = vmatprep.subr.mxu0 %v2587_v29  ;;  %v2703_v43 = vld [vmem:[#allocation9 + $0x688] sm:$0xff]  ;;  %v2574_v51 = vld [vmem:[#allocation9 + $0x280] sm:$0xff]  ;;  %v1180_v22 = vsub.s32 7, %v5327_v55 }
 0x2a7   :  { %3643 = vmatprep.subr.mxu1 %v2715_v12  ;;  %v5532_v61 = vadd.f32 %v1995_v26, %v1919_v13  ;;  %3567 = vmatpush2.msra.mxu0 %v2586_v21  ;;  %v2571_v29 = vld [vmem:[#allocation9 + $0x268] sm:$0xff]  ;;  %v1451_v13 = vadd.f32 %v5390_v52, %v1161_v36  ;;  %v2570_v21 = vld [vmem:[#allocation9 + $0x260] sm:$0xff] }
 0x2a8   :  { %3644 = vmatpush2.msra.mxu1 %v2714_v10  ;;  %v1997_v48 = vpop.f32.mrf.mxu1  ;;  %3568 = vmatprep.subr.mxu0 %v2583_v45  ;;  %v2699_v12 = vld [vmem:[#allocation9 + $0x668] sm:$0xff]  ;;  %v2698_v10 = vld [vmem:[#allocation9 + $0x660] sm:$0xff] }
 0x2a9   :  { %3645 = vmatprep.subr.mxu1 %v2711_v60  ;;  %v5536_v47 = vadd.f32 %v1997_v48, %v1921_v14  ;;  %3569 = vmatpush2.msra.mxu0 %v2582_v34  ;;  %v2567_v45 = vld [vmem:[#allocation9 + $0x248] sm:$0xff]  ;;  %v1459_v14 = vadd.f32 %v5401_v63, %v5497_v62  ;;  %v2566_v26 = vld [vmem:[#allocation9 + $0x240] sm:$0xff] }
 0x2aa   :  { %3646 = vmatpush2.msra.mxu1 %v2710_v3  ;;  %3570 = vmatprep.subr.mxu0 %v2579_v54  ;;  %v2695_v60 = vld [vmem:[#allocation9 + $0x648] sm:$0xff]  ;;  %v2694_v34 = vld [vmem:[#allocation9 + $0x640] sm:$0xff]  ;;  %v5543_v54 = vadd.f32 %v5392_v59, %v1451_v13 }
 0x2ab   :  { %3647 = vmatprep.subr.mxu1 %v2707_v44  ;;  %3571 = vmatpush2.msra.mxu0 %v2578_v58  ;;  %v2563_v52 = vld [vmem:[#allocation9 + $0x228] sm:$0xff]  ;;  %v2562_v44 = vld [vmem:[#allocation9 + $0x220] sm:$0xff]  ;;  %v5548_v58 = vrot.slane %v5493_v28, %v1180_v22 }
 0x2ac   :  { %3648 = vmatpush2.msra.mxu1 %v2706_v39  ;;  %3572 = vmatprep.subr.mxu0 %v2575_v50  ;;  %v2691_v3 = vld [vmem:[#allocation9 + $0x628] sm:$0xff]  ;;  %v2690_v48 = vld [vmem:[#allocation9 + $0x620] sm:$0xff]  ;;  %v1457_v39 = vadd.f32 %v5396_v38, %v1161_v36  ;;  %v5552_v50 = vadd.f32 %v5412_v37, %v1459_v14  ;;  %v5894_v28 = vmax.f32 %v5543_v54, 0.0  ;;  %v5893_v36 = vmax.f32 %v5372_v25, 0.0 }
 0x2ad   :  { %3649 = vmatprep.subr.mxu1 %v2703_v43  ;;  %3573 = vmatpush2.msra.mxu0 %v2574_v51  ;;  %v2559_v63 = vld [vmem:[#allocation9 + $0x208] sm:$0xff]  ;;  %v2558_v59 = vld [vmem:[#allocation9 + $0x200] sm:$0xff]  ;;  %v5895_v51 = vmax.f32 %v5339_v5, 0.0  ;;  %v1761_v37 = vadd.f32 %v5469_v24, %v5548_v58  ;;  %v5891_v14 = vmax.f32 %v5370_v49, 0.0 }
 0x2ae   :  { %3650 = vmatpush2.msra.mxu1 %v2702_v53  ;;  %3574 = vmatprep.subr.mxu0 %v2571_v29  ;;  %v2687_v62 = vld [vmem:[#allocation9 + $0x608] sm:$0xff]  ;;  %v2686_v43 = vld [vmem:[#allocation9 + $0x600] sm:$0xff]  ;;  %v1607_v53 = vadd.f32 %v5434_v33, %v5439_v11  ;;  %v5892_v13 = vmax.f32 %v5552_v50, 0.0 }
 0x2af   :  { %3651 = vmatprep.subr.mxu1 %v2699_v12  ;;  %3575 = vmatpush2.msra.mxu0 %v2570_v21  ;;  %v2811_v29 = vld [vmem:[#allocation9 + $0x9e8] sm:$0xff]  ;;  %v5562_v12 = vadd.f32 %v5403_v1, %v1457_v39  ;;  %v2810_v33 = vld [vmem:[#allocation9 + $0x9e0] sm:$0xff] }
 0x2b0   :  { %3652 = vmatpush2.msra.mxu1 %v2698_v10  ;;  %3576 = vmatprep.subr.mxu0 %v2567_v45  ;;  %v2939_v38 = vld [vmem:[#allocation9 + $0xde8] sm:$0xff]  ;;  %v2938_v11 = vld [vmem:[#allocation9 + $0xde0] sm:$0xff]  ;;  %v5570_v10 = vadd.f32 %v5441_v46, %v1607_v53 }
 0x2b1   :  { %3653 = vmatprep.subr.mxu1 %v2695_v60  ;;  %3577 = vmatpush2.msra.mxu0 %v2566_v26  ;;  %v2807_v24 = vld [vmem:[#allocation9 + $0x9c8] sm:$0xff]  ;;  %v2806_v1 = vld [vmem:[#allocation9 + $0x9c0] sm:$0xff]  ;;  %v5577_v60 = vadd.f32 %v5473_v42, %v1761_v37  ;;  %v5890_v26 = vmax.f32 %v5562_v12, 0.0 }
 0x2b2   :  { %3654 = vmatpush2.msra.mxu1 %v2694_v34  ;;  %3578 = vmatprep.subr.mxu0 %v2563_v52  ;;  %v2935_v21 = vld [vmem:[#allocation9 + $0xdc8] sm:$0xff]  ;;  %v2934_v45 = vld [vmem:[#allocation9 + $0xdc0] sm:$0xff] }
 0x2b3   :  { %3655 = vmatprep.subr.mxu1 %v2691_v3  ;;  %3579 = vmatpush2.msra.mxu0 %v2562_v44  ;;  %v2803_v46 = vld [vmem:[#allocation9 + $0x9a8] sm:$0xff]  ;;  %v2802_v52 = vld [vmem:[#allocation9 + $0x9a0] sm:$0xff]  ;;  %v5889_v3 = vmax.f32 %v5570_v10, 0.0  ;;  %v5888_v44 = vmax.f32 %v5577_v60, 0.0 }
 0x2b4   :  { %3656 = vmatpush2.msra.mxu1 %v2690_v48  ;;  %3580 = vmatprep.subr.mxu0 %v2559_v63  ;;  %v2931_v34 = vld [vmem:[#allocation9 + $0xda8] sm:$0xff]  ;;  %v2930_v42 = vld [vmem:[#allocation9 + $0xda0] sm:$0xff] }
 0x2b5   :  { %3657 = vmatprep.subr.mxu1 %v2687_v62  ;;  %3581 = vmatpush2.msra.mxu0 %v2558_v59  ;;  %v2799_v48 = vld [vmem:[#allocation9 + $0x988] sm:$0xff]  ;;  %v2798_v62 = vld [vmem:[#allocation9 + $0x980] sm:$0xff] }
 0x2b6   :  { %3658 = vmatpush2.msra.mxu1 %v2686_v43  ;;  %3583 = vmatmul.mubr.f32.vlgmr.msra.gmra.mxu0 %v5895_v51  ;;  %v2927_v63 = vld [vmem:[#allocation9 + $0xd88] sm:$0xff]  ;;  %v2926_v39 = vld [vmem:[#allocation9 + $0xd80] sm:$0xff] }
 0x2b7   :  { %3660 = vmatmul.mubr.f32.vlgmr.msra.gmra.mxu1 %v5894_v28  ;;  %3672 = vmatprep.subr.mxu0 %v2811_v29  ;;  %v2795_v59 = vld [vmem:[#allocation9 + $0x968] sm:$0xff]  ;;  %v2794_v53 = vld [vmem:[#allocation9 + $0x960] sm:$0xff] }
 0x2b8   :  { %3749 = vmatprep.subr.mxu1 %v2939_v38  ;;  %3588 = vmatprep.mubr.f32.mxu0 %v5893_v36  ;;  %v2923_v43 = vld [vmem:[#allocation9 + $0xd68] sm:$0xff]  ;;  %v2922_v29 = vld [vmem:[#allocation9 + $0xd60] sm:$0xff] }
 0x2b9   :  { %3665 = vmatprep.mubr.f32.mxu1 %v5892_v13  ;;  %3673 = vmatpush1.msra.mxu0 %v2810_v33  ;;  %v2791_v38 = vld [vmem:[#allocation9 + $0x948] sm:$0xff]  ;;  %v2790_v33 = vld [vmem:[#allocation9 + $0x940] sm:$0xff] }
 0x2ba   :  { %3750 = vmatpush1.msra.mxu1 %v2938_v11  ;;  %3674 = vmatprep.subr.mxu0 %v2807_v24  ;;  %v2919_v37 = vld [vmem:[#allocation9 + $0xd48] sm:$0xff]  ;;  %v2918_v11 = vld [vmem:[#allocation9 + $0xd40] sm:$0xff] }
 0x2bb   :  { %3751 = vmatprep.subr.mxu1 %v2935_v21  ;;  %3675 = vmatpush1.msra.mxu0 %v2806_v1  ;;  %v2787_v24 = vld [vmem:[#allocation9 + $0x928] sm:$0xff]  ;;  %v2786_v1 = vld [vmem:[#allocation9 + $0x920] sm:$0xff] }
 0x2bc   :  { %3752 = vmatpush1.msra.mxu1 %v2934_v45  ;;  %3589 = vmatmul.mubr.f32.gmra.mxu0 %v5891_v14  ;;  %v2915_v21 = vld [vmem:[#allocation9 + $0xd28] sm:$0xff]  ;;  %v2914_v45 = vld [vmem:[#allocation9 + $0xd20] sm:$0xff] }
 0x2bd   :  { %3666 = vmatmul.mubr.f32.gmra.mxu1 %v5890_v26  ;;  %3676 = vmatprep.subr.mxu0 %v2803_v46  ;;  %v2783_v46 = vld [vmem:[#allocation9 + $0x908] sm:$0xff]  ;;  %v2962_v26 = vld [vmem:[#allocation9 + $0xea0] sm:$0xff] }
 0x2be   :  { %3753 = vmatprep.subr.mxu1 %v2931_v34  ;;  %3677 = vmatpush1.msra.mxu0 %v2802_v52  ;;  %v2911_v34 = vld [vmem:[#allocation9 + $0xd08] sm:$0xff]  ;;  %v2782_v52 = vld [vmem:[#allocation9 + $0x900] sm:$0xff] }
 0x2bf   :  { %3736 = vmatprep.mubr.f32.mxu0 %v5889_v3  ;;  %3754 = vmatpush1.msra.mxu1 %v2930_v42  ;;  %v2910_v42 = vld [vmem:[#allocation9 + $0xd00] sm:$0xff]  ;;  %v5024_v3 = vld [vmem:[#allocation8] sm:$0xff]  ;;  %v2831_v14 = vld [vmem:[#allocation9 + $0xa88] sm:$0xff] }
 0x2c0   :  { %3813 = vmatprep.mubr.f32.mxu1 %v5888_v44  ;;  %3678 = vmatprep.subr.mxu0 %v2799_v48  ;;  %v2779_v48 = vld [vmem:[#allocation9 + $0x8e8] sm:$0xff]  ;;  %v5606_v44 = vld [vmem:[#allocation8 + $0x8] sm:$0xff] }
 0x2c1   :  { %3755 = vmatprep.subr.mxu1 %v2927_v63  ;;  %3679 = vmatpush1.msra.mxu0 %v2798_v62  ;;  %v2907_v63 = vld [vmem:[#allocation9 + $0xce8] sm:$0xff]  ;;  %v2778_v62 = vld [vmem:[#allocation9 + $0x8e0] sm:$0xff] }
 0x2c2   :  { %3756 = vmatpush1.msra.mxu1 %v2926_v39  ;;  %3680 = vmatprep.subr.mxu0 %v2795_v59  ;;  %v2906_v39 = vld [vmem:[#allocation9 + $0xce0] sm:$0xff]  ;;  %v2775_v59 = vld [vmem:[#allocation9 + $0x8c8] sm:$0xff] }
 0x2c3   :  { %3757 = vmatprep.subr.mxu1 %v2923_v43  ;;  %3681 = vmatpush1.msra.mxu0 %v2794_v53  ;;  %v2903_v43 = vld [vmem:[#allocation9 + $0xcc8] sm:$0xff]  ;;  %v2774_v53 = vld [vmem:[#allocation9 + $0x8c0] sm:$0xff] }
 0x2c4   :  { %3758 = vmatpush1.msra.mxu1 %v2922_v29  ;;  %3682 = vmatprep.subr.mxu0 %v2791_v38  ;;  %v2902_v29 = vld [vmem:[#allocation9 + $0xcc0] sm:$0xff]  ;;  %v2771_v38 = vld [vmem:[#allocation9 + $0x8a8] sm:$0xff] }
 0x2c5   :  { %3759 = vmatprep.subr.mxu1 %v2919_v37  ;;  %3683 = vmatpush1.msra.mxu0 %v2790_v33  ;;  %v2899_v37 = vld [vmem:[#allocation9 + $0xca8] sm:$0xff]  ;;  %v2770_v33 = vld [vmem:[#allocation9 + $0x8a0] sm:$0xff] }
 0x2c6   :  { %3760 = vmatpush1.msra.mxu1 %v2918_v11  ;;  %3684 = vmatprep.subr.mxu0 %v2787_v24  ;;  %v2898_v11 = vld [vmem:[#allocation9 + $0xca0] sm:$0xff]  ;;  %v2767_v24 = vld [vmem:[#allocation9 + $0x888] sm:$0xff] }
 0x2c7   :  { %3761 = vmatprep.subr.mxu1 %v2915_v21  ;;  %3685 = vmatpush1.msra.mxu0 %v2786_v1  ;;  %v2895_v21 = vld [vmem:[#allocation9 + $0xc88] sm:$0xff]  ;;  %v2766_v1 = vld [vmem:[#allocation9 + $0x880] sm:$0xff] }
 0x2c8   :  { %3762 = vmatpush1.msra.mxu1 %v2914_v45  ;;  %3686 = vmatprep.subr.mxu0 %v2783_v46  ;;  %v2894_v45 = vld [vmem:[#allocation9 + $0xc80] sm:$0xff]  ;;  %v2763_v46 = vld [vmem:[#allocation9 + $0x868] sm:$0xff] }
 0x2c9   :  { %3763 = vmatprep.subr.mxu1 %v2911_v34  ;;  %3687 = vmatpush1.msra.mxu0 %v2782_v52  ;;  %v2891_v34 = vld [vmem:[#allocation9 + $0xc68] sm:$0xff]  ;;  %v2762_v52 = vld [vmem:[#allocation9 + $0x860] sm:$0xff] }
 0x2ca   :  { %3764 = vmatpush1.msra.mxu1 %v2910_v42  ;;  %3688 = vmatprep.subr.mxu0 %v2779_v48  ;;  %v2890_v42 = vld [vmem:[#allocation9 + $0xc60] sm:$0xff]  ;;  %v2759_v48 = vld [vmem:[#allocation9 + $0x848] sm:$0xff] }
 0x2cb   :  { %3765 = vmatprep.subr.mxu1 %v2907_v63  ;;  %3689 = vmatpush1.msra.mxu0 %v2778_v62  ;;  %v2887_v63 = vld [vmem:[#allocation9 + $0xc48] sm:$0xff]  ;;  %v2758_v62 = vld [vmem:[#allocation9 + $0x840] sm:$0xff] }
 0x2cc   :  { %3766 = vmatpush1.msra.mxu1 %v2906_v39  ;;  %3690 = vmatprep.subr.mxu0 %v2775_v59  ;;  %v2886_v39 = vld [vmem:[#allocation9 + $0xc40] sm:$0xff]  ;;  %v2755_v59 = vld [vmem:[#allocation9 + $0x828] sm:$0xff] }
 0x2cd   :  { %3767 = vmatprep.subr.mxu1 %v2903_v43  ;;  %3691 = vmatpush1.msra.mxu0 %v2774_v53  ;;  %v2883_v43 = vld [vmem:[#allocation9 + $0xc28] sm:$0xff]  ;;  %v2754_v53 = vld [vmem:[#allocation9 + $0x820] sm:$0xff] }
 0x2ce   :  { %3768 = vmatpush1.msra.mxu1 %v2902_v29  ;;  %3692 = vmatprep.subr.mxu0 %v2771_v38  ;;  %v2882_v29 = vld [vmem:[#allocation9 + $0xc20] sm:$0xff]  ;;  %v2751_v38 = vld [vmem:[#allocation9 + $0x808] sm:$0xff] }
 0x2cf   :  { %3769 = vmatprep.subr.mxu1 %v2899_v37  ;;  %3693 = vmatpush1.msra.mxu0 %v2770_v33  ;;  %v2879_v37 = vld [vmem:[#allocation9 + $0xc08] sm:$0xff]  ;;  %v2750_v33 = vld [vmem:[#allocation9 + $0x800] sm:$0xff] }
 0x2d0   :  { %3770 = vmatpush1.msra.mxu1 %v2898_v11  ;;  %3694 = vmatprep.subr.mxu0 %v2767_v24  ;;  %v2878_v11 = vld [vmem:[#allocation9 + $0xc00] sm:$0xff]  ;;  %v2875_v24 = vld [vmem:[#allocation9 + $0xbe8] sm:$0xff] }
 0x2d1   :  { %3771 = vmatprep.subr.mxu1 %v2895_v21  ;;  %3695 = vmatpush1.msra.mxu0 %v2766_v1  ;;  %v3003_v21 = vld [vmem:[#allocation9 + $0xfe8] sm:$0xff]  ;;  %v2874_v1 = vld [vmem:[#allocation9 + $0xbe0] sm:$0xff] }
 0x2d2   :  { %3772 = vmatpush1.msra.mxu1 %v2894_v45  ;;  %3696 = vmatprep.subr.mxu0 %v2763_v46  ;;  %v3002_v45 = vld [vmem:[#allocation9 + $0xfe0] sm:$0xff]  ;;  %v2871_v46 = vld [vmem:[#allocation9 + $0xbc8] sm:$0xff] }
 0x2d3   :  { %3773 = vmatprep.subr.mxu1 %v2891_v34  ;;  %3697 = vmatpush1.msra.mxu0 %v2762_v52  ;;  %v2999_v34 = vld [vmem:[#allocation9 + $0xfc8] sm:$0xff]  ;;  %v2870_v52 = vld [vmem:[#allocation9 + $0xbc0] sm:$0xff] }
 0x2d4   :  { %3774 = vmatpush1.msra.mxu1 %v2890_v42  ;;  %3698 = vmatprep.subr.mxu0 %v2759_v48  ;;  %v2998_v42 = vld [vmem:[#allocation9 + $0xfc0] sm:$0xff]  ;;  %v2867_v48 = vld [vmem:[#allocation9 + $0xba8] sm:$0xff] }
 0x2d5   :  { %3775 = vmatprep.subr.mxu1 %v2887_v63  ;;  %3699 = vmatpush1.msra.mxu0 %v2758_v62  ;;  %v2995_v63 = vld [vmem:[#allocation9 + $0xfa8] sm:$0xff]  ;;  %v2866_v62 = vld [vmem:[#allocation9 + $0xba0] sm:$0xff] }
 0x2d6   :  { %3776 = vmatpush1.msra.mxu1 %v2886_v39  ;;  %3700 = vmatprep.subr.mxu0 %v2755_v59  ;;  %v2994_v39 = vld [vmem:[#allocation9 + $0xfa0] sm:$0xff]  ;;  %v2863_v59 = vld [vmem:[#allocation9 + $0xb88] sm:$0xff] }
 0x2d7   :  { %3777 = vmatprep.subr.mxu1 %v2883_v43  ;;  %3701 = vmatpush1.msra.mxu0 %v2754_v53  ;;  %v2991_v43 = vld [vmem:[#allocation9 + $0xf88] sm:$0xff]  ;;  %v2862_v53 = vld [vmem:[#allocation9 + $0xb80] sm:$0xff] }
 0x2d8   :  { %3778 = vmatpush1.msra.mxu1 %v2882_v29  ;;  %3702 = vmatprep.subr.mxu0 %v2751_v38  ;;  %v2990_v29 = vld [vmem:[#allocation9 + $0xf80] sm:$0xff]  ;;  %v2859_v38 = vld [vmem:[#allocation9 + $0xb68] sm:$0xff] }
 0x2d9   :  { %3779 = vmatprep.subr.mxu1 %v2879_v37  ;;  %3703 = vmatpush1.msra.mxu0 %v2750_v33  ;;  %v2987_v37 = vld [vmem:[#allocation9 + $0xf68] sm:$0xff]  ;;  %v5591_v33 = vpop.f32.mrf.mxu0 }
 0x2da   :  { %3780 = vmatpush1.msra.mxu1 %v2878_v11  ;;  %3704 = vmatprep.subr.mxu0 %v2875_v24  ;;  %v2858_v11 = vld [vmem:[#allocation9 + $0xb60] sm:$0xff]  ;;  %v2959_v13 = vld [vmem:[#allocation9 + $0xe88] sm:$0xff] }
 0x2db   :  { %3781 = vmatprep.subr.mxu1 %v3003_v21  ;;  %3705 = vmatpush2.msra.mxu0 %v2874_v1  ;;  %v2986_v24 = vld [vmem:[#allocation9 + $0xf60] sm:$0xff]  ;;  %v2855_v21 = vld [vmem:[#allocation9 + $0xb48] sm:$0xff] }
 0x2dc   :  { %3782 = vmatpush2.msra.mxu1 %v3002_v45  ;;  %3706 = vmatprep.subr.mxu0 %v2871_v46  ;;  %v2983_v1 = vld [vmem:[#allocation9 + $0xf48] sm:$0xff]  ;;  %v2854_v45 = vld [vmem:[#allocation9 + $0xb40] sm:$0xff] }
 0x2dd   :  { %3783 = vmatprep.subr.mxu1 %v2999_v34  ;;  %3707 = vmatpush2.msra.mxu0 %v2870_v52  ;;  %v2982_v46 = vld [vmem:[#allocation9 + $0xf40] sm:$0xff]  ;;  %v5593_v34 = vpop.f32.mrf.mxu1  ;;  %v2851_v52 = vld [vmem:[#allocation9 + $0xb28] sm:$0xff] }
 0x2de   :  { %3784 = vmatpush2.msra.mxu1 %v2998_v42  ;;  %3708 = vmatprep.subr.mxu0 %v2867_v48  ;;  %v2979_v42 = vld [vmem:[#allocation9 + $0xf28] sm:$0xff]  ;;  %v5595_v48 = vpop.f32.mrf.mxu0 }
 0x2df   :  { %3785 = vmatprep.subr.mxu1 %v2995_v63  ;;  %3709 = vmatpush2.msra.mxu0 %v2866_v62  ;;  %v2850_v63 = vld [vmem:[#allocation9 + $0xb20] sm:$0xff]  ;;  %v2827_v28 = vld [vmem:[#allocation9 + $0xa68] sm:$0xff] }
 0x2e0   :  { %3786 = vmatpush2.msra.mxu1 %v2994_v39  ;;  %3710 = vmatprep.subr.mxu0 %v2863_v59  ;;  %v2978_v62 = vld [vmem:[#allocation9 + $0xf20] sm:$0xff]  ;;  %v2847_v39 = vld [vmem:[#allocation9 + $0xb08] sm:$0xff] }
 0x2e1   :  { %3787 = vmatprep.subr.mxu1 %v2991_v43  ;;  %3711 = vmatpush2.msra.mxu0 %v2862_v53  ;;  %v2975_v59 = vld [vmem:[#allocation9 + $0xf08] sm:$0xff]  ;;  %v2846_v43 = vld [vmem:[#allocation9 + $0xb00] sm:$0xff] }
 0x2e2   :  { %3788 = vmatpush2.msra.mxu1 %v2990_v29  ;;  %3712 = vmatprep.subr.mxu0 %v2859_v38  ;;  %v2974_v53 = vld [vmem:[#allocation9 + $0xf00] sm:$0xff]  ;;  %v5599_v38 = vpop.f32.mrf.mxu1  ;;  %v2955_v51 = vld [vmem:[#allocation9 + $0xe68] sm:$0xff] }
 0x2e3   :  { %3789 = vmatprep.subr.mxu1 %v2987_v37  ;;  %3713 = vmatpush2.msra.mxu0 %v2858_v11  ;;  %v2843_v37 = vld [vmem:[#allocation9 + $0xae8] sm:$0xff] }
 0x2e4   :  { %3790 = vmatpush2.msra.mxu1 %v2986_v24  ;;  %3714 = vmatprep.subr.mxu0 %v2855_v21  ;;  %v2971_v11 = vld [vmem:[#allocation9 + $0xee8] sm:$0xff]  ;;  %v1176_v24 = vsub.s32 6, %v5327_v55  ;;  %v2842_v21 = vld [vmem:[#allocation9 + $0xae0] sm:$0xff] }
 0x2e5   :  { %3791 = vmatprep.subr.mxu1 %v2983_v1  ;;  %3715 = vmatpush2.msra.mxu0 %v2854_v45  ;;  %v2970_v1 = vld [vmem:[#allocation9 + $0xee0] sm:$0xff]  ;;  %v2839_v45 = vld [vmem:[#allocation9 + $0xac8] sm:$0xff] }
 0x2e6   :  { %3792 = vmatpush2.msra.mxu1 %v2982_v46  ;;  %3716 = vmatprep.subr.mxu0 %v2851_v52  ;;  %v2967_v46 = vld [vmem:[#allocation9 + $0xec8] sm:$0xff] }
 0x2e7   :  { %3793 = vmatprep.subr.mxu1 %v2979_v42  ;;  %v5597_v29 = vpop.f32.mrf.mxu0  ;;  %3717 = vmatpush2.msra.mxu0 %v2850_v63  ;;  %v2838_v63 = vld [vmem:[#allocation9 + $0xac0] sm:$0xff] }
 0x2e8   :  { %3794 = vmatpush2.msra.mxu1 %v2978_v62  ;;  %3718 = vmatprep.subr.mxu0 %v2847_v39  ;;  %v2966_v62 = vld [vmem:[#allocation9 + $0xec0] sm:$0xff]  ;;  %v5611_v39 = vrot.slane %v5606_v44, %v1168_v15 }
 0x2e9   :  { %3795 = vmatprep.subr.mxu1 %v2975_v59  ;;  %3719 = vmatpush2.msra.mxu0 %v2846_v43  ;;  %v5602_v52 = vpop.f32.mrf.mxu0  ;;  %v2835_v59 = vld [vmem:[#allocation9 + $0xaa8] sm:$0xff] }
 0x2ea   :  { %3796 = vmatpush2.msra.mxu1 %v2974_v53  ;;  %v5604_v42 = vpop.f32.mrf.mxu1  ;;  %3720 = vmatprep.subr.mxu0 %v2843_v37  ;;  %v2963_v43 = vld [vmem:[#allocation9 + $0xea8] sm:$0xff]  ;;  %v1177_v37 = vrot.slane %v5024_v3, %v1176_v24 }
 0x2eb   :  { %3797 = vmatprep.subr.mxu1 %v2971_v11  ;;  %3721 = vmatpush2.msra.mxu0 %v2842_v21  ;;  %v2834_v11 = vld [vmem:[#allocation9 + $0xaa0] sm:$0xff] }
 0x2ec   :  { %3798 = vmatpush2.msra.mxu1 %v2970_v1  ;;  %v5613_v53 = vpop.f32.mrf.mxu1  ;;  %3722 = vmatprep.subr.mxu0 %v2839_v45  ;;  %v2830_v21 = vld [vmem:[#allocation9 + $0xa80] sm:$0xff]  ;;  %v1759_v45 = vadd.f32 %v5465_v31, %v1177_v37  ;;  %v2819_v31 = vld [vmem:[#allocation9 + $0xa28] sm:$0xff] }
 0x2ed   :  { %3799 = vmatprep.subr.mxu1 %v2967_v46  ;;  %3723 = vmatpush2.msra.mxu0 %v2838_v63  ;;  %v2958_v1 = vld [vmem:[#allocation9 + $0xe80] sm:$0xff] }
 0x2ee   :  { %3800 = vmatpush2.msra.mxu1 %v2966_v62  ;;  %v2220_v15 = vpop.f32.mrf.mxu0  ;;  %3724 = vmatprep.subr.mxu0 %v2835_v59  ;;  %v2826_v46 = vld [vmem:[#allocation9 + $0xa60] sm:$0xff]  ;;  %v2823_v59 = vld [vmem:[#allocation9 + $0xa48] sm:$0xff] }
 0x2ef   :  { %3801 = vmatprep.subr.mxu1 %v2963_v43  ;;  %v2221_v36 = vadd.f32 %v2220_v15, %v5611_v39  ;;  %3725 = vmatpush2.msra.mxu0 %v2834_v11  ;;  %v2954_v63 = vld [vmem:[#allocation9 + $0xe60] sm:$0xff]  ;;  %v2951_v43 = vld [vmem:[#allocation9 + $0xe48] sm:$0xff]  ;;  %v1767_v15 = vadd.f32 %v5477_v2, %v5548_v58 }
 0x2f0   :  { %3802 = vmatpush2.msra.mxu1 %v2962_v26  ;;  %v2297_v3 = vpop.f32.mrf.mxu1  ;;  %3726 = vmatprep.subr.mxu0 %v2831_v14  ;;  %v2822_v26 = vld [vmem:[#allocation9 + $0xa40] sm:$0xff]  ;;  %v2947_v14 = vld [vmem:[#allocation9 + $0xe28] sm:$0xff] }
 0x2f1   :  { %3803 = vmatprep.subr.mxu1 %v2959_v13  ;;  %v5619_v62 = vadd.f32 %v2297_v3, %v2221_v36  ;;  %3727 = vmatpush2.msra.mxu0 %v2830_v21  ;;  %v2950_v11 = vld [vmem:[#allocation9 + $0xe40] sm:$0xff]  ;;  %v5624_v13 = vadd.f32 %v5467_v35, %v1759_v45  ;;  %v2815_v2 = vld [vmem:[#allocation9 + $0xa08] sm:$0xff]  ;;  %v2466_v45 = vmax.f32 %v5415_v18, 0.0  ;;  %v3061_v18 = vld [vmem:[#allocation9 + $0x11b8] sm:$0xff] }
 0x2f2   :  { %3804 = vmatpush2.msra.mxu1 %v2958_v1  ;;  %3728 = vmatprep.subr.mxu0 %v2827_v28  ;;  %v2818_v36 = vld [vmem:[#allocation9 + $0xa20] sm:$0xff]  ;;  %v5628_v1 = vrot.slane %v5606_v44, %v5491_v32  ;;  %v2943_v58 = vld [vmem:[#allocation9 + $0xe08] sm:$0xff]  ;;  %v5632_v28 = vadd.f32 %v5485_v30, %v1767_v15 }
 0x2f3   :  { %3805 = vmatprep.subr.mxu1 %v2955_v51  ;;  %3729 = vmatpush2.msra.mxu0 %v2826_v46  ;;  %v2946_v21 = vld [vmem:[#allocation9 + $0xe20] sm:$0xff]  ;;  %v1765_v51 = vadd.f32 %v5471_v6, %v1177_v37  ;;  %v2468_v46 = vmax.f32 %v5624_v13, 0.0  ;;  %v3195_v6 = vld [vmem:[#allocation9 + $0x15e8] sm:$0xff]  ;;  %v2483_v37 = vmax.f32 %v5447_v19, 0.0  ;;  %v3189_v13 = vld [vmem:[#allocation9 + $0x15b8] sm:$0xff] }
 0x2f4   :  { %3806 = vmatpush2.msra.mxu1 %v2954_v63  ;;  %3730 = vmatprep.subr.mxu0 %v2823_v59  ;;  %v2814_v35 = vld [vmem:[#allocation9 + $0xa00] sm:$0xff]  ;;  %v1915_v63 = vadd.f32 %v5519_v16, %v5523_v57  ;;  %v3067_v59 = vld [vmem:[#allocation9 + $0x11e8] sm:$0xff]  ;;  %v2069_v30 = vadd.f32 %v5595_v48, %v5628_v1  ;;  %v5900_v15 = vmax.f32 %v5632_v28, 0.0 }
 0x2f5   :  { %3807 = vmatprep.subr.mxu1 %v2951_v43  ;;  %3731 = vmatpush2.msra.mxu0 %v2822_v26  ;;  %v2942_v3 = vld [vmem:[#allocation9 + $0xe00] sm:$0xff]  ;;  %v5642_v43 = vadd.f32 %v5479_v56, %v1765_v51  ;;  %v3063_v48 = vld [vmem:[#allocation9 + $0x11c8] sm:$0xff] }
 0x2f6   :  { %3808 = vmatpush2.msra.mxu1 %v2950_v11  ;;  %3732 = vmatprep.subr.mxu0 %v2819_v31  ;;  %v3066_v16 = vld [vmem:[#allocation9 + $0x11e0] sm:$0xff]  ;;  %v3191_v26 = vld [vmem:[#allocation9 + $0x15c8] sm:$0xff]  ;;  %v5650_v11 = vadd.f32 %v5525_v4, %v1915_v63 }
 0x2f7   :  { %3809 = vmatprep.subr.mxu1 %v2947_v14  ;;  %3733 = vmatpush2.msra.mxu0 %v2818_v36  ;;  %v3194_v57 = vld [vmem:[#allocation9 + $0x15e0] sm:$0xff]  ;;  %v5657_v14 = vadd.f32 %v5599_v38, %v2069_v30  ;;  %v5899_v36 = vmax.f32 %v5445_v8, 0.0  ;;  %v3059_v4 = vld [vmem:[#allocation9 + $0x11a8] sm:$0xff]  ;;  %v5922_v19 = vmax.f32 %v5642_v43, 0.0 }
 0x2f8   :  { %3810 = vmatpush2.msra.mxu1 %v2946_v21  ;;  %3734 = vmatprep.subr.mxu0 %v2815_v2  ;;  %v3062_v56 = vld [vmem:[#allocation9 + $0x11c0] sm:$0xff]  ;;  %v5898_v21 = vmax.f32 %v5642_v43, 0.0  ;;  %v3187_v2 = vld [vmem:[#allocation9 + $0x15a8] sm:$0xff]  ;;  %v5897_v51 = vmax.f32 %v5650_v11, 0.0  ;;  %v3052_v43 = vld [vmem:[#allocation9 + $0x1170] sm:$0xff] }
 0x2f9   :  { %3811 = vmatprep.subr.mxu1 %v2943_v58  ;;  %3735 = vmatpush2.msra.mxu0 %v2814_v35  ;;  %v3190_v31 = vld [vmem:[#allocation9 + $0x15c0] sm:$0xff]  ;;  %v5896_v35 = vmax.f32 %v5657_v14, 0.0  ;;  %v3183_v63 = vld [vmem:[#allocation9 + $0x1588] sm:$0xff] }
 0x2fa   :  { %3812 = vmatpush2.msra.mxu1 %v2942_v3  ;;  %3737 = vmatmul.mubr.f32.vlgmr.msra.gmra.mxu0 %v2466_v45  ;;  %v3058_v58 = vld [vmem:[#allocation9 + $0x11a0] sm:$0xff]  ;;  %v3055_v3 = vld [vmem:[#allocation9 + $0x1188] sm:$0xff] }
 0x2fb   :  { %3814 = vmatmul.mubr.f32.vlgmr.msra.gmra.mxu1 %v2468_v46  ;;  %3826 = vmatprep.subr.mxu0 %v3067_v59  ;;  %v3186_v38 = vld [vmem:[#allocation9 + $0x15a0] sm:$0xff]  ;;  %v3051_v30 = vld [vmem:[#allocation9 + $0x1168] sm:$0xff] }
 0x2fc   :  { %3903 = vmatprep.subr.mxu1 %v3195_v6  ;;  %3742 = vmatprep.mubr.f32.mxu0 %v2483_v37  ;;  %v3054_v59 = vld [vmem:[#allocation9 + $0x1180] sm:$0xff] }
 0x2fd   :  { %3819 = vmatprep.mubr.f32.mxu1 %v5900_v15  ;;  %3827 = vmatpush1.msra.mxu0 %v3066_v16  ;;  %v3182_v6 = vld [vmem:[#allocation9 + $0x1580] sm:$0xff]  ;;  %v3179_v16 = vld [vmem:[#allocation9 + $0x1568] sm:$0xff] }
 0x2fe   :  { %3904 = vmatpush1.msra.mxu1 %v3194_v57  ;;  %3828 = vmatprep.subr.mxu0 %v3063_v48  ;;  %v3050_v57 = vld [vmem:[#allocation9 + $0x1160] sm:$0xff] }
 0x2ff   :  { %3905 = vmatprep.subr.mxu1 %v3191_v26  ;;  %3829 = vmatpush1.msra.mxu0 %v3062_v56  ;;  %v3178_v48 = vld [vmem:[#allocation9 + $0x1560] sm:$0xff]  ;;  %v3047_v26 = vld [vmem:[#allocation9 + $0x1148] sm:$0xff] }
 0x300   :  { %3906 = vmatpush1.msra.mxu1 %v3190_v31  ;;  %3743 = vmatmul.mubr.f32.gmra.mxu0 %v5899_v36  ;;  %v3175_v56 = vld [vmem:[#allocation9 + $0x1548] sm:$0xff]  ;;  %v3046_v31 = vld [vmem:[#allocation9 + $0x1140] sm:$0xff] }
 0x301   :  { %3820 = vmatmul.mubr.f32.gmra.mxu1 %v5898_v21  ;;  %3830 = vmatprep.subr.mxu0 %v3059_v4  ;;  %v3174_v4 = vld [vmem:[#allocation9 + $0x1540] sm:$0xff] }
 0x302   :  { %3907 = vmatprep.subr.mxu1 %v3187_v2  ;;  %3831 = vmatpush1.msra.mxu0 %v3058_v58  ;;  %v3043_v2 = vld [vmem:[#allocation9 + $0x1128] sm:$0xff]  ;;  %v3094_v21 = vld [vmem:[#allocation9 + $0x12c0] sm:$0xff] }
 0x303   :  { %3890 = vmatprep.mubr.f32.mxu0 %v5897_v51  ;;  %3908 = vmatpush1.msra.mxu1 %v3186_v38  ;;  %v3171_v58 = vld [vmem:[#allocation9 + $0x1528] sm:$0xff]  ;;  %v3042_v38 = vld [vmem:[#allocation9 + $0x1120] sm:$0xff]  ;;  %v5673_v51 = vpop.f32.mrf.mxu1 }
 0x304   :  { %3967 = vmatprep.mubr.f32.mxu1 %v5896_v35  ;;  %3832 = vmatprep.subr.mxu0 %v3055_v3  ;;  %v3170_v35 = vld [vmem:[#allocation9 + $0x1520] sm:$0xff]  ;;  %v3039_v3 = vld [vmem:[#allocation9 + $0x1108] sm:$0xff] }
 0x305   :  { %3909 = vmatprep.subr.mxu1 %v3183_v63  ;;  %3833 = vmatpush1.msra.mxu0 %v3054_v59  ;;  %v3167_v63 = vld [vmem:[#allocation9 + $0x1508] sm:$0xff]  ;;  %v3038_v59 = vld [vmem:[#allocation9 + $0x1100] sm:$0xff] }
 0x306   :  { %3910 = vmatpush1.msra.mxu1 %v3182_v6  ;;  %3834 = vmatprep.subr.mxu0 %v3051_v30  ;;  %v3166_v6 = vld [vmem:[#allocation9 + $0x1500] sm:$0xff]  ;;  %v3035_v30 = vld [vmem:[#allocation9 + $0x10e8] sm:$0xff] }
 0x307   :  { %3911 = vmatprep.subr.mxu1 %v3179_v16  ;;  %3835 = vmatpush1.msra.mxu0 %v3050_v57  ;;  %v3163_v16 = vld [vmem:[#allocation9 + $0x14e8] sm:$0xff]  ;;  %v3034_v57 = vld [vmem:[#allocation9 + $0x10e0] sm:$0xff] }
 0x308   :  { %3912 = vmatpush1.msra.mxu1 %v3178_v48  ;;  %3836 = vmatprep.subr.mxu0 %v3047_v26  ;;  %v3162_v48 = vld [vmem:[#allocation9 + $0x14e0] sm:$0xff]  ;;  %v3031_v26 = vld [vmem:[#allocation9 + $0x10c8] sm:$0xff] }
 0x309   :  { %3913 = vmatprep.subr.mxu1 %v3175_v56  ;;  %3837 = vmatpush1.msra.mxu0 %v3046_v31  ;;  %v3159_v56 = vld [vmem:[#allocation9 + $0x14c8] sm:$0xff]  ;;  %v3030_v31 = vld [vmem:[#allocation9 + $0x10c0] sm:$0xff] }
 0x30a   :  { %3914 = vmatpush1.msra.mxu1 %v3174_v4  ;;  %3838 = vmatprep.subr.mxu0 %v3043_v2  ;;  %v3158_v4 = vld [vmem:[#allocation9 + $0x14c0] sm:$0xff]  ;;  %v3027_v2 = vld [vmem:[#allocation9 + $0x10a8] sm:$0xff] }
 0x30b   :  { %3915 = vmatprep.subr.mxu1 %v3171_v58  ;;  %3839 = vmatpush1.msra.mxu0 %v3042_v38  ;;  %v3155_v58 = vld [vmem:[#allocation9 + $0x14a8] sm:$0xff]  ;;  %v3154_v38 = vld [vmem:[#allocation9 + $0x14a0] sm:$0xff] }
 0x30c   :  { %3916 = vmatpush1.msra.mxu1 %v3170_v35  ;;  %3840 = vmatprep.subr.mxu0 %v3039_v3  ;;  %v3026_v35 = vld [vmem:[#allocation9 + $0x10a0] sm:$0xff]  ;;  %v3023_v3 = vld [vmem:[#allocation9 + $0x1088] sm:$0xff] }
 0x30d   :  { %3917 = vmatprep.subr.mxu1 %v3167_v63  ;;  %3841 = vmatpush1.msra.mxu0 %v3038_v59  ;;  %v3151_v63 = vld [vmem:[#allocation9 + $0x1488] sm:$0xff]  ;;  %v3022_v59 = vld [vmem:[#allocation9 + $0x1080] sm:$0xff] }
 0x30e   :  { %3918 = vmatpush1.msra.mxu1 %v3166_v6  ;;  %3842 = vmatprep.subr.mxu0 %v3035_v30  ;;  %v3150_v6 = vld [vmem:[#allocation9 + $0x1480] sm:$0xff]  ;;  %v3019_v30 = vld [vmem:[#allocation9 + $0x1068] sm:$0xff] }
 0x30f   :  { %3919 = vmatprep.subr.mxu1 %v3163_v16  ;;  %3843 = vmatpush1.msra.mxu0 %v3034_v57  ;;  %v3147_v16 = vld [vmem:[#allocation9 + $0x1468] sm:$0xff]  ;;  %v3018_v57 = vld [vmem:[#allocation9 + $0x1060] sm:$0xff] }
 0x310   :  { %3920 = vmatpush1.msra.mxu1 %v3162_v48  ;;  %3844 = vmatprep.subr.mxu0 %v3031_v26  ;;  %v3146_v48 = vld [vmem:[#allocation9 + $0x1460] sm:$0xff]  ;;  %v3015_v26 = vld [vmem:[#allocation9 + $0x1048] sm:$0xff] }
 0x311   :  { %3921 = vmatprep.subr.mxu1 %v3159_v56  ;;  %3845 = vmatpush1.msra.mxu0 %v3030_v31  ;;  %v3143_v56 = vld [vmem:[#allocation9 + $0x1448] sm:$0xff]  ;;  %v3014_v31 = vld [vmem:[#allocation9 + $0x1040] sm:$0xff] }
 0x312   :  { %3922 = vmatpush1.msra.mxu1 %v3158_v4  ;;  %3846 = vmatprep.subr.mxu0 %v3027_v2  ;;  %v3142_v4 = vld [vmem:[#allocation9 + $0x1440] sm:$0xff]  ;;  %v3011_v2 = vld [vmem:[#allocation9 + $0x1028] sm:$0xff] }
 0x313   :  { %3923 = vmatprep.subr.mxu1 %v3155_v58  ;;  %3847 = vmatpush1.msra.mxu0 %v3026_v35  ;;  %v3139_v58 = vld [vmem:[#allocation9 + $0x1428] sm:$0xff]  ;;  %v3010_v35 = vld [vmem:[#allocation9 + $0x1020] sm:$0xff] }
 0x314   :  { %3924 = vmatpush1.msra.mxu1 %v3154_v38  ;;  %3848 = vmatprep.subr.mxu0 %v3023_v3  ;;  %v3138_v38 = vld [vmem:[#allocation9 + $0x1420] sm:$0xff]  ;;  %v3007_v3 = vld [vmem:[#allocation9 + $0x1008] sm:$0xff] }
 0x315   :  { %3925 = vmatprep.subr.mxu1 %v3151_v63  ;;  %3849 = vmatpush1.msra.mxu0 %v3022_v59  ;;  %v3135_v63 = vld [vmem:[#allocation9 + $0x1408] sm:$0xff]  ;;  %v3006_v59 = vld [vmem:[#allocation9 + $0x1000] sm:$0xff] }
 0x316   :  { %3926 = vmatpush1.msra.mxu1 %v3150_v6  ;;  %3850 = vmatprep.subr.mxu0 %v3019_v30  ;;  %v3134_v6 = vld [vmem:[#allocation9 + $0x1400] sm:$0xff]  ;;  %v3131_v30 = vld [vmem:[#allocation9 + $0x13e8] sm:$0xff] }
 0x317   :  { %3927 = vmatprep.subr.mxu1 %v3147_v16  ;;  %3851 = vmatpush1.msra.mxu0 %v3018_v57  ;;  %v3259_v16 = vld [vmem:[#allocation9 + $0x17e8] sm:$0xff]  ;;  %v3130_v57 = vld [vmem:[#allocation9 + $0x13e0] sm:$0xff] }
 0x318   :  { %3928 = vmatpush1.msra.mxu1 %v3146_v48  ;;  %3852 = vmatprep.subr.mxu0 %v3015_v26  ;;  %v3258_v48 = vld [vmem:[#allocation9 + $0x17e0] sm:$0xff]  ;;  %v3127_v26 = vld [vmem:[#allocation9 + $0x13c8] sm:$0xff] }
 0x319   :  { %3929 = vmatprep.subr.mxu1 %v3143_v56  ;;  %3853 = vmatpush1.msra.mxu0 %v3014_v31  ;;  %v3255_v56 = vld [vmem:[#allocation9 + $0x17c8] sm:$0xff]  ;;  %v3126_v31 = vld [vmem:[#allocation9 + $0x13c0] sm:$0xff] }
 0x31a   :  { %3930 = vmatpush1.msra.mxu1 %v3142_v4  ;;  %3854 = vmatprep.subr.mxu0 %v3011_v2  ;;  %v3254_v4 = vld [vmem:[#allocation9 + $0x17c0] sm:$0xff]  ;;  %v3123_v2 = vld [vmem:[#allocation9 + $0x13a8] sm:$0xff] }
 0x31b   :  { %3931 = vmatprep.subr.mxu1 %v3139_v58  ;;  %3855 = vmatpush1.msra.mxu0 %v3010_v35  ;;  %v3251_v58 = vld [vmem:[#allocation9 + $0x17a8] sm:$0xff]  ;;  %v3122_v35 = vld [vmem:[#allocation9 + $0x13a0] sm:$0xff] }
 0x31c   :  { %3932 = vmatpush1.msra.mxu1 %v3138_v38  ;;  %3856 = vmatprep.subr.mxu0 %v3007_v3  ;;  %v3250_v38 = vld [vmem:[#allocation9 + $0x17a0] sm:$0xff]  ;;  %v3119_v3 = vld [vmem:[#allocation9 + $0x1388] sm:$0xff] }
 0x31d   :  { %3933 = vmatprep.subr.mxu1 %v3135_v63  ;;  %3857 = vmatpush1.msra.mxu0 %v3006_v59  ;;  %v3247_v63 = vld [vmem:[#allocation9 + $0x1788] sm:$0xff]  ;;  %v3118_v59 = vld [vmem:[#allocation9 + $0x1380] sm:$0xff] }
 0x31e   :  { %3934 = vmatpush1.msra.mxu1 %v3134_v6  ;;  %3858 = vmatprep.subr.mxu0 %v3131_v30  ;;  %v3246_v6 = vld [vmem:[#allocation9 + $0x1780] sm:$0xff]  ;;  %v3115_v30 = vld [vmem:[#allocation9 + $0x1368] sm:$0xff] }
 0x31f   :  { %3935 = vmatprep.subr.mxu1 %v3259_v16  ;;  %3859 = vmatpush2.msra.mxu0 %v3130_v57  ;;  %v3243_v16 = vld [vmem:[#allocation9 + $0x1768] sm:$0xff]  ;;  %v3114_v57 = vld [vmem:[#allocation9 + $0x1360] sm:$0xff] }
 0x320   :  { %3936 = vmatpush2.msra.mxu1 %v3258_v48  ;;  %3860 = vmatprep.subr.mxu0 %v3127_v26  ;;  %v3242_v48 = vld [vmem:[#allocation9 + $0x1760] sm:$0xff]  ;;  %v3111_v26 = vld [vmem:[#allocation9 + $0x1348] sm:$0xff] }
 0x321   :  { %3937 = vmatprep.subr.mxu1 %v3255_v56  ;;  %3861 = vmatpush2.msra.mxu0 %v3126_v31  ;;  %v3239_v56 = vld [vmem:[#allocation9 + $0x1748] sm:$0xff]  ;;  %v3110_v31 = vld [vmem:[#allocation9 + $0x1340] sm:$0xff] }
 0x322   :  { %3938 = vmatpush2.msra.mxu1 %v3254_v4  ;;  %3862 = vmatprep.subr.mxu0 %v3123_v2  ;;  %v3238_v4 = vld [vmem:[#allocation9 + $0x1740] sm:$0xff]  ;;  %v3107_v2 = vld [vmem:[#allocation9 + $0x1328] sm:$0xff] }
 0x323   :  { %3939 = vmatprep.subr.mxu1 %v3251_v58  ;;  %3863 = vmatpush2.msra.mxu0 %v3122_v35  ;;  %v3235_v58 = vld [vmem:[#allocation9 + $0x1728] sm:$0xff]  ;;  %v5671_v35 = vpop.f32.mrf.mxu0  ;;  %v3222_v36 = vld [vmem:[#allocation9 + $0x16c0] sm:$0xff] }
 0x324   :  { %3940 = vmatpush2.msra.mxu1 %v3250_v38  ;;  %3864 = vmatprep.subr.mxu0 %v3119_v3  ;;  %v3106_v38 = vld [vmem:[#allocation9 + $0x1320] sm:$0xff] }
 0x325   :  { %3941 = vmatprep.subr.mxu1 %v3247_v63  ;;  %3865 = vmatpush2.msra.mxu0 %v3118_v59  ;;  %v3234_v3 = vld [vmem:[#allocation9 + $0x1720] sm:$0xff]  ;;  %v3103_v63 = vld [vmem:[#allocation9 + $0x1308] sm:$0xff] }
 0x326   :  { %3942 = vmatpush2.msra.mxu1 %v3246_v6  ;;  %3866 = vmatprep.subr.mxu0 %v3115_v30  ;;  %v3231_v59 = vld [vmem:[#allocation9 + $0x1708] sm:$0xff]  ;;  %v3102_v6 = vld [vmem:[#allocation9 + $0x1300] sm:$0xff] }
 0x327   :  { %3943 = vmatprep.subr.mxu1 %v3243_v16  ;;  %3867 = vmatpush2.msra.mxu0 %v3114_v57  ;;  %v3230_v30 = vld [vmem:[#allocation9 + $0x1700] sm:$0xff]  ;;  %v3099_v57 = vld [vmem:[#allocation9 + $0x12e8] sm:$0xff] }
 0x328   :  { %3944 = vmatpush2.msra.mxu1 %v3242_v48  ;;  %3868 = vmatprep.subr.mxu0 %v3111_v26  ;;  %v3227_v48 = vld [vmem:[#allocation9 + $0x16e8] sm:$0xff] }
 0x329   :  { %3945 = vmatprep.subr.mxu1 %v3239_v56  ;;  %3869 = vmatpush2.msra.mxu0 %v3110_v31  ;;  %v3098_v56 = vld [vmem:[#allocation9 + $0x12e0] sm:$0xff] }
 0x32a   :  { %3946 = vmatpush2.msra.mxu1 %v3238_v4  ;;  %3870 = vmatprep.subr.mxu0 %v3107_v2  ;;  %v3226_v31 = vld [vmem:[#allocation9 + $0x16e0] sm:$0xff]  ;;  %v3095_v4 = vld [vmem:[#allocation9 + $0x12c8] sm:$0xff] }
 0x32b   :  { %3947 = vmatprep.subr.mxu1 %v3235_v58  ;;  %v2226_v16 = vpop.f32.mrf.mxu0  ;;  %3871 = vmatpush2.msra.mxu0 %v3106_v38  ;;  %v3223_v2 = vld [vmem:[#allocation9 + $0x16c8] sm:$0xff] }
 0x32c   :  { %3948 = vmatpush2.msra.mxu1 %v3234_v3  ;;  %v2227_v26 = vadd.f32 %v2226_v16, %v5611_v39  ;;  %3872 = vmatprep.subr.mxu0 %v3103_v63  ;;  %v3091_v38 = vld [vmem:[#allocation9 + $0x12a8] sm:$0xff]  ;;  %v1193_v39 = vrot.slane %v5606_v44, %v5529_v20  ;;  %v3090_v63 = vld [vmem:[#allocation9 + $0x12a0] sm:$0xff] }
 0x32d   :  { %3949 = vmatprep.subr.mxu1 %v3231_v59  ;;  %3873 = vmatpush2.msra.mxu0 %v3102_v6  ;;  %v2303_v58 = vpop.f32.mrf.mxu1  ;;  %v3219_v3 = vld [vmem:[#allocation9 + $0x16a8] sm:$0xff]  ;;  %v3218_v59 = vld [vmem:[#allocation9 + $0x16a0] sm:$0xff] }
 0x32e   :  { %3950 = vmatpush2.msra.mxu1 %v3230_v30  ;;  %3874 = vmatprep.subr.mxu0 %v3099_v57  ;;  %v5676_v15 = vadd.f32 %v2303_v58, %v2227_v26  ;;  %v3087_v6 = vld [vmem:[#allocation9 + $0x1288] sm:$0xff]  ;;  %v3086_v16 = vld [vmem:[#allocation9 + $0x1280] sm:$0xff]  ;;  %v2075_v58 = vadd.f32 %v5602_v52, %v5628_v1 }
 0x32f   :  { %3951 = vmatprep.subr.mxu1 %v3227_v48  ;;  %3875 = vmatpush2.msra.mxu0 %v3098_v56  ;;  %v3215_v30 = vld [vmem:[#allocation9 + $0x1688] sm:$0xff]  ;;  %v3214_v57 = vld [vmem:[#allocation9 + $0x1680] sm:$0xff]  ;;  %v2067_v56 = vadd.f32 %v5591_v33, %v1193_v39  ;;  %v5693_v1 = vpop.f32.mrf.mxu1 }
 0x330   :  { %3952 = vmatpush2.msra.mxu1 %v3226_v31  ;;  %3876 = vmatprep.subr.mxu0 %v3095_v4  ;;  %v3083_v48 = vld [vmem:[#allocation9 + $0x1268] sm:$0xff]  ;;  %v3082_v31 = vld [vmem:[#allocation9 + $0x1260] sm:$0xff] }
 0x331   :  { %3953 = vmatprep.subr.mxu1 %v3223_v2  ;;  %3877 = vmatpush2.msra.mxu0 %v3094_v21  ;;  %v3211_v26 = vld [vmem:[#allocation9 + $0x1668] sm:$0xff]  ;;  %v3210_v4 = vld [vmem:[#allocation9 + $0x1660] sm:$0xff]  ;;  %v5681_v2 = vpop.f32.mrf.mxu0 }
 0x332   :  { %3954 = vmatpush2.msra.mxu1 %v3222_v36  ;;  %3878 = vmatprep.subr.mxu0 %v3091_v38  ;;  %v3079_v36 = vld [vmem:[#allocation9 + $0x1248] sm:$0xff]  ;;  %v3078_v38 = vld [vmem:[#allocation9 + $0x1240] sm:$0xff] }
 0x333   :  { %3955 = vmatprep.subr.mxu1 %v3219_v3  ;;  %3879 = vmatpush2.msra.mxu0 %v3090_v63  ;;  %v3207_v21 = vld [vmem:[#allocation9 + $0x1648] sm:$0xff]  ;;  %v3206_v3 = vld [vmem:[#allocation9 + $0x1640] sm:$0xff] }
 0x334   :  { %3956 = vmatpush2.msra.mxu1 %v3218_v59  ;;  %3880 = vmatprep.subr.mxu0 %v3087_v6  ;;  %v3075_v33 = vld [vmem:[#allocation9 + $0x1228] sm:$0xff]  ;;  %v5686_v59 = vadd.f32 %v5593_v34, %v2067_v56  ;;  %v5691_v6 = vrot.slane %v5606_v44, %v1172_v17  ;;  %v3202_v52 = vld [vmem:[#allocation9 + $0x1620] sm:$0xff]  ;;  %v2073_v34 = vadd.f32 %v5597_v29, %v1193_v39 }
 0x335   :  { %3957 = vmatprep.subr.mxu1 %v3215_v30  ;;  %3881 = vmatpush2.msra.mxu0 %v3086_v16  ;;  %v3203_v63 = vld [vmem:[#allocation9 + $0x1628] sm:$0xff]  ;;  %v3074_v30 = vld [vmem:[#allocation9 + $0x1220] sm:$0xff]  ;;  %v5695_v16 = vpop.f32.mrf.mxu0 }
 0x336   :  { %3958 = vmatpush2.msra.mxu1 %v3214_v57  ;;  %3882 = vmatprep.subr.mxu0 %v3083_v48  ;;  %v3071_v57 = vld [vmem:[#allocation9 + $0x1208] sm:$0xff]  ;;  %v3070_v17 = vld [vmem:[#allocation9 + $0x1200] sm:$0xff]  ;;  %v2223_v29 = vadd.f32 %v5671_v35, %v5691_v6 }
 0x337   :  { %3959 = vmatprep.subr.mxu1 %v3211_v26  ;;  %3883 = vmatpush2.msra.mxu0 %v3082_v31  ;;  %v3199_v48 = vld [vmem:[#allocation9 + $0x1608] sm:$0xff]  ;;  %v5699_v26 = vadd.f32 %v5613_v53, %v2075_v58  ;;  %v3198_v56 = vld [vmem:[#allocation9 + $0x1600] sm:$0xff]  ;;  %v5704_v31 = vrot.slane %v5606_v44, %v1180_v22  ;;  %v2376_v58 = vpop.f32.mrf.mxu0  ;;  %v5714_v22 = vadd.f32 %v5604_v42, %v2073_v34  ;;  %v5902_v34 = vmax.f32 %v5532_v61, 0.0 }
 0x338   :  { %3960 = vmatpush2.msra.mxu1 %v3210_v4  ;;  %3884 = vmatprep.subr.mxu0 %v3079_v36  ;;  %v5908_v4 = vmax.f32 %v5488_v27, 0.0  ;;  %v5907_v36 = vmax.f32 %v5686_v59, 0.0  ;;  %v3323_v53 = vld [vmem:[#allocation9 + $0x19e8] sm:$0xff]  ;;  %v3322_v35 = vld [vmem:[#allocation9 + $0x19e0] sm:$0xff] }
 0x339   :  { %3961 = vmatprep.subr.mxu1 %v3207_v21  ;;  %3885 = vmatpush2.msra.mxu0 %v3078_v38  ;;  %v3451_v39 = vld [vmem:[#allocation9 + $0x1de8] sm:$0xff]  ;;  %v5710_v21 = vpop.f32.mrf.mxu1  ;;  %v5906_v38 = vmax.f32 %v5536_v47, 0.0  ;;  %v5905_v44 = vmax.f32 %v5699_v26, 0.0 }
 0x33a   :  { %3962 = vmatpush2.msra.mxu1 %v3206_v3  ;;  %3886 = vmatprep.subr.mxu0 %v3075_v33  ;;  %v3450_v3 = vld [vmem:[#allocation9 + $0x1de0] sm:$0xff]  ;;  %v2377_v33 = vadd.f32 %v2376_v58, %v5704_v31 }
 0x33b   :  { %3963 = vmatprep.subr.mxu1 %v3203_v63  ;;  %3887 = vmatpush2.msra.mxu0 %v3074_v30  ;;  %v3319_v63 = vld [vmem:[#allocation9 + $0x19c8] sm:$0xff]  ;;  %v2453_v42 = vpop.f32.mrf.mxu1  ;;  %v3442_v58 = vld [vmem:[#allocation9 + $0x1da0] sm:$0xff] }
 0x33c   :  { %3964 = vmatpush2.msra.mxu1 %v3202_v52  ;;  %3888 = vmatprep.subr.mxu0 %v3071_v57  ;;  %v3447_v30 = vld [vmem:[#allocation9 + $0x1dc8] sm:$0xff]  ;;  %v5723_v52 = vadd.f32 %v5673_v51, %v2223_v29  ;;  %v3318_v57 = vld [vmem:[#allocation9 + $0x19c0] sm:$0xff]  ;;  %v5731_v29 = vadd.f32 %v2453_v42, %v2377_v33 }
 0x33d   :  { %3965 = vmatprep.subr.mxu1 %v3199_v48  ;;  %3889 = vmatpush2.msra.mxu0 %v3070_v17  ;;  %v3446_v48 = vld [vmem:[#allocation9 + $0x1dc0] sm:$0xff]  ;;  %v5901_v17 = vmax.f32 %v5714_v22, 0.0  ;;  %v3443_v51 = vld [vmem:[#allocation9 + $0x1da8] sm:$0xff] }
 0x33e   :  { %3966 = vmatpush2.msra.mxu1 %v3198_v56  ;;  %3891 = vmatmul.mubr.f32.vlgmr.msra.gmra.mxu0 %v5908_v4  ;;  %v3315_v56 = vld [vmem:[#allocation9 + $0x19a8] sm:$0xff]  ;;  %v3438_v33 = vld [vmem:[#allocation9 + $0x1d80] sm:$0xff]  ;;  %v5904_v42 = vmax.f32 %v5731_v29, 0.0  ;;  %v2457_v4 = vpop.f32.mrf.mxu1 }
 0x33f   :  { %3968 = vmatmul.mubr.f32.vlgmr.msra.gmra.mxu1 %v5907_v36  ;;  %3980 = vmatprep.subr.mxu0 %v3323_v53  ;;  %v3314_v53 = vld [vmem:[#allocation9 + $0x19a0] sm:$0xff] }
 0x340   :  { %4057 = vmatprep.subr.mxu1 %v3451_v39  ;;  %3896 = vmatprep.mubr.f32.mxu0 %v5906_v38  ;;  %v5903_v39 = vmax.f32 %v5723_v52, 0.0  ;;  %v3467_v38 = vld [vmem:[#allocation9 + $0x1e68] sm:$0xff] }
 0x341   :  { %3973 = vmatprep.mubr.f32.mxu1 %v5905_v44  ;;  %3981 = vmatpush1.msra.mxu0 %v3322_v35  ;;  %v3311_v35 = vld [vmem:[#allocation9 + $0x1988] sm:$0xff]  ;;  %v3418_v44 = vld [vmem:[#allocation9 + $0x1ce0] sm:$0xff] }
 0x342   :  { %4058 = vmatpush1.msra.mxu1 %v3450_v3  ;;  %3982 = vmatprep.subr.mxu0 %v3319_v63  ;;  %v3439_v3 = vld [vmem:[#allocation9 + $0x1d88] sm:$0xff]  ;;  %v3310_v63 = vld [vmem:[#allocation9 + $0x1980] sm:$0xff] }
 0x343   :  { %4059 = vmatprep.subr.mxu1 %v3447_v30  ;;  %3983 = vmatpush1.msra.mxu0 %v3318_v57  ;;  %v3307_v30 = vld [vmem:[#allocation9 + $0x1968] sm:$0xff] }
 0x344   :  { %4060 = vmatpush1.msra.mxu1 %v3446_v48  ;;  %3897 = vmatmul.mubr.f32.gmra.mxu0 %v5902_v34  ;;  %v3435_v57 = vld [vmem:[#allocation9 + $0x1d68] sm:$0xff]  ;;  %v3306_v48 = vld [vmem:[#allocation9 + $0x1960] sm:$0xff] }
 0x345   :  { %3974 = vmatmul.mubr.f32.gmra.mxu1 %v5901_v17  ;;  %3984 = vmatprep.subr.mxu0 %v3315_v56  ;;  %v3434_v17 = vld [vmem:[#allocation9 + $0x1d60] sm:$0xff]  ;;  %v3303_v56 = vld [vmem:[#allocation9 + $0x1948] sm:$0xff] }
 0x346   :  { %4061 = vmatprep.subr.mxu1 %v3443_v51  ;;  %3985 = vmatpush1.msra.mxu0 %v3314_v53  ;;  %v3431_v51 = vld [vmem:[#allocation9 + $0x1d48] sm:$0xff]  ;;  %v3302_v53 = vld [vmem:[#allocation9 + $0x1940] sm:$0xff] }
 0x347   :  { %4044 = vmatprep.mubr.f32.mxu0 %v5903_v39  ;;  %4062 = vmatpush1.msra.mxu1 %v3442_v58  ;;  %v3430_v34 = vld [vmem:[#allocation9 + $0x1d40] sm:$0xff]  ;;  %v3299_v39 = vld [vmem:[#allocation9 + $0x1928] sm:$0xff] }
 0x348   :  { %3986 = vmatprep.subr.mxu0 %v3311_v35  ;;  %4063 = vmatprep.subr.mxu1 %v3439_v3  ;;  %v3427_v58 = vld [vmem:[#allocation9 + $0x1d28] sm:$0xff]  ;;  %v3298_v35 = vld [vmem:[#allocation9 + $0x1920] sm:$0xff] }
 0x349   :  { %3987 = vmatpush1.msra.mxu0 %v3310_v63  ;;  %4064 = vmatpush1.msra.mxu1 %v3438_v33  ;;  %v3426_v3 = vld [vmem:[#allocation9 + $0x1d20] sm:$0xff]  ;;  %v3295_v63 = vld [vmem:[#allocation9 + $0x1908] sm:$0xff] }
 0x34a   :  { %3988 = vmatprep.subr.mxu0 %v3307_v30  ;;  %4065 = vmatprep.subr.mxu1 %v3435_v57  ;;  %v3423_v33 = vld [vmem:[#allocation9 + $0x1d08] sm:$0xff]  ;;  %v3294_v30 = vld [vmem:[#allocation9 + $0x1900] sm:$0xff] }
 0x34b   :  { %3989 = vmatpush1.msra.mxu0 %v3306_v48  ;;  %4066 = vmatpush1.msra.mxu1 %v3434_v17  ;;  %v3422_v57 = vld [vmem:[#allocation9 + $0x1d00] sm:$0xff]  ;;  %v3291_v17 = vld [vmem:[#allocation9 + $0x18e8] sm:$0xff] }
 0x34c   :  { %4121 = vmatprep.mubr.f32.mxu1 %v5904_v42  ;;  %3990 = vmatprep.subr.mxu0 %v3303_v56  ;;  %v3419_v48 = vld [vmem:[#allocation9 + $0x1ce8] sm:$0xff]  ;;  %v3290_v42 = vld [vmem:[#allocation9 + $0x18e0] sm:$0xff] }
 0x34d   :  { %4067 = vmatprep.subr.mxu1 %v3431_v51  ;;  %3991 = vmatpush1.msra.mxu0 %v3302_v53  ;;  %v3287_v56 = vld [vmem:[#allocation9 + $0x18c8] sm:$0xff]  ;;  %v3414_v53 = vld [vmem:[#allocation9 + $0x1cc0] sm:$0xff] }
 0x34e   :  { %4068 = vmatpush1.msra.mxu1 %v3430_v34  ;;  %3992 = vmatprep.subr.mxu0 %v3299_v39  ;;  %v3415_v51 = vld [vmem:[#allocation9 + $0x1cc8] sm:$0xff]  ;;  %v3286_v34 = vld [vmem:[#allocation9 + $0x18c0] sm:$0xff] }
 0x34f   :  { %4069 = vmatprep.subr.mxu1 %v3427_v58  ;;  %3993 = vmatpush1.msra.mxu0 %v3298_v35  ;;  %v3283_v39 = vld [vmem:[#allocation9 + $0x18a8] sm:$0xff]  ;;  %v3282_v35 = vld [vmem:[#allocation9 + $0x18a0] sm:$0xff] }
 0x350   :  { %4070 = vmatpush1.msra.mxu1 %v3426_v3  ;;  %3994 = vmatprep.subr.mxu0 %v3295_v63  ;;  %v3411_v58 = vld [vmem:[#allocation9 + $0x1ca8] sm:$0xff]  ;;  %v3410_v3 = vld [vmem:[#allocation9 + $0x1ca0] sm:$0xff] }
 0x351   :  { %4071 = vmatprep.subr.mxu1 %v3423_v33  ;;  %3995 = vmatpush1.msra.mxu0 %v3294_v30  ;;  %v3279_v63 = vld [vmem:[#allocation9 + $0x1888] sm:$0xff]  ;;  %v3278_v30 = vld [vmem:[#allocation9 + $0x1880] sm:$0xff] }
 0x352   :  { %4072 = vmatpush1.msra.mxu1 %v3422_v57  ;;  %3996 = vmatprep.subr.mxu0 %v3291_v17  ;;  %v3407_v33 = vld [vmem:[#allocation9 + $0x1c88] sm:$0xff]  ;;  %v3406_v57 = vld [vmem:[#allocation9 + $0x1c80] sm:$0xff] }
 0x353   :  { %4073 = vmatprep.subr.mxu1 %v3419_v48  ;;  %3997 = vmatpush1.msra.mxu0 %v3290_v42  ;;  %v3275_v17 = vld [vmem:[#allocation9 + $0x1868] sm:$0xff]  ;;  %v3402_v42 = vld [vmem:[#allocation9 + $0x1c60] sm:$0xff] }
 0x354   :  { %4074 = vmatpush1.msra.mxu1 %v3418_v44  ;;  %3998 = vmatprep.subr.mxu0 %v3287_v56  ;;  %v3403_v48 = vld [vmem:[#allocation9 + $0x1c68] sm:$0xff]  ;;  %v3274_v44 = vld [vmem:[#allocation9 + $0x1860] sm:$0xff] }
 0x355   :  { %4075 = vmatprep.subr.mxu1 %v3415_v51  ;;  %3999 = vmatpush1.msra.mxu0 %v3286_v34  ;;  %v3271_v56 = vld [vmem:[#allocation9 + $0x1848] sm:$0xff]  ;;  %v3270_v34 = vld [vmem:[#allocation9 + $0x1840] sm:$0xff] }
 0x356   :  { %4076 = vmatpush1.msra.mxu1 %v3414_v53  ;;  %4000 = vmatprep.subr.mxu0 %v3283_v39  ;;  %v3399_v51 = vld [vmem:[#allocation9 + $0x1c48] sm:$0xff]  ;;  %v3398_v53 = vld [vmem:[#allocation9 + $0x1c40] sm:$0xff] }
 0x357   :  { %4077 = vmatprep.subr.mxu1 %v3411_v58  ;;  %4001 = vmatpush1.msra.mxu0 %v3282_v35  ;;  %v3267_v39 = vld [vmem:[#allocation9 + $0x1828] sm:$0xff]  ;;  %v3266_v35 = vld [vmem:[#allocation9 + $0x1820] sm:$0xff] }
 0x358   :  { %4078 = vmatpush1.msra.mxu1 %v3410_v3  ;;  %4002 = vmatprep.subr.mxu0 %v3279_v63  ;;  %v3395_v58 = vld [vmem:[#allocation9 + $0x1c28] sm:$0xff]  ;;  %v3394_v3 = vld [vmem:[#allocation9 + $0x1c20] sm:$0xff] }
 0x359   :  { %4079 = vmatprep.subr.mxu1 %v3407_v33  ;;  %4003 = vmatpush1.msra.mxu0 %v3278_v30  ;;  %v3263_v63 = vld [vmem:[#allocation9 + $0x1808] sm:$0xff]  ;;  %v3262_v30 = vld [vmem:[#allocation9 + $0x1800] sm:$0xff] }
 0x35a   :  { %4080 = vmatpush1.msra.mxu1 %v3406_v57  ;;  %4004 = vmatprep.subr.mxu0 %v3275_v17  ;;  %v3391_v33 = vld [vmem:[#allocation9 + $0x1c08] sm:$0xff]  ;;  %v3390_v57 = vld [vmem:[#allocation9 + $0x1c00] sm:$0xff] }
 0x35b   :  { %4081 = vmatprep.subr.mxu1 %v3403_v48  ;;  %4005 = vmatpush1.msra.mxu0 %v3274_v44  ;;  %v3387_v17 = vld [vmem:[#allocation9 + $0x1be8] sm:$0xff]  ;;  %v3386_v44 = vld [vmem:[#allocation9 + $0x1be0] sm:$0xff] }
 0x35c   :  { %4082 = vmatpush1.msra.mxu1 %v3402_v42  ;;  %4006 = vmatprep.subr.mxu0 %v3271_v56  ;;  %v3515_v48 = vld [vmem:[#allocation9 + $0x1fe8] sm:$0xff]  ;;  %v3514_v42 = vld [vmem:[#allocation9 + $0x1fe0] sm:$0xff] }
 0x35d   :  { %4083 = vmatprep.subr.mxu1 %v3399_v51  ;;  %4007 = vmatpush1.msra.mxu0 %v3270_v34  ;;  %v3383_v56 = vld [vmem:[#allocation9 + $0x1bc8] sm:$0xff]  ;;  %v3382_v34 = vld [vmem:[#allocation9 + $0x1bc0] sm:$0xff] }
 0x35e   :  { %4084 = vmatpush1.msra.mxu1 %v3398_v53  ;;  %4008 = vmatprep.subr.mxu0 %v3267_v39  ;;  %v3511_v51 = vld [vmem:[#allocation9 + $0x1fc8] sm:$0xff]  ;;  %v3510_v53 = vld [vmem:[#allocation9 + $0x1fc0] sm:$0xff] }
 0x35f   :  { %4085 = vmatprep.subr.mxu1 %v3395_v58  ;;  %4009 = vmatpush1.msra.mxu0 %v3266_v35  ;;  %v3379_v39 = vld [vmem:[#allocation9 + $0x1ba8] sm:$0xff]  ;;  %v3378_v35 = vld [vmem:[#allocation9 + $0x1ba0] sm:$0xff] }
 0x360   :  { %4086 = vmatpush1.msra.mxu1 %v3394_v3  ;;  %4010 = vmatprep.subr.mxu0 %v3263_v63  ;;  %v3507_v58 = vld [vmem:[#allocation9 + $0x1fa8] sm:$0xff]  ;;  %v3506_v3 = vld [vmem:[#allocation9 + $0x1fa0] sm:$0xff] }
 0x361   :  { %4087 = vmatprep.subr.mxu1 %v3391_v33  ;;  %4011 = vmatpush1.msra.mxu0 %v3262_v30  ;;  %v3375_v63 = vld [vmem:[#allocation9 + $0x1b88] sm:$0xff]  ;;  %v3374_v30 = vld [vmem:[#allocation9 + $0x1b80] sm:$0xff] }
 0x362   :  { %4088 = vmatpush1.msra.mxu1 %v3390_v57  ;;  %4012 = vmatprep.subr.mxu0 %v3387_v17  ;;  %v3503_v33 = vld [vmem:[#allocation9 + $0x1f88] sm:$0xff]  ;;  %v3502_v57 = vld [vmem:[#allocation9 + $0x1f80] sm:$0xff] }
 0x363   :  { %4089 = vmatprep.subr.mxu1 %v3515_v48  ;;  %4013 = vmatpush2.msra.mxu0 %v3386_v44  ;;  %v3371_v17 = vld [vmem:[#allocation9 + $0x1b68] sm:$0xff]  ;;  %v3370_v44 = vld [vmem:[#allocation9 + $0x1b60] sm:$0xff] }
 0x364   :  { %4090 = vmatpush2.msra.mxu1 %v3514_v42  ;;  %4014 = vmatprep.subr.mxu0 %v3383_v56  ;;  %v3499_v48 = vld [vmem:[#allocation9 + $0x1f68] sm:$0xff]  ;;  %v3498_v42 = vld [vmem:[#allocation9 + $0x1f60] sm:$0xff] }
 0x365   :  { %4091 = vmatprep.subr.mxu1 %v3511_v51  ;;  %4015 = vmatpush2.msra.mxu0 %v3382_v34  ;;  %v3367_v56 = vld [vmem:[#allocation9 + $0x1b48] sm:$0xff]  ;;  %v3366_v34 = vld [vmem:[#allocation9 + $0x1b40] sm:$0xff] }
 0x366   :  { %4092 = vmatpush2.msra.mxu1 %v3510_v53  ;;  %4016 = vmatprep.subr.mxu0 %v3379_v39  ;;  %v3495_v51 = vld [vmem:[#allocation9 + $0x1f48] sm:$0xff]  ;;  %v3494_v53 = vld [vmem:[#allocation9 + $0x1f40] sm:$0xff] }
 0x367   :  { %4093 = vmatprep.subr.mxu1 %v3507_v58  ;;  %4017 = vmatpush2.msra.mxu0 %v3378_v35  ;;  %v3363_v39 = vld [vmem:[#allocation9 + $0x1b28] sm:$0xff]  ;;  %v3362_v35 = vld [vmem:[#allocation9 + $0x1b20] sm:$0xff] }
 0x368   :  { %4094 = vmatpush2.msra.mxu1 %v3506_v3  ;;  %4018 = vmatprep.subr.mxu0 %v3375_v63  ;;  %v3491_v58 = vld [vmem:[#allocation9 + $0x1f28] sm:$0xff]  ;;  %v3490_v3 = vld [vmem:[#allocation9 + $0x1f20] sm:$0xff] }
 0x369   :  { %4095 = vmatprep.subr.mxu1 %v3503_v33  ;;  %4019 = vmatpush2.msra.mxu0 %v3374_v30  ;;  %v3359_v63 = vld [vmem:[#allocation9 + $0x1b08] sm:$0xff]  ;;  %v3358_v30 = vld [vmem:[#allocation9 + $0x1b00] sm:$0xff] }
 0x36a   :  { %4096 = vmatpush2.msra.mxu1 %v3502_v57  ;;  %4020 = vmatprep.subr.mxu0 %v3371_v17  ;;  %v3487_v33 = vld [vmem:[#allocation9 + $0x1f08] sm:$0xff]  ;;  %v3486_v57 = vld [vmem:[#allocation9 + $0x1f00] sm:$0xff] }
 0x36b   :  { %4097 = vmatprep.subr.mxu1 %v3499_v48  ;;  %4021 = vmatpush2.msra.mxu0 %v3370_v44  ;;  %v3355_v17 = vld [vmem:[#allocation9 + $0x1ae8] sm:$0xff]  ;;  %v3354_v44 = vld [vmem:[#allocation9 + $0x1ae0] sm:$0xff] }
 0x36c   :  { %4098 = vmatpush2.msra.mxu1 %v3498_v42  ;;  %4022 = vmatprep.subr.mxu0 %v3367_v56  ;;  %v3483_v48 = vld [vmem:[#allocation9 + $0x1ee8] sm:$0xff]  ;;  %v3482_v42 = vld [vmem:[#allocation9 + $0x1ee0] sm:$0xff] }
 0x36d   :  { %4099 = vmatprep.subr.mxu1 %v3495_v51  ;;  %4023 = vmatpush2.msra.mxu0 %v3366_v34  ;;  %v3351_v56 = vld [vmem:[#allocation9 + $0x1ac8] sm:$0xff]  ;;  %v3350_v34 = vld [vmem:[#allocation9 + $0x1ac0] sm:$0xff] }
 0x36e   :  { %4100 = vmatpush2.msra.mxu1 %v3494_v53  ;;  %4024 = vmatprep.subr.mxu0 %v3363_v39  ;;  %v3479_v51 = vld [vmem:[#allocation9 + $0x1ec8] sm:$0xff]  ;;  %v3478_v53 = vld [vmem:[#allocation9 + $0x1ec0] sm:$0xff] }
 0x36f   :  { %4101 = vmatprep.subr.mxu1 %v3491_v58  ;;  %4025 = vmatpush2.msra.mxu0 %v3362_v35  ;;  %v3347_v39 = vld [vmem:[#allocation9 + $0x1aa8] sm:$0xff]  ;;  %v2380_v35 = vpop.f32.mrf.mxu0 }
 0x370   :  { %4102 = vmatpush2.msra.mxu1 %v3490_v3  ;;  %4026 = vmatprep.subr.mxu0 %v3359_v63  ;;  %v3475_v58 = vld [vmem:[#allocation9 + $0x1ea8] sm:$0xff]  ;;  %v5025_v3 = vld [vmem:[#allocation8 + $0x8] sm:$0xff] }
 0x371   :  { %4103 = vmatprep.subr.mxu1 %v3487_v33  ;;  %4027 = vmatpush2.msra.mxu0 %v3358_v30  ;;  %v1209_v63 = vrot.slane %v5025_v3, %v1176_v24  ;;  %v3346_v33 = vld [vmem:[#allocation9 + $0x1aa0] sm:$0xff]  ;;  %v2382_v36 = vpop.f32.mrf.mxu0 }
 0x372   :  { %4104 = vmatpush2.msra.mxu1 %v3486_v57  ;;  %4028 = vmatprep.subr.mxu0 %v3355_v17  ;;  %v3474_v30 = vld [vmem:[#allocation9 + $0x1ea0] sm:$0xff]  ;;  %v3343_v57 = vld [vmem:[#allocation9 + $0x1a88] sm:$0xff]  ;;  %v2383_v3 = vadd.f32 %v2382_v36, %v5704_v31 }
 0x373   :  { %4105 = vmatprep.subr.mxu1 %v3483_v48  ;;  %4029 = vmatpush2.msra.mxu0 %v3354_v44  ;;  %v3471_v17 = vld [vmem:[#allocation9 + $0x1e88] sm:$0xff]  ;;  %v3342_v48 = vld [vmem:[#allocation9 + $0x1a80] sm:$0xff]  ;;  %v2375_v55 = vadd.f32 %v5695_v16, %v1209_v63 }
 0x374   :  { %4106 = vmatpush2.msra.mxu1 %v3482_v42  ;;  %4030 = vmatprep.subr.mxu0 %v3351_v56  ;;  %v3470_v44 = vld [vmem:[#allocation9 + $0x1e80] sm:$0xff]  ;;  %v3339_v42 = vld [vmem:[#allocation9 + $0x1a68] sm:$0xff] }
 0x375   :  { %4107 = vmatprep.subr.mxu1 %v3479_v51  ;;  %4031 = vmatpush2.msra.mxu0 %v3350_v34  ;;  %v3338_v24 = vld [vmem:[#allocation9 + $0x1a60] sm:$0xff]  ;;  %v3335_v51 = vld [vmem:[#allocation9 + $0x1a48] sm:$0xff] }
 0x376   :  { %4108 = vmatpush2.msra.mxu1 %v3478_v53  ;;  %4032 = vmatprep.subr.mxu0 %v3347_v39  ;;  %v3466_v56 = vld [vmem:[#allocation9 + $0x1e60] sm:$0xff]  ;;  %v3463_v34 = vld [vmem:[#allocation9 + $0x1e48] sm:$0xff]  ;;  %v2229_v53 = vadd.f32 %v5681_v2, %v5691_v6 }
 0x377   :  { %4109 = vmatprep.subr.mxu1 %v3475_v58  ;;  %4033 = vmatpush2.msra.mxu0 %v3346_v33  ;;  %v3334_v39 = vld [vmem:[#allocation9 + $0x1a40] sm:$0xff]  ;;  %v3331_v16 = vld [vmem:[#allocation9 + $0x1a28] sm:$0xff] }
 0x378   :  { %4110 = vmatpush2.msra.mxu1 %v3474_v30  ;;  %4034 = vmatprep.subr.mxu0 %v3343_v57  ;;  %v3462_v58 = vld [vmem:[#allocation9 + $0x1e40] sm:$0xff]  ;;  %v3459_v33 = vld [vmem:[#allocation9 + $0x1e28] sm:$0xff]  ;;  %v2459_v30 = vpop.f32.mrf.mxu1  ;;  %v5750_v57 = vadd.f32 %v5710_v21, %v2375_v55  ;;  %v2474_v21 = vmax.f32 %v5619_v62, 0.0  ;;  %v2557_v55 = vld [vmem:[#allocation9 + $0x1f8] sm:$0xff] }
 0x379   :  { %4111 = vmatprep.subr.mxu1 %v3471_v17  ;;  %4035 = vmatpush2.msra.mxu0 %v3342_v48  ;;  %v2381_v17 = vadd.f32 %v2380_v35, %v1209_v63  ;;  %v3330_v48 = vld [vmem:[#allocation9 + $0x1a20] sm:$0xff]  ;;  %v3327_v2 = vld [vmem:[#allocation9 + $0x1a08] sm:$0xff]  ;;  %v5755_v31 = vadd.f32 %v2459_v30, %v2383_v3  ;;  %v2680_v3 = vld [vmem:[#allocation9 + $0x5d0] sm:$0xff] }
 0x37a   :  { %4112 = vmatpush2.msra.mxu1 %v3470_v44  ;;  %4036 = vmatprep.subr.mxu0 %v3339_v42  ;;  %v3458_v44 = vld [vmem:[#allocation9 + $0x1e20] sm:$0xff]  ;;  %v3455_v6 = vld [vmem:[#allocation9 + $0x1e08] sm:$0xff]  ;;  %v2476_v35 = vmax.f32 %v5750_v57, 0.0  ;;  %v2677_v30 = vld [vmem:[#allocation9 + $0x5b8] sm:$0xff] }
 0x37b   :  { %4113 = vmatprep.subr.mxu1 %v3467_v38  ;;  %4037 = vmatpush2.msra.mxu0 %v3338_v24  ;;  %v5753_v38 = vadd.f32 %v5693_v1, %v2229_v53  ;;  %v3326_v36 = vld [vmem:[#allocation9 + $0x1a00] sm:$0xff]  ;;  %v5759_v63 = vadd.f32 %v2457_v4, %v2381_v17  ;;  %v2685_v24 = vld [vmem:[#allocation9 + $0x5f8] sm:$0xff]  ;;  %v2556_v1 = vld [vmem:[#allocation9 + $0x1f0] sm:$0xff] }
 0x37c   :  { %4114 = vmatpush2.msra.mxu1 %v3466_v56  ;;  %4038 = vmatprep.subr.mxu0 %v3335_v51  ;;  %v3454_v42 = vld [vmem:[#allocation9 + $0x1e00] sm:$0xff]  ;;  %v2493_v51 = vmax.f32 %v5755_v31, 0.0  ;;  %v2553_v4 = vld [vmem:[#allocation9 + $0x1d8] sm:$0xff]  ;;  %v2548_v17 = vld [vmem:[#allocation9 + $0x1b0] sm:$0xff] }
 0x37d   :  { %4115 = vmatprep.subr.mxu1 %v3463_v34  ;;  %4039 = vmatpush2.msra.mxu0 %v3334_v39  ;;  %v2491_v56 = vmax.f32 %v5753_v38, 0.0  ;;  %v2684_v34 = vld [vmem:[#allocation9 + $0x5f0] sm:$0xff]  ;;  %v2681_v53 = vld [vmem:[#allocation9 + $0x5d8] sm:$0xff]  ;;  %v2492_v39 = vmax.f32 %v5759_v63, 0.0 }
 0x37e   :  { %4116 = vmatpush2.msra.mxu1 %v3462_v58  ;;  %4040 = vmatprep.subr.mxu0 %v3331_v16  ;;  %v2552_v58 = vld [vmem:[#allocation9 + $0x1d0] sm:$0xff]  ;;  %v2490_v16 = vmax.f32 %v5676_v15, 0.0 }
 0x37f   :  { %4117 = vmatprep.subr.mxu1 %v3459_v33  ;;  %4041 = vmatpush2.msra.mxu0 %v3330_v48  ;;  %v2549_v33 = vld [vmem:[#allocation9 + $0x1b8] sm:$0xff]  ;;  %v2676_v48 = vld [vmem:[#allocation9 + $0x5b0] sm:$0xff] }
 0x380   :  { %4118 = vmatpush2.msra.mxu1 %v3458_v44  ;;  %4042 = vmatprep.subr.mxu0 %v3327_v2  ;;  %v2545_v44 = vld [vmem:[#allocation9 + $0x198] sm:$0xff] }
 0x381   :  { %4119 = vmatprep.subr.mxu1 %v3455_v6  ;;  %4043 = vmatpush2.msra.mxu0 %v3326_v36  ;;  %v2673_v2 = vld [vmem:[#allocation9 + $0x598] sm:$0xff]  ;;  %v2544_v6 = vld [vmem:[#allocation9 + $0x190] sm:$0xff] }
 0x382   :  { %4120 = vmatpush2.msra.mxu1 %v3454_v42  ;;  %4045 = vmatmul.mubr.f32.vlgmr.msra.gmra.mxu0 %v2474_v21  ;;  %v2672_v36 = vld [vmem:[#allocation9 + $0x590] sm:$0xff]  ;;  %v2541_v42 = vld [vmem:[#allocation9 + $0x178] sm:$0xff] }
 0x383   :  { %4122 = vmatmul.mubr.f32.vlgmr.msra.gmra.mxu1 %v2476_v35  ;;  %4134 = vmatprep.subr.mxu0 %v2557_v55  ;;  %v2669_v55 = vld [vmem:[#allocation9 + $0x578] sm:$0xff] }
 0x384   :  { %4211 = vmatprep.subr.mxu1 %v2685_v24  ;;  %4050 = vmatprep.mubr.f32.mxu0 %v2491_v56  ;;  %v2540_v24 = vld [vmem:[#allocation9 + $0x170] sm:$0xff] }
 0x385   :  { %4135 = vmatpush1.msra.mxu0 %v2556_v1  ;;  %4212 = vmatpush1.msra.mxu1 %v2684_v34  ;;  %v2668_v1 = vld [vmem:[#allocation9 + $0x570] sm:$0xff]  ;;  %v2537_v34 = vld [vmem:[#allocation9 + $0x158] sm:$0xff] }
 0x386   :  { %4136 = vmatprep.subr.mxu0 %v2553_v4  ;;  %4213 = vmatprep.subr.mxu1 %v2681_v53  ;;  %v2665_v4 = vld [vmem:[#allocation9 + $0x558] sm:$0xff] }
 0x387   :  { %4127 = vmatprep.mubr.f32.mxu1 %v2493_v51  ;;  %4137 = vmatpush1.msra.mxu0 %v2552_v58  ;;  %v2533_v53 = vld [vmem:[#allocation9 + $0x138] sm:$0xff] }
 0x388   :  { %4214 = vmatpush1.msra.mxu1 %v2680_v3  ;;  %4051 = vmatmul.mubr.f32.gmra.mxu0 %v2490_v16  ;;  %v2661_v58 = vld [vmem:[#allocation9 + $0x538] sm:$0xff] }
 0x389   :  { %4128 = vmatmul.mubr.f32.gmra.mxu1 %v2492_v39  ;;  %4138 = vmatprep.subr.mxu0 %v2549_v33  ;;  %v2529_v3 = vld [vmem:[#allocation9 + $0x118] sm:$0xff] }
 0x38a   :  { %4215 = vmatprep.subr.mxu1 %v2677_v30  ;;  %4139 = vmatpush1.msra.mxu0 %v2548_v17  ;;  %v2657_v33 = vld [vmem:[#allocation9 + $0x518] sm:$0xff]  ;;  %v2528_v30 = vld [vmem:[#allocation9 + $0x110] sm:$0xff] }
 0x38b   :  { %4198 = vmatprep.mubr.f32.mxu0 %v2463_v40  ;;  %4216 = vmatpush1.msra.mxu1 %v2676_v48  ;;  %v2664_v40 = vld [vmem:[#allocation9 + $0x550] sm:$0xff]  ;;  %v2525_v48 = vld [vmem:[#allocation9 + $0xf8] sm:$0xff] }
 0x38c   :  { %4275 = vmatprep.mubr.f32.mxu1 %v2465_v23  ;;  %4140 = vmatprep.subr.mxu0 %v2545_v44  ;;  %v2660_v23 = vld [vmem:[#allocation9 + $0x530] sm:$0xff]  ;;  %v2653_v44 = vld [vmem:[#allocation9 + $0x4f8] sm:$0xff] }
 0x38d   :  { %4217 = vmatprep.subr.mxu1 %v2673_v2  ;;  %4141 = vmatpush1.msra.mxu0 %v2544_v6  ;;  %v2656_v17 = vld [vmem:[#allocation9 + $0x510] sm:$0xff] }
 0x38e   :  { %4218 = vmatpush1.msra.mxu1 %v2672_v36  ;;  %4142 = vmatprep.subr.mxu0 %v2541_v42  ;;  %v2524_v2 = vld [vmem:[#allocation9 + $0xf0] sm:$0xff]  ;;  %v2521_v36 = vld [vmem:[#allocation9 + $0xd8] sm:$0xff] }
 0x38f   :  { %4219 = vmatprep.subr.mxu1 %v2669_v55  ;;  %4143 = vmatpush1.msra.mxu0 %v2540_v24  ;;  %v2652_v6 = vld [vmem:[#allocation9 + $0x4f0] sm:$0xff]  ;;  %v2649_v42 = vld [vmem:[#allocation9 + $0x4d8] sm:$0xff] }
 0x390   :  { %4220 = vmatpush1.msra.mxu1 %v2668_v1  ;;  %4144 = vmatprep.subr.mxu0 %v2537_v34  ;;  %v2520_v55 = vld [vmem:[#allocation9 + $0xd0] sm:$0xff]  ;;  %v2517_v1 = vld [vmem:[#allocation9 + $0xb8] sm:$0xff] }
 0x391   :  { %4221 = vmatprep.subr.mxu1 %v2665_v4  ;;  %4145 = vmatpush1.msra.mxu0 %v2536_v9  ;;  %v2648_v24 = vld [vmem:[#allocation9 + $0x4d0] sm:$0xff]  ;;  %v2645_v34 = vld [vmem:[#allocation9 + $0x4b8] sm:$0xff] }
 0x392   :  { %4222 = vmatpush1.msra.mxu1 %v2664_v40  ;;  %4146 = vmatprep.subr.mxu0 %v2533_v53  ;;  %v2516_v4 = vld [vmem:[#allocation9 + $0xb0] sm:$0xff]  ;;  %v2513_v40 = vld [vmem:[#allocation9 + $0x98] sm:$0xff] }
 0x393   :  { %4223 = vmatprep.subr.mxu1 %v2661_v58  ;;  %4147 = vmatpush1.msra.mxu0 %v2532_v41  ;;  %v2644_v9 = vld [vmem:[#allocation9 + $0x4b0] sm:$0xff]  ;;  %v2641_v53 = vld [vmem:[#allocation9 + $0x498] sm:$0xff] }
 0x394   :  { %4224 = vmatpush1.msra.mxu1 %v2660_v23  ;;  %4148 = vmatprep.subr.mxu0 %v2529_v3  ;;  %v2512_v58 = vld [vmem:[#allocation9 + $0x90] sm:$0xff]  ;;  %v2509_v23 = vld [vmem:[#allocation9 + $0x78] sm:$0xff] }
 0x395   :  { %4225 = vmatprep.subr.mxu1 %v2657_v33  ;;  %4149 = vmatpush1.msra.mxu0 %v2528_v30  ;;  %v2640_v41 = vld [vmem:[#allocation9 + $0x490] sm:$0xff]  ;;  %v2637_v3 = vld [vmem:[#allocation9 + $0x478] sm:$0xff] }
 0x396   :  { %4226 = vmatpush1.msra.mxu1 %v2656_v17  ;;  %4150 = vmatprep.subr.mxu0 %v2525_v48  ;;  %v2508_v33 = vld [vmem:[#allocation9 + $0x70] sm:$0xff]  ;;  %v2505_v17 = vld [vmem:[#allocation9 + $0x58] sm:$0xff] }
 0x397   :  { %4227 = vmatprep.subr.mxu1 %v2653_v44  ;;  %4151 = vmatpush1.msra.mxu0 %v2524_v2  ;;  %v2636_v30 = vld [vmem:[#allocation9 + $0x470] sm:$0xff]  ;;  %v2633_v48 = vld [vmem:[#allocation9 + $0x458] sm:$0xff] }
 0x398   :  { %4228 = vmatpush1.msra.mxu1 %v2652_v6  ;;  %4152 = vmatprep.subr.mxu0 %v2521_v36  ;;  %v2504_v44 = vld [vmem:[#allocation9 + $0x50] sm:$0xff]  ;;  %v2501_v6 = vld [vmem:[#allocation9 + $0x38] sm:$0xff] }
 0x399   :  { %4229 = vmatprep.subr.mxu1 %v2649_v42  ;;  %4153 = vmatpush1.msra.mxu0 %v2520_v55  ;;  %v2632_v2 = vld [vmem:[#allocation9 + $0x450] sm:$0xff]  ;;  %v2629_v36 = vld [vmem:[#allocation9 + $0x438] sm:$0xff] }
 0x39a   :  { %4230 = vmatpush1.msra.mxu1 %v2648_v24  ;;  %4154 = vmatprep.subr.mxu0 %v2517_v1  ;;  %v2500_v42 = vld [vmem:[#allocation9 + $0x30] sm:$0xff]  ;;  %v2497_v24 = vld [vmem:[#allocation9 + $0x18] sm:$0xff] }
 0x39b   :  { %4231 = vmatprep.subr.mxu1 %v2645_v34  ;;  %4155 = vmatpush1.msra.mxu0 %v2516_v4  ;;  %v2628_v55 = vld [vmem:[#allocation9 + $0x430] sm:$0xff]  ;;  %v2625_v1 = vld [vmem:[#allocation9 + $0x418] sm:$0xff] }
 0x39c   :  { %4232 = vmatpush1.msra.mxu1 %v2644_v9  ;;  %4156 = vmatprep.subr.mxu0 %v2513_v40  ;;  %v2496_v34 = vld [vmem:[#allocation9 + $0x10] sm:$0xff]  ;;  %v2621_v9 = vld [vmem:[#allocation9 + $0x3f8] sm:$0xff] }
 0x39d   :  { %4233 = vmatprep.subr.mxu1 %v2641_v53  ;;  %4157 = vmatpush1.msra.mxu0 %v2512_v58  ;;  %v2624_v4 = vld [vmem:[#allocation9 + $0x410] sm:$0xff]  ;;  %v2749_v40 = vld [vmem:[#allocation9 + $0x7f8] sm:$0xff] }
 0x39e   :  { %4234 = vmatpush1.msra.mxu1 %v2640_v41  ;;  %4158 = vmatprep.subr.mxu0 %v2509_v23  ;;  %v2620_v53 = vld [vmem:[#allocation9 + $0x3f0] sm:$0xff]  ;;  %v2617_v41 = vld [vmem:[#allocation9 + $0x3d8] sm:$0xff] }
 0x39f   :  { %4235 = vmatprep.subr.mxu1 %v2637_v3  ;;  %4159 = vmatpush1.msra.mxu0 %v2508_v33  ;;  %v2748_v58 = vld [vmem:[#allocation9 + $0x7f0] sm:$0xff]  ;;  %v2745_v23 = vld [vmem:[#allocation9 + $0x7d8] sm:$0xff] }
 0x3a0   :  { %4236 = vmatpush1.msra.mxu1 %v2636_v30  ;;  %4160 = vmatprep.subr.mxu0 %v2505_v17  ;;  %v2616_v3 = vld [vmem:[#allocation9 + $0x3d0] sm:$0xff]  ;;  %v2613_v30 = vld [vmem:[#allocation9 + $0x3b8] sm:$0xff] }
 0x3a1   :  { %4237 = vmatprep.subr.mxu1 %v2633_v48  ;;  %4161 = vmatpush1.msra.mxu0 %v2504_v44  ;;  %v2744_v33 = vld [vmem:[#allocation9 + $0x7d0] sm:$0xff]  ;;  %v2741_v17 = vld [vmem:[#allocation9 + $0x7b8] sm:$0xff] }
 0x3a2   :  { %4238 = vmatpush1.msra.mxu1 %v2632_v2  ;;  %4162 = vmatprep.subr.mxu0 %v2501_v6  ;;  %v2612_v48 = vld [vmem:[#allocation9 + $0x3b0] sm:$0xff]  ;;  %v2609_v2 = vld [vmem:[#allocation9 + $0x398] sm:$0xff] }
 0x3a3   :  { %4239 = vmatprep.subr.mxu1 %v2629_v36  ;;  %4163 = vmatpush1.msra.mxu0 %v2500_v42  ;;  %v2740_v44 = vld [vmem:[#allocation9 + $0x7b0] sm:$0xff]  ;;  %v2737_v6 = vld [vmem:[#allocation9 + $0x798] sm:$0xff] }
 0x3a4   :  { %4240 = vmatpush1.msra.mxu1 %v2628_v55  ;;  %4164 = vmatprep.subr.mxu0 %v2497_v24  ;;  %v2608_v36 = vld [vmem:[#allocation9 + $0x390] sm:$0xff]  ;;  %v2605_v55 = vld [vmem:[#allocation9 + $0x378] sm:$0xff] }
 0x3a5   :  { %4241 = vmatprep.subr.mxu1 %v2625_v1  ;;  %4165 = vmatpush1.msra.mxu0 %v2496_v34  ;;  %v2736_v42 = vld [vmem:[#allocation9 + $0x790] sm:$0xff]  ;;  %v2733_v24 = vld [vmem:[#allocation9 + $0x778] sm:$0xff] }
 0x3a6   :  { %4242 = vmatpush1.msra.mxu1 %v2624_v4  ;;  %4166 = vmatprep.subr.mxu0 %v2621_v9  ;;  %v2604_v1 = vld [vmem:[#allocation9 + $0x370] sm:$0xff]  ;;  %v2601_v4 = vld [vmem:[#allocation9 + $0x358] sm:$0xff] }
 0x3a7   :  { %4243 = vmatprep.subr.mxu1 %v2749_v40  ;;  %4167 = vmatpush2.msra.mxu0 %v2620_v53  ;;  %v2732_v34 = vld [vmem:[#allocation9 + $0x770] sm:$0xff]  ;;  %v2729_v9 = vld [vmem:[#allocation9 + $0x758] sm:$0xff] }
 0x3a8   :  { %4244 = vmatpush2.msra.mxu1 %v2748_v58  ;;  %4168 = vmatprep.subr.mxu0 %v2617_v41  ;;  %v2600_v40 = vld [vmem:[#allocation9 + $0x350] sm:$0xff]  ;;  %v2597_v58 = vld [vmem:[#allocation9 + $0x338] sm:$0xff] }
 0x3a9   :  { %4245 = vmatprep.subr.mxu1 %v2745_v23  ;;  %4169 = vmatpush2.msra.mxu0 %v2616_v3  ;;  %v2728_v53 = vld [vmem:[#allocation9 + $0x750] sm:$0xff]  ;;  %v2725_v41 = vld [vmem:[#allocation9 + $0x738] sm:$0xff] }
 0x3aa   :  { %4246 = vmatpush2.msra.mxu1 %v2744_v33  ;;  %4170 = vmatprep.subr.mxu0 %v2613_v30  ;;  %v2596_v23 = vld [vmem:[#allocation9 + $0x330] sm:$0xff]  ;;  %v2593_v33 = vld [vmem:[#allocation9 + $0x318] sm:$0xff] }
 0x3ab   :  { %4247 = vmatprep.subr.mxu1 %v2741_v17  ;;  %4171 = vmatpush2.msra.mxu0 %v2612_v48  ;;  %v2724_v3 = vld [vmem:[#allocation9 + $0x730] sm:$0xff]  ;;  %v2721_v30 = vld [vmem:[#allocation9 + $0x718] sm:$0xff] }
 0x3ac   :  { %4248 = vmatpush2.msra.mxu1 %v2740_v44  ;;  %4172 = vmatprep.subr.mxu0 %v2609_v2  ;;  %v2592_v17 = vld [vmem:[#allocation9 + $0x310] sm:$0xff]  ;;  %v2589_v44 = vld [vmem:[#allocation9 + $0x2f8] sm:$0xff] }
 0x3ad   :  { %4249 = vmatprep.subr.mxu1 %v2737_v6  ;;  %4173 = vmatpush2.msra.mxu0 %v2608_v36  ;;  %v2720_v48 = vld [vmem:[#allocation9 + $0x710] sm:$0xff]  ;;  %v2717_v2 = vld [vmem:[#allocation9 + $0x6f8] sm:$0xff] }
 0x3ae   :  { %4250 = vmatpush2.msra.mxu1 %v2736_v42  ;;  %4174 = vmatprep.subr.mxu0 %v2605_v55  ;;  %v2588_v6 = vld [vmem:[#allocation9 + $0x2f0] sm:$0xff]  ;;  %v2585_v42 = vld [vmem:[#allocation9 + $0x2d8] sm:$0xff] }
 0x3af   :  { %4251 = vmatprep.subr.mxu1 %v2733_v24  ;;  %4175 = vmatpush2.msra.mxu0 %v2604_v1  ;;  %v2716_v36 = vld [vmem:[#allocation9 + $0x6f0] sm:$0xff]  ;;  %v2713_v55 = vld [vmem:[#allocation9 + $0x6d8] sm:$0xff] }
 0x3b0   :  { %4252 = vmatpush2.msra.mxu1 %v2732_v34  ;;  %4176 = vmatprep.subr.mxu0 %v2601_v4  ;;  %v2584_v24 = vld [vmem:[#allocation9 + $0x2d0] sm:$0xff]  ;;  %v2581_v34 = vld [vmem:[#allocation9 + $0x2b8] sm:$0xff] }
 0x3b1   :  { %4253 = vmatprep.subr.mxu1 %v2729_v9  ;;  %4177 = vmatpush2.msra.mxu0 %v2600_v40  ;;  %v2712_v1 = vld [vmem:[#allocation9 + $0x6d0] sm:$0xff]  ;;  %v2709_v4 = vld [vmem:[#allocation9 + $0x6b8] sm:$0xff] }
 0x3b2   :  { %4254 = vmatpush2.msra.mxu1 %v2728_v53  ;;  %4178 = vmatprep.subr.mxu0 %v2597_v58  ;;  %v2580_v9 = vld [vmem:[#allocation9 + $0x2b0] sm:$0xff]  ;;  %v2577_v53 = vld [vmem:[#allocation9 + $0x298] sm:$0xff] }
 0x3b3   :  { %4255 = vmatprep.subr.mxu1 %v2725_v41  ;;  %4179 = vmatpush2.msra.mxu0 %v2596_v23  ;;  %v2708_v40 = vld [vmem:[#allocation9 + $0x6b0] sm:$0xff]  ;;  %v2705_v58 = vld [vmem:[#allocation9 + $0x698] sm:$0xff] }
 0x3b4   :  { %4256 = vmatpush2.msra.mxu1 %v2724_v3  ;;  %4180 = vmatprep.subr.mxu0 %v2593_v33  ;;  %v2576_v41 = vld [vmem:[#allocation9 + $0x290] sm:$0xff]  ;;  %v2573_v3 = vld [vmem:[#allocation9 + $0x278] sm:$0xff] }
 0x3b5   :  { %4257 = vmatprep.subr.mxu1 %v2721_v30  ;;  %4181 = vmatpush2.msra.mxu0 %v2592_v17  ;;  %v2704_v23 = vld [vmem:[#allocation9 + $0x690] sm:$0xff]  ;;  %v2701_v33 = vld [vmem:[#allocation9 + $0x678] sm:$0xff] }
 0x3b6   :  { %4258 = vmatpush2.msra.mxu1 %v2720_v48  ;;  %4182 = vmatprep.subr.mxu0 %v2589_v44  ;;  %v2572_v30 = vld [vmem:[#allocation9 + $0x270] sm:$0xff]  ;;  %v2569_v48 = vld [vmem:[#allocation9 + $0x258] sm:$0xff] }
 0x3b7   :  { %4259 = vmatprep.subr.mxu1 %v2717_v2  ;;  %4183 = vmatpush2.msra.mxu0 %v2588_v6  ;;  %v2700_v17 = vld [vmem:[#allocation9 + $0x670] sm:$0xff]  ;;  %v2697_v44 = vld [vmem:[#allocation9 + $0x658] sm:$0xff] }
 0x3b8   :  { %4260 = vmatpush2.msra.mxu1 %v2716_v36  ;;  %4184 = vmatprep.subr.mxu0 %v2585_v42  ;;  %v2568_v2 = vld [vmem:[#allocation9 + $0x250] sm:$0xff]  ;;  %v2565_v36 = vld [vmem:[#allocation9 + $0x238] sm:$0xff] }
 0x3b9   :  { %4261 = vmatprep.subr.mxu1 %v2713_v55  ;;  %4185 = vmatpush2.msra.mxu0 %v2584_v24  ;;  %v2696_v6 = vld [vmem:[#allocation9 + $0x650] sm:$0xff]  ;;  %v2693_v42 = vld [vmem:[#allocation9 + $0x638] sm:$0xff] }
 0x3ba   :  { %4262 = vmatpush2.msra.mxu1 %v2712_v1  ;;  %4186 = vmatprep.subr.mxu0 %v2581_v34  ;;  %v2564_v55 = vld [vmem:[#allocation9 + $0x230] sm:$0xff]  ;;  %v2561_v1 = vld [vmem:[#allocation9 + $0x218] sm:$0xff] }
 0x3bb   :  { %4263 = vmatprep.subr.mxu1 %v2709_v4  ;;  %4187 = vmatpush2.msra.mxu0 %v2580_v9  ;;  %v2692_v24 = vld [vmem:[#allocation9 + $0x630] sm:$0xff]  ;;  %v2689_v34 = vld [vmem:[#allocation9 + $0x618] sm:$0xff] }
 0x3bc   :  { %4264 = vmatpush2.msra.mxu1 %v2708_v40  ;;  %4188 = vmatprep.subr.mxu0 %v2577_v53  ;;  %v2560_v4 = vld [vmem:[#allocation9 + $0x210] sm:$0xff]  ;;  %v2813_v40 = vld [vmem:[#allocation9 + $0x9f8] sm:$0xff] }
 0x3bd   :  { %4265 = vmatprep.subr.mxu1 %v2705_v58  ;;  %4189 = vmatpush2.msra.mxu0 %v2576_v41  ;;  %v2688_v9 = vld [vmem:[#allocation9 + $0x610] sm:$0xff]  ;;  %v2941_v53 = vld [vmem:[#allocation9 + $0xdf8] sm:$0xff]  ;;  %v5912_v58 = vmax.f32 %v5339_v5, 0.0  ;;  %v5913_v41 = vmax.f32 %v5543_v54, 0.0 }
 0x3be   :  { %4266 = vmatpush2.msra.mxu1 %v2704_v23  ;;  %4190 = vmatprep.subr.mxu0 %v2573_v3  ;;  %v2812_v23 = vld [vmem:[#allocation9 + $0x9f0] sm:$0xff]  ;;  %v2805_v5 = vld [vmem:[#allocation9 + $0x9b8] sm:$0xff] }
 0x3bf   :  { %4267 = vmatprep.subr.mxu1 %v2701_v33  ;;  %4191 = vmatpush2.msra.mxu0 %v2572_v30  ;;  %v2940_v3 = vld [vmem:[#allocation9 + $0xdf0] sm:$0xff]  ;;  %v2809_v33 = vld [vmem:[#allocation9 + $0x9d8] sm:$0xff] }
 0x3c0   :  { %4268 = vmatpush2.msra.mxu1 %v2700_v17  ;;  %4192 = vmatprep.subr.mxu0 %v2569_v48  ;;  %v2937_v30 = vld [vmem:[#allocation9 + $0xdd8] sm:$0xff]  ;;  %v5914_v17 = vmax.f32 %v5372_v25, 0.0  ;;  %v5915_v48 = vmax.f32 %v5552_v50, 0.0  ;;  %v5917_v25 = vmax.f32 %v5562_v12, 0.0  ;;  %v2796_v12 = vld [vmem:[#allocation9 + $0x970] sm:$0xff] }
 0x3c1   :  { %4269 = vmatprep.subr.mxu1 %v2697_v44  ;;  %4193 = vmatpush2.msra.mxu0 %v2568_v2  ;;  %v2808_v44 = vld [vmem:[#allocation9 + $0x9d0] sm:$0xff]  ;;  %v2933_v54 = vld [vmem:[#allocation9 + $0xdb8] sm:$0xff] }
 0x3c2   :  { %4270 = vmatpush2.msra.mxu1 %v2696_v6  ;;  %4194 = vmatprep.subr.mxu0 %v2565_v36  ;;  %v2936_v2 = vld [vmem:[#allocation9 + $0xdd0] sm:$0xff]  ;;  %v5916_v36 = vmax.f32 %v5370_v49, 0.0  ;;  %v2801_v50 = vld [vmem:[#allocation9 + $0x998] sm:$0xff] }
 0x3c3   :  { %4271 = vmatprep.subr.mxu1 %v2693_v42  ;;  %4195 = vmatpush2.msra.mxu0 %v2564_v55  ;;  %v2804_v6 = vld [vmem:[#allocation9 + $0x9b0] sm:$0xff]  ;;  %v2929_v55 = vld [vmem:[#allocation9 + $0xd98] sm:$0xff] }
 0x3c4   :  { %4272 = vmatpush2.msra.mxu1 %v2692_v24  ;;  %4196 = vmatprep.subr.mxu0 %v2561_v1  ;;  %v2932_v42 = vld [vmem:[#allocation9 + $0xdb0] sm:$0xff]  ;;  %v5918_v24 = vmax.f32 %v5570_v10, 0.0  ;;  %v2797_v49 = vld [vmem:[#allocation9 + $0x978] sm:$0xff] }
 0x3c5   :  { %4273 = vmatprep.subr.mxu1 %v2689_v34  ;;  %4197 = vmatpush2.msra.mxu0 %v2560_v4  ;;  %v2800_v1 = vld [vmem:[#allocation9 + $0x990] sm:$0xff]  ;;  %v5919_v4 = vmax.f32 %v5577_v60, 0.0 }
 0x3c6   :  { %4274 = vmatpush2.msra.mxu1 %v2688_v9  ;;  %4199 = vmatmul.mubr.f32.vlgmr.msra.gmra.mxu0 %v5912_v58  ;;  %v2928_v34 = vld [vmem:[#allocation9 + $0xd90] sm:$0xff]  ;;  %v2925_v9 = vld [vmem:[#allocation9 + $0xd78] sm:$0xff] }
 0x3c7   :  { %4276 = vmatmul.mubr.f32.vlgmr.msra.gmra.mxu1 %v5913_v41  ;;  %4288 = vmatprep.subr.mxu0 %v2813_v40  ;;  %v2924_v40 = vld [vmem:[#allocation9 + $0xd70] sm:$0xff]  ;;  %v2921_v58 = vld [vmem:[#allocation9 + $0xd58] sm:$0xff] }
 0x3c8   :  { %4365 = vmatprep.subr.mxu1 %v2941_v53  ;;  %4204 = vmatprep.mubr.f32.mxu0 %v5914_v17  ;;  %v2793_v53 = vld [vmem:[#allocation9 + $0x958] sm:$0xff]  ;;  %v2792_v10 = vld [vmem:[#allocation9 + $0x950] sm:$0xff] }
 0x3c9   :  { %4281 = vmatprep.mubr.f32.mxu1 %v5915_v48  ;;  %4289 = vmatpush1.msra.mxu0 %v2812_v23  ;;  %v2920_v41 = vld [vmem:[#allocation9 + $0xd50] sm:$0xff]  ;;  %v2789_v23 = vld [vmem:[#allocation9 + $0x938] sm:$0xff] }
 0x3ca   :  { %4366 = vmatpush1.msra.mxu1 %v2940_v3  ;;  %4290 = vmatprep.subr.mxu0 %v2809_v33  ;;  %v2917_v3 = vld [vmem:[#allocation9 + $0xd38] sm:$0xff]  ;;  %v2788_v60 = vld [vmem:[#allocation9 + $0x930] sm:$0xff] }
 0x3cb   :  { %4367 = vmatprep.subr.mxu1 %v2937_v30  ;;  %4291 = vmatpush1.msra.mxu0 %v2808_v44  ;;  %v2916_v33 = vld [vmem:[#allocation9 + $0xd30] sm:$0xff]  ;;  %v2785_v30 = vld [vmem:[#allocation9 + $0x918] sm:$0xff] }
 0x3cc   :  { %4368 = vmatpush1.msra.mxu1 %v2936_v2  ;;  %4205 = vmatmul.mubr.f32.gmra.mxu0 %v5916_v36  ;;  %v2913_v17 = vld [vmem:[#allocation9 + $0xd18] sm:$0xff]  ;;  %v2784_v48 = vld [vmem:[#allocation9 + $0x910] sm:$0xff] }
 0x3cd   :  { %4282 = vmatmul.mubr.f32.gmra.mxu1 %v5917_v25  ;;  %4292 = vmatprep.subr.mxu0 %v2805_v5  ;;  %v2912_v44 = vld [vmem:[#allocation9 + $0xd10] sm:$0xff]  ;;  %v2781_v2 = vld [vmem:[#allocation9 + $0x8f8] sm:$0xff] }
 0x3ce   :  { %4369 = vmatprep.subr.mxu1 %v2933_v54  ;;  %4293 = vmatpush1.msra.mxu0 %v2804_v6  ;;  %v2909_v5 = vld [vmem:[#allocation9 + $0xcf8] sm:$0xff]  ;;  %v2780_v54 = vld [vmem:[#allocation9 + $0x8f0] sm:$0xff] }
 0x3cf   :  { %4352 = vmatprep.mubr.f32.mxu0 %v5918_v24  ;;  %4370 = vmatpush1.msra.mxu1 %v2932_v42  ;;  %v2908_v6 = vld [vmem:[#allocation9 + $0xcf0] sm:$0xff]  ;;  %v2777_v36 = vld [vmem:[#allocation9 + $0x8d8] sm:$0xff] }
 0x3d0   :  { %4429 = vmatprep.mubr.f32.mxu1 %v5919_v4  ;;  %4294 = vmatprep.subr.mxu0 %v2801_v50  ;;  %v2905_v25 = vld [vmem:[#allocation9 + $0xcd8] sm:$0xff]  ;;  %v2776_v42 = vld [vmem:[#allocation9 + $0x8d0] sm:$0xff] }
 0x3d1   :  { %4371 = vmatprep.subr.mxu1 %v2929_v55  ;;  %4295 = vmatpush1.msra.mxu0 %v2800_v1  ;;  %v2904_v50 = vld [vmem:[#allocation9 + $0xcd0] sm:$0xff]  ;;  %v2773_v55 = vld [vmem:[#allocation9 + $0x8b8] sm:$0xff] }
 0x3d2   :  { %4372 = vmatpush1.msra.mxu1 %v2928_v34  ;;  %4296 = vmatprep.subr.mxu0 %v2797_v49  ;;  %v2901_v24 = vld [vmem:[#allocation9 + $0xcb8] sm:$0xff]  ;;  %v2772_v1 = vld [vmem:[#allocation9 + $0x8b0] sm:$0xff] }
 0x3d3   :  { %4373 = vmatprep.subr.mxu1 %v2925_v9  ;;  %4297 = vmatpush1.msra.mxu0 %v2796_v12  ;;  %v2900_v34 = vld [vmem:[#allocation9 + $0xcb0] sm:$0xff]  ;;  %v2769_v4 = vld [vmem:[#allocation9 + $0x898] sm:$0xff] }
 0x3d4   :  { %4374 = vmatpush1.msra.mxu1 %v2924_v40  ;;  %4298 = vmatprep.subr.mxu0 %v2793_v53  ;;  %v2897_v49 = vld [vmem:[#allocation9 + $0xc98] sm:$0xff]  ;;  %v2768_v9 = vld [vmem:[#allocation9 + $0x890] sm:$0xff] }
 0x3d5   :  { %4375 = vmatprep.subr.mxu1 %v2921_v58  ;;  %4299 = vmatpush1.msra.mxu0 %v2792_v10  ;;  %v2896_v12 = vld [vmem:[#allocation9 + $0xc90] sm:$0xff]  ;;  %v2765_v40 = vld [vmem:[#allocation9 + $0x878] sm:$0xff] }
 0x3d6   :  { %4376 = vmatpush1.msra.mxu1 %v2920_v41  ;;  %4300 = vmatprep.subr.mxu0 %v2789_v23  ;;  %v2893_v53 = vld [vmem:[#allocation9 + $0xc78] sm:$0xff]  ;;  %v2764_v58 = vld [vmem:[#allocation9 + $0x870] sm:$0xff] }
 0x3d7   :  { %4377 = vmatprep.subr.mxu1 %v2917_v3  ;;  %4301 = vmatpush1.msra.mxu0 %v2788_v60  ;;  %v2892_v10 = vld [vmem:[#allocation9 + $0xc70] sm:$0xff]  ;;  %v2761_v41 = vld [vmem:[#allocation9 + $0x858] sm:$0xff] }
 0x3d8   :  { %4378 = vmatpush1.msra.mxu1 %v2916_v33  ;;  %4302 = vmatprep.subr.mxu0 %v2785_v30  ;;  %v2889_v23 = vld [vmem:[#allocation9 + $0xc58] sm:$0xff]  ;;  %v2760_v3 = vld [vmem:[#allocation9 + $0x850] sm:$0xff] }
 0x3d9   :  { %4379 = vmatprep.subr.mxu1 %v2913_v17  ;;  %4303 = vmatpush1.msra.mxu0 %v2784_v48  ;;  %v2888_v60 = vld [vmem:[#allocation9 + $0xc50] sm:$0xff]  ;;  %v2757_v33 = vld [vmem:[#allocation9 + $0x838] sm:$0xff] }
 0x3da   :  { %4380 = vmatpush1.msra.mxu1 %v2912_v44  ;;  %4304 = vmatprep.subr.mxu0 %v2781_v2  ;;  %v2885_v30 = vld [vmem:[#allocation9 + $0xc38] sm:$0xff]  ;;  %v2756_v17 = vld [vmem:[#allocation9 + $0x830] sm:$0xff] }
 0x3db   :  { %4381 = vmatprep.subr.mxu1 %v2909_v5  ;;  %4305 = vmatpush1.msra.mxu0 %v2780_v54  ;;  %v2884_v48 = vld [vmem:[#allocation9 + $0xc30] sm:$0xff]  ;;  %v2753_v44 = vld [vmem:[#allocation9 + $0x818] sm:$0xff] }
 0x3dc   :  { %4382 = vmatpush1.msra.mxu1 %v2908_v6  ;;  %4306 = vmatprep.subr.mxu0 %v2777_v36  ;;  %v2881_v2 = vld [vmem:[#allocation9 + $0xc18] sm:$0xff]  ;;  %v2752_v5 = vld [vmem:[#allocation9 + $0x810] sm:$0xff] }
 0x3dd   :  { %4383 = vmatprep.subr.mxu1 %v2905_v25  ;;  %4307 = vmatpush1.msra.mxu0 %v2776_v42  ;;  %v2880_v54 = vld [vmem:[#allocation9 + $0xc10] sm:$0xff]  ;;  %v2877_v6 = vld [vmem:[#allocation9 + $0xbf8] sm:$0xff] }
 0x3de   :  { %4384 = vmatpush1.msra.mxu1 %v2904_v50  ;;  %4308 = vmatprep.subr.mxu0 %v2773_v55  ;;  %v3005_v36 = vld [vmem:[#allocation9 + $0xff8] sm:$0xff]  ;;  %v2876_v25 = vld [vmem:[#allocation9 + $0xbf0] sm:$0xff] }
 0x3df   :  { %4385 = vmatprep.subr.mxu1 %v2901_v24  ;;  %4309 = vmatpush1.msra.mxu0 %v2772_v1  ;;  %v3004_v42 = vld [vmem:[#allocation9 + $0xff0] sm:$0xff]  ;;  %v2873_v50 = vld [vmem:[#allocation9 + $0xbd8] sm:$0xff] }
 0x3e0   :  { %4386 = vmatpush1.msra.mxu1 %v2900_v34  ;;  %4310 = vmatprep.subr.mxu0 %v2769_v4  ;;  %v3001_v55 = vld [vmem:[#allocation9 + $0xfd8] sm:$0xff]  ;;  %v2872_v24 = vld [vmem:[#allocation9 + $0xbd0] sm:$0xff] }
 0x3e1   :  { %4387 = vmatprep.subr.mxu1 %v2897_v49  ;;  %4311 = vmatpush1.msra.mxu0 %v2768_v9  ;;  %v3000_v1 = vld [vmem:[#allocation9 + $0xfd0] sm:$0xff]  ;;  %v2869_v34 = vld [vmem:[#allocation9 + $0xbb8] sm:$0xff] }
 0x3e2   :  { %4388 = vmatpush1.msra.mxu1 %v2896_v12  ;;  %4312 = vmatprep.subr.mxu0 %v2765_v40  ;;  %v2997_v4 = vld [vmem:[#allocation9 + $0xfb8] sm:$0xff]  ;;  %v2868_v49 = vld [vmem:[#allocation9 + $0xbb0] sm:$0xff] }
 0x3e3   :  { %4389 = vmatprep.subr.mxu1 %v2893_v53  ;;  %4313 = vmatpush1.msra.mxu0 %v2764_v58  ;;  %v2996_v9 = vld [vmem:[#allocation9 + $0xfb0] sm:$0xff]  ;;  %v2865_v12 = vld [vmem:[#allocation9 + $0xb98] sm:$0xff] }
 0x3e4   :  { %4390 = vmatpush1.msra.mxu1 %v2892_v10  ;;  %4314 = vmatprep.subr.mxu0 %v2761_v41  ;;  %v2993_v40 = vld [vmem:[#allocation9 + $0xf98] sm:$0xff]  ;;  %v2864_v53 = vld [vmem:[#allocation9 + $0xb90] sm:$0xff] }
 0x3e5   :  { %4391 = vmatprep.subr.mxu1 %v2889_v23  ;;  %4315 = vmatpush1.msra.mxu0 %v2760_v3  ;;  %v2992_v58 = vld [vmem:[#allocation9 + $0xf90] sm:$0xff]  ;;  %v2861_v10 = vld [vmem:[#allocation9 + $0xb78] sm:$0xff] }
 0x3e6   :  { %4392 = vmatpush1.msra.mxu1 %v2888_v60  ;;  %4316 = vmatprep.subr.mxu0 %v2757_v33  ;;  %v2989_v41 = vld [vmem:[#allocation9 + $0xf78] sm:$0xff]  ;;  %v2860_v23 = vld [vmem:[#allocation9 + $0xb70] sm:$0xff] }
 0x3e7   :  { %4393 = vmatprep.subr.mxu1 %v2885_v30  ;;  %4317 = vmatpush1.msra.mxu0 %v2756_v17  ;;  %v2988_v3 = vld [vmem:[#allocation9 + $0xf70] sm:$0xff]  ;;  %v2857_v60 = vld [vmem:[#allocation9 + $0xb58] sm:$0xff] }
 0x3e8   :  { %4394 = vmatpush1.msra.mxu1 %v2884_v48  ;;  %4318 = vmatprep.subr.mxu0 %v2753_v44  ;;  %v2985_v33 = vld [vmem:[#allocation9 + $0xf58] sm:$0xff]  ;;  %v2856_v30 = vld [vmem:[#allocation9 + $0xb50] sm:$0xff] }
 0x3e9   :  { %4395 = vmatprep.subr.mxu1 %v2881_v2  ;;  %4319 = vmatpush1.msra.mxu0 %v2752_v5  ;;  %v2984_v17 = vld [vmem:[#allocation9 + $0xf50] sm:$0xff]  ;;  %v2853_v48 = vld [vmem:[#allocation9 + $0xb38] sm:$0xff] }
 0x3ea   :  { %4396 = vmatpush1.msra.mxu1 %v2880_v54  ;;  %4320 = vmatprep.subr.mxu0 %v2877_v6  ;;  %v2981_v44 = vld [vmem:[#allocation9 + $0xf38] sm:$0xff]  ;;  %v2852_v2 = vld [vmem:[#allocation9 + $0xb30] sm:$0xff] }
 0x3eb   :  { %4397 = vmatprep.subr.mxu1 %v3005_v36  ;;  %4321 = vmatpush2.msra.mxu0 %v2876_v25  ;;  %v2980_v5 = vld [vmem:[#allocation9 + $0xf30] sm:$0xff]  ;;  %v2849_v54 = vld [vmem:[#allocation9 + $0xb18] sm:$0xff] }
 0x3ec   :  { %4398 = vmatpush2.msra.mxu1 %v3004_v42  ;;  %4322 = vmatprep.subr.mxu0 %v2873_v50  ;;  %v2977_v6 = vld [vmem:[#allocation9 + $0xf18] sm:$0xff]  ;;  %v2848_v36 = vld [vmem:[#allocation9 + $0xb10] sm:$0xff] }
 0x3ed   :  { %4399 = vmatprep.subr.mxu1 %v3001_v55  ;;  %4323 = vmatpush2.msra.mxu0 %v2872_v24  ;;  %v2976_v25 = vld [vmem:[#allocation9 + $0xf10] sm:$0xff]  ;;  %v2845_v42 = vld [vmem:[#allocation9 + $0xaf8] sm:$0xff] }
 0x3ee   :  { %4400 = vmatpush2.msra.mxu1 %v3000_v1  ;;  %4324 = vmatprep.subr.mxu0 %v2869_v34  ;;  %v2973_v50 = vld [vmem:[#allocation9 + $0xef8] sm:$0xff]  ;;  %v2844_v55 = vld [vmem:[#allocation9 + $0xaf0] sm:$0xff] }
 0x3ef   :  { %4401 = vmatprep.subr.mxu1 %v2997_v4  ;;  %4325 = vmatpush2.msra.mxu0 %v2868_v49  ;;  %v2972_v24 = vld [vmem:[#allocation9 + $0xef0] sm:$0xff]  ;;  %v2841_v1 = vld [vmem:[#allocation9 + $0xad8] sm:$0xff] }
 0x3f0   :  { %4402 = vmatpush2.msra.mxu1 %v2996_v9  ;;  %4326 = vmatprep.subr.mxu0 %v2865_v12  ;;  %v2969_v34 = vld [vmem:[#allocation9 + $0xed8] sm:$0xff]  ;;  %v2840_v4 = vld [vmem:[#allocation9 + $0xad0] sm:$0xff] }
 0x3f1   :  { %4403 = vmatprep.subr.mxu1 %v2993_v40  ;;  %4327 = vmatpush2.msra.mxu0 %v2864_v53  ;;  %v2968_v49 = vld [vmem:[#allocation9 + $0xed0] sm:$0xff]  ;;  %v2837_v9 = vld [vmem:[#allocation9 + $0xab8] sm:$0xff] }
 0x3f2   :  { %4404 = vmatpush2.msra.mxu1 %v2992_v58  ;;  %4328 = vmatprep.subr.mxu0 %v2861_v10  ;;  %v2965_v12 = vld [vmem:[#allocation9 + $0xeb8] sm:$0xff]  ;;  %v2836_v40 = vld [vmem:[#allocation9 + $0xab0] sm:$0xff] }
 0x3f3   :  { %4405 = vmatprep.subr.mxu1 %v2989_v41  ;;  %4329 = vmatpush2.msra.mxu0 %v2860_v23  ;;  %v2964_v53 = vld [vmem:[#allocation9 + $0xeb0] sm:$0xff]  ;;  %v2833_v58 = vld [vmem:[#allocation9 + $0xa98] sm:$0xff] }
 0x3f4   :  { %4406 = vmatpush2.msra.mxu1 %v2988_v3  ;;  %4330 = vmatprep.subr.mxu0 %v2857_v60  ;;  %v2961_v10 = vld [vmem:[#allocation9 + $0xe98] sm:$0xff]  ;;  %v2832_v41 = vld [vmem:[#allocation9 + $0xa90] sm:$0xff] }
 0x3f5   :  { %4407 = vmatprep.subr.mxu1 %v2985_v33  ;;  %4331 = vmatpush2.msra.mxu0 %v2856_v30  ;;  %v2960_v23 = vld [vmem:[#allocation9 + $0xe90] sm:$0xff]  ;;  %v2829_v3 = vld [vmem:[#allocation9 + $0xa78] sm:$0xff] }
 0x3f6   :  { %4408 = vmatpush2.msra.mxu1 %v2984_v17  ;;  %4332 = vmatprep.subr.mxu0 %v2853_v48  ;;  %v2957_v60 = vld [vmem:[#allocation9 + $0xe78] sm:$0xff]  ;;  %v2828_v33 = vld [vmem:[#allocation9 + $0xa70] sm:$0xff] }
 0x3f7   :  { %4409 = vmatprep.subr.mxu1 %v2981_v44  ;;  %4333 = vmatpush2.msra.mxu0 %v2852_v2  ;;  %v2956_v30 = vld [vmem:[#allocation9 + $0xe70] sm:$0xff]  ;;  %v2825_v17 = vld [vmem:[#allocation9 + $0xa58] sm:$0xff] }
 0x3f8   :  { %4410 = vmatpush2.msra.mxu1 %v2980_v5  ;;  %4334 = vmatprep.subr.mxu0 %v2849_v54  ;;  %v2953_v48 = vld [vmem:[#allocation9 + $0xe58] sm:$0xff]  ;;  %v2824_v44 = vld [vmem:[#allocation9 + $0xa50] sm:$0xff] }
 0x3f9   :  { %4411 = vmatprep.subr.mxu1 %v2977_v6  ;;  %4335 = vmatpush2.msra.mxu0 %v2848_v36  ;;  %v2952_v2 = vld [vmem:[#allocation9 + $0xe50] sm:$0xff]  ;;  %v2821_v5 = vld [vmem:[#allocation9 + $0xa38] sm:$0xff] }
 0x3fa   :  { %4412 = vmatpush2.msra.mxu1 %v2976_v25  ;;  %4336 = vmatprep.subr.mxu0 %v2845_v42  ;;  %v2949_v54 = vld [vmem:[#allocation9 + $0xe38] sm:$0xff]  ;;  %v2820_v6 = vld [vmem:[#allocation9 + $0xa30] sm:$0xff] }
 0x3fb   :  { %4413 = vmatprep.subr.mxu1 %v2973_v50  ;;  %4337 = vmatpush2.msra.mxu0 %v2844_v55  ;;  %v2948_v36 = vld [vmem:[#allocation9 + $0xe30] sm:$0xff]  ;;  %v2817_v25 = vld [vmem:[#allocation9 + $0xa18] sm:$0xff] }
 0x3fc   :  { %4414 = vmatpush2.msra.mxu1 %v2972_v24  ;;  %4338 = vmatprep.subr.mxu0 %v2841_v1  ;;  %v2945_v42 = vld [vmem:[#allocation9 + $0xe18] sm:$0xff]  ;;  %v2816_v50 = vld [vmem:[#allocation9 + $0xa10] sm:$0xff] }
 0x3fd   :  { %4415 = vmatprep.subr.mxu1 %v2969_v34  ;;  %4339 = vmatpush2.msra.mxu0 %v2840_v4  ;;  %v2944_v55 = vld [vmem:[#allocation9 + $0xe10] sm:$0xff]  ;;  %v3069_v24 = vld [vmem:[#allocation9 + $0x11f8] sm:$0xff] }
 0x3fe   :  { %4416 = vmatpush2.msra.mxu1 %v2968_v49  ;;  %4340 = vmatprep.subr.mxu0 %v2837_v9  ;;  %v3197_v1 = vld [vmem:[#allocation9 + $0x15f8] sm:$0xff]  ;;  %v3068_v34 = vld [vmem:[#allocation9 + $0x11f0] sm:$0xff] }
 0x3ff   :  { %4417 = vmatprep.subr.mxu1 %v2965_v12  ;;  %4341 = vmatpush2.msra.mxu0 %v2836_v40  ;;  %v3196_v4 = vld [vmem:[#allocation9 + $0x15f0] sm:$0xff]  ;;  %v3065_v49 = vld [vmem:[#allocation9 + $0x11d8] sm:$0xff]  ;;  %v5920_v12 = vmax.f32 %v5632_v28, 0.0 }
 0x400   :  { %4418 = vmatpush2.msra.mxu1 %v2964_v53  ;;  %4342 = vmatprep.subr.mxu0 %v2833_v58  ;;  %v3193_v9 = vld [vmem:[#allocation9 + $0x15d8] sm:$0xff]  ;;  %v3064_v40 = vld [vmem:[#allocation9 + $0x11d0] sm:$0xff] }
 0x401   :  { %4419 = vmatprep.subr.mxu1 %v2961_v10  ;;  %4343 = vmatpush2.msra.mxu0 %v2832_v41  ;;  %v3192_v53 = vld [vmem:[#allocation9 + $0x15d0] sm:$0xff]  ;;  %v3057_v28 = vld [vmem:[#allocation9 + $0x1198] sm:$0xff]  ;;  %v5923_v10 = vmax.f32 %v5650_v11, 0.0 }
 0x402   :  { %4420 = vmatpush2.msra.mxu1 %v2960_v23  ;;  %4344 = vmatprep.subr.mxu0 %v2829_v3  ;;  %v3185_v58 = vld [vmem:[#allocation9 + $0x1598] sm:$0xff]  ;;  %v3056_v41 = vld [vmem:[#allocation9 + $0x1190] sm:$0xff]  ;;  %v5924_v3 = vmax.f32 %v5657_v14, 0.0 }
 0x403   :  { %4421 = vmatprep.subr.mxu1 %v2957_v60  ;;  %4345 = vmatpush2.msra.mxu0 %v2828_v33  ;;  %v3184_v23 = vld [vmem:[#allocation9 + $0x1590] sm:$0xff]  ;;  %v3181_v60 = vld [vmem:[#allocation9 + $0x1578] sm:$0xff] }
 0x404   :  { %4422 = vmatpush2.msra.mxu1 %v2956_v30  ;;  %4346 = vmatprep.subr.mxu0 %v2825_v17  ;;  %v3180_v33 = vld [vmem:[#allocation9 + $0x1570] sm:$0xff]  ;;  %v3049_v30 = vld [vmem:[#allocation9 + $0x1158] sm:$0xff] }
 0x405   :  { %4423 = vmatprep.subr.mxu1 %v2953_v48  ;;  %4347 = vmatpush2.msra.mxu0 %v2824_v44  ;;  %v3177_v17 = vld [vmem:[#allocation9 + $0x1558] sm:$0xff]  ;;  %v3048_v11 = vld [vmem:[#allocation9 + $0x1150] sm:$0xff] }
 0x406   :  { %4424 = vmatpush2.msra.mxu1 %v2952_v2  ;;  %4348 = vmatprep.subr.mxu0 %v2821_v5  ;;  %v3176_v48 = vld [vmem:[#allocation9 + $0x1550] sm:$0xff]  ;;  %v3045_v44 = vld [vmem:[#allocation9 + $0x1138] sm:$0xff] }
 0x407   :  { %4425 = vmatprep.subr.mxu1 %v2949_v54  ;;  %4349 = vmatpush2.msra.mxu0 %v2820_v6  ;;  %v3173_v2 = vld [vmem:[#allocation9 + $0x1538] sm:$0xff]  ;;  %v3044_v14 = vld [vmem:[#allocation9 + $0x1130] sm:$0xff] }
 0x408   :  { %4426 = vmatpush2.msra.mxu1 %v2948_v36  ;;  %4350 = vmatprep.subr.mxu0 %v2817_v25  ;;  %v3172_v5 = vld [vmem:[#allocation9 + $0x1530] sm:$0xff]  ;;  %v3041_v54 = vld [vmem:[#allocation9 + $0x1118] sm:$0xff] }
 0x409   :  { %4427 = vmatprep.subr.mxu1 %v2945_v42  ;;  %4351 = vmatpush2.msra.mxu0 %v2816_v50  ;;  %v3169_v6 = vld [vmem:[#allocation9 + $0x1518] sm:$0xff]  ;;  %v3040_v36 = vld [vmem:[#allocation9 + $0x1110] sm:$0xff] }
 0x40a   :  { %4428 = vmatpush2.msra.mxu1 %v2944_v55  ;;  %4353 = vmatmul.mubr.f32.vlgmr.msra.gmra.mxu0 %v2466_v45  ;;  %v3060_v45 = vld [vmem:[#allocation9 + $0x11b0] sm:$0xff]  ;;  %v3037_v42 = vld [vmem:[#allocation9 + $0x10f8] sm:$0xff] }
 0x40b   :  { %4430 = vmatmul.mubr.f32.vlgmr.msra.gmra.mxu1 %v2468_v46  ;;  %4442 = vmatprep.subr.mxu0 %v3069_v24  ;;  %v5921_v46 = vmax.f32 %v5445_v8, 0.0  ;;  %v3053_v8 = vld [vmem:[#allocation9 + $0x1178] sm:$0xff]  ;;  %v3168_v25 = vld [vmem:[#allocation9 + $0x1510] sm:$0xff] }
 0x40c   :  { %4519 = vmatprep.subr.mxu1 %v3197_v1  ;;  %4358 = vmatprep.mubr.f32.mxu0 %v2483_v37  ;;  %v3188_v37 = vld [vmem:[#allocation9 + $0x15b0] sm:$0xff]  ;;  %v3165_v50 = vld [vmem:[#allocation9 + $0x14f8] sm:$0xff] }
 0x40d   :  { %4435 = vmatprep.mubr.f32.mxu1 %v5920_v12  ;;  %4443 = vmatpush1.msra.mxu0 %v3068_v34  ;;  %v3036_v55 = vld [vmem:[#allocation9 + $0x10f0] sm:$0xff]  ;;  %v3033_v1 = vld [vmem:[#allocation9 + $0x10d8] sm:$0xff] }
 0x40e   :  { %4520 = vmatpush1.msra.mxu1 %v3196_v4  ;;  %4444 = vmatprep.subr.mxu0 %v3065_v49  ;;  %v3164_v24 = vld [vmem:[#allocation9 + $0x14f0] sm:$0xff]  ;;  %v3161_v34 = vld [vmem:[#allocation9 + $0x14d8] sm:$0xff] }
 0x40f   :  { %4521 = vmatprep.subr.mxu1 %v3193_v9  ;;  %4445 = vmatpush1.msra.mxu0 %v3064_v40  ;;  %v3032_v4 = vld [vmem:[#allocation9 + $0x10d0] sm:$0xff]  ;;  %v3029_v9 = vld [vmem:[#allocation9 + $0x10b8] sm:$0xff] }
 0x410   :  { %4522 = vmatpush1.msra.mxu1 %v3192_v53  ;;  %4359 = vmatmul.mubr.f32.gmra.mxu0 %v5921_v46  ;;  %v3160_v49 = vld [vmem:[#allocation9 + $0x14d0] sm:$0xff]  ;;  %v3157_v12 = vld [vmem:[#allocation9 + $0x14b8] sm:$0xff] }
 0x411   :  { %4436 = vmatmul.mubr.f32.gmra.mxu1 %v5922_v19  ;;  %4446 = vmatprep.subr.mxu0 %v3061_v18  ;;  %v3028_v40 = vld [vmem:[#allocation9 + $0x10b0] sm:$0xff]  ;;  %v3025_v18 = vld [vmem:[#allocation9 + $0x1098] sm:$0xff] }
 0x412   :  { %4523 = vmatprep.subr.mxu1 %v3189_v13  ;;  %4447 = vmatpush1.msra.mxu0 %v3060_v45  ;;  %v3156_v53 = vld [vmem:[#allocation9 + $0x14b0] sm:$0xff]  ;;  %v3153_v13 = vld [vmem:[#allocation9 + $0x1498] sm:$0xff] }
 0x413   :  { %4506 = vmatprep.mubr.f32.mxu0 %v5923_v10  ;;  %4524 = vmatpush1.msra.mxu1 %v3188_v37  ;;  %v3024_v45 = vld [vmem:[#allocation9 + $0x1090] sm:$0xff]  ;;  %v3021_v19 = vld [vmem:[#allocation9 + $0x1078] sm:$0xff] }
 0x414   :  { %4583 = vmatprep.mubr.f32.mxu1 %v5924_v3  ;;  %4448 = vmatprep.subr.mxu0 %v3057_v28  ;;  %v3152_v46 = vld [vmem:[#allocation9 + $0x1490] sm:$0xff]  ;;  %v3149_v37 = vld [vmem:[#allocation9 + $0x1478] sm:$0xff] }
 0x415   :  { %4525 = vmatprep.subr.mxu1 %v3185_v58  ;;  %4449 = vmatpush1.msra.mxu0 %v3056_v41  ;;  %v3020_v28 = vld [vmem:[#allocation9 + $0x1070] sm:$0xff]  ;;  %v3017_v10 = vld [vmem:[#allocation9 + $0x1058] sm:$0xff] }
 0x416   :  { %4526 = vmatpush1.msra.mxu1 %v3184_v23  ;;  %4450 = vmatprep.subr.mxu0 %v3053_v8  ;;  %v3148_v58 = vld [vmem:[#allocation9 + $0x1470] sm:$0xff]  ;;  %v3145_v41 = vld [vmem:[#allocation9 + $0x1458] sm:$0xff] }
 0x417   :  { %4527 = vmatprep.subr.mxu1 %v3181_v60  ;;  %4451 = vmatpush1.msra.mxu0 %v3052_v43  ;;  %v3016_v23 = vld [vmem:[#allocation9 + $0x1050] sm:$0xff]  ;;  %v3013_v8 = vld [vmem:[#allocation9 + $0x1038] sm:$0xff] }
 0x418   :  { %4528 = vmatpush1.msra.mxu1 %v3180_v33  ;;  %4452 = vmatprep.subr.mxu0 %v3049_v30  ;;  %v3144_v3 = vld [vmem:[#allocation9 + $0x1450] sm:$0xff]  ;;  %v3141_v60 = vld [vmem:[#allocation9 + $0x1438] sm:$0xff] }
 0x419   :  { %4529 = vmatprep.subr.mxu1 %v3177_v17  ;;  %4453 = vmatpush1.msra.mxu0 %v3048_v11  ;;  %v3012_v43 = vld [vmem:[#allocation9 + $0x1030] sm:$0xff]  ;;  %v3009_v30 = vld [vmem:[#allocation9 + $0x1018] sm:$0xff] }
 0x41a   :  { %4530 = vmatpush1.msra.mxu1 %v3176_v48  ;;  %4454 = vmatprep.subr.mxu0 %v3045_v44  ;;  %v3140_v33 = vld [vmem:[#allocation9 + $0x1430] sm:$0xff]  ;;  %v3137_v17 = vld [vmem:[#allocation9 + $0x1418] sm:$0xff] }
 0x41b   :  { %4531 = vmatprep.subr.mxu1 %v3173_v2  ;;  %4455 = vmatpush1.msra.mxu0 %v3044_v14  ;;  %v3008_v11 = vld [vmem:[#allocation9 + $0x1010] sm:$0xff]  ;;  %v3133_v44 = vld [vmem:[#allocation9 + $0x13f8] sm:$0xff] }
 0x41c   :  { %4532 = vmatpush1.msra.mxu1 %v3172_v5  ;;  %4456 = vmatprep.subr.mxu0 %v3041_v54  ;;  %v3136_v48 = vld [vmem:[#allocation9 + $0x1410] sm:$0xff]  ;;  %v3261_v2 = vld [vmem:[#allocation9 + $0x17f8] sm:$0xff] }
 0x41d   :  { %4533 = vmatprep.subr.mxu1 %v3169_v6  ;;  %4457 = vmatpush1.msra.mxu0 %v3040_v36  ;;  %v3132_v14 = vld [vmem:[#allocation9 + $0x13f0] sm:$0xff]  ;;  %v3129_v54 = vld [vmem:[#allocation9 + $0x13d8] sm:$0xff] }
 0x41e   :  { %4534 = vmatpush1.msra.mxu1 %v3168_v25  ;;  %4458 = vmatprep.subr.mxu0 %v3037_v42  ;;  %v3260_v5 = vld [vmem:[#allocation9 + $0x17f0] sm:$0xff]  ;;  %v3257_v6 = vld [vmem:[#allocation9 + $0x17d8] sm:$0xff] }
 0x41f   :  { %4535 = vmatprep.subr.mxu1 %v3165_v50  ;;  %4459 = vmatpush1.msra.mxu0 %v3036_v55  ;;  %v3128_v36 = vld [vmem:[#allocation9 + $0x13d0] sm:$0xff]  ;;  %v3125_v42 = vld [vmem:[#allocation9 + $0x13b8] sm:$0xff] }
 0x420   :  { %4536 = vmatpush1.msra.mxu1 %v3164_v24  ;;  %4460 = vmatprep.subr.mxu0 %v3033_v1  ;;  %v3256_v25 = vld [vmem:[#allocation9 + $0x17d0] sm:$0xff]  ;;  %v3253_v50 = vld [vmem:[#allocation9 + $0x17b8] sm:$0xff] }
 0x421   :  { %4537 = vmatprep.subr.mxu1 %v3161_v34  ;;  %4461 = vmatpush1.msra.mxu0 %v3032_v4  ;;  %v3124_v55 = vld [vmem:[#allocation9 + $0x13b0] sm:$0xff]  ;;  %v3121_v1 = vld [vmem:[#allocation9 + $0x1398] sm:$0xff] }
 0x422   :  { %4538 = vmatpush1.msra.mxu1 %v3160_v49  ;;  %4462 = vmatprep.subr.mxu0 %v3029_v9  ;;  %v3252_v24 = vld [vmem:[#allocation9 + $0x17b0] sm:$0xff]  ;;  %v3249_v34 = vld [vmem:[#allocation9 + $0x1798] sm:$0xff] }
 0x423   :  { %4539 = vmatprep.subr.mxu1 %v3157_v12  ;;  %4463 = vmatpush1.msra.mxu0 %v3028_v40  ;;  %v3120_v4 = vld [vmem:[#allocation9 + $0x1390] sm:$0xff]  ;;  %v3117_v9 = vld [vmem:[#allocation9 + $0x1378] sm:$0xff] }
 0x424   :  { %4540 = vmatpush1.msra.mxu1 %v3156_v53  ;;  %4464 = vmatprep.subr.mxu0 %v3025_v18  ;;  %v3248_v49 = vld [vmem:[#allocation9 + $0x1790] sm:$0xff]  ;;  %v3245_v12 = vld [vmem:[#allocation9 + $0x1778] sm:$0xff] }
 0x425   :  { %4541 = vmatprep.subr.mxu1 %v3153_v13  ;;  %4465 = vmatpush1.msra.mxu0 %v3024_v45  ;;  %v3116_v40 = vld [vmem:[#allocation9 + $0x1370] sm:$0xff]  ;;  %v3113_v18 = vld [vmem:[#allocation9 + $0x1358] sm:$0xff] }
 0x426   :  { %4542 = vmatpush1.msra.mxu1 %v3152_v46  ;;  %4466 = vmatprep.subr.mxu0 %v3021_v19  ;;  %v3244_v53 = vld [vmem:[#allocation9 + $0x1770] sm:$0xff]  ;;  %v3241_v13 = vld [vmem:[#allocation9 + $0x1758] sm:$0xff] }
 0x427   :  { %4543 = vmatprep.subr.mxu1 %v3149_v37  ;;  %4467 = vmatpush1.msra.mxu0 %v3020_v28  ;;  %v3112_v45 = vld [vmem:[#allocation9 + $0x1350] sm:$0xff]  ;;  %v3109_v19 = vld [vmem:[#allocation9 + $0x1338] sm:$0xff] }
 0x428   :  { %4544 = vmatpush1.msra.mxu1 %v3148_v58  ;;  %4468 = vmatprep.subr.mxu0 %v3017_v10  ;;  %v3240_v46 = vld [vmem:[#allocation9 + $0x1750] sm:$0xff]  ;;  %v3237_v37 = vld [vmem:[#allocation9 + $0x1738] sm:$0xff] }
 0x429   :  { %4545 = vmatprep.subr.mxu1 %v3145_v41  ;;  %4469 = vmatpush1.msra.mxu0 %v3016_v23  ;;  %v3108_v28 = vld [vmem:[#allocation9 + $0x1330] sm:$0xff]  ;;  %v3105_v10 = vld [vmem:[#allocation9 + $0x1318] sm:$0xff] }
 0x42a   :  { %4546 = vmatpush1.msra.mxu1 %v3144_v3  ;;  %4470 = vmatprep.subr.mxu0 %v3013_v8  ;;  %v3236_v58 = vld [vmem:[#allocation9 + $0x1730] sm:$0xff]  ;;  %v3233_v41 = vld [vmem:[#allocation9 + $0x1718] sm:$0xff] }
 0x42b   :  { %4547 = vmatprep.subr.mxu1 %v3141_v60  ;;  %4471 = vmatpush1.msra.mxu0 %v3012_v43  ;;  %v3104_v23 = vld [vmem:[#allocation9 + $0x1310] sm:$0xff]  ;;  %v3101_v8 = vld [vmem:[#allocation9 + $0x12f8] sm:$0xff] }
 0x42c   :  { %4548 = vmatpush1.msra.mxu1 %v3140_v33  ;;  %4472 = vmatprep.subr.mxu0 %v3009_v30  ;;  %v3232_v3 = vld [vmem:[#allocation9 + $0x1710] sm:$0xff]  ;;  %v3229_v60 = vld [vmem:[#allocation9 + $0x16f8] sm:$0xff] }
 0x42d   :  { %4549 = vmatprep.subr.mxu1 %v3137_v17  ;;  %4473 = vmatpush1.msra.mxu0 %v3008_v11  ;;  %v3100_v43 = vld [vmem:[#allocation9 + $0x12f0] sm:$0xff]  ;;  %v3097_v30 = vld [vmem:[#allocation9 + $0x12d8] sm:$0xff] }
 0x42e   :  { %4550 = vmatpush1.msra.mxu1 %v3136_v48  ;;  %4474 = vmatprep.subr.mxu0 %v3133_v44  ;;  %v3228_v33 = vld [vmem:[#allocation9 + $0x16f0] sm:$0xff]  ;;  %v3225_v17 = vld [vmem:[#allocation9 + $0x16d8] sm:$0xff] }
 0x42f   :  { %4551 = vmatprep.subr.mxu1 %v3261_v2  ;;  %4475 = vmatpush2.msra.mxu0 %v3132_v14  ;;  %v3096_v11 = vld [vmem:[#allocation9 + $0x12d0] sm:$0xff]  ;;  %v3093_v44 = vld [vmem:[#allocation9 + $0x12b8] sm:$0xff] }
 0x430   :  { %4552 = vmatpush2.msra.mxu1 %v3260_v5  ;;  %4476 = vmatprep.subr.mxu0 %v3129_v54  ;;  %v3224_v48 = vld [vmem:[#allocation9 + $0x16d0] sm:$0xff]  ;;  %v3221_v2 = vld [vmem:[#allocation9 + $0x16b8] sm:$0xff] }
 0x431   :  { %4553 = vmatprep.subr.mxu1 %v3257_v6  ;;  %4477 = vmatpush2.msra.mxu0 %v3128_v36  ;;  %v3092_v14 = vld [vmem:[#allocation9 + $0x12b0] sm:$0xff]  ;;  %v3089_v54 = vld [vmem:[#allocation9 + $0x1298] sm:$0xff] }
 0x432   :  { %4554 = vmatpush2.msra.mxu1 %v3256_v25  ;;  %4478 = vmatprep.subr.mxu0 %v3125_v42  ;;  %v3220_v5 = vld [vmem:[#allocation9 + $0x16b0] sm:$0xff]  ;;  %v3217_v6 = vld [vmem:[#allocation9 + $0x1698] sm:$0xff] }
 0x433   :  { %4555 = vmatprep.subr.mxu1 %v3253_v50  ;;  %4479 = vmatpush2.msra.mxu0 %v3124_v55  ;;  %v3088_v36 = vld [vmem:[#allocation9 + $0x1290] sm:$0xff]  ;;  %v3085_v42 = vld [vmem:[#allocation9 + $0x1278] sm:$0xff] }
 0x434   :  { %4556 = vmatpush2.msra.mxu1 %v3252_v24  ;;  %4480 = vmatprep.subr.mxu0 %v3121_v1  ;;  %v3216_v25 = vld [vmem:[#allocation9 + $0x1690] sm:$0xff]  ;;  %v3213_v50 = vld [vmem:[#allocation9 + $0x1678] sm:$0xff] }
 0x435   :  { %4557 = vmatprep.subr.mxu1 %v3249_v34  ;;  %4481 = vmatpush2.msra.mxu0 %v3120_v4  ;;  %v3084_v55 = vld [vmem:[#allocation9 + $0x1270] sm:$0xff]  ;;  %v3081_v1 = vld [vmem:[#allocation9 + $0x1258] sm:$0xff] }
 0x436   :  { %4558 = vmatpush2.msra.mxu1 %v3248_v49  ;;  %4482 = vmatprep.subr.mxu0 %v3117_v9  ;;  %v3212_v24 = vld [vmem:[#allocation9 + $0x1670] sm:$0xff]  ;;  %v3209_v34 = vld [vmem:[#allocation9 + $0x1658] sm:$0xff] }
 0x437   :  { %4559 = vmatprep.subr.mxu1 %v3245_v12  ;;  %4483 = vmatpush2.msra.mxu0 %v3116_v40  ;;  %v3080_v4 = vld [vmem:[#allocation9 + $0x1250] sm:$0xff]  ;;  %v3077_v9 = vld [vmem:[#allocation9 + $0x1238] sm:$0xff] }
 0x438   :  { %4560 = vmatpush2.msra.mxu1 %v3244_v53  ;;  %4484 = vmatprep.subr.mxu0 %v3113_v18  ;;  %v3208_v49 = vld [vmem:[#allocation9 + $0x1650] sm:$0xff]  ;;  %v3205_v12 = vld [vmem:[#allocation9 + $0x1638] sm:$0xff] }
 0x439   :  { %4561 = vmatprep.subr.mxu1 %v3241_v13  ;;  %4485 = vmatpush2.msra.mxu0 %v3112_v45  ;;  %v3076_v40 = vld [vmem:[#allocation9 + $0x1230] sm:$0xff]  ;;  %v3073_v18 = vld [vmem:[#allocation9 + $0x1218] sm:$0xff] }
 0x43a   :  { %4562 = vmatpush2.msra.mxu1 %v3240_v46  ;;  %4486 = vmatprep.subr.mxu0 %v3109_v19  ;;  %v3204_v53 = vld [vmem:[#allocation9 + $0x1630] sm:$0xff]  ;;  %v3201_v13 = vld [vmem:[#allocation9 + $0x1618] sm:$0xff] }
 0x43b   :  { %4563 = vmatprep.subr.mxu1 %v3237_v37  ;;  %4487 = vmatpush2.msra.mxu0 %v3108_v28  ;;  %v3072_v45 = vld [vmem:[#allocation9 + $0x1210] sm:$0xff]  ;;  %v3325_v19 = vld [vmem:[#allocation9 + $0x19f8] sm:$0xff]  ;;  %v5925_v28 = vmax.f32 %v5488_v27, 0.0 }
 0x43c   :  { %4564 = vmatpush2.msra.mxu1 %v3236_v58  ;;  %4488 = vmatprep.subr.mxu0 %v3105_v10  ;;  %v3200_v46 = vld [vmem:[#allocation9 + $0x1610] sm:$0xff]  ;;  %v3453_v37 = vld [vmem:[#allocation9 + $0x1df8] sm:$0xff]  ;;  %v5926_v58 = vmax.f32 %v5686_v59, 0.0 }
 0x43d   :  { %4565 = vmatprep.subr.mxu1 %v3233_v41  ;;  %4489 = vmatpush2.msra.mxu0 %v3104_v23  ;;  %v3324_v10 = vld [vmem:[#allocation9 + $0x19f0] sm:$0xff]  ;;  %v3321_v23 = vld [vmem:[#allocation9 + $0x19d8] sm:$0xff] }
 0x43e   :  { %4566 = vmatpush2.msra.mxu1 %v3232_v3  ;;  %4490 = vmatprep.subr.mxu0 %v3101_v8  ;;  %v3452_v41 = vld [vmem:[#allocation9 + $0x1df0] sm:$0xff]  ;;  %v3449_v3 = vld [vmem:[#allocation9 + $0x1dd8] sm:$0xff]  ;;  %v5927_v8 = vmax.f32 %v5536_v47, 0.0  ;;  %v5930_v47 = vmax.f32 %v5714_v22, 0.0 }
 0x43f   :  { %4567 = vmatprep.subr.mxu1 %v3229_v60  ;;  %4491 = vmatpush2.msra.mxu0 %v3100_v43  ;;  %v5928_v60 = vmax.f32 %v5699_v26, 0.0  ;;  %v3320_v43 = vld [vmem:[#allocation9 + $0x19d0] sm:$0xff]  ;;  %v3317_v27 = vld [vmem:[#allocation9 + $0x19b8] sm:$0xff] }
 0x440   :  { %4568 = vmatpush2.msra.mxu1 %v3228_v33  ;;  %4492 = vmatprep.subr.mxu0 %v3097_v30  ;;  %v3448_v33 = vld [vmem:[#allocation9 + $0x1dd0] sm:$0xff]  ;;  %v3445_v59 = vld [vmem:[#allocation9 + $0x1db8] sm:$0xff] }
 0x441   :  { %4569 = vmatprep.subr.mxu1 %v3225_v17  ;;  %4493 = vmatpush2.msra.mxu0 %v3096_v11  ;;  %v3316_v30 = vld [vmem:[#allocation9 + $0x19b0] sm:$0xff]  ;;  %v5929_v17 = vmax.f32 %v5532_v61, 0.0  ;;  %v3313_v26 = vld [vmem:[#allocation9 + $0x1998] sm:$0xff] }
 0x442   :  { %4570 = vmatpush2.msra.mxu1 %v3224_v48  ;;  %4494 = vmatprep.subr.mxu0 %v3093_v44  ;;  %v3444_v11 = vld [vmem:[#allocation9 + $0x1db0] sm:$0xff]  ;;  %v3441_v48 = vld [vmem:[#allocation9 + $0x1d98] sm:$0xff]  ;;  %v5931_v44 = vmax.f32 %v5723_v52, 0.0 }
 0x443   :  { %4571 = vmatprep.subr.mxu1 %v3221_v2  ;;  %4495 = vmatpush2.msra.mxu0 %v3092_v14  ;;  %v3312_v2 = vld [vmem:[#allocation9 + $0x1990] sm:$0xff]  ;;  %v3309_v61 = vld [vmem:[#allocation9 + $0x1978] sm:$0xff] }
 0x444   :  { %4572 = vmatpush2.msra.mxu1 %v3220_v5  ;;  %4496 = vmatprep.subr.mxu0 %v3089_v54  ;;  %v3440_v14 = vld [vmem:[#allocation9 + $0x1d90] sm:$0xff]  ;;  %v5932_v5 = vmax.f32 %v5731_v29, 0.0  ;;  %v3437_v54 = vld [vmem:[#allocation9 + $0x1d78] sm:$0xff] }
 0x445   :  { %4573 = vmatprep.subr.mxu1 %v3217_v6  ;;  %4497 = vmatpush2.msra.mxu0 %v3088_v36  ;;  %v3308_v22 = vld [vmem:[#allocation9 + $0x1970] sm:$0xff]  ;;  %v3305_v36 = vld [vmem:[#allocation9 + $0x1958] sm:$0xff] }
 0x446   :  { %4574 = vmatpush2.msra.mxu1 %v3216_v25  ;;  %4498 = vmatprep.subr.mxu0 %v3085_v42  ;;  %v3436_v6 = vld [vmem:[#allocation9 + $0x1d70] sm:$0xff]  ;;  %v3433_v25 = vld [vmem:[#allocation9 + $0x1d58] sm:$0xff] }
 0x447   :  { %4575 = vmatprep.subr.mxu1 %v3213_v50  ;;  %4499 = vmatpush2.msra.mxu0 %v3084_v55  ;;  %v3304_v52 = vld [vmem:[#allocation9 + $0x1950] sm:$0xff]  ;;  %v3301_v50 = vld [vmem:[#allocation9 + $0x1938] sm:$0xff] }
 0x448   :  { %4576 = vmatpush2.msra.mxu1 %v3212_v24  ;;  %4500 = vmatprep.subr.mxu0 %v3081_v1  ;;  %v3432_v42 = vld [vmem:[#allocation9 + $0x1d50] sm:$0xff]  ;;  %v3429_v55 = vld [vmem:[#allocation9 + $0x1d38] sm:$0xff] }
 0x449   :  { %4577 = vmatprep.subr.mxu1 %v3209_v34  ;;  %4501 = vmatpush2.msra.mxu0 %v3080_v4  ;;  %v3300_v29 = vld [vmem:[#allocation9 + $0x1930] sm:$0xff]  ;;  %v3297_v1 = vld [vmem:[#allocation9 + $0x1918] sm:$0xff] }
 0x44a   :  { %4578 = vmatpush2.msra.mxu1 %v3208_v49  ;;  %4502 = vmatprep.subr.mxu0 %v3077_v9  ;;  %v3428_v24 = vld [vmem:[#allocation9 + $0x1d30] sm:$0xff]  ;;  %v3425_v34 = vld [vmem:[#allocation9 + $0x1d18] sm:$0xff] }
 0x44b   :  { %4579 = vmatprep.subr.mxu1 %v3205_v12  ;;  %4503 = vmatpush2.msra.mxu0 %v3076_v40  ;;  %v3296_v4 = vld [vmem:[#allocation9 + $0x1910] sm:$0xff]  ;;  %v3293_v9 = vld [vmem:[#allocation9 + $0x18f8] sm:$0xff] }
 0x44c   :  { %4580 = vmatpush2.msra.mxu1 %v3204_v53  ;;  %4504 = vmatprep.subr.mxu0 %v3073_v18  ;;  %v3424_v49 = vld [vmem:[#allocation9 + $0x1d10] sm:$0xff]  ;;  %v3421_v12 = vld [vmem:[#allocation9 + $0x1cf8] sm:$0xff] }
 0x44d   :  { %4581 = vmatprep.subr.mxu1 %v3201_v13  ;;  %4505 = vmatpush2.msra.mxu0 %v3072_v45  ;;  %v3292_v40 = vld [vmem:[#allocation9 + $0x18f0] sm:$0xff]  ;;  %v3289_v18 = vld [vmem:[#allocation9 + $0x18d8] sm:$0xff] }
 0x44e   :  { %4582 = vmatpush2.msra.mxu1 %v3200_v46  ;;  %4507 = vmatmul.mubr.f32.vlgmr.msra.gmra.mxu0 %v5925_v28  ;;  %v3420_v53 = vld [vmem:[#allocation9 + $0x1cf0] sm:$0xff]  ;;  %v3417_v13 = vld [vmem:[#allocation9 + $0x1cd8] sm:$0xff] }
 0x44f   :  { %4584 = vmatmul.mubr.f32.vlgmr.msra.gmra.mxu1 %v5926_v58  ;;  %4596 = vmatprep.subr.mxu0 %v3325_v19  ;;  %v3288_v45 = vld [vmem:[#allocation9 + $0x18d0] sm:$0xff]  ;;  %v3285_v19 = vld [vmem:[#allocation9 + $0x18b8] sm:$0xff] }
 0x450   :  { %4673 = vmatprep.subr.mxu1 %v3453_v37  ;;  %4512 = vmatprep.mubr.f32.mxu0 %v5927_v8  ;;  %v3416_v46 = vld [vmem:[#allocation9 + $0x1cd0] sm:$0xff]  ;;  %v3413_v37 = vld [vmem:[#allocation9 + $0x1cb8] sm:$0xff] }
 0x451   :  { %4589 = vmatprep.mubr.f32.mxu1 %v5928_v60  ;;  %4597 = vmatpush1.msra.mxu0 %v3324_v10  ;;  %v3284_v28 = vld [vmem:[#allocation9 + $0x18b0] sm:$0xff]  ;;  %v3281_v10 = vld [vmem:[#allocation9 + $0x1898] sm:$0xff] }
 0x452   :  { %4674 = vmatpush1.msra.mxu1 %v3452_v41  ;;  %4598 = vmatprep.subr.mxu0 %v3321_v23  ;;  %v3412_v58 = vld [vmem:[#allocation9 + $0x1cb0] sm:$0xff]  ;;  %v3409_v41 = vld [vmem:[#allocation9 + $0x1c98] sm:$0xff] }
 0x453   :  { %4675 = vmatprep.subr.mxu1 %v3449_v3  ;;  %4599 = vmatpush1.msra.mxu0 %v3320_v43  ;;  %v3280_v23 = vld [vmem:[#allocation9 + $0x1890] sm:$0xff]  ;;  %v3277_v8 = vld [vmem:[#allocation9 + $0x1878] sm:$0xff] }
 0x454   :  { %4676 = vmatpush1.msra.mxu1 %v3448_v33  ;;  %4513 = vmatmul.mubr.f32.gmra.mxu0 %v5929_v17  ;;  %v3408_v3 = vld [vmem:[#allocation9 + $0x1c90] sm:$0xff]  ;;  %v3405_v60 = vld [vmem:[#allocation9 + $0x1c78] sm:$0xff] }
 0x455   :  { %4590 = vmatmul.mubr.f32.gmra.mxu1 %v5930_v47  ;;  %4600 = vmatprep.subr.mxu0 %v3317_v27  ;;  %v3276_v43 = vld [vmem:[#allocation9 + $0x1870] sm:$0xff]  ;;  %v3273_v27 = vld [vmem:[#allocation9 + $0x1858] sm:$0xff] }
 0x456   :  { %4677 = vmatprep.subr.mxu1 %v3445_v59  ;;  %4601 = vmatpush1.msra.mxu0 %v3316_v30  ;;  %v3404_v33 = vld [vmem:[#allocation9 + $0x1c70] sm:$0xff]  ;;  %v3401_v59 = vld [vmem:[#allocation9 + $0x1c58] sm:$0xff] }
 0x457   :  { %4660 = vmatprep.mubr.f32.mxu0 %v5931_v44  ;;  %4678 = vmatpush1.msra.mxu1 %v3444_v11  ;;  %v3272_v30 = vld [vmem:[#allocation9 + $0x1850] sm:$0xff]  ;;  %v3269_v47 = vld [vmem:[#allocation9 + $0x1838] sm:$0xff] }
 0x458   :  { %4737 = vmatprep.mubr.f32.mxu1 %v5932_v5  ;;  %4602 = vmatprep.subr.mxu0 %v3313_v26  ;;  %v3400_v17 = vld [vmem:[#allocation9 + $0x1c50] sm:$0xff]  ;;  %v3397_v11 = vld [vmem:[#allocation9 + $0x1c38] sm:$0xff] }
 0x459   :  { %4679 = vmatprep.subr.mxu1 %v3441_v48  ;;  %4603 = vmatpush1.msra.mxu0 %v3312_v2  ;;  %v3268_v26 = vld [vmem:[#allocation9 + $0x1830] sm:$0xff]  ;;  %v3265_v44 = vld [vmem:[#allocation9 + $0x1818] sm:$0xff] }
 0x45a   :  { %4680 = vmatpush1.msra.mxu1 %v3440_v14  ;;  %4604 = vmatprep.subr.mxu0 %v3309_v61  ;;  %v3396_v48 = vld [vmem:[#allocation9 + $0x1c30] sm:$0xff]  ;;  %v3393_v2 = vld [vmem:[#allocation9 + $0x1c18] sm:$0xff] }
 0x45b   :  { %4681 = vmatprep.subr.mxu1 %v3437_v54  ;;  %4605 = vmatpush1.msra.mxu0 %v3308_v22  ;;  %v3264_v14 = vld [vmem:[#allocation9 + $0x1810] sm:$0xff]  ;;  %v3389_v61 = vld [vmem:[#allocation9 + $0x1bf8] sm:$0xff] }
 0x45c   :  { %4682 = vmatpush1.msra.mxu1 %v3436_v6  ;;  %4606 = vmatprep.subr.mxu0 %v3305_v36  ;;  %v3392_v5 = vld [vmem:[#allocation9 + $0x1c10] sm:$0xff]  ;;  %v3517_v54 = vld [vmem:[#allocation9 + $0x1ff8] sm:$0xff] }
 0x45d   :  { %4683 = vmatprep.subr.mxu1 %v3433_v25  ;;  %4607 = vmatpush1.msra.mxu0 %v3304_v52  ;;  %v3388_v22 = vld [vmem:[#allocation9 + $0x1bf0] sm:$0xff]  ;;  %v3385_v36 = vld [vmem:[#allocation9 + $0x1bd8] sm:$0xff] }
 0x45e   :  { %4684 = vmatpush1.msra.mxu1 %v3432_v42  ;;  %4608 = vmatprep.subr.mxu0 %v3301_v50  ;;  %v3516_v6 = vld [vmem:[#allocation9 + $0x1ff0] sm:$0xff]  ;;  %v3513_v25 = vld [vmem:[#allocation9 + $0x1fd8] sm:$0xff] }
 0x45f   :  { %4685 = vmatprep.subr.mxu1 %v3429_v55  ;;  %4609 = vmatpush1.msra.mxu0 %v3300_v29  ;;  %v3384_v52 = vld [vmem:[#allocation9 + $0x1bd0] sm:$0xff]  ;;  %v3381_v50 = vld [vmem:[#allocation9 + $0x1bb8] sm:$0xff] }
 0x460   :  { %4686 = vmatpush1.msra.mxu1 %v3428_v24  ;;  %4610 = vmatprep.subr.mxu0 %v3297_v1  ;;  %v3512_v42 = vld [vmem:[#allocation9 + $0x1fd0] sm:$0xff]  ;;  %v3509_v55 = vld [vmem:[#allocation9 + $0x1fb8] sm:$0xff] }
 0x461   :  { %4687 = vmatprep.subr.mxu1 %v3425_v34  ;;  %4611 = vmatpush1.msra.mxu0 %v3296_v4  ;;  %v3380_v29 = vld [vmem:[#allocation9 + $0x1bb0] sm:$0xff]  ;;  %v3377_v1 = vld [vmem:[#allocation9 + $0x1b98] sm:$0xff] }
 0x462   :  { %4688 = vmatpush1.msra.mxu1 %v3424_v49  ;;  %4612 = vmatprep.subr.mxu0 %v3293_v9  ;;  %v3508_v24 = vld [vmem:[#allocation9 + $0x1fb0] sm:$0xff]  ;;  %v3505_v34 = vld [vmem:[#allocation9 + $0x1f98] sm:$0xff] }
 0x463   :  { %4689 = vmatprep.subr.mxu1 %v3421_v12  ;;  %4613 = vmatpush1.msra.mxu0 %v3292_v40  ;;  %v3376_v4 = vld [vmem:[#allocation9 + $0x1b90] sm:$0xff]  ;;  %v3373_v9 = vld [vmem:[#allocation9 + $0x1b78] sm:$0xff] }
 0x464   :  { %4690 = vmatpush1.msra.mxu1 %v3420_v53  ;;  %4614 = vmatprep.subr.mxu0 %v3289_v18  ;;  %v3504_v49 = vld [vmem:[#allocation9 + $0x1f90] sm:$0xff]  ;;  %v3501_v12 = vld [vmem:[#allocation9 + $0x1f78] sm:$0xff] }
 0x465   :  { %4691 = vmatprep.subr.mxu1 %v3417_v13  ;;  %4615 = vmatpush1.msra.mxu0 %v3288_v45  ;;  %v3372_v40 = vld [vmem:[#allocation9 + $0x1b70] sm:$0xff]  ;;  %v3369_v18 = vld [vmem:[#allocation9 + $0x1b58] sm:$0xff] }
 0x466   :  { %4692 = vmatpush1.msra.mxu1 %v3416_v46  ;;  %4616 = vmatprep.subr.mxu0 %v3285_v19  ;;  %v3500_v53 = vld [vmem:[#allocation9 + $0x1f70] sm:$0xff]  ;;  %v3497_v13 = vld [vmem:[#allocation9 + $0x1f58] sm:$0xff] }
 0x467   :  { %4693 = vmatprep.subr.mxu1 %v3413_v37  ;;  %4617 = vmatpush1.msra.mxu0 %v3284_v28  ;;  %v3368_v45 = vld [vmem:[#allocation9 + $0x1b50] sm:$0xff]  ;;  %v3365_v19 = vld [vmem:[#allocation9 + $0x1b38] sm:$0xff] }
 0x468   :  { %4694 = vmatpush1.msra.mxu1 %v3412_v58  ;;  %4618 = vmatprep.subr.mxu0 %v3281_v10  ;;  %v3496_v46 = vld [vmem:[#allocation9 + $0x1f50] sm:$0xff]  ;;  %v3493_v37 = vld [vmem:[#allocation9 + $0x1f38] sm:$0xff] }
 0x469   :  { %4695 = vmatprep.subr.mxu1 %v3409_v41  ;;  %4619 = vmatpush1.msra.mxu0 %v3280_v23  ;;  %v3364_v28 = vld [vmem:[#allocation9 + $0x1b30] sm:$0xff]  ;;  %v3361_v10 = vld [vmem:[#allocation9 + $0x1b18] sm:$0xff] }
 0x46a   :  { %4696 = vmatpush1.msra.mxu1 %v3408_v3  ;;  %4620 = vmatprep.subr.mxu0 %v3277_v8  ;;  %v3492_v58 = vld [vmem:[#allocation9 + $0x1f30] sm:$0xff]  ;;  %v3489_v41 = vld [vmem:[#allocation9 + $0x1f18] sm:$0xff] }
 0x46b   :  { %4697 = vmatprep.subr.mxu1 %v3405_v60  ;;  %4621 = vmatpush1.msra.mxu0 %v3276_v43  ;;  %v3360_v23 = vld [vmem:[#allocation9 + $0x1b10] sm:$0xff]  ;;  %v3357_v8 = vld [vmem:[#allocation9 + $0x1af8] sm:$0xff] }
 0x46c   :  { %4698 = vmatpush1.msra.mxu1 %v3404_v33  ;;  %4622 = vmatprep.subr.mxu0 %v3273_v27  ;;  %v3488_v3 = vld [vmem:[#allocation9 + $0x1f10] sm:$0xff]  ;;  %v3485_v60 = vld [vmem:[#allocation9 + $0x1ef8] sm:$0xff] }
 0x46d   :  { %4699 = vmatprep.subr.mxu1 %v3401_v59  ;;  %4623 = vmatpush1.msra.mxu0 %v3272_v30  ;;  %v3356_v43 = vld [vmem:[#allocation9 + $0x1af0] sm:$0xff]  ;;  %v3353_v27 = vld [vmem:[#allocation9 + $0x1ad8] sm:$0xff] }
 0x46e   :  { %4700 = vmatpush1.msra.mxu1 %v3400_v17  ;;  %4624 = vmatprep.subr.mxu0 %v3269_v47  ;;  %v3484_v33 = vld [vmem:[#allocation9 + $0x1ef0] sm:$0xff]  ;;  %v3481_v59 = vld [vmem:[#allocation9 + $0x1ed8] sm:$0xff] }
 0x46f   :  { %4701 = vmatprep.subr.mxu1 %v3397_v11  ;;  %4625 = vmatpush1.msra.mxu0 %v3268_v26  ;;  %v3352_v30 = vld [vmem:[#allocation9 + $0x1ad0] sm:$0xff]  ;;  %v3349_v47 = vld [vmem:[#allocation9 + $0x1ab8] sm:$0xff] }
 0x470   :  { %4702 = vmatpush1.msra.mxu1 %v3396_v48  ;;  %4626 = vmatprep.subr.mxu0 %v3265_v44  ;;  %v3480_v17 = vld [vmem:[#allocation9 + $0x1ed0] sm:$0xff]  ;;  %v3477_v11 = vld [vmem:[#allocation9 + $0x1eb8] sm:$0xff] }
 0x471   :  { %4703 = vmatprep.subr.mxu1 %v3393_v2  ;;  %4627 = vmatpush1.msra.mxu0 %v3264_v14  ;;  %v3348_v26 = vld [vmem:[#allocation9 + $0x1ab0] sm:$0xff]  ;;  %v3345_v44 = vld [vmem:[#allocation9 + $0x1a98] sm:$0xff] }
 0x472   :  { %4704 = vmatpush1.msra.mxu1 %v3392_v5  ;;  %4628 = vmatprep.subr.mxu0 %v3389_v61  ;;  %v3476_v48 = vld [vmem:[#allocation9 + $0x1eb0] sm:$0xff]  ;;  %v3473_v2 = vld [vmem:[#allocation9 + $0x1e98] sm:$0xff] }
 0x473   :  { %4705 = vmatprep.subr.mxu1 %v3517_v54  ;;  %4629 = vmatpush2.msra.mxu0 %v3388_v22  ;;  %v3344_v14 = vld [vmem:[#allocation9 + $0x1a90] sm:$0xff]  ;;  %v3341_v61 = vld [vmem:[#allocation9 + $0x1a78] sm:$0xff] }
 0x474   :  { %4706 = vmatpush2.msra.mxu1 %v3516_v6  ;;  %4630 = vmatprep.subr.mxu0 %v3385_v36  ;;  %v3472_v5 = vld [vmem:[#allocation9 + $0x1e90] sm:$0xff]  ;;  %v3469_v54 = vld [vmem:[#allocation9 + $0x1e78] sm:$0xff] }
 0x475   :  { %4707 = vmatprep.subr.mxu1 %v3513_v25  ;;  %4631 = vmatpush2.msra.mxu0 %v3384_v52  ;;  %v3340_v22 = vld [vmem:[#allocation9 + $0x1a70] sm:$0xff]  ;;  %v3337_v36 = vld [vmem:[#allocation9 + $0x1a58] sm:$0xff] }
 0x476   :  { %4708 = vmatpush2.msra.mxu1 %v3512_v42  ;;  %4632 = vmatprep.subr.mxu0 %v3381_v50  ;;  %v3468_v6 = vld [vmem:[#allocation9 + $0x1e70] sm:$0xff]  ;;  %v3465_v25 = vld [vmem:[#allocation9 + $0x1e58] sm:$0xff] }
 0x477   :  { %4709 = vmatprep.subr.mxu1 %v3509_v55  ;;  %4633 = vmatpush2.msra.mxu0 %v3380_v29  ;;  %v3336_v52 = vld [vmem:[#allocation9 + $0x1a50] sm:$0xff]  ;;  %v3333_v50 = vld [vmem:[#allocation9 + $0x1a38] sm:$0xff] }
 0x478   :  { %4710 = vmatpush2.msra.mxu1 %v3508_v24  ;;  %4634 = vmatprep.subr.mxu0 %v3377_v1  ;;  %v3464_v42 = vld [vmem:[#allocation9 + $0x1e50] sm:$0xff]  ;;  %v3461_v55 = vld [vmem:[#allocation9 + $0x1e38] sm:$0xff] }
 0x479   :  { %4711 = vmatprep.subr.mxu1 %v3505_v34  ;;  %4635 = vmatpush2.msra.mxu0 %v3376_v4  ;;  %v3332_v29 = vld [vmem:[#allocation9 + $0x1a30] sm:$0xff]  ;;  %v3329_v1 = vld [vmem:[#allocation9 + $0x1a18] sm:$0xff] }
 0x47a   :  { %4712 = vmatpush2.msra.mxu1 %v3504_v49  ;;  %4636 = vmatprep.subr.mxu0 %v3373_v9  ;;  %v3460_v24 = vld [vmem:[#allocation9 + $0x1e30] sm:$0xff]  ;;  %v3457_v34 = vld [vmem:[#allocation9 + $0x1e18] sm:$0xff]  ;;  %v3584_v9 = vpop.f32.mrf.mxu0 }
 0x47b   :  { %4713 = vmatprep.subr.mxu1 %v3501_v12  ;;  %4637 = vmatpush2.msra.mxu0 %v3372_v40  ;;  %v3328_v4 = vld [vmem:[#allocation9 + $0x1a10] sm:$0xff]  ;;  %v3661_v12 = vpop.f32.mrf.mxu1 }
 0x47c   :  { %4714 = vmatpush2.msra.mxu1 %v3500_v53  ;;  %4638 = vmatprep.subr.mxu0 %v3369_v18  ;;  %v3456_v49 = vld [vmem:[#allocation9 + $0x1e10] sm:$0xff]  ;;  %v3586_v40 = vpop.f32.mrf.mxu0 }
 0x47d   :  { %4715 = vmatprep.subr.mxu1 %v3497_v13  ;;  %4639 = vmatpush2.msra.mxu0 %v3368_v45  ;;  %v3663_v62 = vpop.f32.mrf.mxu1 }
 0x47e   :  { %4716 = vmatpush2.msra.mxu1 %v3496_v46  ;;  %4640 = vmatprep.subr.mxu0 %v3365_v19 }
 0x47f   :  { %4717 = vmatprep.subr.mxu1 %v3493_v37  ;;  %4641 = vmatpush2.msra.mxu0 %v3364_v28  ;;  %v3667_v53 = vpop.f32.mrf.mxu1 }
 0x480   :  { %4718 = vmatpush2.msra.mxu1 %v3492_v58  ;;  %4642 = vmatprep.subr.mxu0 %v3361_v10 }
 0x481   :  { %4719 = vmatprep.subr.mxu1 %v3489_v41  ;;  %4643 = vmatpush2.msra.mxu0 %v3360_v23 }
 0x482   :  { %4720 = vmatpush2.msra.mxu1 %v3488_v3  ;;  %4644 = vmatprep.subr.mxu0 %v3357_v8 }
 0x483   :  { %4721 = vmatprep.subr.mxu1 %v3485_v60  ;;  %4645 = vmatpush2.msra.mxu0 %v3356_v43 }
 0x484   :  { %4722 = vmatpush2.msra.mxu1 %v3484_v33  ;;  %4646 = vmatprep.subr.mxu0 %v3353_v27 }
 0x485   :  { %4723 = vmatprep.subr.mxu1 %v3481_v59  ;;  %4647 = vmatpush2.msra.mxu0 %v3352_v30 }
 0x486   :  { %4724 = vmatpush2.msra.mxu1 %v3480_v17  ;;  %4648 = vmatprep.subr.mxu0 %v3349_v47 }
 0x487   :  { %4725 = vmatprep.subr.mxu1 %v3477_v11  ;;  %4649 = vmatpush2.msra.mxu0 %v3348_v26 }
 0x488   :  { %4726 = vmatpush2.msra.mxu1 %v3476_v48  ;;  %4650 = vmatprep.subr.mxu0 %v3345_v44 }
 0x489   :  { %4727 = vmatprep.subr.mxu1 %v3473_v2  ;;  %4651 = vmatpush2.msra.mxu0 %v3344_v14 }
 0x48a   :  { %4728 = vmatpush2.msra.mxu1 %v3472_v5  ;;  %4652 = vmatprep.subr.mxu0 %v3341_v61  ;;  %v3664_v61 = vadd.f32 %v3663_v62, %v3586_v40 }
 0x48b   :  { %4729 = vmatprep.subr.mxu1 %v3469_v54  ;;  %4653 = vmatpush2.msra.mxu0 %v3340_v22  ;;  %v3662_v54 = vadd.f32 %v3661_v12, %v3584_v9 }
 0x48c   :  { %4730 = vmatpush2.msra.mxu1 %v3468_v6  ;;  %4654 = vmatprep.subr.mxu0 %v3337_v36 }
 0x48d   :  { %4731 = vmatprep.subr.mxu1 %v3465_v25  ;;  %4655 = vmatpush2.msra.mxu0 %v3336_v52 }
 0x48e   :  { %4732 = vmatpush2.msra.mxu1 %v3464_v42  ;;  %4656 = vmatprep.subr.mxu0 %v3333_v50 }
 0x48f   :  { %4733 = vmatprep.subr.mxu1 %v3461_v55  ;;  %4657 = vmatpush2.msra.mxu0 %v3332_v29 }
 0x490   :  { %4734 = vmatpush2.msra.mxu1 %v3460_v24  ;;  %4658 = vmatprep.subr.mxu0 %v3329_v1 }
 0x491   :  { %4735 = vmatprep.subr.mxu1 %v3457_v34  ;;  %4659 = vmatpush2.msra.mxu0 %v3328_v4 }
 0x492   :  { %4736 = vmatpush2.msra.mxu1 %v3456_v49  ;;  %4661 = vmatmul.mubr.f32.vlgmr.msra.gmra.mxu0 %v2474_v21  ;;  %v3590_v21 = vpop.f32.mrf.mxu0 }
 0x493   :  { %4738 = vmatmul.mubr.f32.vlgmr.msra.gmra.mxu1 %v2476_v35  ;;  %4666 = vmatprep.mubr.f32.mxu0 %v2491_v56  ;;  %v3669_v35 = vpop.f32.mrf.mxu1  ;;  %v3668_v42 = vadd.f32 %v3667_v53, %v3590_v21  ;;  %v4754_v21 = vld [vmem:[#allocation11] sm:$0xf] }
 0x494   :  { %4743 = vmatprep.mubr.f32.mxu1 %v2493_v51  ;;  %v3592_v57 = vpop.f32.mrf.mxu0 }
 0x495   :  { %v3815_v38 = vpop.f32.mrf.mxu1  ;;  %v3670_v25 = vadd.f32 %v3669_v35, %v3592_v57 }
 0x496   :  { %4667 = vmatmul.mubr.f32.gmra.mxu0 %v2490_v16  ;;  %v3738_v18 = vpop.f32.mrf.mxu0 }
 0x497   :  { %4744 = vmatmul.mubr.f32.gmra.mxu1 %v2492_v39  ;;  %v3817_v13 = vpop.f32.mrf.mxu1  ;;  %v3739_v52 = vadd.f32 %v3738_v18, %v3662_v54 }
 0x498   :  { %v3740_v56 = vpop.f32.mrf.mxu0 }
 0x499   :  { %v3821_v51 = vpop.f32.mrf.mxu1  ;;  %v3741_v22 = vadd.f32 %v3740_v56, %v3664_v61  ;;  %v3816_v1 = vadd.f32 %v3815_v38, %v3739_v52 }
 0x49a   :  { %v3744_v31 = vpop.f32.mrf.mxu0 }
 0x49b   :  { %v3823_v15 = vpop.f32.mrf.mxu1  ;;  %v3818_v50 = vadd.f32 %v3817_v13, %v3741_v22  ;;  %v3745_v34 = vadd.f32 %v3744_v31, %v3668_v42  ;;  %v4763_v31 = vrot.slane %v4754_v21, %v5358_v0 }
 0x49c   :  { %v3746_v45 = vpop.f32.mrf.mxu0 }
 0x49d   :  { %v3969_v46 = vpop.f32.mrf.mxu1  ;;  %v3747_v55 = vadd.f32 %v3746_v45, %v3670_v25  ;;  %v3822_v12 = vadd.f32 %v3821_v51, %v3745_v34 }
 0x49e   :  { %v3892_v16 = vpop.f32.mrf.mxu0 }
 0x49f   :  { %v3971_v39 = vpop.f32.mrf.mxu1  ;;  %v3824_v32 = vadd.f32 %v3823_v15, %v3747_v55 }
 0x4a0   :  { %v3894_v63 = vpop.f32.mrf.mxu0 }
 0x4a1   :  { %v5841_v37 = vpop.f32.mrf.mxu1  ;;  %v3895_v4 = vadd.f32 %v3894_v63, %v3818_v50 }
 0x4a2   :  { %v3898_v19 = vpop.f32.mrf.mxu0 }
 0x4a3   :  { %v3977_v58 = vpop.f32.mrf.mxu1  ;;  %v3972_v62 = vadd.f32 %v3971_v39, %v3895_v4  ;;  %v3899_v45 = vadd.f32 %v3898_v19, %v3822_v12  ;;  %v5026_v19 = vld [vmem:[#allocation3 + $0x8] sm:$0xff] }
 0x4a4   :  { %v3900_v28 = vpop.f32.mrf.mxu0 }
 0x4a5   :  { %v5843_v41 = vpop.f32.mrf.mxu1  ;;  %v3901_v56 = vadd.f32 %v3900_v28, %v3824_v32 }
 0x4a6   :  { %v4046_v10 = vpop.f32.mrf.mxu0 }
 0x4a7   :  { %v5845_v3 = vpop.f32.mrf.mxu1  ;;  %v3978_v15 = vadd.f32 %v3977_v58, %v3901_v56  ;;  %v4767_v58 = vrot.slane %v4754_v21, %v5529_v20 }
 0x4a8   :  { %v4048_v23 = vpop.f32.mrf.mxu0 }
 0x4a9   :  { %v5849_v60 = vpop.f32.mrf.mxu1  ;;  %v4049_v38 = vadd.f32 %v4048_v23, %v3972_v62  ;;  %v4777_v23 = vadd.f32 %v5026_v19, %v4763_v31 }
 0x4aa   :  { %v5847_v8 = vpop.f32.mrf.mxu0  ;;  %5934 = vst [vmem:[#allocation23_spill] sm:$0xff] %v5849_v60 }
 0x4ab   :  { %5933 = vst [vmem:[#allocation22_spill] sm:$0xff] %v5847_v8  ;;  %v5853_v33 = vpop.f32.mrf.mxu1  ;;  %v3893_v8 = vadd.f32 %v3892_v16, %v3816_v1  ;;  %v5029_v1 = vld [vmem:[#allocation3 + $0x10] sm:$0xff] }
 0x4ac   :  { %v5851_v43 = vpop.f32.mrf.mxu0  ;;  %5935 = vst [vmem:[#allocation24_spill] sm:$0xff] %v5853_v33  ;;  %v4778_v34 = vadd.f32 %v5029_v1, %v4767_v58 }
 0x4ad   :  { %v4277_v59 = vpop.f32.mrf.mxu1  ;;  %v3970_v13 = vadd.f32 %v3969_v46, %v3893_v8  ;;  %v4126_v46 = vadd.f32 %v5845_v3, %v4049_v38  ;;  %v4055_v8 = vadd.f32 %v5851_v43, %v3978_v15  ;;  %v5937_v3 = vld [vmem:[#allocation21_spill] sm:$0xff] }
 0x4ae   :  { %v4200_v27 = vpop.f32.mrf.mxu0  ;;  %v4771_v22 = vrot.slane %v4754_v21, %v5937_v3 }
 0x4af   :  { %v4279_v17 = vpop.f32.mrf.mxu1  ;;  %v4278_v33 = vadd.f32 %v4277_v59, %v4200_v27  ;;  %v4047_v16 = vadd.f32 %v4046_v10, %v3970_v13 }
 0x4b0   :  { %v4202_v30 = vpop.f32.mrf.mxu0 }
 0x4b1   :  { %v4283_v11 = vpop.f32.mrf.mxu1  ;;  %v4280_v40 = vadd.f32 %v4279_v17, %v4202_v30  ;;  %v3976_v30 = vadd.f32 %v5841_v37, %v3899_v45  ;;  %v4124_v10 = vadd.f32 %v5843_v41, %v4047_v16 }
 0x4b2   :  { %v4206_v47 = vpop.f32.mrf.mxu0 }
 0x4b3   :  { %v4285_v48 = vpop.f32.mrf.mxu1  ;;  %v4284_v53 = vadd.f32 %v4283_v11, %v4206_v47  ;;  %v5027_v11 = vld [vmem:[#allocation3] sm:$0xff]  ;;  %v5938_v25 = vld [vmem:[#allocation24_spill] sm:$0xff] }
 0x4b4   :  { %v4208_v26 = vpop.f32.mrf.mxu0  ;;  %v4132_v43 = vadd.f32 %v5938_v25, %v4055_v8 }
 0x4b5   :  { %v4286_v63 = vadd.f32 %v4285_v48, %v4208_v26  ;;  %v5936_v48 = vld [vmem:[#allocation22_spill] sm:$0xff] }
 0x4ca   :  { %v4354_v44 = vpop.f32.mrf.mxu0 }
 0x4cb   :  { %v4431_v2 = vpop.f32.mrf.mxu1  ;;  %v4355_v9 = vadd.f32 %v4354_v44, %v4278_v33  ;;  %v4759_v33 = vrot.slane %v4754_v21, %v5330_v7  ;;  %v4053_v44 = vadd.f32 %v5936_v48, %v3976_v30  ;;  %v5031_v21 = vld [vmem:[#allocation3 + $0x18] sm:$0xff] }
 0x4cc   :  { %v4356_v14 = vpop.f32.mrf.mxu0 }
 0x4cd   :  { %v4433_v5 = vpop.f32.mrf.mxu1  ;;  %v4357_v18 = vadd.f32 %v4356_v14, %v4280_v40  ;;  %v4432_v61 = vadd.f32 %v4431_v2, %v4355_v9  ;;  %v4776_v26 = vadd.f32 %v5027_v11, %v4759_v33 }
 0x4cf   :  { %v4434_v32 = vadd.f32 %v4433_v5, %v4357_v18  ;;  %v4784_v4 = vadd.f32 %v4776_v26, %v4124_v10 }
 0x4d0   :  { %v4360_v6 = vpop.f32.mrf.mxu0 }
 0x4d1   :  { %v4437_v36 = vpop.f32.mrf.mxu1  ;;  %v4361_v27 = vadd.f32 %v4360_v6, %v4284_v53  ;;  %v4785_v6 = vadd.f32 %v4777_v23, %v4126_v46  ;;  %v4779_v53 = vadd.f32 %v5031_v21, %v4771_v22 }
 0x4d2   :  { %v4362_v29 = vpop.f32.mrf.mxu0 }
 0x4d3   :  { %v4439_v24 = vpop.f32.mrf.mxu1  ;;  %v4363_v28 = vadd.f32 %v4362_v29, %v4286_v63  ;;  %v4438_v17 = vadd.f32 %v4437_v36, %v4361_v27  ;;  %v5028_v36 = vld [vmem:[#allocation3 + $0x28] sm:$0xff] }
 0x4d4   :  { %v4781_v52 = vadd.f32 %v5028_v36, %v4763_v31  ;;  %v4839_v31 = vadd.f32 %v4785_v6, %v4784_v4 }
 0x4d5   :  { %v4440_v5 = vadd.f32 %v4439_v24, %v4363_v28  ;;  %v5030_v24 = vld [vmem:[#allocation3 + $0x20] sm:$0xff] }
 0x4d6   :  { %v4789_v18 = vadd.f32 %v4781_v52, %v4132_v43 }
 0x50e   :  { %v4508_v49 = vpop.f32.mrf.mxu0 }
 0x50f   :  { %v4585_v60 = vpop.f32.mrf.mxu1  ;;  %v4509_v59 = vadd.f32 %v4508_v49, %v4432_v61  ;;  %v5939_v49 = vld [vmem:[#allocation23_spill] sm:$0xff] }
 0x510   :  { %v4510_v57 = vpop.f32.mrf.mxu0  ;;  %v4130_v40 = vadd.f32 %v5939_v49, %v4053_v44 }
 0x511   :  { %v4587_v35 = vpop.f32.mrf.mxu1  ;;  %v4511_v47 = vadd.f32 %v4510_v57, %v4434_v32  ;;  %v4586_v37 = vadd.f32 %v4585_v60, %v4509_v59  ;;  %v4780_v60 = vadd.f32 %v5030_v24, %v4759_v33  ;;  %v5033_v33 = vld [vmem:[#allocation3 + $0x38] sm:$0xff] }
 0x512   :  { %v4783_v32 = vadd.f32 %v5033_v33, %v4771_v22 }
 0x513   :  { %v4588_v55 = vadd.f32 %v4587_v35, %v4511_v47  ;;  %v5032_v35 = vld [vmem:[#allocation3 + $0x30] sm:$0xff]  ;;  %v4788_v16 = vadd.f32 %v4780_v60, %v4130_v40 }
 0x514   :  { %v4514_v51 = vpop.f32.mrf.mxu0  ;;  %v4782_v38 = vadd.f32 %v5032_v35, %v4767_v58 }
 0x515   :  { %v4591_v39 = vpop.f32.mrf.mxu1  ;;  %v4515_v54 = vadd.f32 %v4514_v51, %v4438_v17  ;;  %v4844_v19 = vadd.f32 %v4789_v18, %v4788_v16 }
 0x516   :  { %v4516_v2 = vpop.f32.mrf.mxu0 }
 0x517   :  { %v4593_v14 = vpop.f32.mrf.mxu1  ;;  %v4517_v41 = vadd.f32 %v4516_v2, %v4440_v5  ;;  %v4592_v62 = vadd.f32 %v4591_v39, %v4515_v54 }
 0x519   :  { %v4594_v63 = vadd.f32 %v4593_v14, %v4517_v41 }
 0x552   :  { %v4662_v42 = vpop.f32.mrf.mxu0 }
 0x553   :  { %v4739_v50 = vpop.f32.mrf.mxu1  ;;  %v4663_v29 = vadd.f32 %v4662_v42, %v4586_v37 }
 0x554   :  { %v4664_v9 = vpop.f32.mrf.mxu0 }
 0x555   :  { %v4741_v12 = vpop.f32.mrf.mxu1  ;;  %v4740_v56 = vadd.f32 %v4739_v50, %v4663_v29  ;;  %v4665_v57 = vadd.f32 %v4664_v9, %v4588_v55 }
 0x556   :  { %v4668_v13 = vpop.f32.mrf.mxu0 }
 0x557   :  { %v4745_v45 = vpop.f32.mrf.mxu1  ;;  %v4786_v61 = vadd.f32 %v4778_v34, %v4740_v56  ;;  %v4742_v27 = vadd.f32 %v4741_v12, %v4665_v57  ;;  %v4669_v15 = vadd.f32 %v4668_v13, %v4592_v62 }
 0x558   :  { %v4670_v51 = vpop.f32.mrf.mxu0 }
 0x559   :  { %v4746_v28 = vadd.f32 %v4745_v45, %v4669_v15  ;;  %v4671_v39 = vadd.f32 %v4670_v51, %v4594_v63  ;;  %v4787_v59 = vadd.f32 %v4779_v53, %v4742_v27  ;;  %v4840_v30 = vadd.f32 %v4839_v31, %v4786_v61  ;;  %v4747_v46 = vpop.f32.mrf.mxu1  ;;  %v4923_v45 = vld [vmem:[#allocation14] sm:$0xf] }
 0x55a   :  { %v4928_v51 = vrot.slane %v4923_v45, %v5330_v7  ;;  %v4932_v33 = vrot.slane %v4923_v45, %v5358_v0 }
 0x55b   :  { %v4790_v23 = vadd.f32 %v4782_v38, %v4746_v28  ;;  %v4748_v8 = vadd.f32 %v4747_v46, %v4671_v39  ;;  %v4841_v17 = vadd.f32 %v4840_v30, %v4787_v59  ;;  %v4940_v28 = vrot.slane %v4923_v45, %v5937_v3 }
 0x55d   :  { %v4791_v47 = vadd.f32 %v4783_v32, %v4748_v8  ;;  %4842 = vadd.xlane.f32.xlu0 %v4841_v17  ;;  %v4845_v58 = vadd.f32 %v4844_v19, %v4790_v23  ;;  %v4936_v32 = vrot.slane %v4923_v45, %v5529_v20 }
 0x55f   :  { %v4846_v10 = vadd.f32 %v4845_v58, %v4791_v47 }
 0x561   :  { %4847 = vadd.xlane.f32.xlu0 %v4846_v10 }
 0x5e6   :  { %v4843_v11 = vpop.xlane.xlu0 %4842 }
 0x5e7   :  { %v4849_v26 = vmul.f32 0.001953125, %v4843_v11 }
 0x5e9   :  { %v4851_v48 = vsub.f32 %v4784_v4, %v4849_v26  ;;  %v4852_v44 = vsub.f32 %v4785_v6, %v4849_v26  ;;  %v4853_v2 = vsub.f32 %v4786_v61, %v4849_v26  ;;  %v4854_v5 = vsub.f32 %v4787_v59, %v4849_v26 }
 0x5ea   :  { %v4848_v14 = vpop.xlane.xlu0 %4847 }
 0x5eb   :  { %v4850_v37 = vmul.f32 0.001953125, %v4848_v14  ;;  %v4859_v54 = vmul.f32 %v4851_v48, %v4851_v48  ;;  %v4860_v22 = vmul.f32 %v4852_v44, %v4852_v44  ;;  %v4861_v25 = vmul.f32 %v4853_v2, %v4853_v2 }
 0x5ec   :  { %v4862_v50 = vmul.f32 %v4854_v5, %v4854_v5 }
 0x5ed   :  { %v4855_v43 = vsub.f32 %v4788_v16, %v4850_v37  ;;  %v4856_v36 = vsub.f32 %v4789_v18, %v4850_v37  ;;  %v4867_v52 = vadd.f32 %v4860_v22, %v4859_v54  ;;  %v4857_v42 = vsub.f32 %v4790_v23, %v4850_v37  ;;  %v4893_v18 = vld [vmem:[#allocation12] sm:$0xf] }
 0x5ee   :  { %v4858_v41 = vsub.f32 %v4791_v47, %v4850_v37  ;;  %v4898_v13 = vrot.slane %v4893_v18, %v5330_v7  ;;  %v4902_v35 = vrot.slane %v4893_v18, %v5358_v0  ;;  %v4906_v38 = vrot.slane %v4893_v18, %v5529_v20 }
 0x5ef   :  { %v4868_v55 = vadd.f32 %v4867_v52, %v4861_v25  ;;  %v4863_v29 = vmul.f32 %v4855_v43, %v4855_v43  ;;  %v4864_v1 = vmul.f32 %v4856_v36, %v4856_v36  ;;  %v4865_v49 = vmul.f32 %v4857_v42, %v4857_v42 }
 0x5f0   :  { %v4866_v6 = vmul.f32 %v4858_v41, %v4858_v41  ;;  %v4910_v31 = vrot.slane %v4893_v18, %v5937_v3 }
 0x5f1   :  { %v4869_v34 = vadd.f32 %v4868_v55, %v4862_v50  ;;  %v4872_v4 = vadd.f32 %v4864_v1, %v4863_v29 }
 0x5f3   :  { %4870 = vadd.xlane.f32.xlu1 %v4869_v34  ;;  %v4873_v40 = vadd.f32 %v4872_v4, %v4865_v49 }
 0x5f5   :  { %v4874_v24 = vadd.f32 %v4873_v40, %v4866_v6 }
 0x5f7   :  { %4875 = vadd.xlane.f32.xlu1 %v4874_v24 }
 0x67c   :  { %v4871_v60 = vpop.xlane.xlu1 %4870 }
 0x67d   :  { %v4877_v9 = vmul.f32 0.001953125, %v4871_v60 }
 0x67f   :  { %v4879_v12 = vmax.f32 %v4877_v9, 0.0 }
 0x680   :  { %v4876_v62 = vpop.xlane.xlu1 %4875 }
 0x681   :  { %v4881_v56 = vadd.f32 1e-05, %v4879_v12  ;;  %v4878_v57 = vmul.f32 0.001953125, %v4876_v62 }
 0x683   :  { %4993 = vrsqrt.f32 %v4881_v56  ;;  %v4880_v21 = vmax.f32 %v4878_v57, 0.0 }
 0x685   :  { %v4882_v53 = vadd.f32 1e-05, %v4880_v21 }
 0x687   :  { %4995 = vrsqrt.f32 %v4882_v53 }
 0x690   :  { %v4994_v63 = vpop.eup %4993 }
 0x691   :  { %v4885_v61 = vmul.f32 %v4994_v63, %v4851_v48  ;;  %v4886_v27 = vmul.f32 %v4994_v63, %v4852_v44  ;;  %v4887_v15 = vmul.f32 %v4994_v63, %v4853_v2  ;;  %v4888_v16 = vmul.f32 %v4994_v63, %v4854_v5 }
 0x693   :  { %v4915_v39 = vmul.f32 %v4898_v13, %v4885_v61  ;;  %v4916_v59 = vmul.f32 %v4902_v35, %v4886_v27  ;;  %v4917_v30 = vmul.f32 %v4906_v38, %v4887_v15  ;;  %v4918_v46 = vmul.f32 %v4910_v31, %v4888_v16 }
 0x694   :  { %v4996_v19 = vpop.eup %4995 }
 0x695   :  { %v4889_v23 = vmul.f32 %v4996_v19, %v4855_v43  ;;  %v4890_v8 = vmul.f32 %v4996_v19, %v4856_v36  ;;  %v4891_v17 = vmul.f32 %v4996_v19, %v4857_v42  ;;  %v4892_v47 = vmul.f32 %v4996_v19, %v4858_v41 }
 0x696   :  { %v4945_v58 = vadd.f32 %v4928_v51, %v4915_v39  ;;  %v4946_v10 = vadd.f32 %v4932_v33, %v4916_v59  ;;  %v4947_v11 = vadd.f32 %v4936_v32, %v4917_v30  ;;  %v4948_v26 = vadd.f32 %v4940_v28, %v4918_v46 }
 0x697   :  { %v4919_v7 = vmul.f32 %v4898_v13, %v4889_v23  ;;  %v4920_v0 = vmul.f32 %v4902_v35, %v4890_v8  ;;  %v4921_v20 = vmul.f32 %v4906_v38, %v4891_v17  ;;  %v4922_v48 = vmul.f32 %v4910_v31, %v4892_v47 }
 0x698   :  { %4953 = vst [vmem:[#allocation15] sm:$0xff] %v4945_v58  ;;  %4954 = vst [vmem:[#allocation15 + $0x8] sm:$0xff] %v4946_v10 }
 0x699   :  { %4955 = vst [vmem:[#allocation15 + $0x10] sm:$0xff] %v4947_v11  ;;  %4956 = vst [vmem:[#allocation15 + $0x18] sm:$0xff] %v4948_v26  ;;  %v4949_v3 = vadd.f32 %v4928_v51, %v4919_v7  ;;  %v4950_v44 = vadd.f32 %v4932_v33, %v4920_v0  ;;  %v4951_v2 = vadd.f32 %v4936_v32, %v4921_v20 }
 0x69a   :  { %v4952_v14 = vadd.f32 %v4940_v28, %v4922_v48 }
 0x69b   :  { %4957 = vst [vmem:[#allocation15 + $0x20] sm:$0xff] %v4949_v3  ;;  %4958 = vst [vmem:[#allocation15 + $0x28] sm:$0xff] %v4950_v44 }
 0x69c   :  { %4959 = vst [vmem:[#allocation15 + $0x30] sm:$0xff] %v4951_v2  ;;  %4960 = vst [vmem:[#allocation15 + $0x38] sm:$0xff] %v4952_v14 }
 0x69d   :  { %5185 = shalt.err (!%p5182_p11)
}
 0x69e   :  { %4972 = dma.vmem_to_hbm [thread:$0]  %s4967_s6, 1024, %s5887_s7, [#allocation5], %s5209_s13, %s5209_s13, %s5210_s14  }
 0x69f   :  { %5202 = dma.done.wait [#allocation5], 1024  }
 0x6a0   :  { %5203 = vsyncadd [#allocation5], 4294966272 }
 0x6a1   :  { %4976 = vsyncpa [#allocation4], 1 }
 0x6a2   :  { %4977 = vsyncpa [#allocation7], 1 }
 0x6a3   :  { %4978 = vsyncpa [#allocation10], 1 }
 0x6a4   :  { %4979 = vsyncpa [#allocation13], 1 }
 0x6a5   :  { %4980 = vsyncpa [#allocation5], 1 }

</bundles_post_ra>
